<compile_context>
chip_gen: v6e
topology: v6e:2x2x1
jax: 0.10.0
libtpu: 0.0.40
codegen_flags: <defaults>
</compile_context>

<pallas_src>
import functools

import numpy as np
import jax
import jax.numpy as jnp
from jax import lax
from jax.experimental import pallas as pl
from jax.experimental.pallas import tpu as pltpu

DATA_DIM = 15            # -> n = sqrt(data_dim + 1) = 4  (two-qubit system)
N1 = DATA_DIM + 1        # 16
DT = 0.01                # time step
TB = 8                   # samples packed block-diagonally per chain -> 128x128
TBN = TB * N1            # 128 (lane-dense)
C = 4                    # interleaved exp chains per grid step (32 samples/step)
TAYLOR_ORDER = 6         # Taylor order for exp of the scaled matrix
NORM_TARGET = 0.5        # scale so ||dt*L||_1 / 2^NSQ <= NORM_TARGET
MXU_PRECISION = jax.lax.Precision.DEFAULT   # pinned explicitly; operands stay f32


# ----------------------------------------------------------------------------
# Structure constants f, d of su(n) (generalized Gell-Mann basis, Tr(l_a l_b)=2d_ab)
# TODO(synk): original `pauli_s_const()` source not provided; reconstructed with
#             the standard generalized Gell-Mann convention (generator ordering
#             may differ from the original, contraction structure is identical).
# ----------------------------------------------------------------------------
def gell_mann(n):
    mats = []
    for j in range(n):
        for k in range(j + 1, n):
            m = np.zeros((n, n), dtype=np.complex128)
            m[j, k] = 1.0
            m[k, j] = 1.0
            mats.append(m)
    for j in range(n):
        for k in range(j + 1, n):
            m = np.zeros((n, n), dtype=np.complex128)
            m[j, k] = -1j
            m[k, j] = 1j
            mats.append(m)
    for l in range(1, n):
        m = np.zeros((n, n), dtype=np.complex128)
        for jj in range(l):
            m[jj, jj] = 1.0
        m[l, l] = -float(l)
        m *= np.sqrt(2.0 / (l * (l + 1)))
        mats.append(m)
    return np.stack(mats)  # (n^2 - 1, n, n)


def pauli_s_const(n):
    lam = gell_mann(n)
    t1 = np.einsum("aij,bjk,cki->abc", lam, lam, lam)   # Tr(l_a l_b l_c)
    t2 = np.einsum("bij,ajk,cki->abc", lam, lam, lam)   # Tr(l_b l_a l_c)
    f = np.real((t1 - t2) / 4j)                         # antisymmetric structure const
    d = np.real((t1 + t2) / 4.0)                        # symmetric structure const
    return f.astype(np.float32), d.astype(np.float32)


# ----------------------------------------------------------------------------
# Deterministic parameter initialization (mirrors the torch __init__)
# ----------------------------------------------------------------------------
def init_params(key, data_dim):
    k1, k2, k3, k4 = jax.random.split(key, 4)
    fan_in = data_dim
    # kaiming_uniform_ with a=1: gain = sqrt(2/(1+1)) = 1, bound = sqrt(3/fan_in)
    bound_v = float(np.sqrt(3.0 / fan_in))
    v_x = 0.001 * jax.random.uniform(k1, (data_dim, data_dim), jnp.float32, -bound_v, bound_v)
    v_y = 0.001 * jax.random.uniform(k2, (data_dim, data_dim), jnp.float32, -bound_v, bound_v)
    bound_o = float(1.0 / np.sqrt(fan_in))
    omega = jax.random.uniform(k3, (data_dim,), jnp.float32, -bound_o, bound_o)
    omega_int = jax.random.uniform(k4, (data_dim,), jnp.float32, -bound_o, bound_o)
    return v_x, v_y, omega, omega_int


# ----------------------------------------------------------------------------
# Norm-gated choice of the scaling exponent (computed once at parameter time).
# Rigorous bound: ||dt*L_b||_1 <= dt*(||H0||_1 + 100*|p|max*||Hint||_1
#                                     + |p|max^2*||D||_1) for every sample b.
# ----------------------------------------------------------------------------
def _choose_num_squarings(H0, Hint, diss, potential):
    try:
        h0 = np.asarray(H0)
        hi = np.asarray(Hint)
        dd = np.asarray(diss)
        pmax = float(np.max(np.abs(np.asarray(potential))))
    except Exception:
        # Traced (e.g. under jit with parameters as args): conservative static default.
        return 5
    one_norm = lambda m: float(np.abs(m).sum(axis=0).max())
    theta = DT * (one_norm(h0) + 100.0 * pmax * one_norm(hi) + (pmax ** 2) * one_norm(dd))
    if theta <= NORM_TARGET:
        return 0
    return int(min(10, int(np.ceil(np.log2(theta / NORM_TARGET)))))


# ----------------------------------------------------------------------------
# Pallas kernel: one grid step = C interleaved chains of TB samples each.
#   px_ref  : (2*C, TBN)  rows 0..C-1  -> per-lane potential for chain c
#                         rows C..2C-1 -> augmented input x for chain c
#   *_t_ref : (TBN, TBN) transposed block-diagonal constants (H0^T, Hint^T, D^T)
#   y_ref   : (C, TBN)   per-chain outputs (lane-dense, last dim = 128)
# Per chain c:
#   A_c = (dt/2^nsq) * (H0^T_bd + 100*p_c*Hint^T_bd + p_c^2*D^T_bd)   [= scaled L_c^T]
#   S_c = exp(A_c) - I  via Taylor; squaring: S <- 2S + S@S
#   y_c = x_c + x_c @ S_c   (x @ exp(dt L)^T == exp(dt L) x  per sample block)
# ----------------------------------------------------------------------------
def expm_matvec_kernel(px_ref, h0t_ref, hintt_ref, disst_ref, y_ref, *,
                       nsq, order, n_chains):
    h0t = h0t_ref[...]
    hintt = hintt_ref[...]
    disst = disst_ref[...]
    scale = DT / float(2 ** nsq)

    # Per-chain scaled transposed Liouvillians.  p is a (1, TBN) row vector that
    # broadcasts over rows, i.e. COLUMN scaling -- equal to per-block scaling
    # because the *_bd matrices are exactly block-diagonal.
    a_list = []
    x_list = []
    for c in range(n_chains):
        p = px_ref[pl.ds(c, 1), :]                       # (1, TBN)
        x_list.append(px_ref[pl.ds(n_chains + c, 1), :]) # (1, TBN)
        a_list.append(scale * (h0t + (100.0 * p) * hintt + (p * p) * disst))

    # Taylor series of exp(A) - I, statically unrolled, chains interleaved so the
    # MXU gets n_chains independent dots per serial step.
    term = list(a_list)
    s_list = list(a_list)
    for k in range(2, order + 1):
        inv_k = 1.0 / float(k)
        term = [jnp.dot(term[c], a_list[c],
                        preferred_element_type=jnp.float32,
                        precision=MXU_PRECISION) * inv_k
                for c in range(n_chains)]
        s_list = [s_list[c] + term[c] for c in range(n_chains)]

    # Squaring in S-form: exp(2A) - I = 2S + S@S (no identity materialized).
    for _ in range(nsq):
        sq = [jnp.dot(s_list[c], s_list[c],
                      preferred_element_type=jnp.float32,
                      precision=MXU_PRECISION)
              for c in range(n_chains)]
        s_list = [2.0 * s_list[c] + sq[c] for c in range(n_chains)]

    # Final matvec, MXU-native orientation (contract lhs dim 1 with rhs dim 0):
    # y_c = x_c @ (I + S_c) = x_c + x_c @ S_c.  Lane-dense (1,128) stores.
    for c in range(n_chains):
        yc = x_list[c] + lax.dot_general(
            x_list[c], s_list[c], (((1,), (0,)), ((), ())),
            preferred_element_type=jnp.float32, precision=MXU_PRECISION)
        y_ref[pl.ds(c, 1), :] = yc.astype(y_ref.dtype)


# ----------------------------------------------------------------------------
# Forward (glue: batch-independent contractions + pallas_call)
# ----------------------------------------------------------------------------
def exp_ll_forward(x, potential, v_x, v_y, omega, omega_int, f, d):
    data_dim = v_x.shape[0]
    n1 = data_dim + 1

    c_re = v_x.T @ v_x + v_y.T @ v_y
    c_im = v_x.T @ v_y - v_y.T @ v_x

    re_1 = -4.0 * jnp.einsum("mjk,nik,ij->mn", f, f, c_re)
    re_2 = -4.0 * jnp.einsum("mik,njk,ij->mn", f, f, c_re)
    im_1 = -4.0 * jnp.einsum("mjk,nik,ij->mn", f, d, c_im)
    im_2 = 4.0 * jnp.einsum("mik,njk,ij->mn", f, d, c_im)
    d_super_x = re_1 + re_2 + im_1 + im_2
    tr_id = -4.0 * jnp.einsum("imj,ij->m", f, c_im)

    diss = (jnp.zeros((n1, n1), jnp.float32)
            .at[1:, 1:].set(d_super_x)
            .at[1:, 0].set(tr_id))
    h_x = 4.0 * jnp.einsum("ijk,k->ji", f, omega)
    h_x_int = 4.0 * jnp.einsum("ijk,k->ji", f, omega_int)
    H0 = jnp.zeros((n1, n1), jnp.float32).at[1:, 1:].set(h_x)
    Hint = jnp.zeros((n1, n1), jnp.float32).at[1:, 1:].set(h_x_int)

    # Minimal static scaling exponent that keeps the scaled 1-norm <= NORM_TARGET.
    nsq = _choose_num_squarings(H0, Hint, diss, potential)

    # TRANSPOSED block-diagonal replicas (TB copies on the diagonal) -> (TBN, TBN),
    # so the whole exp-chain runs on dt*L^T and the final matvec needs no transpose.
    eye_tb = jnp.eye(TB, dtype=jnp.float32)
    H0T_bd = jnp.kron(eye_tb, H0.T)
    HintT_bd = jnp.kron(eye_tb, Hint.T)
    DissT_bd = jnp.kron(eye_tb, diss.T)

    if x.ndim == 1:
        x = x.reshape(1, data_dim)
    B = x.shape[0]
    samples_per_step = C * TB
    num_steps = (B + samples_per_step - 1) // samples_per_step
    B_pad = num_steps * samples_per_step

    # Augmented inputs and per-lane potentials, padded (padded rows are all-zero;
    # they are computed at p=0 and discarded after the kernel -> no masking needed).
    x_aug = jnp.concatenate([jnp.ones((B, 1), jnp.float32), x.astype(jnp.float32)], axis=1)
    x_aug = jnp.pad(x_aug, ((0, B_pad - B), (0, 0)))
    pot = jnp.pad(potential.astype(jnp.float32), (0, B_pad - B))

    x_tiles = x_aug.reshape(num_steps, C, TB * n1)
    pot_tiles = jnp.repeat(pot, n1).reshape(num_steps, C, TB * n1)
    # Single packed data input per step: rows 0..C-1 = potentials, C..2C-1 = x.
    px = jnp.concatenate([pot_tiles, x_tiles], axis=1)   # (num_steps, 2C, TBN)

    kernel = functools.partial(expm_matvec_kernel, nsq=nsq,
                               order=TAYLOR_ORDER, n_chains=C)

    y_packed = pl.pallas_call(
        kernel,
        out_shape=jax.ShapeDtypeStruct((num_steps, C, TB * n1), jnp.float32),
        grid_spec=pltpu.PrefetchScalarGridSpec(
            num_scalar_prefetch=0,
            grid=(num_steps,),
            in_specs=[
                # (2C, TBN) = (8, 128): one full vreg-shaped, lane-dense block.
                pl.BlockSpec((None, 2 * C, TB * n1), lambda i: (i, 0, 0)),
                # Constant blocks: index never changes, DMA'd once and kept resident.
                pl.BlockSpec((TB * n1, TB * n1), lambda i: (0, 0)),   # H0^T block-diag
                pl.BlockSpec((TB * n1, TB * n1), lambda i: (0, 0)),   # Hint^T block-diag
                pl.BlockSpec((TB * n1, TB * n1), lambda i: (0, 0)),   # D^T block-diag
            ],
            out_specs=pl.BlockSpec((None, C, TB * n1), lambda i: (i, 0, 0)),
        ),
        # Each grid step is independent -> shards across TensorCores (v7x megacore).
        compiler_params=pltpu.CompilerParams(dimension_semantics=("parallel",)),
    )(px, H0T_bd, HintT_bd, DissT_bd)

    y = y_packed.reshape(B_pad, n1)[:B, 1:]
    return y


# Pure-JAX reference (uses jax.scipy expm) for a sanity check
def exp_ll_forward_ref(x, potential, v_x, v_y, omega, omega_int, f, d):
    data_dim = v_x.shape[0]
    n1 = data_dim + 1
    c_re = v_x.T @ v_x + v_y.T @ v_y
    c_im = v_x.T @ v_y - v_y.T @ v_x
    re_1 = -4.0 * jnp.einsum("mjk,nik,ij->mn", f, f, c_re)
    re_2 = -4.0 * jnp.einsum("mik,njk,ij->mn", f, f, c_re)
    im_1 = -4.0 * jnp.einsum("mjk,nik,ij->mn", f, d, c_im)
    im_2 = 4.0 * jnp.einsum("mik,njk,ij->mn", f, d, c_im)
    d_super_x = re_1 + re_2 + im_1 + im_2
    tr_id = -4.0 * jnp.einsum("imj,ij->m", f, c_im)
    diss = (jnp.zeros((n1, n1), jnp.float32)
            .at[1:, 1:].set(d_super_x)
            .at[1:, 0].set(tr_id))
    H0 = jnp.zeros((n1, n1), jnp.float32).at[1:, 1:].set(4.0 * jnp.einsum("ijk,k->ji", f, omega))
    Hint = jnp.zeros((n1, n1), jnp.float32).at[1:, 1:].set(4.0 * jnp.einsum("ijk,k->ji", f, omega_int))
    L = (H0[None, :, :]
         + (100.0 * potential)[:, None, None] * Hint[None, :, :]
         + (potential ** 2)[:, None, None] * diss[None, :, :])
    expL = jax.scipy.linalg.expm(DT * L)
    B = x.shape[0]
    x_aug = jnp.concatenate([jnp.ones((B, 1), jnp.float32), x.astype(jnp.float32)], axis=1)
    y = jnp.einsum("ikj,ij->ik", expL, x_aug)
    return y[:, 1:]


if __name__ == "__main__":
    key = jax.random.PRNGKey(0)
    kp, kx, kpot = jax.random.split(key, 3)

    n = int(np.sqrt(DATA_DIM + 1))
    f_np, d_np = pauli_s_const(n)
    f = jnp.asarray(f_np)
    d = jnp.asarray(d_np)

    v_x, v_y, omega, omega_int = init_params(kp, DATA_DIM)

    B = 40   # exercises 2 grid steps (32 samples each) + a padded tail (24 rows)
    x = 0.1 * jax.random.normal(kx, (B, DATA_DIM), jnp.float32)
    potential = jax.random.uniform(kpot, (B,), jnp.float32, 0.0, 1.0)

    y = exp_ll_forward(x, potential, v_x, v_y, omega, omega_int, f, d)
    y = jax.block_until_ready(y)

    y_ref = jax.block_until_ready(
        exp_ll_forward_ref(x, potential, v_x, v_y, omega, omega_int, f, d))
    np.testing.assert_allclose(np.asarray(y), np.asarray(y_ref), rtol=5e-3, atol=5e-3)

    print("KERNEL_OK")
</pallas_src>

<mosaic_0001>
module attributes {stable_mosaic.version = 11 : i64} {
  func.func @expm_matvec_kernel(%arg0: i32, %arg1: memref<1x8x128xf32, #tpu.memory_space<vmem>>, %arg2: memref<128x128xf32, #tpu.memory_space<vmem>>, %arg3: memref<128x128xf32, #tpu.memory_space<vmem>>, %arg4: memref<128x128xf32, #tpu.memory_space<vmem>>, %arg5: memref<1x4x128xf32, #tpu.memory_space<vmem>>) attributes {dimension_semantics = [#tpu.dimension_semantics<parallel>], iteration_bounds = array<i64: 2>, scalar_prefetch = 0 : i64, scratch_operands = 0 : i64, tpu.core_type = #tpu.core_type<tc>, window_params = [{transform_indices = @transform_0, window_bounds = array<i64: 1, 8, 128>}, {pipeline_mode = #tpu.pipeline_mode<synchronous>, transform_indices = @transform_1, window_bounds = array<i64: 128, 128>}, {pipeline_mode = #tpu.pipeline_mode<synchronous>, transform_indices = @transform_2, window_bounds = array<i64: 128, 128>}, {pipeline_mode = #tpu.pipeline_mode<synchronous>, transform_indices = @transform_3, window_bounds = array<i64: 128, 128>}, {transform_indices = @transform_4, window_bounds = array<i64: 1, 4, 128>}]} {
    %c0 = arith.constant 0 : index
    %c0_0 = arith.constant 0 : index
    %0 = vector.load %arg2[%c0, %c0_0] : memref<128x128xf32, #tpu.memory_space<vmem>>, vector<128x128xf32>
    %c0_1 = arith.constant 0 : index
    %c0_2 = arith.constant 0 : index
    %1 = vector.load %arg3[%c0_1, %c0_2] : memref<128x128xf32, #tpu.memory_space<vmem>>, vector<128x128xf32>
    %c0_3 = arith.constant 0 : index
    %c0_4 = arith.constant 0 : index
    %2 = vector.load %arg4[%c0_3, %c0_4] : memref<128x128xf32, #tpu.memory_space<vmem>>, vector<128x128xf32>
    %c0_5 = arith.constant 0 : index
    %c0_6 = arith.constant 0 : index
    %c0_7 = arith.constant 0 : index
    %3 = vector.load %arg1[%c0_5, %c0_6, %c0_7] : memref<1x8x128xf32, #tpu.memory_space<vmem>>, vector<1x1x128xf32>
    %4 = vector.shape_cast %3 : vector<1x1x128xf32> to vector<1x128xf32>
    %c0_8 = arith.constant 0 : index
    %c4 = arith.constant 4 : index
    %c0_9 = arith.constant 0 : index
    %5 = vector.load %arg1[%c0_8, %c4, %c0_9] : memref<1x8x128xf32, #tpu.memory_space<vmem>>, vector<1x1x128xf32>
    %6 = vector.shape_cast %5 : vector<1x1x128xf32> to vector<1x128xf32>
    %cst = arith.constant 1.000000e+02 : f32
    %7 = vector.broadcast %cst : f32 to vector<1x128xf32>
    %8 = arith.mulf %7, %4 : vector<1x128xf32>
    %9 = vector.broadcast %8 : vector<1x128xf32> to vector<128x128xf32>
    %10 = arith.mulf %9, %1 : vector<128x128xf32>
    %11 = arith.addf %0, %10 : vector<128x128xf32>
    %12 = arith.mulf %4, %4 : vector<1x128xf32>
    %13 = vector.broadcast %12 : vector<1x128xf32> to vector<128x128xf32>
    %14 = arith.mulf %13, %2 : vector<128x128xf32>
    %15 = arith.addf %11, %14 : vector<128x128xf32>
    %cst_10 = arith.constant 1.250000e-03 : f32
    %16 = vector.broadcast %cst_10 : f32 to vector<128x128xf32>
    %17 = arith.mulf %16, %15 : vector<128x128xf32>
    %c0_11 = arith.constant 0 : index
    %c1 = arith.constant 1 : index
    %c0_12 = arith.constant 0 : index
    %18 = vector.load %arg1[%c0_11, %c1, %c0_12] : memref<1x8x128xf32, #tpu.memory_space<vmem>>, vector<1x1x128xf32>
    %19 = vector.shape_cast %18 : vector<1x1x128xf32> to vector<1x128xf32>
    %c0_13 = arith.constant 0 : index
    %c5 = arith.constant 5 : index
    %c0_14 = arith.constant 0 : index
    %20 = vector.load %arg1[%c0_13, %c5, %c0_14] : memref<1x8x128xf32, #tpu.memory_space<vmem>>, vector<1x1x128xf32>
    %21 = vector.shape_cast %20 : vector<1x1x128xf32> to vector<1x128xf32>
    %cst_15 = arith.constant 1.000000e+02 : f32
    %22 = vector.broadcast %cst_15 : f32 to vector<1x128xf32>
    %23 = arith.mulf %22, %19 : vector<1x128xf32>
    %24 = vector.broadcast %23 : vector<1x128xf32> to vector<128x128xf32>
    %25 = arith.mulf %24, %1 : vector<128x128xf32>
    %26 = arith.addf %0, %25 : vector<128x128xf32>
    %27 = arith.mulf %19, %19 : vector<1x128xf32>
    %28 = vector.broadcast %27 : vector<1x128xf32> to vector<128x128xf32>
    %29 = arith.mulf %28, %2 : vector<128x128xf32>
    %30 = arith.addf %26, %29 : vector<128x128xf32>
    %cst_16 = arith.constant 1.250000e-03 : f32
    %31 = vector.broadcast %cst_16 : f32 to vector<128x128xf32>
    %32 = arith.mulf %31, %30 : vector<128x128xf32>
    %c0_17 = arith.constant 0 : index
    %c2 = arith.constant 2 : index
    %c0_18 = arith.constant 0 : index
    %33 = vector.load %arg1[%c0_17, %c2, %c0_18] : memref<1x8x128xf32, #tpu.memory_space<vmem>>, vector<1x1x128xf32>
    %34 = vector.shape_cast %33 : vector<1x1x128xf32> to vector<1x128xf32>
    %c0_19 = arith.constant 0 : index
    %c6 = arith.constant 6 : index
    %c0_20 = arith.constant 0 : index
    %35 = vector.load %arg1[%c0_19, %c6, %c0_20] : memref<1x8x128xf32, #tpu.memory_space<vmem>>, vector<1x1x128xf32>
    %36 = vector.shape_cast %35 : vector<1x1x128xf32> to vector<1x128xf32>
    %cst_21 = arith.constant 1.000000e+02 : f32
    %37 = vector.broadcast %cst_21 : f32 to vector<1x128xf32>
    %38 = arith.mulf %37, %34 : vector<1x128xf32>
    %39 = vector.broadcast %38 : vector<1x128xf32> to vector<128x128xf32>
    %40 = arith.mulf %39, %1 : vector<128x128xf32>
    %41 = arith.addf %0, %40 : vector<128x128xf32>
    %42 = arith.mulf %34, %34 : vector<1x128xf32>
    %43 = vector.broadcast %42 : vector<1x128xf32> to vector<128x128xf32>
    %44 = arith.mulf %43, %2 : vector<128x128xf32>
    %45 = arith.addf %41, %44 : vector<128x128xf32>
    %cst_22 = arith.constant 1.250000e-03 : f32
    %46 = vector.broadcast %cst_22 : f32 to vector<128x128xf32>
    %47 = arith.mulf %46, %45 : vector<128x128xf32>
    %c0_23 = arith.constant 0 : index
    %c3 = arith.constant 3 : index
    %c0_24 = arith.constant 0 : index
    %48 = vector.load %arg1[%c0_23, %c3, %c0_24] : memref<1x8x128xf32, #tpu.memory_space<vmem>>, vector<1x1x128xf32>
    %49 = vector.shape_cast %48 : vector<1x1x128xf32> to vector<1x128xf32>
    %c0_25 = arith.constant 0 : index
    %c7 = arith.constant 7 : index
    %c0_26 = arith.constant 0 : index
    %50 = vector.load %arg1[%c0_25, %c7, %c0_26] : memref<1x8x128xf32, #tpu.memory_space<vmem>>, vector<1x1x128xf32>
    %51 = vector.shape_cast %50 : vector<1x1x128xf32> to vector<1x128xf32>
    %cst_27 = arith.constant 1.000000e+02 : f32
    %52 = vector.broadcast %cst_27 : f32 to vector<1x128xf32>
    %53 = arith.mulf %52, %49 : vector<1x128xf32>
    %54 = vector.broadcast %53 : vector<1x128xf32> to vector<128x128xf32>
    %55 = arith.mulf %54, %1 : vector<128x128xf32>
    %56 = arith.addf %0, %55 : vector<128x128xf32>
    %57 = arith.mulf %49, %49 : vector<1x128xf32>
    %58 = vector.broadcast %57 : vector<1x128xf32> to vector<128x128xf32>
    %59 = arith.mulf %58, %2 : vector<128x128xf32>
    %60 = arith.addf %56, %59 : vector<128x128xf32>
    %cst_28 = arith.constant 1.250000e-03 : f32
    %61 = vector.broadcast %cst_28 : f32 to vector<128x128xf32>
    %62 = arith.mulf %61, %60 : vector<128x128xf32>
    %cst_29 = arith.constant dense<0.000000e+00> : vector<128x128xf32>
    %63 = tpu.matmul %17, %17, %cst_29 {dimension_numbers = #tpu.dot_dimension_numbers<[1], [0], [0], [1], [0, 0, 1, 1], [], []>} : vector<128x128xf32>, vector<128x128xf32>, vector<128x128xf32> -> vector<128x128xf32>
    %cst_30 = arith.constant 5.000000e-01 : f32
    %64 = vector.broadcast %cst_30 : f32 to vector<128x128xf32>
    %65 = arith.mulf %63, %64 : vector<128x128xf32>
    %cst_31 = arith.constant dense<0.000000e+00> : vector<128x128xf32>
    %66 = tpu.matmul %32, %32, %cst_31 {dimension_numbers = #tpu.dot_dimension_numbers<[1], [0], [0], [1], [0, 0, 1, 1], [], []>} : vector<128x128xf32>, vector<128x128xf32>, vector<128x128xf32> -> vector<128x128xf32>
    %cst_32 = arith.constant 5.000000e-01 : f32
    %67 = vector.broadcast %cst_32 : f32 to vector<128x128xf32>
    %68 = arith.mulf %66, %67 : vector<128x128xf32>
    %cst_33 = arith.constant dense<0.000000e+00> : vector<128x128xf32>
    %69 = tpu.matmul %47, %47, %cst_33 {dimension_numbers = #tpu.dot_dimension_numbers<[1], [0], [0], [1], [0, 0, 1, 1], [], []>} : vector<128x128xf32>, vector<128x128xf32>, vector<128x128xf32> -> vector<128x128xf32>
    %cst_34 = arith.constant 5.000000e-01 : f32
    %70 = vector.broadcast %cst_34 : f32 to vector<128x128xf32>
    %71 = arith.mulf %69, %70 : vector<128x128xf32>
    %cst_35 = arith.constant dense<0.000000e+00> : vector<128x128xf32>
    %72 = tpu.matmul %62, %62, %cst_35 {dimension_numbers = #tpu.dot_dimension_numbers<[1], [0], [0], [1], [0, 0, 1, 1], [], []>} : vector<128x128xf32>, vector<128x128xf32>, vector<128x128xf32> -> vector<128x128xf32>
    %cst_36 = arith.constant 5.000000e-01 : f32
    %73 = vector.broadcast %cst_36 : f32 to vector<128x128xf32>
    %74 = arith.mulf %72, %73 : vector<128x128xf32>
    %75 = arith.addf %17, %65 : vector<128x128xf32>
    %76 = arith.addf %32, %68 : vector<128x128xf32>
    %77 = arith.addf %47, %71 : vector<128x128xf32>
    %78 = arith.addf %62, %74 : vector<128x128xf32>
    %cst_37 = arith.constant dense<0.000000e+00> : vector<128x128xf32>
    %79 = tpu.matmul %65, %17, %cst_37 {dimension_numbers = #tpu.dot_dimension_numbers<[1], [0], [0], [1], [0, 0, 1, 1], [], []>} : vector<128x128xf32>, vector<128x128xf32>, vector<128x128xf32> -> vector<128x128xf32>
    %cst_38 = arith.constant 0.333333343 : f32
    %80 = vector.broadcast %cst_38 : f32 to vector<128x128xf32>
    %81 = arith.mulf %79, %80 : vector<128x128xf32>
    %cst_39 = arith.constant dense<0.000000e+00> : vector<128x128xf32>
    %82 = tpu.matmul %68, %32, %cst_39 {dimension_numbers = #tpu.dot_dimension_numbers<[1], [0], [0], [1], [0, 0, 1, 1], [], []>} : vector<128x128xf32>, vector<128x128xf32>, vector<128x128xf32> -> vector<128x128xf32>
    %cst_40 = arith.constant 0.333333343 : f32
    %83 = vector.broadcast %cst_40 : f32 to vector<128x128xf32>
    %84 = arith.mulf %82, %83 : vector<128x128xf32>
    %cst_41 = arith.constant dense<0.000000e+00> : vector<128x128xf32>
    %85 = tpu.matmul %71, %47, %cst_41 {dimension_numbers = #tpu.dot_dimension_numbers<[1], [0], [0], [1], [0, 0, 1, 1], [], []>} : vector<128x128xf32>, vector<128x128xf32>, vector<128x128xf32> -> vector<128x128xf32>
    %cst_42 = arith.constant 0.333333343 : f32
    %86 = vector.broadcast %cst_42 : f32 to vector<128x128xf32>
    %87 = arith.mulf %85, %86 : vector<128x128xf32>
    %cst_43 = arith.constant dense<0.000000e+00> : vector<128x128xf32>
    %88 = tpu.matmul %74, %62, %cst_43 {dimension_numbers = #tpu.dot_dimension_numbers<[1], [0], [0], [1], [0, 0, 1, 1], [], []>} : vector<128x128xf32>, vector<128x128xf32>, vector<128x128xf32> -> vector<128x128xf32>
    %cst_44 = arith.constant 0.333333343 : f32
    %89 = vector.broadcast %cst_44 : f32 to vector<128x128xf32>
    %90 = arith.mulf %88, %89 : vector<128x128xf32>
    %91 = arith.addf %75, %81 : vector<128x128xf32>
    %92 = arith.addf %76, %84 : vector<128x128xf32>
    %93 = arith.addf %77, %87 : vector<128x128xf32>
    %94 = arith.addf %78, %90 : vector<128x128xf32>
    %cst_45 = arith.constant dense<0.000000e+00> : vector<128x128xf32>
    %95 = tpu.matmul %81, %17, %cst_45 {dimension_numbers = #tpu.dot_dimension_numbers<[1], [0], [0], [1], [0, 0, 1, 1], [], []>} : vector<128x128xf32>, vector<128x128xf32>, vector<128x128xf32> -> vector<128x128xf32>
    %cst_46 = arith.constant 2.500000e-01 : f32
    %96 = vector.broadcast %cst_46 : f32 to vector<128x128xf32>
    %97 = arith.mulf %95, %96 : vector<128x128xf32>
    %cst_47 = arith.constant dense<0.000000e+00> : vector<128x128xf32>
    %98 = tpu.matmul %84, %32, %cst_47 {dimension_numbers = #tpu.dot_dimension_numbers<[1], [0], [0], [1], [0, 0, 1, 1], [], []>} : vector<128x128xf32>, vector<128x128xf32>, vector<128x128xf32> -> vector<128x128xf32>
    %cst_48 = arith.constant 2.500000e-01 : f32
    %99 = vector.broadcast %cst_48 : f32 to vector<128x128xf32>
    %100 = arith.mulf %98, %99 : vector<128x128xf32>
    %cst_49 = arith.constant dense<0.000000e+00> : vector<128x128xf32>
    %101 = tpu.matmul %87, %47, %cst_49 {dimension_numbers = #tpu.dot_dimension_numbers<[1], [0], [0], [1], [0, 0, 1, 1], [], []>} : vector<128x128xf32>, vector<128x128xf32>, vector<128x128xf32> -> vector<128x128xf32>
    %cst_50 = arith.constant 2.500000e-01 : f32
    %102 = vector.broadcast %cst_50 : f32 to vector<128x128xf32>
    %103 = arith.mulf %101, %102 : vector<128x128xf32>
    %cst_51 = arith.constant dense<0.000000e+00> : vector<128x128xf32>
    %104 = tpu.matmul %90, %62, %cst_51 {dimension_numbers = #tpu.dot_dimension_numbers<[1], [0], [0], [1], [0, 0, 1, 1], [], []>} : vector<128x128xf32>, vector<128x128xf32>, vector<128x128xf32> -> vector<128x128xf32>
    %cst_52 = arith.constant 2.500000e-01 : f32
    %105 = vector.broadcast %cst_52 : f32 to vector<128x128xf32>
    %106 = arith.mulf %104, %105 : vector<128x128xf32>
    %107 = arith.addf %91, %97 : vector<128x128xf32>
    %108 = arith.addf %92, %100 : vector<128x128xf32>
    %109 = arith.addf %93, %103 : vector<128x128xf32>
    %110 = arith.addf %94, %106 : vector<128x128xf32>
    %cst_53 = arith.constant dense<0.000000e+00> : vector<128x128xf32>
    %111 = tpu.matmul %97, %17, %cst_53 {dimension_numbers = #tpu.dot_dimension_numbers<[1], [0], [0], [1], [0, 0, 1, 1], [], []>} : vector<128x128xf32>, vector<128x128xf32>, vector<128x128xf32> -> vector<128x128xf32>
    %cst_54 = arith.constant 2.000000e-01 : f32
    %112 = vector.broadcast %cst_54 : f32 to vector<128x128xf32>
    %113 = arith.mulf %111, %112 : vector<128x128xf32>
    %cst_55 = arith.constant dense<0.000000e+00> : vector<128x128xf32>
    %114 = tpu.matmul %100, %32, %cst_55 {dimension_numbers = #tpu.dot_dimension_numbers<[1], [0], [0], [1], [0, 0, 1, 1], [], []>} : vector<128x128xf32>, vector<128x128xf32>, vector<128x128xf32> -> vector<128x128xf32>
    %cst_56 = arith.constant 2.000000e-01 : f32
    %115 = vector.broadcast %cst_56 : f32 to vector<128x128xf32>
    %116 = arith.mulf %114, %115 : vector<128x128xf32>
    %cst_57 = arith.constant dense<0.000000e+00> : vector<128x128xf32>
    %117 = tpu.matmul %103, %47, %cst_57 {dimension_numbers = #tpu.dot_dimension_numbers<[1], [0], [0], [1], [0, 0, 1, 1], [], []>} : vector<128x128xf32>, vector<128x128xf32>, vector<128x128xf32> -> vector<128x128xf32>
    %cst_58 = arith.constant 2.000000e-01 : f32
    %118 = vector.broadcast %cst_58 : f32 to vector<128x128xf32>
    %119 = arith.mulf %117, %118 : vector<128x128xf32>
    %cst_59 = arith.constant dense<0.000000e+00> : vector<128x128xf32>
    %120 = tpu.matmul %106, %62, %cst_59 {dimension_numbers = #tpu.dot_dimension_numbers<[1], [0], [0], [1], [0, 0, 1, 1], [], []>} : vector<128x128xf32>, vector<128x128xf32>, vector<128x128xf32> -> vector<128x128xf32>
    %cst_60 = arith.constant 2.000000e-01 : f32
    %121 = vector.broadcast %cst_60 : f32 to vector<128x128xf32>
    %122 = arith.mulf %120, %121 : vector<128x128xf32>
    %123 = arith.addf %107, %113 : vector<128x128xf32>
    %124 = arith.addf %108, %116 : vector<128x128xf32>
    %125 = arith.addf %109, %119 : vector<128x128xf32>
    %126 = arith.addf %110, %122 : vector<128x128xf32>
    %cst_61 = arith.constant dense<0.000000e+00> : vector<128x128xf32>
    %127 = tpu.matmul %113, %17, %cst_61 {dimension_numbers = #tpu.dot_dimension_numbers<[1], [0], [0], [1], [0, 0, 1, 1], [], []>} : vector<128x128xf32>, vector<128x128xf32>, vector<128x128xf32> -> vector<128x128xf32>
    %cst_62 = arith.constant 0.166666672 : f32
    %128 = vector.broadcast %cst_62 : f32 to vector<128x128xf32>
    %129 = arith.mulf %127, %128 : vector<128x128xf32>
    %cst_63 = arith.constant dense<0.000000e+00> : vector<128x128xf32>
    %130 = tpu.matmul %116, %32, %cst_63 {dimension_numbers = #tpu.dot_dimension_numbers<[1], [0], [0], [1], [0, 0, 1, 1], [], []>} : vector<128x128xf32>, vector<128x128xf32>, vector<128x128xf32> -> vector<128x128xf32>
    %cst_64 = arith.constant 0.166666672 : f32
    %131 = vector.broadcast %cst_64 : f32 to vector<128x128xf32>
    %132 = arith.mulf %130, %131 : vector<128x128xf32>
    %cst_65 = arith.constant dense<0.000000e+00> : vector<128x128xf32>
    %133 = tpu.matmul %119, %47, %cst_65 {dimension_numbers = #tpu.dot_dimension_numbers<[1], [0], [0], [1], [0, 0, 1, 1], [], []>} : vector<128x128xf32>, vector<128x128xf32>, vector<128x128xf32> -> vector<128x128xf32>
    %cst_66 = arith.constant 0.166666672 : f32
    %134 = vector.broadcast %cst_66 : f32 to vector<128x128xf32>
    %135 = arith.mulf %133, %134 : vector<128x128xf32>
    %cst_67 = arith.constant dense<0.000000e+00> : vector<128x128xf32>
    %136 = tpu.matmul %122, %62, %cst_67 {dimension_numbers = #tpu.dot_dimension_numbers<[1], [0], [0], [1], [0, 0, 1, 1], [], []>} : vector<128x128xf32>, vector<128x128xf32>, vector<128x128xf32> -> vector<128x128xf32>
    %cst_68 = arith.constant 0.166666672 : f32
    %137 = vector.broadcast %cst_68 : f32 to vector<128x128xf32>
    %138 = arith.mulf %136, %137 : vector<128x128xf32>
    %139 = arith.addf %123, %129 : vector<128x128xf32>
    %140 = arith.addf %124, %132 : vector<128x128xf32>
    %141 = arith.addf %125, %135 : vector<128x128xf32>
    %142 = arith.addf %126, %138 : vector<128x128xf32>
    %cst_69 = arith.constant dense<0.000000e+00> : vector<128x128xf32>
    %143 = tpu.matmul %139, %139, %cst_69 {dimension_numbers = #tpu.dot_dimension_numbers<[1], [0], [0], [1], [0, 0, 1, 1], [], []>} : vector<128x128xf32>, vector<128x128xf32>, vector<128x128xf32> -> vector<128x128xf32>
    %cst_70 = arith.constant dense<0.000000e+00> : vector<128x128xf32>
    %144 = tpu.matmul %140, %140, %cst_70 {dimension_numbers = #tpu.dot_dimension_numbers<[1], [0], [0], [1], [0, 0, 1, 1], [], []>} : vector<128x128xf32>, vector<128x128xf32>, vector<128x128xf32> -> vector<128x128xf32>
    %cst_71 = arith.constant dense<0.000000e+00> : vector<128x128xf32>
    %145 = tpu.matmul %141, %141, %cst_71 {dimension_numbers = #tpu.dot_dimension_numbers<[1], [0], [0], [1], [0, 0, 1, 1], [], []>} : vector<128x128xf32>, vector<128x128xf32>, vector<128x128xf32> -> vector<128x128xf32>
    %cst_72 = arith.constant dense<0.000000e+00> : vector<128x128xf32>
    %146 = tpu.matmul %142, %142, %cst_72 {dimension_numbers = #tpu.dot_dimension_numbers<[1], [0], [0], [1], [0, 0, 1, 1], [], []>} : vector<128x128xf32>, vector<128x128xf32>, vector<128x128xf32> -> vector<128x128xf32>
    %cst_73 = arith.constant 2.000000e+00 : f32
    %147 = vector.broadcast %cst_73 : f32 to vector<128x128xf32>
    %148 = arith.mulf %147, %139 : vector<128x128xf32>
    %149 = arith.addf %148, %143 : vector<128x128xf32>
    %cst_74 = arith.constant 2.000000e+00 : f32
    %150 = vector.broadcast %cst_74 : f32 to vector<128x128xf32>
    %151 = arith.mulf %150, %140 : vector<128x128xf32>
    %152 = arith.addf %151, %144 : vector<128x128xf32>
    %cst_75 = arith.constant 2.000000e+00 : f32
    %153 = vector.broadcast %cst_75 : f32 to vector<128x128xf32>
    %154 = arith.mulf %153, %141 : vector<128x128xf32>
    %155 = arith.addf %154, %145 : vector<128x128xf32>
    %cst_76 = arith.constant 2.000000e+00 : f32
    %156 = vector.broadcast %cst_76 : f32 to vector<128x128xf32>
    %157 = arith.mulf %156, %142 : vector<128x128xf32>
    %158 = arith.addf %157, %146 : vector<128x128xf32>
    %cst_77 = arith.constant dense<0.000000e+00> : vector<128x128xf32>
    %159 = tpu.matmul %149, %149, %cst_77 {dimension_numbers = #tpu.dot_dimension_numbers<[1], [0], [0], [1], [0, 0, 1, 1], [], []>} : vector<128x128xf32>, vector<128x128xf32>, vector<128x128xf32> -> vector<128x128xf32>
    %cst_78 = arith.constant dense<0.000000e+00> : vector<128x128xf32>
    %160 = tpu.matmul %152, %152, %cst_78 {dimension_numbers = #tpu.dot_dimension_numbers<[1], [0], [0], [1], [0, 0, 1, 1], [], []>} : vector<128x128xf32>, vector<128x128xf32>, vector<128x128xf32> -> vector<128x128xf32>
    %cst_79 = arith.constant dense<0.000000e+00> : vector<128x128xf32>
    %161 = tpu.matmul %155, %155, %cst_79 {dimension_numbers = #tpu.dot_dimension_numbers<[1], [0], [0], [1], [0, 0, 1, 1], [], []>} : vector<128x128xf32>, vector<128x128xf32>, vector<128x128xf32> -> vector<128x128xf32>
    %cst_80 = arith.constant dense<0.000000e+00> : vector<128x128xf32>
    %162 = tpu.matmul %158, %158, %cst_80 {dimension_numbers = #tpu.dot_dimension_numbers<[1], [0], [0], [1], [0, 0, 1, 1], [], []>} : vector<128x128xf32>, vector<128x128xf32>, vector<128x128xf32> -> vector<128x128xf32>
    %cst_81 = arith.constant 2.000000e+00 : f32
    %163 = vector.broadcast %cst_81 : f32 to vector<128x128xf32>
    %164 = arith.mulf %163, %149 : vector<128x128xf32>
    %165 = arith.addf %164, %159 : vector<128x128xf32>
    %cst_82 = arith.constant 2.000000e+00 : f32
    %166 = vector.broadcast %cst_82 : f32 to vector<128x128xf32>
    %167 = arith.mulf %166, %152 : vector<128x128xf32>
    %168 = arith.addf %167, %160 : vector<128x128xf32>
    %cst_83 = arith.constant 2.000000e+00 : f32
    %169 = vector.broadcast %cst_83 : f32 to vector<128x128xf32>
    %170 = arith.mulf %169, %155 : vector<128x128xf32>
    %171 = arith.addf %170, %161 : vector<128x128xf32>
    %cst_84 = arith.constant 2.000000e+00 : f32
    %172 = vector.broadcast %cst_84 : f32 to vector<128x128xf32>
    %173 = arith.mulf %172, %158 : vector<128x128xf32>
    %174 = arith.addf %173, %162 : vector<128x128xf32>
    %cst_85 = arith.constant dense<0.000000e+00> : vector<128x128xf32>
    %175 = tpu.matmul %165, %165, %cst_85 {dimension_numbers = #tpu.dot_dimension_numbers<[1], [0], [0], [1], [0, 0, 1, 1], [], []>} : vector<128x128xf32>, vector<128x128xf32>, vector<128x128xf32> -> vector<128x128xf32>
    %cst_86 = arith.constant dense<0.000000e+00> : vector<128x128xf32>
    %176 = tpu.matmul %168, %168, %cst_86 {dimension_numbers = #tpu.dot_dimension_numbers<[1], [0], [0], [1], [0, 0, 1, 1], [], []>} : vector<128x128xf32>, vector<128x128xf32>, vector<128x128xf32> -> vector<128x128xf32>
    %cst_87 = arith.constant dense<0.000000e+00> : vector<128x128xf32>
    %177 = tpu.matmul %171, %171, %cst_87 {dimension_numbers = #tpu.dot_dimension_numbers<[1], [0], [0], [1], [0, 0, 1, 1], [], []>} : vector<128x128xf32>, vector<128x128xf32>, vector<128x128xf32> -> vector<128x128xf32>
    %cst_88 = arith.constant dense<0.000000e+00> : vector<128x128xf32>
    %178 = tpu.matmul %174, %174, %cst_88 {dimension_numbers = #tpu.dot_dimension_numbers<[1], [0], [0], [1], [0, 0, 1, 1], [], []>} : vector<128x128xf32>, vector<128x128xf32>, vector<128x128xf32> -> vector<128x128xf32>
    %cst_89 = arith.constant 2.000000e+00 : f32
    %179 = vector.broadcast %cst_89 : f32 to vector<128x128xf32>
    %180 = arith.mulf %179, %165 : vector<128x128xf32>
    %181 = arith.addf %180, %175 : vector<128x128xf32>
    %cst_90 = arith.constant 2.000000e+00 : f32
    %182 = vector.broadcast %cst_90 : f32 to vector<128x128xf32>
    %183 = arith.mulf %182, %168 : vector<128x128xf32>
    %184 = arith.addf %183, %176 : vector<128x128xf32>
    %cst_91 = arith.constant 2.000000e+00 : f32
    %185 = vector.broadcast %cst_91 : f32 to vector<128x128xf32>
    %186 = arith.mulf %185, %171 : vector<128x128xf32>
    %187 = arith.addf %186, %177 : vector<128x128xf32>
    %cst_92 = arith.constant 2.000000e+00 : f32
    %188 = vector.broadcast %cst_92 : f32 to vector<128x128xf32>
    %189 = arith.mulf %188, %174 : vector<128x128xf32>
    %190 = arith.addf %189, %178 : vector<128x128xf32>
    %cst_93 = arith.constant dense<0.000000e+00> : vector<1x128xf32>
    %191 = tpu.matmul %6, %181, %cst_93 {dimension_numbers = #tpu.dot_dimension_numbers<[1], [0], [0], [1], [0, 0, 1, 1], [], []>} : vector<1x128xf32>, vector<128x128xf32>, vector<1x128xf32> -> vector<1x128xf32>
    %192 = arith.addf %6, %191 : vector<1x128xf32>
    %c0_94 = arith.constant 0 : index
    %c0_95 = arith.constant 0 : index
    %c0_96 = arith.constant 0 : index
    %193 = vector.load %arg5[%c0_94, %c0_95, %c0_96] : memref<1x4x128xf32, #tpu.memory_space<vmem>>, vector<1x1x128xf32>
    %194 = vector.shape_cast %193 : vector<1x1x128xf32> to vector<1x128xf32>
    %195 = vector.shape_cast %192 : vector<1x128xf32> to vector<1x1x128xf32>
    tpu.vector_store %arg5[%c0_94, %c0_95, %c0_96], %195 {strides = array<i32>} : memref<1x4x128xf32, #tpu.memory_space<vmem>>, vector<1x1x128xf32>,
    %cst_97 = arith.constant dense<0.000000e+00> : vector<1x128xf32>
    %196 = tpu.matmul %21, %184, %cst_97 {dimension_numbers = #tpu.dot_dimension_numbers<[1], [0], [0], [1], [0, 0, 1, 1], [], []>} : vector<1x128xf32>, vector<128x128xf32>, vector<1x128xf32> -> vector<1x128xf32>
    %197 = arith.addf %21, %196 : vector<1x128xf32>
    %c0_98 = arith.constant 0 : index
    %c1_99 = arith.constant 1 : index
    %c0_100 = arith.constant 0 : index
    %198 = vector.load %arg5[%c0_98, %c1_99, %c0_100] : memref<1x4x128xf32, #tpu.memory_space<vmem>>, vector<1x1x128xf32>
    %199 = vector.shape_cast %198 : vector<1x1x128xf32> to vector<1x128xf32>
    %200 = vector.shape_cast %197 : vector<1x128xf32> to vector<1x1x128xf32>
    tpu.vector_store %arg5[%c0_98, %c1_99, %c0_100], %200 {strides = array<i32>} : memref<1x4x128xf32, #tpu.memory_space<vmem>>, vector<1x1x128xf32>,
    %cst_101 = arith.constant dense<0.000000e+00> : vector<1x128xf32>
    %201 = tpu.matmul %36, %187, %cst_101 {dimension_numbers = #tpu.dot_dimension_numbers<[1], [0], [0], [1], [0, 0, 1, 1], [], []>} : vector<1x128xf32>, vector<128x128xf32>, vector<1x128xf32> -> vector<1x128xf32>
    %202 = arith.addf %36, %201 : vector<1x128xf32>
    %c0_102 = arith.constant 0 : index
    %c2_103 = arith.constant 2 : index
    %c0_104 = arith.constant 0 : index
    %203 = vector.load %arg5[%c0_102, %c2_103, %c0_104] : memref<1x4x128xf32, #tpu.memory_space<vmem>>, vector<1x1x128xf32>
    %204 = vector.shape_cast %203 : vector<1x1x128xf32> to vector<1x128xf32>
    %205 = vector.shape_cast %202 : vector<1x128xf32> to vector<1x1x128xf32>
    tpu.vector_store %arg5[%c0_102, %c2_103, %c0_104], %205 {strides = array<i32>} : memref<1x4x128xf32, #tpu.memory_space<vmem>>, vector<1x1x128xf32>,
    %cst_105 = arith.constant dense<0.000000e+00> : vector<1x128xf32>
    %206 = tpu.matmul %51, %190, %cst_105 {dimension_numbers = #tpu.dot_dimension_numbers<[1], [0], [0], [1], [0, 0, 1, 1], [], []>} : vector<1x128xf32>, vector<128x128xf32>, vector<1x128xf32> -> vector<1x128xf32>
    %207 = arith.addf %51, %206 : vector<1x128xf32>
    %c0_106 = arith.constant 0 : index
    %c3_107 = arith.constant 3 : index
    %c0_108 = arith.constant 0 : index
    %208 = vector.load %arg5[%c0_106, %c3_107, %c0_108] : memref<1x4x128xf32, #tpu.memory_space<vmem>>, vector<1x1x128xf32>
    %209 = vector.shape_cast %208 : vector<1x1x128xf32> to vector<1x128xf32>
    %210 = vector.shape_cast %207 : vector<1x128xf32> to vector<1x1x128xf32>
    tpu.vector_store %arg5[%c0_106, %c3_107, %c0_108], %210 {strides = array<i32>} : memref<1x4x128xf32, #tpu.memory_space<vmem>>, vector<1x1x128xf32>,
    return
  }
  func.func @transform_0(%arg0: i32) -> (i32, i32, i32) {
    %c0_i32 = arith.constant 0 : i32
    %c0_i32_0 = arith.constant 0 : i32
    %c0_i32_1 = arith.constant 0 : i32
    return %arg0, %c0_i32, %c0_i32_0 : i32, i32, i32
  }
  func.func @transform_1(%arg0: i32) -> (i32, i32) {
    %c0_i32 = arith.constant 0 : i32
    %c0_i32_0 = arith.constant 0 : i32
    %c0_i32_1 = arith.constant 0 : i32
    return %c0_i32, %c0_i32_0 : i32, i32
  }
  func.func @transform_2(%arg0: i32) -> (i32, i32) {
    %c0_i32 = arith.constant 0 : i32
    %c0_i32_0 = arith.constant 0 : i32
    %c0_i32_1 = arith.constant 0 : i32
    return %c0_i32, %c0_i32_0 : i32, i32
  }
  func.func @transform_3(%arg0: i32) -> (i32, i32) {
    %c0_i32 = arith.constant 0 : i32
    %c0_i32_0 = arith.constant 0 : i32
    %c0_i32_1 = arith.constant 0 : i32
    return %c0_i32, %c0_i32_0 : i32, i32
  }
  func.func @transform_4(%arg0: i32) -> (i32, i32, i32) {
    %c0_i32 = arith.constant 0 : i32
    %c0_i32_0 = arith.constant 0 : i32
    %c0_i32_1 = arith.constant 0 : i32
    return %arg0, %c0_i32, %c0_i32_0 : i32, i32, i32
  }
}

</mosaic_0001>

<bundles_post_ra>
// kernel: tpu_custom_call.1
= control target key start
LH: loop header
LB: loop body
LE: loop exit
PB: predicated region body
PF: predicated region fallthrough
CT: control target
= control target key end

     0   :  { %9 = vsyncpa [#allocation3], 0  ;;  %s14185_s0 = inlined_call_operand.hbm [shape: f32[2,8,128], index: 0, kind: input, shape index: {}]   ;;  %s14186_s1 = inlined_call_operand.hbm [shape: f32[128,128], index: 1, kind: input, shape index: {}]   ;;  %s14187_s2 = inlined_call_operand.hbm [shape: f32[128,128], index: 2, kind: input, shape index: {}]   ;;  %s14188_s3 = inlined_call_operand.hbm [shape: f32[128,128], index: 3, kind: input, shape index: {}]   ;;  %s14189_s4 = inlined_call_operand.hbm [shape: f32[2,4,128], index: 4, kind: output, shape index: {}]  }
   0x1   :  { %11 = vsyncpa [#allocation3 + $0x1], 0 }
   0x2   :  { %12 = vsyncpa [#allocation6], 0 }
   0x3   :  { %13 = vsyncpa [#allocation9], 0 }
   0x4   :  { %14 = vsyncpa [#allocation4], 0 }
   0x5   :  { %16 = vsyncpa [#allocation4 + $0x1], 0  ;;  %s10075_s15 = smov 0   ;;  %s10077_s16 = smov 0  }
   0x6   :  { %s10079_s17 = smov 0   ;;  %s10081_s18 = smov 0  }
   0x7 LB: > { %s10096_s19 = sadd.s32 4294967295, %s10039_s18   ;;  %s6738_s20 = sadd.s32 4294967294, %s10039_s18   ;;  %s10039_s18 = sphi %s10081_s18, %s15470_s18   ;;  %s10035_s17 = sphi %s10079_s17, %s15469_s17   ;;  %s10031_s16 = sphi %s10077_s16, %s15468_s16   ;;  %s10027_s15 = sphi %s10075_s15, %s15467_s15  }
   0x8   : > { %p42_p0 = scmp.ne.s32.totalorder %s10031_s16, %s10027_s15  ;;  %p14190_p1 = scmp.eq.s32.totalorder %s10096_s19, 0 }
   0x9   : > { %p135_p3 = scmp.eq.s32.totalorder %s6738_s20, 1  ;;  %p6739_p5 = scmp.ge.s32.totalorder %s10039_s18, 1 }
   0xa   : > { %p10105_p4 = por %p14190_p1, %p42_p0  ;;  %p142_p7 = scmp.lt.s32.totalorder %s10039_s18, 3 }
   0xb   : > { %p10110_p6 = por %p135_p3, %p42_p0  ;;  %s10041_s24 = smov [#allocation5]  }
   0xc   : > { %s14597_s21 = scalar_select %p10105_p4, 1, 0 }
   0xd   : > { %s14598_s22 = scalar_select %p10110_p6, 1, 0 }
   0xe   : > { %p10115_p8 = pnand %p6739_p5, %p142_p7  ;;  %s154_s25 = sshll.u32 %s10041_s24, 4  ;;  %s155_s25 = int_to_ptr.vmem [resolvable:$true] %s154_s25 }
   0xf   : > { %s10042_s27 = smov [#allocation7]   ;;  %s10043_s29 = smov [#allocation8]  }
  0x10   : > { %s14599_s23 = scalar_select %p10115_p8, 1, 0 }
  0x11   : > { %p9796_p9 = pneg %p10115_p8  ;;  %s167_s28 = sshll.u32 %s10042_s27, 4  ;;  %s168_s28 = int_to_ptr.vmem [resolvable:$true] %s167_s28 }
  0x12   : > { %s180_s30 = sshll.u32 %s10043_s29, 4  ;;  %s9872_s5 = scalar_lea.vmem %s155_s25, 2048  ;;  %s181_s30 = int_to_ptr.vmem [resolvable:$true] %s180_s30 }
  0x13   : > { %p10124_p11 = pnand %p9796_p9, %p14190_p1  ;;  %p9873_p13 = scmp.ne.s32.totalorder %s155_s25, %s9872_s5 }
  0x14   : > { %p9880_p5 = scmp.lt.s32.totalorder %s155_s25, %s155_s25  ;;  %p9881_p7 = scmp.lt.s32.totalorder %s9872_s5, %s9872_s5 }
  0x15   : > { %p9863_p12 = pneg %p10124_p11 }
  0x16   : > { %p9882_p9 = por %p9881_p7, %p9880_p5 }
  0x17   : > { %p9875_p0 = pnand %p9873_p13, %p9863_p12 }
  0x19   : > { %p9876_p3 = pneg %p9875_p0 }
  0x1b   : > { %p9883_p10 = pnand %p9882_p9, %p9876_p3 }
  0x1d   : > { %9886 = shalt.err (!%p9883_p10)
}
  0x1e   : > { %s10044_s6 = smov 128   ;;  %s10045_s7 = smov 8  }
  0x1f   : > { %9799 = dma.hbm_to_vmem [thread:$0]  (!%p10124_p11), %s14186_s1, 2048, %s155_s25, [#allocation6], %s10044_s6, %s10044_s6, %s10045_s7  }
  0x20   : > { %s9898_s10 = scalar_lea.vmem %s168_s28, 2048  ;;  %p9906_p2 = scmp.lt.s32.totalorder %s168_s28, %s168_s28 }
  0x21   : > { %p9899_p1 = scmp.ne.s32.totalorder %s168_s28, %s9898_s10  ;;  %p9907_p6 = scmp.lt.s32.totalorder %s9898_s10, %s9898_s10 }
  0x23   : > { %p9901_p13 = pnand %p9899_p1, %p9863_p12  ;;  %p9908_p5 = por %p9907_p6, %p9906_p2 }
  0x25   : > { %p9902_p0 = pneg %p9901_p13 }
  0x27   : > { %p9909_p3 = pnand %p9908_p5, %p9902_p0 }
  0x29   : > { %9912 = shalt.err (!%p9909_p3)
}
  0x2a   : > { %9802 = dma.hbm_to_vmem [thread:$0]  (!%p10124_p11), %s14187_s2, 2048, %s168_s28, [#allocation6], %s10044_s6, %s10044_s6, %s10045_s7  }
  0x2b   : > { %s9924_s13 = scalar_lea.vmem %s181_s30, 2048  ;;  %p9932_p9 = scmp.lt.s32.totalorder %s181_s30, %s181_s30 }
  0x2c   : > { %p9925_p10 = scmp.ne.s32.totalorder %s181_s30, %s9924_s13  ;;  %p9933_p13 = scmp.lt.s32.totalorder %s9924_s13, %s9924_s13 }
  0x2e   : > { %p9927_p7 = pnand %p9925_p10, %p9863_p12  ;;  %p9934_p4 = por %p9933_p13, %p9932_p9 }
  0x30   : > { %p9928_p1 = pneg %p9927_p7 }
  0x32   : > { %p9935_p2 = pnand %p9934_p4, %p9928_p1 }
  0x34   : > { %9938 = shalt.err (!%p9935_p2)
}
  0x35   : > { %9805 = dma.hbm_to_vmem [thread:$0]  (!%p10124_p11), %s14188_s3, 2048, %s181_s30, [#allocation9], %s10044_s6, %s10044_s6, %s10045_s7  }
  0x36   : > { %s10155_s24 = sadd.s32 1, %s10039_s18   ;;  %s29_s26 = sadd.s32 1, %s10035_s17 }
  0x37   : > { %s26_s25 = ssub.s32 %s10039_s18, %s10155_s24  ;;  %p36_p6 = scmp.ne.s32.totalorder %s10035_s17, %s10031_s16 }
  0x38   : > { %p27_p4 = scmp.eq.s32.totalorder %s26_s25, 0  ;;  %p37_p12 = scmp.eq.s32.totalorder %s10039_s18, 0 }
  0x39   : > { %p9817_p0 = scmp.lt.s32.totalorder %s10039_s18, 2  ;;  %p14601_p3 = scmp.eq.s32.totalorder %s10096_s19, 1 }
  0x3a   : > { %s10165_s27 = scalar_select %p27_p4, %s10035_s17, %s29_s26  }
  0x3b   : > { %p38_p5 = por %p37_p12, %p36_p6  ;;  %p10169_p10 = por %p14601_p3, %p36_p6 }
  0x3c   : > { %s194_s29 = sand.u32 1, %s10035_s17   ;;  %s6745_s5 = sshll.u32 %s10039_s18, 7 }
  0x3d   : > { %s14602_s28 = scalar_select %p10169_p10, 1, 0 }
  0x3e   : > { %s6744_s30 = sshll.u32 %s194_s29, 3  ;;  %s10178_s8 = scalar_lea.hbm %s14185_s0, %s6745_s5 }
  0x3f   : > { %s198_s9 = scalar_lea.vmem [#allocation2], %s6744_s30  ;;  %p10180_p11 = pnand %p9817_p0, %p38_p5 }
  0x40   : > { %s205_s10 = sshll.u32 %s198_s9, 4  ;;  %s195_s12 = scalar_lea.sflag [#allocation3], %s194_s29  ;;  %s206_s10 = int_to_ptr.vmem [resolvable:$true] %s205_s10 }
  0x41   : > { %s9939_s13 = scalar_lea.hbm %s10178_s8, 128  ;;  %p9941_p1 = pneg %p10180_p11 }
  0x42   : > { %p9940_p7 = scmp.ne.s32.totalorder %s10178_s8, %s9939_s13  ;;  %s9944_s25 = scalar_lea.hbm %s14185_s0, 256 }
  0x43   : > { %p9945_p2 = scmp.lt.s32.totalorder %s10178_s8, %s14185_s0  ;;  %p9946_p4 = scmp.lt.s32.totalorder %s9944_s25, %s9939_s13 }
  0x44   : > { %p9942_p9 = pnand %p9941_p1, %p9940_p7 }
  0x45   : > { %p9947_p6 = por %p9946_p4, %p9945_p2 }
  0x46   : > { %p9943_p13 = pneg %p9942_p9 }
  0x48   : > { %p9948_p12 = pnand %p9947_p6, %p9943_p13 }
  0x4a   : > { %9951 = shalt.err (!%p9948_p12)
}
  0x4b   : > { %s9952_s30 = scalar_lea.vmem %s206_s10, 128  ;;  %s10046_s29 = smov [#allocation2]  }
  0x4c   : > { %p9953_p0 = scmp.ne.s32.totalorder %s206_s10, %s9952_s30  ;;  %s9957_s6 = sshll.u32 %s10046_s29, 4  ;;  %s9958_s6 = int_to_ptr.vmem [resolvable:$false] %s9957_s6 }
  0x4d   : > { %s9959_s7 = scalar_lea.vmem %s9958_s6, 256  ;;  %p9960_p7 = scmp.lt.s32.totalorder %s206_s10, %s9958_s6 }
  0x4e   : > { %p9955_p5 = pnand %p9953_p0, %p9941_p1  ;;  %p9961_p9 = scmp.lt.s32.totalorder %s9959_s7, %s9952_s30 }
  0x50   : > { %p9956_p3 = pneg %p9955_p5  ;;  %p9962_p10 = por %p9961_p9, %p9960_p7 }
  0x52   : > { %p9963_p8 = pnand %p9962_p10, %p9956_p3 }
  0x54   : > { %9966 = shalt.err (!%p9963_p8)
}
  0x55   : > { %9809 = dma.hbm_to_vmem [thread:$0]  (!%p10180_p11), %s10178_s8, 128, %s206_s10, %s195_s12  }
  0x56   : > { %p14604_p13 = scmp.ne.s32.totalorder %s14599_s23, 0 }
  0x58   : > { %214 = sbr.rel (%p14604_p13) target bundleno = 2281 (0x8e9), region = 36 }
  0x5d   : > { %s10201_s9 = sand.u32 1, %s10031_s16   ;;  %p14605_p1 = scmp.ne.s32.totalorder %s14597_s21, 0 }
  0x5e   : > { %s6747_s13 = sshll.u32 %s10201_s9, 3  ;;  %s217_s14 = scalar_lea.sflag [#allocation3], %s10201_s9 }
  0x5f   : > { %s10205_s20 = scalar_lea.vmem [#allocation2], %s6747_s13 }
  0x60   : > { %10010 = dma.done.wait (%p14605_p1), %s217_s14, 128  }
  0x61   : > { %10012 = vsyncadd (%p14605_p1), %s217_s14, 4294967168  ;;  %p14606_p8 = scmp.eq.s32.totalorder %s10096_s19, 0 }
  0x63   : > { %10014 = dma.done.wait (%p14606_p8), [#allocation6], 4096   ;;  %p14607_p10 = pmov %p14606_p8 }
  0x64   : > { %p14608_p11 = pmov %p14606_p8 }
  0x65   : > { %10016 = vsyncadd (%p14607_p10), [#allocation6], 4294963200 }
  0x66   : > { %10018 = dma.done.wait (%p14608_p11), [#allocation9], 2048   ;;  %p14609_p2 = pmov %p14606_p8 }
  0x67   : > { %v308_v0 = vlaneseq  ;;  %v305_v3 = vld [vmem:[%s10205_s20] sm:$0x1]  ;;  %v397_v4 = vld [vmem:[%s10205_s20 + $0x1] sm:$0x1]  ;;  %v10245_v18 = vld [vmem:[#allocation7 + $0x68] sm:$0xff]  ;;  %vm10048_vm0 = vmmov 0  }
  0x68   : > { %10020 = vsyncadd (%p14609_p2), [#allocation9], 4294965248  ;;  %v307_v5 = vmul.f32 100.0, %v305_v3  ;;  %v344_v6 = vmul.f32 %v305_v3, %v305_v3  ;;  %v399_v7 = vmul.f32 100.0, %v397_v4  ;;  %v436_v8 = vmul.f32 %v397_v4, %v397_v4  ;;  %v10223_v9 = vld [vmem:[#allocation7 + $0x78] sm:$0xff]  ;;  %v10239_v15 = vld [vmem:[#allocation7 + $0x70] sm:$0xff] }
  0x69   : > { %v309_v1 = vshrl.u32 %v308_v0, 7  ;;  %v10225_v10 = vld [vmem:[#allocation8 + $0x78] sm:$0xff]  ;;  %v10241_v16 = vld [vmem:[#allocation8 + $0x70] sm:$0xff]  ;;  %v10247_v19 = vld [vmem:[#allocation8 + $0x68] sm:$0xff]  ;;  %s6751_s21 = sshll.u32 %s10201_s9, 2  ;;  %s6753_s8 = sshll.u32 %s10096_s19, 6 }
  0x6a   : > { %v10243_v17 = vld [vmem:[#allocation5 + $0x78] sm:$0xff]  ;;  %v10257_v24 = vld [vmem:[#allocation5 + $0x70] sm:$0xff]  ;;  %v10267_v29 = vld [vmem:[#allocation5 + $0x68] sm:$0xff]  ;;  %s256_s23 = scalar_lea.vmem [#allocation10], %s6751_s21  ;;  %s14142_s25 = scalar_lea.hbm %s14189_s4, %s6753_s8 }
  0x6b   : > { %v10219_v2 = vsub.s32 0, %v309_v1  ;;  %v10269_v30 = vld [vmem:[#allocation7 + $0x60] sm:$0xff]  ;;  %v10293_v49 = vld [vmem:[#allocation7 + $0x58] sm:$0xff]  ;;  %v10310_v60 = vld [vmem:[#allocation7 + $0x50] sm:$0xff]  ;;  %s6639_s10 = sshll.u32 %s256_s23, 4  ;;  %s6626_s19 = scalar_lea.sflag [#allocation4], %s10201_s9  ;;  %s14144_s10 = int_to_ptr.vmem [resolvable:$true] %s6639_s10 }
  0x6c   : > { %v10277_v35 = vld [vmem:[#allocation8 + $0x60] sm:$0xff]  ;;  %v10300_v54 = vld [vmem:[#allocation8 + $0x58] sm:$0xff]  ;;  %v10320_v1 = vld [vmem:[#allocation8 + $0x50] sm:$0xff]  ;;  %s9967_s26 = scalar_lea.vmem %s14144_s10, 64  ;;  %p15464_p6 = scmp.ne.s32.totalorder %s14602_s28, 0 }
  0x6d   : > { %v10228_v11 = vrot.slane %v307_v5, %v10219_v2  ;;  %v10231_v12 = vrot.slane %v344_v6, %v10219_v2  ;;  %v10234_v13 = vrot.slane %v399_v7, %v10219_v2  ;;  %v10237_v14 = vrot.slane %v436_v8, %v10219_v2  ;;  %v10285_v40 = vld [vmem:[#allocation5 + $0x60] sm:$0xff]  ;;  %v10308_v59 = vld [vmem:[#allocation5 + $0x58] sm:$0xff]  ;;  %v10331_v7 = vld [vmem:[#allocation5 + $0x50] sm:$0xff]  ;;  %p9968_p4 = scmp.ne.s32.totalorder %s14144_s10, %s9967_s26  ;;  %s10049_s5 = smov [#allocation10]  }
  0x6e   : > { %s9971_s30 = sshll.u32 %s10049_s5, 4  ;;  %s9972_s30 = int_to_ptr.vmem [resolvable:$false] %s9971_s30 }
  0x6f   : > { %v327_v20 = vmul.f32 %v10228_v11, %v10223_v9  ;;  %v364_v21 = vmul.f32 %v10231_v12, %v10225_v10  ;;  %v419_v22 = vmul.f32 %v10234_v13, %v10223_v9  ;;  %v456_v23 = vmul.f32 %v10237_v14, %v10225_v10  ;;  %p9969_p12 = pnand %p9968_p4, %p15464_p6  ;;  %s9973_s29 = scalar_lea.vmem %s9972_s30, 128 }
  0x70   : > { %v326_v25 = vmul.f32 %v10228_v11, %v10239_v15  ;;  %v363_v26 = vmul.f32 %v10231_v12, %v10241_v16  ;;  %v418_v27 = vmul.f32 %v10234_v13, %v10239_v15  ;;  %v455_v28 = vmul.f32 %v10237_v14, %v10241_v16  ;;  %p9974_p5 = scmp.lt.s32.totalorder %s14144_s10, %s9972_s30  ;;  %p9975_p3 = scmp.lt.s32.totalorder %s9973_s29, %s9967_s26 }
  0x71   : > { %v343_v31 = vadd.f32 %v327_v20, %v10243_v17  ;;  %v435_v32 = vadd.f32 %v419_v22, %v10243_v17  ;;  %v325_v33 = vmul.f32 %v10228_v11, %v10245_v18  ;;  %v362_v34 = vmul.f32 %v10231_v12, %v10247_v19  ;;  %p9970_p0 = pneg %p9969_p12 }
  0x72   : > { %v342_v36 = vadd.f32 %v326_v25, %v10257_v24  ;;  %v434_v37 = vadd.f32 %v418_v27, %v10257_v24  ;;  %v417_v38 = vmul.f32 %v10234_v13, %v10245_v18  ;;  %v454_v39 = vmul.f32 %v10237_v14, %v10247_v19  ;;  %p9976_p7 = por %p9975_p3, %p9974_p5 }
  0x73   : > { %v380_v41 = vadd.f32 %v364_v21, %v343_v31  ;;  %v472_v42 = vadd.f32 %v456_v23, %v435_v32  ;;  %v341_v43 = vadd.f32 %v325_v33, %v10267_v29  ;;  %v324_v44 = vmul.f32 %v10228_v11, %v10269_v30  ;;  %v10342_v23 = vld [vmem:[#allocation7 + $0x48] sm:$0xff] }
  0x74   : > { %v379_v45 = vadd.f32 %v363_v26, %v342_v36  ;;  %v471_v46 = vadd.f32 %v455_v28, %v434_v37  ;;  %v433_v47 = vadd.f32 %v417_v38, %v10267_v29  ;;  %v361_v48 = vmul.f32 %v10231_v12, %v10277_v35  ;;  %v10349_v28 = vld [vmem:[#allocation8 + $0x48] sm:$0xff]  ;;  %p9977_p9 = pnand %p9976_p7, %p9970_p0 }
  0x75   : > { %v10295_v50 = vmul.f32 0.00125, %v380_v41  ;;  %v10297_v51 = vmul.f32 0.00125, %v472_v42  ;;  %v378_v52 = vadd.f32 %v362_v34, %v341_v43  ;;  %v340_v53 = vadd.f32 %v324_v44, %v10285_v40  ;;  %v10356_v34 = vld [vmem:[#allocation5 + $0x48] sm:$0xff]  ;;  %v10366_v41 = vld [vmem:[#allocation7 + $0x40] sm:$0xff] }
  0x76   : > { %v10302_v55 = vmul.f32 0.00125, %v379_v45  ;;  %v10304_v56 = vmul.f32 0.00125, %v471_v46  ;;  %v470_v57 = vadd.f32 %v454_v39, %v433_v47  ;;  %v416_v58 = vmul.f32 %v10234_v13, %v10269_v30  ;;  %v10368_v42 = vld [vmem:[#allocation8 + $0x40] sm:$0xff] }
  0x77   : > { %14610 = vst [vmem:[#allocation15_spill] sm:$0xff] %v10295_v50  ;;  %14611 = vst [vmem:[#allocation16_spill] sm:$0xff] %v10297_v51  ;;  %7848 = vmatprep.subr.mxu0 %v10295_v50  ;;  %7904 = vmatprep.subr.mxu1 %v10297_v51  ;;  %v10314_v61 = vmul.f32 0.00125, %v378_v52  ;;  %v377_v62 = vadd.f32 %v361_v48, %v340_v53  ;;  %v453_v63 = vmul.f32 %v10237_v14, %v10277_v35 }
  0x78   : > { %14612 = vst [vmem:[#allocation17_spill] sm:$0xff] %v10302_v55  ;;  %14613 = vst [vmem:[#allocation18_spill] sm:$0xff] %v10304_v56  ;;  %v323_v0 = vmul.f32 %v10228_v11, %v10293_v49  ;;  %7849 = vmatpush3.msra.mxu0 %v10295_v50  ;;  %7905 = vmatpush3.msra.mxu1 %v10297_v51  ;;  %v10324_v3 = vmul.f32 0.00125, %v470_v57  ;;  %v432_v4 = vadd.f32 %v416_v58, %v10285_v40  ;;  %v10385_v57 = vld [vmem:[#allocation5 + $0x40] sm:$0xff]  ;;  %v10387_v58 = vld [vmem:[#allocation7 + $0x38] sm:$0xff] }
  0x79   : > { %14614 = vst [vmem:[#allocation19_spill] sm:$0xff] %v10314_v61  ;;  %v360_v5 = vmul.f32 %v10231_v12, %v10300_v54  ;;  %v415_v6 = vmul.f32 %v10234_v13, %v10293_v49  ;;  %7850 = vmatprep.subr.mxu0 %v10302_v55  ;;  %7906 = vmatprep.subr.mxu1 %v10304_v56  ;;  %v10335_v8 = vmul.f32 0.00125, %v377_v62  ;;  %v10451_v50 = vld [vmem:[#allocation5 + $0x28] sm:$0xff] }
  0x7a   : > { %14615 = vst [vmem:[#allocation20_spill] sm:$0xff] %v10324_v3  ;;  %v339_v20 = vadd.f32 %v323_v0, %v10308_v59  ;;  %v452_v21 = vmul.f32 %v10237_v14, %v10300_v54  ;;  %v322_v22 = vmul.f32 %v10228_v11, %v10310_v60  ;;  %7851 = vmatpush3.msra.mxu0 %v10302_v55  ;;  %14630 = vst [vmem:[#allocation35_spill] sm:$0xff] %v10451_v50 }
  0x7b   : > { %14616 = vst [vmem:[#allocation21_spill] sm:$0xff] %v10335_v8  ;;  %7907 = vmatpush3.msra.mxu1 %v10304_v56  ;;  %v469_v25 = vadd.f32 %v453_v63, %v432_v4  ;;  %v431_v26 = vadd.f32 %v415_v6, %v10308_v59  ;;  %v359_v27 = vmul.f32 %v10231_v12, %v10320_v1 }
  0x7c   : > { %7852 = vmatprep.subr.mxu0 %v10314_v61  ;;  %7908 = vmatprep.subr.mxu1 %v10324_v3  ;;  %v376_v31 = vadd.f32 %v360_v5, %v339_v20  ;;  %v338_v32 = vadd.f32 %v322_v22, %v10331_v7  ;;  %v414_v33 = vmul.f32 %v10234_v13, %v10310_v60  ;;  %v10397_v5 = vld [vmem:[#allocation8 + $0x38] sm:$0xff] }
  0x7d   : > { %7853 = vmatpush3.msra.mxu0 %v10314_v61  ;;  %7909 = vmatpush3.msra.mxu1 %v10324_v3  ;;  %v10360_v36 = vmul.f32 0.00125, %v469_v25  ;;  %v468_v37 = vadd.f32 %v452_v21, %v431_v26  ;;  %v451_v38 = vmul.f32 %v10237_v14, %v10320_v1  ;;  %v321_v39 = vmul.f32 %v10228_v11, %v10342_v23  ;;  %v10404_v22 = vld [vmem:[#allocation5 + $0x38] sm:$0xff]  ;;  %v10473_v3 = vld [vmem:[#allocation8 + $0x20] sm:$0xff] }
  0x7e   : > { %7854 = vmatprep.subr.mxu0 %v10335_v8  ;;  %v10371_v43 = vmul.f32 0.00125, %v376_v31  ;;  %v375_v44 = vadd.f32 %v359_v27, %v338_v32  ;;  %v430_v45 = vadd.f32 %v414_v33, %v10331_v7  ;;  %v358_v46 = vmul.f32 %v10231_v12, %v10349_v28  ;;  %v10415_v32 = vld [vmem:[#allocation7 + $0x30] sm:$0xff]  ;;  %14634 = vst [vmem:[#allocation39_spill] sm:$0xff] %v10473_v3 }
  0x7f   : > { %14617 = vst [vmem:[#allocation22_spill] sm:$0xff] %v10360_v36  ;;  %7910 = vmatprep.subr.mxu1 %v10360_v36  ;;  %7855 = vmatpush3.msra.mxu0 %v10335_v8  ;;  %v10378_v47 = vmul.f32 0.00125, %v468_v37  ;;  %v337_v48 = vadd.f32 %v321_v39, %v10356_v34  ;;  %v413_v52 = vmul.f32 %v10234_v13, %v10342_v23  ;;  %14622 = vst [vmem:[#allocation27_spill] sm:$0xff] %v10415_v32  ;;  %v10417_v33 = vld [vmem:[#allocation8 + $0x30] sm:$0xff] }
  0x80   : > { %14618 = vst [vmem:[#allocation23_spill] sm:$0xff] %v10371_v43  ;;  %v450_v53 = vmul.f32 %v10237_v14, %v10349_v28  ;;  %7911 = vmatpush3.msra.mxu1 %v10360_v36  ;;  %7856 = vmatprep.subr.mxu0 %v10371_v43  ;;  %v10391_v62 = vmul.f32 0.00125, %v375_v44  ;;  %v467_v63 = vadd.f32 %v451_v38, %v430_v45  ;;  %14623 = vst [vmem:[#allocation28_spill] sm:$0xff] %v10417_v33 }
  0x81   : > { %14619 = vst [vmem:[#allocation24_spill] sm:$0xff] %v10378_v47  ;;  %v320_v0 = vmul.f32 %v10228_v11, %v10366_v41  ;;  %v357_v4 = vmul.f32 %v10231_v12, %v10368_v42  ;;  %7912 = vmatprep.subr.mxu1 %v10378_v47  ;;  %7857 = vmatpush3.msra.mxu0 %v10371_v43 }
  0x82   : > { %14620 = vst [vmem:[#allocation25_spill] sm:$0xff] %v10391_v62  ;;  %v374_v6 = vadd.f32 %v358_v46, %v337_v48  ;;  %v429_v20 = vadd.f32 %v413_v52, %v10356_v34  ;;  %v412_v21 = vmul.f32 %v10234_v13, %v10366_v41  ;;  %7913 = vmatpush3.msra.mxu1 %v10378_v47  ;;  %v10408_v25 = vmul.f32 0.00125, %v467_v63  ;;  %v10431_v63 = vld [vmem:[#allocation5 + $0x30] sm:$0xff]  ;;  %v10495_v47 = vld [vmem:[#allocation8 + $0x18] sm:$0xff] }
  0x83   : > { %7858 = vmatprep.subr.mxu0 %v10391_v62  ;;  %v336_v26 = vadd.f32 %v320_v0, %v10385_v57  ;;  %v449_v27 = vmul.f32 %v10237_v14, %v10368_v42  ;;  %v319_v31 = vmul.f32 %v10228_v11, %v10387_v58  ;;  %v356_v44 = vmul.f32 %v10231_v12, %v10397_v5 }
  0x84   : > { %14621 = vst [vmem:[#allocation26_spill] sm:$0xff] %v10408_v25  ;;  %7859 = vmatpush3.msra.mxu0 %v10391_v62  ;;  %v10420_v37 = vmul.f32 0.00125, %v374_v6  ;;  %v466_v38 = vadd.f32 %v450_v53, %v429_v20  ;;  %v428_v39 = vadd.f32 %v412_v21, %v10385_v57  ;;  %7914 = vmatprep.subr.mxu1 %v10408_v25  ;;  %14625 = vst [vmem:[#allocation30_spill] sm:$0xff] %v10431_v63  ;;  %v10433_v53 = vld [vmem:[#allocation7 + $0x28] sm:$0xff] }
  0x85   : > { %v373_v45 = vadd.f32 %v357_v4, %v336_v26  ;;  %v335_v46 = vadd.f32 %v319_v31, %v10404_v22  ;;  %v411_v48 = vmul.f32 %v10234_v13, %v10387_v58  ;;  %v448_v52 = vmul.f32 %v10237_v14, %v10397_v5  ;;  %14626 = vst [vmem:[#allocation31_spill] sm:$0xff] %v10433_v53  ;;  %v10443_v21 = vld [vmem:[#allocation8 + $0x28] sm:$0xff] }
  0x86   : > { %14624 = vst [vmem:[#allocation29_spill] sm:$0xff] %v10420_v37  ;;  %7915 = vmatpush3.msra.mxu1 %v10408_v25  ;;  %7860 = vmatprep.subr.mxu0 %v10420_v37  ;;  %v10437_v0 = vmul.f32 0.00125, %v466_v38  ;;  %v465_v4 = vadd.f32 %v449_v27, %v428_v39  ;;  %v318_v6 = vmul.f32 %v10228_v11, %v10415_v32  ;;  %14628 = vst [vmem:[#allocation33_spill] sm:$0xff] %v10443_v21  ;;  %v10454_v27 = vld [vmem:[%s10205_s20 + $0x2] sm:$0x1] }
  0x87   : > { %v355_v20 = vmul.f32 %v10231_v12, %v10417_v33  ;;  %7861 = vmatpush3.msra.mxu0 %v10420_v37  ;;  %v10446_v26 = vmul.f32 0.00125, %v373_v45  ;;  %v372_v31 = vadd.f32 %v356_v44, %v335_v46  ;;  %v427_v51 = vadd.f32 %v411_v48, %v10404_v22  ;;  %v10464_v46 = vld [vmem:[#allocation7 + $0x20] sm:$0xff]  ;;  %14638 = vst [vmem:[#allocation43_spill] sm:$0xff] %v10495_v47 }
  0x88   : > { %14627 = vst [vmem:[#allocation32_spill] sm:$0xff] %v10437_v0  ;;  %v410_v38 = vmul.f32 %v10234_v13, %v10415_v32  ;;  %7916 = vmatprep.subr.mxu1 %v10437_v0  ;;  %v10457_v39 = vmul.f32 0.00125, %v465_v4  ;;  %v334_v56 = vadd.f32 %v318_v6, %v10431_v63  ;;  %v447_v45 = vmul.f32 %v10237_v14, %v10417_v33  ;;  %v10563_v32 = vld [vmem:[#allocation5 + $0x8] sm:$0xff] }
  0x89   : > { %14629 = vst [vmem:[#allocation34_spill] sm:$0xff] %v10446_v26  ;;  %v317_v44 = vmul.f32 %v10228_v11, %v10433_v53  ;;  %14632 = vst [vmem:[#allocation37_spill] sm:$0xff] %v10464_v46  ;;  %7917 = vmatpush3.msra.mxu1 %v10437_v0  ;;  %7862 = vmatprep.subr.mxu0 %v10446_v26  ;;  %v10468_v48 = vmul.f32 0.00125, %v372_v31  ;;  %v464_v55 = vadd.f32 %v448_v52, %v427_v51  ;;  %v10480_v31 = vld [vmem:[#allocation5 + $0x20] sm:$0xff] }
  0x8a   : > { %14631 = vst [vmem:[#allocation36_spill] sm:$0xff] %v10457_v39  ;;  %v426_v4 = vadd.f32 %v410_v38, %v10431_v63  ;;  %v354_v6 = vmul.f32 %v10231_v12, %v10443_v21  ;;  %7918 = vmatprep.subr.mxu1 %v10457_v39  ;;  %7863 = vmatpush3.msra.mxu0 %v10446_v26  ;;  %14635 = vst [vmem:[#allocation40_spill] sm:$0xff] %v10480_v31  ;;  %v10483_v51 = vmul.f32 100.0, %v10454_v27  ;;  %v10533_v26 = vld [vmem:[#allocation5 + $0x10] sm:$0xff] }
  0x8b   : > { %14633 = vst [vmem:[#allocation38_spill] sm:$0xff] %v10468_v48  ;;  %v371_v61 = vadd.f32 %v355_v20, %v334_v56  ;;  %v333_v36 = vadd.f32 %v317_v44, %v10451_v50  ;;  %v409_v8 = vmul.f32 %v10234_v13, %v10433_v53  ;;  %7919 = vmatpush3.msra.mxu1 %v10457_v39  ;;  %v10487_v52 = vmul.f32 0.00125, %v464_v55  ;;  %v10493_v44 = vld [vmem:[#allocation7 + $0x18] sm:$0xff]  ;;  %v10526_v39 = vld [vmem:[#allocation8 + $0x10] sm:$0xff] }
  0x8c   : > { %7864 = vmatprep.subr.mxu0 %v10468_v48  ;;  %v463_v38 = vadd.f32 %v447_v45, %v426_v4  ;;  %v446_v56 = vmul.f32 %v10237_v14, %v10443_v21  ;;  %v316_v20 = vmul.f32 %v10228_v11, %v10464_v46  ;;  %14637 = vst [vmem:[#allocation42_spill] sm:$0xff] %v10493_v44  ;;  %v10504_v45 = vld [vmem:[%s10205_s20 + $0x3] sm:$0x1]  ;;  %14644 = vst [vmem:[#allocation49_spill] sm:$0xff] %v10526_v39 }
  0x8d   : > { %14636 = vst [vmem:[#allocation41_spill] sm:$0xff] %v10487_v52  ;;  %7865 = vmatpush3.msra.mxu0 %v10468_v48  ;;  %v10498_v43 = vmul.f32 0.00125, %v371_v61  ;;  %v370_v25 = vadd.f32 %v354_v6, %v333_v36  ;;  %v425_v62 = vadd.f32 %v409_v8, %v10451_v50  ;;  %v353_v55 = vmul.f32 %v10231_v12, %v10473_v3  ;;  %v10514_v36 = vld [vmem:[#allocation5 + $0x18] sm:$0xff]  ;;  %v10516_v8 = vld [vmem:[#allocation7 + $0x10] sm:$0xff] }
  0x8e   : > { %7920 = vmatprep.subr.mxu1 %v10487_v52  ;;  %v10507_v4 = vmul.f32 0.00125, %v463_v38  ;;  %v332_v0 = vadd.f32 %v316_v20, %v10480_v31  ;;  %v408_v37 = vmul.f32 %v10234_v13, %v10464_v46  ;;  %v445_v61 = vmul.f32 %v10237_v14, %v10473_v3  ;;  %14641 = vst [vmem:[#allocation46_spill] sm:$0xff] %v10514_v36 }
  0x8f   : > { %14639 = vst [vmem:[#allocation44_spill] sm:$0xff] %v10498_v43  ;;  %14642 = vst [vmem:[#allocation47_spill] sm:$0xff] %v10516_v8  ;;  %7921 = vmatpush3.msra.mxu1 %v10487_v52  ;;  %7866 = vmatprep.subr.mxu0 %v10498_v43  ;;  %v10520_v6 = vmul.f32 0.00125, %v370_v25  ;;  %v462_v38 = vadd.f32 %v446_v56, %v425_v62  ;;  %v315_v20 = vmul.f32 %v10228_v11, %v10493_v44 }
  0x90   : > { %14640 = vst [vmem:[#allocation45_spill] sm:$0xff] %v10507_v4  ;;  %v352_v46 = vmul.f32 %v10231_v12, %v10495_v47  ;;  %7922 = vmatprep.subr.mxu1 %v10507_v4  ;;  %7867 = vmatpush3.msra.mxu0 %v10498_v43  ;;  %v369_v3 = vadd.f32 %v353_v55, %v332_v0  ;;  %v10536_v62 = vmul.f32 100.0, %v10504_v45  ;;  %v10547_v55 = vld [vmem:[#allocation7 + $0x8] sm:$0xff] }
  0x91   : > { %14643 = vst [vmem:[#allocation48_spill] sm:$0xff] %v10520_v6  ;;  %v424_v50 = vadd.f32 %v408_v37, %v10480_v31  ;;  %v407_v25 = vmul.f32 %v10234_v13, %v10493_v44  ;;  %7923 = vmatpush3.msra.mxu1 %v10507_v4  ;;  %7868 = vmatprep.subr.mxu0 %v10520_v6  ;;  %v10540_v56 = vmul.f32 0.00125, %v462_v38  ;;  %v10549_v44 = vld [vmem:[#allocation8 + $0x8] sm:$0xff] }
  0x92   : > { %v331_v21 = vadd.f32 %v315_v20, %v10514_v36  ;;  %v444_v0 = vmul.f32 %v10237_v14, %v10495_v47  ;;  %v314_v37 = vmul.f32 %v10228_v11, %v10516_v8  ;;  %14646 = vst [vmem:[#allocation51_spill] sm:$0xff] %v10549_v44  ;;  %7869 = vmatpush3.msra.mxu0 %v10520_v6  ;;  %v10552_v31 = vmul.f32 0.00125, %v369_v3  ;;  %v10565_v3 = vld [vmem:[#allocation7] sm:$0xff] }
  0x93   : > { %14645 = vst [vmem:[#allocation50_spill] sm:$0xff] %v10540_v56  ;;  %v461_v53 = vadd.f32 %v445_v61, %v424_v50  ;;  %v423_v38 = vadd.f32 %v407_v25, %v10514_v36  ;;  %v351_v20 = vmul.f32 %v10231_v12, %v10526_v39  ;;  %7924 = vmatprep.subr.mxu1 %v10540_v56  ;;  %v10575_v25 = vld [vmem:[#allocation8] sm:$0xff] }
  0x94   : > { %14647 = vst [vmem:[#allocation52_spill] sm:$0xff] %v10552_v31  ;;  %v368_v47 = vadd.f32 %v352_v46, %v331_v21  ;;  %v330_v63 = vadd.f32 %v314_v37, %v10533_v26  ;;  %v406_v52 = vmul.f32 %v10234_v13, %v10516_v8  ;;  %v443_v33 = vmul.f32 %v10237_v14, %v10526_v39  ;;  %v10583_v36 = vld [vmem:[#allocation5] sm:$0xff] }
  0x95   : > { %7925 = vmatpush3.msra.mxu1 %v10540_v56  ;;  %7870 = vmatprep.subr.mxu0 %v10552_v31  ;;  %v10569_v50 = vmul.f32 0.00125, %v461_v53  ;;  %v460_v61 = vadd.f32 %v444_v0, %v423_v38  ;;  %v313_v21 = vmul.f32 %v10228_v11, %v10547_v55  ;;  %v350_v46 = vmul.f32 %v10231_v12, %v10549_v44 }
  0x96   : > { %7871 = vmatpush3.msra.mxu0 %v10552_v31  ;;  %v10578_v37 = vmul.f32 0.00125, %v368_v47  ;;  %v367_v39 = vadd.f32 %v351_v20, %v330_v63  ;;  %v422_v8 = vadd.f32 %v406_v52, %v10533_v26  ;;  %v405_v53 = vmul.f32 %v10234_v13, %v10547_v55 }
  0x97   : > { %14648 = vst [vmem:[#allocation53_spill] sm:$0xff] %v10569_v50  ;;  %7926 = vmatprep.subr.mxu1 %v10569_v50  ;;  %v10586_v0 = vmul.f32 0.00125, %v460_v61  ;;  %v329_v38 = vadd.f32 %v313_v21, %v10563_v32  ;;  %v442_v48 = vmul.f32 %v10237_v14, %v10549_v44  ;;  %v312_v47 = vmul.f32 %v10228_v11, %v10565_v3 }
  0x98   : > { %14649 = vst [vmem:[#allocation54_spill] sm:$0xff] %v10578_v37  ;;  %7927 = vmatpush3.msra.mxu1 %v10569_v50  ;;  %7872 = vmatprep.subr.mxu0 %v10578_v37  ;;  %v10595_v63 = vmul.f32 0.00125, %v367_v39  ;;  %v459_v52 = vadd.f32 %v443_v33, %v422_v8  ;;  %v421_v20 = vadd.f32 %v405_v53, %v10563_v32 }
  0x99   : > { %14650 = vst [vmem:[#allocation55_spill] sm:$0xff] %v10586_v0  ;;  %v349_v61 = vmul.f32 %v10231_v12, %v10575_v25  ;;  %7928 = vmatprep.subr.mxu1 %v10586_v0  ;;  %7873 = vmatpush3.msra.mxu0 %v10578_v37  ;;  %v366_v21 = vadd.f32 %v350_v46, %v329_v38 }
  0x9a   : > { %14651 = vst [vmem:[#allocation56_spill] sm:$0xff] %v10595_v63  ;;  %v328_v44 = vadd.f32 %v312_v47, %v10583_v36  ;;  %v404_v11 = vmul.f32 %v10234_v13, %v10565_v3  ;;  %7929 = vmatpush3.msra.mxu1 %v10586_v0  ;;  %7874 = vmatprep.subr.mxu0 %v10595_v63  ;;  %v10607_v33 = vmul.f32 0.00125, %v459_v52 }
  0x9b   : > { %v458_v39 = vadd.f32 %v442_v48, %v421_v20  ;;  %v441_v12 = vmul.f32 %v10237_v14, %v10575_v25  ;;  %v10613_v8 = vrot.slane %v10483_v51, %v10219_v2  ;;  %7875 = vmatpush3.msra.mxu0 %v10595_v63  ;;  %v10616_v46 = vmul.f32 0.00125, %v366_v21 }
  0x9c   : > { %14652 = vst [vmem:[#allocation57_spill] sm:$0xff] %v10607_v33  ;;  %v365_v53 = vadd.f32 %v349_v61, %v328_v44  ;;  %v420_v13 = vadd.f32 %v404_v11, %v10583_v36  ;;  %v528_v38 = vmul.f32 %v10454_v27, %v10454_v27  ;;  %7930 = vmatprep.subr.mxu1 %v10607_v33 }
  0x9d   : > { %14653 = vst [vmem:[#allocation58_spill] sm:$0xff] %v10616_v46  ;;  %v10622_v48 = vmul.f32 0.00125, %v458_v39  ;;  %v511_v14 = vmul.f32 %v10613_v8, %v10223_v9  ;;  %v10628_v51 = vrot.slane %v10536_v62, %v10219_v2  ;;  %v620_v47 = vmul.f32 %v10504_v45, %v10504_v45  ;;  %7931 = vmatpush3.msra.mxu1 %v10607_v33 }
  0x9e   : > { %7876 = vmatprep.subr.mxu0 %v10616_v46  ;;  %v10634_v44 = vmul.f32 0.00125, %v365_v53  ;;  %v457_v27 = vadd.f32 %v441_v12, %v420_v13  ;;  %v10637_v52 = vrot.slane %v528_v38, %v10219_v2  ;;  %v510_v20 = vmul.f32 %v10613_v8, %v10239_v15 }
  0x9f   : > { %14654 = vst [vmem:[#allocation59_spill] sm:$0xff] %v10622_v48  ;;  %7932 = vmatprep.subr.mxu1 %v10622_v48  ;;  %7877 = vmatpush3.msra.mxu0 %v10616_v46  ;;  %v527_v62 = vadd.f32 %v511_v14, %v10243_v17  ;;  %v603_v45 = vmul.f32 %v10628_v51, %v10223_v9 }
  0xa0   : > { %14655 = vst [vmem:[#allocation60_spill] sm:$0xff] %v10634_v44  ;;  %v10647_v61 = vrot.slane %v620_v47, %v10219_v2  ;;  %7933 = vmatpush3.msra.mxu1 %v10622_v48  ;;  %7878 = vmatprep.subr.mxu0 %v10634_v44  ;;  %v10651_v21 = vmul.f32 0.00125, %v457_v27  ;;  %v548_v11 = vmul.f32 %v10637_v52, %v10225_v10 }
  0xa1   : > { %v526_v39 = vadd.f32 %v510_v20, %v10257_v24  ;;  %v547_v12 = vmul.f32 %v10637_v52, %v10241_v16  ;;  %7879 = vmatpush3.msra.mxu0 %v10634_v44  ;;  %7880 = vmatprep.mubr.f32.mxu0 %v10634_v44  ;;  %v619_v2 = vadd.f32 %v603_v45, %v10243_v17  ;;  %v14686_v44 = vld [vmem:[#allocation43_spill] sm:$0xff] }
  0xa2   : > { %14656 = vst [vmem:[#allocation61_spill] sm:$0xff] %v10651_v21  ;;  %v640_v9 = vmul.f32 %v10647_v61, %v10225_v10  ;;  %v602_v53 = vmul.f32 %v10628_v51, %v10239_v15  ;;  %7934 = vmatprep.subr.mxu1 %v10651_v21  ;;  %7936 = vmatprep.mubr.f32.mxu1 %v10651_v21 }
  0xa3   : > { %v564_v13 = vadd.f32 %v548_v11, %v527_v62  ;;  %v563_v38 = vadd.f32 %v547_v12, %v526_v39  ;;  %v639_v14 = vmul.f32 %v10647_v61, %v10241_v16  ;;  %7935 = vmatpush3.msra.mxu1 %v10651_v21  ;;  %7881 = vmatmul.mubr.f32.vlgmr.msra.gmra.mxu0 %v10616_v46  ;;  %v14682_v21 = vld [vmem:[#allocation32_spill] sm:$0xff]  ;;  %v14690_v46 = vld [vmem:[#allocation46_spill] sm:$0xff] }
  0xa4   : > { %v656_v17 = vadd.f32 %v640_v9, %v619_v2  ;;  %v618_v47 = vadd.f32 %v602_v53, %v10257_v24  ;;  %v509_v10 = vmul.f32 %v10613_v8, %v10245_v18  ;;  %7937 = vmatmul.mubr.f32.vlgmr.msra.gmra.mxu1 %v10622_v48  ;;  %7883 = vmatprep.mubr.f32.mxu0 %v10595_v63  ;;  %v14691_v63 = vld [vmem:[#allocation47_spill] sm:$0xff] }
  0xa5   : > { %v10675_v15 = vmul.f32 0.00125, %v564_v13  ;;  %v10677_v27 = vmul.f32 0.00125, %v563_v38  ;;  %v546_v16 = vmul.f32 %v10637_v52, %v10247_v19  ;;  %v601_v20 = vmul.f32 %v10628_v51, %v10245_v18  ;;  %7939 = vmatprep.mubr.f32.mxu1 %v10607_v33 }
  0xa6   : > { %v10684_v62 = vmul.f32 0.00125, %v656_v17  ;;  %v655_v24 = vadd.f32 %v639_v14, %v618_v47  ;;  %v525_v45 = vadd.f32 %v509_v10, %v10267_v29  ;;  %v638_v11 = vmul.f32 %v10647_v61, %v10247_v19 }
  0xa7   : > { %7960 = vmatprep.subr.mxu0 %v10675_v15  ;;  %v617_v39 = vadd.f32 %v601_v20, %v10267_v29  ;;  %v508_v12 = vmul.f32 %v10613_v8, %v10269_v30  ;;  %v545_v18 = vmul.f32 %v10637_v52, %v10277_v35  ;;  %v600_v2 = vmul.f32 %v10628_v51, %v10269_v30 }
  0xa8   : > { %8016 = vmatprep.subr.mxu1 %v10684_v62  ;;  %7961 = vmatpush3.msra.mxu0 %v10675_v15  ;;  %v10700_v9 = vmul.f32 0.00125, %v655_v24  ;;  %v562_v19 = vadd.f32 %v546_v16, %v525_v45  ;;  %v637_v53 = vmul.f32 %v10647_v61, %v10277_v35  ;;  %v507_v29 = vmul.f32 %v10613_v8, %v10293_v49 }
  0xa9   : > { %8017 = vmatpush3.msra.mxu1 %v10684_v62  ;;  %7962 = vmatprep.subr.mxu0 %v10677_v27  ;;  %v654_v13 = vadd.f32 %v638_v11, %v617_v39  ;;  %v524_v30 = vadd.f32 %v508_v12, %v10285_v40  ;;  %v616_v38 = vadd.f32 %v600_v2, %v10285_v40 }
  0xaa   : > { %14657 = vst [vmem:[#allocation62_spill] sm:$0xff] %v10700_v9  ;;  %8018 = vmatprep.subr.mxu1 %v10700_v9  ;;  %7963 = vmatpush3.msra.mxu0 %v10677_v27  ;;  %v10712_v14 = vmul.f32 0.00125, %v562_v19  ;;  %v523_v35 = vadd.f32 %v507_v29, %v10308_v59  ;;  %v544_v17 = vmul.f32 %v10637_v52, %v10300_v54 }
  0xab   : > { %v599_v47 = vmul.f32 %v10628_v51, %v10293_v49  ;;  %8019 = vmatpush3.msra.mxu1 %v10700_v9  ;;  %7884 = vmatmul.mubr.f32.gmra.mxu0 %v10578_v37  ;;  %v10721_v10 = vmul.f32 0.00125, %v654_v13  ;;  %v561_v40 = vadd.f32 %v545_v18, %v524_v30  ;;  %v653_v16 = vadd.f32 %v637_v53, %v616_v38 }
  0xac   : > { %14658 = vst [vmem:[#allocation63_spill] sm:$0xff] %v10712_v14  ;;  %v636_v20 = vmul.f32 %v10647_v61, %v10300_v54  ;;  %7940 = vmatmul.mubr.f32.gmra.mxu1 %v10586_v0  ;;  %7964 = vmatprep.subr.mxu0 %v10712_v14  ;;  %v560_v24 = vadd.f32 %v544_v17, %v523_v35  ;;  %v14692_v0 = vld [vmem:[#allocation26_spill] sm:$0xff] }
  0xad   : > { %14659 = vst [vmem:[#allocation64_spill] sm:$0xff] %v10721_v10  ;;  %v615_v45 = vadd.f32 %v599_v47, %v10308_v59  ;;  %v506_v49 = vmul.f32 %v10613_v8, %v10310_v60  ;;  %8020 = vmatprep.subr.mxu1 %v10721_v10  ;;  %7965 = vmatpush3.msra.mxu0 %v10712_v14  ;;  %v10732_v11 = vmul.f32 0.00125, %v561_v40  ;;  %v10734_v39 = vmul.f32 0.00125, %v653_v16 }
  0xae   : > { %v543_v54 = vmul.f32 %v10637_v52, %v10320_v1  ;;  %v598_v12 = vmul.f32 %v10628_v51, %v10310_v60  ;;  %8021 = vmatpush3.msra.mxu1 %v10721_v10  ;;  %7886 = vmatprep.mubr.f32.mxu0 %v10552_v31  ;;  %v10742_v59 = vmul.f32 0.00125, %v560_v24  ;;  %v635_v19 = vmul.f32 %v10647_v61, %v10320_v1  ;;  %v14706_v31 = vld [vmem:[#allocation20_spill] sm:$0xff] }
  0xaf   : > { %14660 = vst [vmem:[#allocation65_spill] sm:$0xff] %v10734_v39  ;;  %v652_v18 = vadd.f32 %v636_v20, %v615_v45  ;;  %v522_v2 = vadd.f32 %v506_v49, %v10331_v7  ;;  %7966 = vmatprep.subr.mxu0 %v10732_v11  ;;  %8022 = vmatprep.subr.mxu1 %v10734_v39 }
  0xb0   : > { %14661 = vst [vmem:[#allocation66_spill] sm:$0xff] %v10742_v59  ;;  %v614_v53 = vadd.f32 %v598_v12, %v10331_v7  ;;  %v505_v60 = vmul.f32 %v10613_v8, %v10342_v23  ;;  %v542_v29 = vmul.f32 %v10637_v52, %v10349_v28  ;;  %7942 = vmatprep.mubr.f32.mxu1 %v10569_v50  ;;  %v14697_v50 = vld [vmem:[#allocation24_spill] sm:$0xff] }
  0xb1   : > { %7967 = vmatpush3.msra.mxu0 %v10732_v11  ;;  %v10756_v13 = vmul.f32 0.00125, %v652_v18  ;;  %v559_v30 = vadd.f32 %v543_v54, %v522_v2  ;;  %v597_v1 = vmul.f32 %v10628_v51, %v10342_v23  ;;  %v634_v38 = vmul.f32 %v10647_v61, %v10349_v28  ;;  %8023 = vmatpush3.msra.mxu1 %v10734_v39 }
  0xb2   : > { %7887 = vmatmul.mubr.f32.gmra.mxu0 %v10520_v6  ;;  %v651_v7 = vadd.f32 %v635_v19, %v614_v53  ;;  %v521_v35 = vadd.f32 %v505_v60, %v10356_v34  ;;  %v504_v17 = vmul.f32 %v10613_v8, %v10366_v41  ;;  %7943 = vmatmul.mubr.f32.gmra.mxu1 %v10540_v56  ;;  %v14666_v60 = vld [vmem:[#allocation38_spill] sm:$0xff] }
  0xb3   : > { %14662 = vst [vmem:[#allocation67_spill] sm:$0xff] %v10756_v13  ;;  %7968 = vmatprep.subr.mxu0 %v10742_v59  ;;  %v10769_v47 = vmul.f32 0.00125, %v559_v30  ;;  %v613_v23 = vadd.f32 %v597_v1, %v10356_v34  ;;  %v541_v28 = vmul.f32 %v10637_v52, %v10368_v42  ;;  %v596_v40 = vmul.f32 %v10628_v51, %v10366_v41  ;;  %v14667_v30 = vld [vmem:[#allocation27_spill] sm:$0xff] }
  0xb4   : > { %8024 = vmatprep.subr.mxu1 %v10756_v13  ;;  %7969 = vmatpush3.msra.mxu0 %v10742_v59  ;;  %v10778_v16 = vmul.f32 0.00125, %v651_v7  ;;  %v558_v20 = vadd.f32 %v542_v29, %v521_v35  ;;  %v520_v24 = vadd.f32 %v504_v17, %v10385_v57  ;;  %v633_v45 = vmul.f32 %v10647_v61, %v10368_v42  ;;  %v14669_v35 = vld [vmem:[#allocation41_spill] sm:$0xff] }
  0xb5   : > { %8025 = vmatpush3.msra.mxu1 %v10756_v13  ;;  %7970 = vmatprep.subr.mxu0 %v10769_v47  ;;  %v650_v34 = vadd.f32 %v634_v38, %v613_v23  ;;  %v612_v49 = vadd.f32 %v596_v40, %v10385_v57  ;;  %v503_v41 = vmul.f32 %v10613_v8, %v10387_v58  ;;  %v14668_v38 = vld [vmem:[#allocation28_spill] sm:$0xff]  ;;  %v14671_v40 = vld [vmem:[#allocation30_spill] sm:$0xff] }
  0xb6   : > { %14663 = vst [vmem:[#allocation68_spill] sm:$0xff] %v10778_v16  ;;  %8026 = vmatprep.subr.mxu1 %v10778_v16  ;;  %7889 = vmatprep.mubr.f32.mxu0 %v10498_v43  ;;  %v10790_v54 = vmul.f32 0.00125, %v558_v20  ;;  %v557_v12 = vadd.f32 %v541_v28, %v520_v24  ;;  %v540_v42 = vmul.f32 %v10637_v52, %v10397_v5  ;;  %v14672_v24 = vld [vmem:[#allocation31_spill] sm:$0xff] }
  0xb7   : > { %v595_v18 = vmul.f32 %v10628_v51, %v10387_v58  ;;  %7945 = vmatprep.mubr.f32.mxu1 %v10507_v4  ;;  %7971 = vmatpush3.msra.mxu0 %v10769_v47  ;;  %v10798_v57 = vmul.f32 0.00125, %v650_v34  ;;  %v649_v2 = vadd.f32 %v633_v45, %v612_v49  ;;  %v519_v19 = vadd.f32 %v503_v41, %v10404_v22  ;;  %v14674_v41 = vld [vmem:[#allocation33_spill] sm:$0xff] }
  0xb8   : > { %14664 = vst [vmem:[#allocation69_spill] sm:$0xff] %v10790_v54  ;;  %v632_v53 = vmul.f32 %v10647_v61, %v10397_v5  ;;  %8027 = vmatpush3.msra.mxu1 %v10778_v16  ;;  %7890 = vmatmul.mubr.f32.gmra.mxu0 %v14666_v60  ;;  %v10805_v29 = vmul.f32 0.00125, %v557_v12  ;;  %v502_v1 = vmul.f32 %v10613_v8, %v14667_v30 }
  0xb9   : > { %14665 = vst [vmem:[#allocation70_spill] sm:$0xff] %v10798_v57  ;;  %v611_v58 = vadd.f32 %v595_v18, %v10404_v22  ;;  %v539_v7 = vmul.f32 %v10637_v52, %v14668_v38  ;;  %7946 = vmatmul.mubr.f32.gmra.mxu1 %v14669_v35  ;;  %7972 = vmatprep.subr.mxu0 %v10790_v54  ;;  %v10814_v17 = vmul.f32 0.00125, %v649_v2  ;;  %v14675_v18 = vld [vmem:[#allocation34_spill] sm:$0xff] }
  0xba   : > { %v556_v5 = vadd.f32 %v540_v42, %v519_v19  ;;  %v594_v23 = vmul.f32 %v10628_v51, %v14667_v30  ;;  %v631_v28 = vmul.f32 %v10647_v61, %v14668_v38  ;;  %8028 = vmatprep.subr.mxu1 %v10798_v57  ;;  %7973 = vmatpush3.msra.mxu0 %v10790_v54 }
  0xbb   : > { %14670 = vst [vmem:[#allocation27_spill] sm:$0xff] %v10814_v17  ;;  %v648_v22 = vadd.f32 %v632_v53, %v611_v58  ;;  %v518_v20 = vadd.f32 %v502_v1, %v14671_v40  ;;  %v501_v45 = vmul.f32 %v10613_v8, %v14672_v24  ;;  %8029 = vmatpush3.msra.mxu1 %v10798_v57  ;;  %v14677_v53 = vld [vmem:[#allocation35_spill] sm:$0xff]  ;;  %v14678_v1 = vld [vmem:[#allocation36_spill] sm:$0xff] }
  0xbc   : > { %7974 = vmatprep.subr.mxu0 %v10805_v29  ;;  %v10827_v34 = vmul.f32 0.00125, %v556_v5  ;;  %v610_v49 = vadd.f32 %v594_v23, %v14671_v40  ;;  %v538_v12 = vmul.f32 %v10637_v52, %v14674_v41  ;;  %v593_v42 = vmul.f32 %v10628_v51, %v14672_v24  ;;  %8030 = vmatprep.subr.mxu1 %v10814_v17  ;;  %v14679_v23 = vld [vmem:[#allocation37_spill] sm:$0xff]  ;;  %v14681_v24 = vld [vmem:[#allocation39_spill] sm:$0xff] }
  0xbd   : > { %7892 = vmatprep.mubr.f32.mxu0 %v14675_v18  ;;  %v10836_v2 = vmul.f32 0.00125, %v648_v22  ;;  %v555_v19 = vadd.f32 %v539_v7, %v518_v20  ;;  %v517_v58 = vadd.f32 %v501_v45, %v14677_v53  ;;  %v630_v30 = vmul.f32 %v10647_v61, %v14674_v41  ;;  %7948 = vmatprep.mubr.f32.mxu1 %v14678_v1  ;;  %v14680_v22 = vld [vmem:[#allocation29_spill] sm:$0xff] }
  0xbe   : > { %14673 = vst [vmem:[#allocation28_spill] sm:$0xff] %v10827_v34  ;;  %7975 = vmatpush3.msra.mxu0 %v10805_v29  ;;  %v647_v38 = vadd.f32 %v631_v28, %v610_v49  ;;  %v609_v5 = vadd.f32 %v593_v42, %v14677_v53  ;;  %v500_v40 = vmul.f32 %v10613_v8, %v14679_v23  ;;  %v14684_v42 = vld [vmem:[#allocation40_spill] sm:$0xff] }
  0xbf   : > { %14676 = vst [vmem:[#allocation30_spill] sm:$0xff] %v10836_v2  ;;  %8031 = vmatpush3.msra.mxu1 %v10814_v17  ;;  %7893 = vmatmul.mubr.f32.gmra.mxu0 %v14680_v22  ;;  %v10848_v7 = vmul.f32 0.00125, %v555_v19  ;;  %v554_v20 = vadd.f32 %v538_v12, %v517_v58  ;;  %v537_v45 = vmul.f32 %v10637_v52, %v14681_v24  ;;  %v14685_v58 = vld [vmem:[#allocation42_spill] sm:$0xff] }
  0xc0   : > { %v592_v41 = vmul.f32 %v10628_v51, %v14679_v23  ;;  %7949 = vmatmul.mubr.f32.gmra.mxu1 %v14682_v21  ;;  %7976 = vmatprep.subr.mxu0 %v10827_v34  ;;  %v10856_v28 = vmul.f32 0.00125, %v647_v38  ;;  %v646_v49 = vadd.f32 %v630_v30, %v609_v5  ;;  %v516_v53 = vadd.f32 %v500_v40, %v14684_v42 }
  0xc1   : > { %v629_v19 = vmul.f32 %v10647_v61, %v14681_v24  ;;  %8032 = vmatprep.subr.mxu1 %v10836_v2  ;;  %7977 = vmatpush3.msra.mxu0 %v10827_v34  ;;  %v499_v23 = vmul.f32 %v10613_v8, %v14685_v58  ;;  %v536_v48 = vmul.f32 %v10637_v52, %v14686_v44  ;;  %v10870_v30 = vmul.f32 0.00125, %v554_v20  ;;  %v14688_v24 = vld [vmem:[#allocation25_spill] sm:$0xff] }
  0xc2   : > { %14683 = vst [vmem:[#allocation31_spill] sm:$0xff] %v10856_v28  ;;  %v608_v12 = vadd.f32 %v592_v41, %v14684_v42  ;;  %8033 = vmatpush3.msra.mxu1 %v10836_v2  ;;  %7978 = vmatprep.subr.mxu0 %v10848_v7  ;;  %v553_v38 = vadd.f32 %v537_v45, %v516_v53  ;;  %v10878_v41 = vmul.f32 0.00125, %v646_v49  ;;  %v14694_v53 = vld [vmem:[#allocation49_spill] sm:$0xff] }
  0xc3   : > { %14687 = vst [vmem:[#allocation33_spill] sm:$0xff] %v10870_v30  ;;  %v591_v5 = vmul.f32 %v10628_v51, %v14685_v58  ;;  %v628_v40 = vmul.f32 %v10647_v61, %v14686_v44  ;;  %8034 = vmatprep.subr.mxu1 %v10856_v28  ;;  %7895 = vmatprep.mubr.f32.mxu0 %v14688_v24 }
  0xc4   : > { %14689 = vst [vmem:[#allocation34_spill] sm:$0xff] %v10878_v41  ;;  %v645_v42 = vadd.f32 %v629_v19, %v608_v12  ;;  %v515_v33 = vadd.f32 %v499_v23, %v14690_v46  ;;  %v498_v20 = vmul.f32 %v10613_v8, %v14691_v63  ;;  %7951 = vmatprep.mubr.f32.mxu1 %v14692_v0  ;;  %v10885_v45 = vmul.f32 0.00125, %v553_v38  ;;  %v14695_v19 = vld [vmem:[#allocation23_spill] sm:$0xff] }
  0xc5   : > { %7979 = vmatpush3.msra.mxu0 %v10848_v7  ;;  %v607_v44 = vadd.f32 %v591_v5, %v14690_v46  ;;  %v535_v58 = vmul.f32 %v10637_v52, %v14694_v53  ;;  %v590_v49 = vmul.f32 %v10628_v51, %v14691_v63  ;;  %8035 = vmatpush3.msra.mxu1 %v10856_v28 }
  0xc6   : > { %14693 = vst [vmem:[#allocation35_spill] sm:$0xff] %v10885_v45  ;;  %7896 = vmatmul.mubr.f32.gmra.mxu0 %v14695_v19  ;;  %v10894_v12 = vmul.f32 0.00125, %v645_v42  ;;  %v552_v23 = vadd.f32 %v536_v48, %v515_v33  ;;  %v514_v37 = vadd.f32 %v498_v20, %v10533_v26  ;;  %v627_v38 = vmul.f32 %v10647_v61, %v14694_v53  ;;  %v14698_v48 = vld [vmem:[#allocation51_spill] sm:$0xff] }
  0xc7   : > { %7952 = vmatmul.mubr.f32.gmra.mxu1 %v14697_v50  ;;  %7980 = vmatprep.subr.mxu0 %v10870_v30  ;;  %v644_v46 = vadd.f32 %v628_v40, %v607_v44  ;;  %v606_v5 = vadd.f32 %v590_v49, %v10533_v26  ;;  %v497_v63 = vmul.f32 %v10613_v8, %v10547_v55 }
  0xc8   : > { %14696 = vst [vmem:[#allocation37_spill] sm:$0xff] %v10894_v12  ;;  %8036 = vmatprep.subr.mxu1 %v10878_v41  ;;  %7981 = vmatpush3.msra.mxu0 %v10870_v30  ;;  %v551_v33 = vadd.f32 %v535_v58, %v514_v37  ;;  %v534_v42 = vmul.f32 %v10637_v52, %v14698_v48  ;;  %v10912_v40 = vmul.f32 0.00125, %v552_v23  ;;  %v14700_v37 = vld [vmem:[#allocation21_spill] sm:$0xff] }
  0xc9   : > { %v589_v20 = vmul.f32 %v10628_v51, %v10547_v55  ;;  %8037 = vmatpush3.msra.mxu1 %v10878_v41  ;;  %7982 = vmatprep.subr.mxu0 %v10885_v45  ;;  %v643_v26 = vadd.f32 %v627_v38, %v606_v5  ;;  %v513_v44 = vadd.f32 %v497_v63, %v10563_v32  ;;  %v10919_v58 = vmul.f32 0.00125, %v644_v46  ;;  %v14702_v38 = vld [vmem:[#allocation22_spill] sm:$0xff] }
  0xca   : > { %14699 = vst [vmem:[#allocation29_spill] sm:$0xff] %v10912_v40  ;;  %v626_v53 = vmul.f32 %v10647_v61, %v14698_v48  ;;  %8038 = vmatprep.subr.mxu1 %v10894_v12  ;;  %7898 = vmatprep.mubr.f32.mxu0 %v14700_v37  ;;  %v496_v49 = vmul.f32 %v10613_v8, %v10565_v3  ;;  %v10928_v5 = vmul.f32 0.00125, %v551_v33 }
  0xcb   : > { %14701 = vst [vmem:[#allocation39_spill] sm:$0xff] %v10919_v58  ;;  %v605_v55 = vadd.f32 %v589_v20, %v10563_v32  ;;  %v533_v23 = vmul.f32 %v10637_v52, %v10575_v25  ;;  %7954 = vmatprep.mubr.f32.mxu1 %v14702_v38  ;;  %7983 = vmatpush3.msra.mxu0 %v10885_v45  ;;  %v14704_v32 = vld [vmem:[#allocation19_spill] sm:$0xff]  ;;  %v10936_v8 = vmul.f32 0.00125, %v643_v26  ;;  %v14710_v26 = vld [vmem:[#allocation18_spill] sm:$0xff] }
  0xcc   : > { %14703 = vst [vmem:[#allocation32_spill] sm:$0xff] %v10928_v5  ;;  %v550_v63 = vadd.f32 %v534_v42, %v513_v44  ;;  %v588_v48 = vmul.f32 %v10628_v51, %v10565_v3  ;;  %v625_v46 = vmul.f32 %v10647_v61, %v10575_v25  ;;  %8039 = vmatpush3.msra.mxu1 %v10894_v12  ;;  %v14708_v61 = vld [vmem:[#allocation17_spill] sm:$0xff]  ;;  %v14712_v44 = vld [vmem:[#allocation15_spill] sm:$0xff] }
  0xcd   : > { %7899 = vmatmul.mubr.f32.gmra.mxu0 %v14704_v32  ;;  %14705 = vst [vmem:[#allocation40_spill] sm:$0xff] %v10936_v8  ;;  %v642_v52 = vadd.f32 %v626_v53, %v605_v55  ;;  %v512_v20 = vadd.f32 %v496_v49, %v10583_v36  ;;  %7955 = vmatmul.mubr.f32.gmra.mxu1 %v14706_v31  ;;  %v14714_v55 = vld [vmem:[#allocation16_spill] sm:$0xff] }
  0xce   : > { %7984 = vmatprep.subr.mxu0 %v10912_v40  ;;  %v604_v33 = vadd.f32 %v588_v48, %v10583_v36  ;;  %8040 = vmatprep.subr.mxu1 %v10919_v58  ;;  %v10946_v25 = vmul.f32 0.00125, %v550_v63  ;;  %v14715_v49 = vld [vmem:[#allocation52_spill] sm:$0xff]  ;;  %v14717_v63 = vld [vmem:[#allocation54_spill] sm:$0xff]  ;;  %v14718_v48 = vld [vmem:[#allocation55_spill] sm:$0xff] }
  0xcf   : > { %7985 = vmatpush3.msra.mxu0 %v10912_v40  ;;  %v549_v3 = vadd.f32 %v533_v23, %v512_v20  ;;  %8041 = vmatpush3.msra.mxu1 %v10919_v58  ;;  %v10950_v42 = vmul.f32 0.00125, %v642_v52  ;;  %v14716_v23 = vld [vmem:[#allocation53_spill] sm:$0xff]  ;;  %v14721_v20 = vld [vmem:[#allocation58_spill] sm:$0xff] }
  0xd0   : > { %7986 = vmatprep.subr.mxu0 %v10928_v5  ;;  %14707 = vst [vmem:[#allocation42_spill] sm:$0xff] %v10946_v25  ;;  %v641_v51 = vadd.f32 %v625_v46, %v604_v33  ;;  %8042 = vmatprep.subr.mxu1 %v10936_v8  ;;  %v14719_v46 = vld [vmem:[#allocation56_spill] sm:$0xff]  ;;  %v14720_v52 = vld [vmem:[#allocation57_spill] sm:$0xff]  ;;  %v14722_v33 = vld [vmem:[#allocation59_spill] sm:$0xff] }
  0xd1   : > { %7901 = vmatprep.mubr.f32.mxu0 %v14708_v61  ;;  %14709 = vst [vmem:[#allocation43_spill] sm:$0xff] %v10950_v42  ;;  %7957 = vmatprep.mubr.f32.mxu1 %v14710_v26  ;;  %v10954_v36 = vmul.f32 0.00125, %v549_v3  ;;  %v14723_v3 = vld [vmem:[#allocation60_spill] sm:$0xff] }
  0xd2   : > { %7987 = vmatpush3.msra.mxu0 %v10928_v5  ;;  %8043 = vmatpush3.msra.mxu1 %v10936_v8  ;;  %v10958_v53 = vmul.f32 0.00125, %v641_v51  ;;  %v14724_v51 = vld [vmem:[#allocation61_spill] sm:$0xff] }
  0xd3   : > { %14711 = vst [vmem:[#allocation25_spill] sm:$0xff] %v10954_v36  ;;  %7902 = vmatmul.mubr.f32.gmra.mxu0 %v14712_v44  ;;  %7958 = vmatmul.mubr.f32.gmra.mxu1 %v14714_v55 }
  0xd4   : > { %14713 = vst [vmem:[#allocation46_spill] sm:$0xff] %v10958_v53  ;;  %7988 = vmatprep.subr.mxu0 %v10946_v25  ;;  %8044 = vmatprep.subr.mxu1 %v10950_v42 }
  0xd5   : > { %7989 = vmatpush3.msra.mxu0 %v10946_v25  ;;  %8045 = vmatpush3.msra.mxu1 %v10950_v42 }
  0xd6   : > { %7990 = vmatprep.subr.mxu0 %v10954_v36  ;;  %8046 = vmatprep.subr.mxu1 %v10958_v53 }
  0xd7   : > { %7991 = vmatpush3.msra.mxu0 %v10954_v36  ;;  %7992 = vmatprep.mubr.f32.mxu0 %v10954_v36 }
  0xd8   : > { %8047 = vmatpush3.msra.mxu1 %v10958_v53  ;;  %8048 = vmatprep.mubr.f32.mxu1 %v10958_v53 }
  0xd9   : > { %7993 = vmatmul.mubr.f32.vlgmr.msra.gmra.mxu0 %v10946_v25  ;;  %8049 = vmatmul.mubr.f32.vlgmr.msra.gmra.mxu1 %v10950_v42 }
  0xda   : > { %7995 = vmatprep.mubr.f32.mxu0 %v10928_v5  ;;  %8051 = vmatprep.mubr.f32.mxu1 %v10936_v8 }
  0xdb   : > { %8072 = vmatprep.subr.mxu0 %v14712_v44  ;;  %8128 = vmatprep.subr.mxu1 %v14714_v55 }
  0xdc   : > { %8073 = vmatpush3.msra.mxu0 %v14712_v44  ;;  %8129 = vmatpush3.msra.mxu1 %v14714_v55 }
  0xdd   : > { %7996 = vmatmul.mubr.f32.gmra.mxu0 %v10912_v40  ;;  %8052 = vmatmul.mubr.f32.gmra.mxu1 %v10919_v58 }
  0xde   : > { %7998 = vmatprep.mubr.f32.mxu0 %v10885_v45  ;;  %8054 = vmatprep.mubr.f32.mxu1 %v10894_v12 }
  0xdf   : > { %8074 = vmatprep.subr.mxu0 %v14708_v61  ;;  %8130 = vmatprep.subr.mxu1 %v14710_v26 }
  0xe0   : > { %8075 = vmatpush3.msra.mxu0 %v14708_v61  ;;  %8131 = vmatpush3.msra.mxu1 %v14710_v26 }
  0xe1   : > { %7999 = vmatmul.mubr.f32.gmra.mxu0 %v10870_v30  ;;  %8055 = vmatmul.mubr.f32.gmra.mxu1 %v10878_v41 }
  0xe2   : > { %8001 = vmatprep.mubr.f32.mxu0 %v10848_v7  ;;  %8057 = vmatprep.mubr.f32.mxu1 %v10856_v28 }
  0xe3   : > { %8076 = vmatprep.subr.mxu0 %v14704_v32  ;;  %8132 = vmatprep.subr.mxu1 %v14706_v31 }
  0xe4   : > { %8077 = vmatpush3.msra.mxu0 %v14704_v32  ;;  %8133 = vmatpush3.msra.mxu1 %v14706_v31 }
  0xe5   : > { %8002 = vmatmul.mubr.f32.gmra.mxu0 %v10827_v34  ;;  %8058 = vmatmul.mubr.f32.gmra.mxu1 %v10836_v2 }
  0xe6   : > { %8004 = vmatprep.mubr.f32.mxu0 %v10805_v29  ;;  %8060 = vmatprep.mubr.f32.mxu1 %v10814_v17 }
  0xe7   : > { %8078 = vmatprep.subr.mxu0 %v14700_v37  ;;  %8134 = vmatprep.subr.mxu1 %v14702_v38 }
  0xe8   : > { %8079 = vmatpush3.msra.mxu0 %v14700_v37  ;;  %8135 = vmatpush3.msra.mxu1 %v14702_v38 }
  0xe9   : > { %8005 = vmatmul.mubr.f32.gmra.mxu0 %v10790_v54  ;;  %8061 = vmatmul.mubr.f32.gmra.mxu1 %v10798_v57 }
  0xea   : > { %8007 = vmatprep.mubr.f32.mxu0 %v10769_v47  ;;  %8063 = vmatprep.mubr.f32.mxu1 %v10778_v16 }
  0xeb   : > { %8080 = vmatprep.subr.mxu0 %v14695_v19  ;;  %8136 = vmatprep.subr.mxu1 %v14697_v50 }
  0xec   : > { %8081 = vmatpush3.msra.mxu0 %v14695_v19  ;;  %8137 = vmatpush3.msra.mxu1 %v14697_v50 }
  0xed   : > { %8008 = vmatmul.mubr.f32.gmra.mxu0 %v10742_v59  ;;  %8064 = vmatmul.mubr.f32.gmra.mxu1 %v10756_v13 }
  0xee   : > { %8010 = vmatprep.mubr.f32.mxu0 %v10732_v11  ;;  %8066 = vmatprep.mubr.f32.mxu1 %v10734_v39 }
  0xef   : > { %8082 = vmatprep.subr.mxu0 %v14688_v24  ;;  %8138 = vmatprep.subr.mxu1 %v14692_v0 }
  0xf0   : > { %8083 = vmatpush3.msra.mxu0 %v14688_v24  ;;  %8139 = vmatpush3.msra.mxu1 %v14692_v0 }
  0xf1   : > { %8011 = vmatmul.mubr.f32.gmra.mxu0 %v10712_v14  ;;  %8067 = vmatmul.mubr.f32.gmra.mxu1 %v10721_v10 }
  0xf2   : > { %8013 = vmatprep.mubr.f32.mxu0 %v10677_v27  ;;  %8069 = vmatprep.mubr.f32.mxu1 %v10700_v9 }
  0xf3   : > { %8084 = vmatprep.subr.mxu0 %v14680_v22  ;;  %8140 = vmatprep.subr.mxu1 %v14682_v21 }
  0xf4   : > { %8085 = vmatpush3.msra.mxu0 %v14680_v22  ;;  %8141 = vmatpush3.msra.mxu1 %v14682_v21 }
  0xf5   : > { %8014 = vmatmul.mubr.f32.gmra.mxu0 %v10675_v15  ;;  %8070 = vmatmul.mubr.f32.gmra.mxu1 %v10684_v62 }
  0xf6   : > { %8086 = vmatprep.subr.mxu0 %v14675_v18  ;;  %8142 = vmatprep.subr.mxu1 %v14678_v1 }
  0xf7   : > { %8087 = vmatpush3.msra.mxu0 %v14675_v18  ;;  %8143 = vmatpush3.msra.mxu1 %v14678_v1 }
  0xf8   : > { %8088 = vmatprep.subr.mxu0 %v14666_v60  ;;  %8144 = vmatprep.subr.mxu1 %v14669_v35 }
  0xf9   : > { %8089 = vmatpush3.msra.mxu0 %v14666_v60  ;;  %8145 = vmatpush3.msra.mxu1 %v14669_v35 }
  0xfa   : > { %8090 = vmatprep.subr.mxu0 %v10498_v43  ;;  %8146 = vmatprep.subr.mxu1 %v10507_v4 }
  0xfb   : > { %8091 = vmatpush3.msra.mxu0 %v10498_v43  ;;  %8147 = vmatpush3.msra.mxu1 %v10507_v4 }
  0xfc   : > { %8092 = vmatprep.subr.mxu0 %v10520_v6  ;;  %8148 = vmatprep.subr.mxu1 %v10540_v56 }
  0xfd   : > { %8093 = vmatpush3.msra.mxu0 %v10520_v6  ;;  %8149 = vmatpush3.msra.mxu1 %v10540_v56 }
  0xfe   : > { %8094 = vmatprep.subr.mxu0 %v14715_v49  ;;  %8150 = vmatprep.subr.mxu1 %v14716_v23 }
  0xff   : > { %8095 = vmatpush3.msra.mxu0 %v14715_v49  ;;  %8151 = vmatpush3.msra.mxu1 %v14716_v23 }
 0x100   : > { %8096 = vmatprep.subr.mxu0 %v14717_v63  ;;  %8152 = vmatprep.subr.mxu1 %v14718_v48 }
 0x101   : > { %8097 = vmatpush3.msra.mxu0 %v14717_v63  ;;  %8153 = vmatpush3.msra.mxu1 %v14718_v48 }
 0x102   : > { %8098 = vmatprep.subr.mxu0 %v14719_v46  ;;  %8154 = vmatprep.subr.mxu1 %v14720_v52 }
 0x103   : > { %8099 = vmatpush3.msra.mxu0 %v14719_v46  ;;  %8155 = vmatpush3.msra.mxu1 %v14720_v52 }
 0x104   : > { %8100 = vmatprep.subr.mxu0 %v14721_v20  ;;  %8156 = vmatprep.subr.mxu1 %v14722_v33 }
 0x105   : > { %8101 = vmatpush3.msra.mxu0 %v14721_v20  ;;  %8157 = vmatpush3.msra.mxu1 %v14722_v33 }
 0x106   : > { %8102 = vmatprep.subr.mxu0 %v14723_v3  ;;  %8158 = vmatprep.subr.mxu1 %v14724_v51 }
 0x107   : > { %8103 = vmatpush3.msra.mxu0 %v14723_v3  ;;  %8159 = vmatpush3.msra.mxu1 %v14724_v51 }
 0x108   : > { %8184 = vmatprep.subr.mxu0 %v10675_v15  ;;  %8240 = vmatprep.subr.mxu1 %v10684_v62 }
 0x163   : > { %v7882_v52 = vpop.f32.mrf.mxu0 }
 0x164   : > { %v7938_v46 = vpop.f32.mrf.mxu1  ;;  %v11069_v23 = vmul.f32 0.5, %v7882_v52 }
 0x165   : > { %v739_v48 = vpop.f32.mrf.mxu0  ;;  %v11073_v49 = vmul.f32 0.5, %v7938_v46 }
 0x166   : > { %v11067_v63 = vmul.f32 0.5, %v739_v48  ;;  %v900_v20 = vpop.f32.mrf.mxu1 }
 0x167   : > { %v11071_v33 = vmul.f32 0.5, %v900_v20  ;;  %14727 = vst [vmem:[#allocation49_spill] sm:$0xff] %v11073_v49 }
 0x168   : > { %14725 = vst [vmem:[#allocation47_spill] sm:$0xff] %v11067_v63  ;;  %8104 = vmatprep.mubr.f32.mxu0 %v11067_v63 }
 0x169   : > { %14726 = vst [vmem:[#allocation26_spill] sm:$0xff] %v11071_v33  ;;  %8160 = vmatprep.mubr.f32.mxu1 %v11071_v33  ;;  %8105 = vmatmul.mubr.f32.vlgmr.msra.gmra.mxu0 %v11069_v23 }
 0x16a   : > { %8161 = vmatmul.mubr.f32.vlgmr.msra.gmra.mxu1 %v11073_v49  ;;  %8185 = vmatpush3.msra.mxu0 %v10675_v15 }
 0x16b   : > { %v7885_v51 = vpop.f32.mrf.mxu0  ;;  %8241 = vmatpush3.msra.mxu1 %v10684_v62  ;;  %8186 = vmatprep.subr.mxu0 %v10677_v27 }
 0x16c   : > { %v7941_v48 = vpop.f32.mrf.mxu1  ;;  %8242 = vmatprep.subr.mxu1 %v10700_v9  ;;  %8187 = vmatpush3.msra.mxu0 %v10677_v27  ;;  %v11088_v33 = vmul.f32 0.5, %v7885_v51 }
 0x16d   : > { %v749_v52 = vpop.f32.mrf.mxu0  ;;  %8243 = vmatpush3.msra.mxu1 %v10700_v9  ;;  %8188 = vmatprep.subr.mxu0 %v10712_v14  ;;  %v11094_v49 = vmul.f32 0.5, %v7941_v48 }
 0x16e   : > { %v11084_v46 = vmul.f32 0.5, %v749_v52  ;;  %v910_v20 = vpop.f32.mrf.mxu1  ;;  %8244 = vmatprep.subr.mxu1 %v10721_v10  ;;  %8189 = vmatpush3.msra.mxu0 %v10712_v14 }
 0x16f   : > { %v11090_v63 = vmul.f32 0.5, %v910_v20  ;;  %8245 = vmatpush3.msra.mxu1 %v10721_v10  ;;  %8190 = vmatprep.subr.mxu0 %v10732_v11 }
 0x170   : > { %8107 = vmatprep.mubr.f32.mxu0 %v11084_v46  ;;  %8246 = vmatprep.subr.mxu1 %v10734_v39 }
 0x171   : > { %14728 = vst [vmem:[#allocation23_spill] sm:$0xff] %v11090_v63  ;;  %8163 = vmatprep.mubr.f32.mxu1 %v11090_v63  ;;  %8108 = vmatmul.mubr.f32.gmra.mxu0 %v11088_v33 }
 0x172   : > { %v7888_v52 = vpop.f32.mrf.mxu0  ;;  %v7944_v9 = vpop.f32.mrf.mxu1  ;;  %8164 = vmatmul.mubr.f32.gmra.mxu1 %v11094_v49  ;;  %8191 = vmatpush3.msra.mxu0 %v10732_v11 }
 0x173   : > { %8247 = vmatpush3.msra.mxu1 %v10734_v39  ;;  %8192 = vmatprep.subr.mxu0 %v10742_v59  ;;  %v11108_v10 = vmul.f32 0.5, %v7888_v52  ;;  %v11114_v14 = vmul.f32 0.5, %v7944_v9 }
 0x174   : > { %v759_v51 = vpop.f32.mrf.mxu0  ;;  %v920_v20 = vpop.f32.mrf.mxu1  ;;  %8248 = vmatprep.subr.mxu1 %v10756_v13  ;;  %8193 = vmatpush3.msra.mxu0 %v10742_v59 }
 0x175   : > { %v11104_v48 = vmul.f32 0.5, %v759_v51  ;;  %v11110_v63 = vmul.f32 0.5, %v920_v20  ;;  %8249 = vmatpush3.msra.mxu1 %v10756_v13  ;;  %8194 = vmatprep.subr.mxu0 %v10769_v47 }
 0x176   : > { %8250 = vmatprep.subr.mxu1 %v10778_v16  ;;  %8195 = vmatpush3.msra.mxu0 %v10769_v47 }
 0x177   : > { %14729 = vst [vmem:[#allocation24_spill] sm:$0xff] %v11110_v63  ;;  %8110 = vmatprep.mubr.f32.mxu0 %v11104_v48  ;;  %8166 = vmatprep.mubr.f32.mxu1 %v11110_v63 }
 0x178   : > { %v7891_v51 = vpop.f32.mrf.mxu0  ;;  %8111 = vmatmul.mubr.f32.gmra.mxu0 %v11108_v10  ;;  %8167 = vmatmul.mubr.f32.gmra.mxu1 %v11114_v14 }
 0x179   : > { %v7947_v39 = vpop.f32.mrf.mxu1  ;;  %8251 = vmatpush3.msra.mxu1 %v10778_v16  ;;  %8196 = vmatprep.subr.mxu0 %v10790_v54  ;;  %v11128_v13 = vmul.f32 0.5, %v7891_v51 }
 0x17a   : > { %v769_v52 = vpop.f32.mrf.mxu0  ;;  %8252 = vmatprep.subr.mxu1 %v10798_v57  ;;  %8197 = vmatpush3.msra.mxu0 %v10790_v54  ;;  %v11134_v59 = vmul.f32 0.5, %v7947_v39 }
 0x17b   : > { %v11124_v9 = vmul.f32 0.5, %v769_v52  ;;  %v930_v20 = vpop.f32.mrf.mxu1  ;;  %8253 = vmatpush3.msra.mxu1 %v10798_v57  ;;  %8198 = vmatprep.subr.mxu0 %v10805_v29 }
 0x17c   : > { %v11130_v63 = vmul.f32 0.5, %v930_v20  ;;  %8254 = vmatprep.subr.mxu1 %v10814_v17  ;;  %8199 = vmatpush3.msra.mxu0 %v10805_v29 }
 0x17d   : > { %8113 = vmatprep.mubr.f32.mxu0 %v11124_v9  ;;  %8255 = vmatpush3.msra.mxu1 %v10814_v17 }
 0x17e   : > { %14730 = vst [vmem:[#allocation51_spill] sm:$0xff] %v11130_v63  ;;  %8169 = vmatprep.mubr.f32.mxu1 %v11130_v63  ;;  %8114 = vmatmul.mubr.f32.gmra.mxu0 %v11128_v13 }
 0x17f   : > { %v7894_v52 = vpop.f32.mrf.mxu0  ;;  %8170 = vmatmul.mubr.f32.gmra.mxu1 %v11134_v59  ;;  %8200 = vmatprep.subr.mxu0 %v10827_v34 }
 0x180   : > { %v7950_v16 = vpop.f32.mrf.mxu1  ;;  %v11148_v57 = vmul.f32 0.5, %v7894_v52  ;;  %8256 = vmatprep.subr.mxu1 %v10836_v2  ;;  %8201 = vmatpush3.msra.mxu0 %v10827_v34 }
 0x181   : > { %v779_v51 = vpop.f32.mrf.mxu0  ;;  %v11154_v54 = vmul.f32 0.5, %v7950_v16  ;;  %8257 = vmatpush3.msra.mxu1 %v10836_v2  ;;  %8202 = vmatprep.subr.mxu0 %v10848_v7 }
 0x182   : > { %v11144_v39 = vmul.f32 0.5, %v779_v51  ;;  %v940_v20 = vpop.f32.mrf.mxu1  ;;  %8258 = vmatprep.subr.mxu1 %v10856_v28  ;;  %8203 = vmatpush3.msra.mxu0 %v10848_v7 }
 0x183   : > { %v11150_v63 = vmul.f32 0.5, %v940_v20  ;;  %8259 = vmatpush3.msra.mxu1 %v10856_v28  ;;  %8204 = vmatprep.subr.mxu0 %v10870_v30 }
 0x184   : > { %8116 = vmatprep.mubr.f32.mxu0 %v11144_v39  ;;  %8260 = vmatprep.subr.mxu1 %v10878_v41 }
 0x185   : > { %14731 = vst [vmem:[#allocation19_spill] sm:$0xff] %v11150_v63  ;;  %8172 = vmatprep.mubr.f32.mxu1 %v11150_v63  ;;  %8117 = vmatmul.mubr.f32.gmra.mxu0 %v11148_v57 }
 0x186   : > { %v7897_v51 = vpop.f32.mrf.mxu0  ;;  %8173 = vmatmul.mubr.f32.gmra.mxu1 %v11154_v54  ;;  %8205 = vmatpush3.msra.mxu0 %v10870_v30 }
 0x187   : > { %v7953_v17 = vpop.f32.mrf.mxu1  ;;  %v11168_v2 = vmul.f32 0.5, %v7897_v51  ;;  %8261 = vmatpush3.msra.mxu1 %v10878_v41  ;;  %8206 = vmatprep.subr.mxu0 %v10885_v45 }
 0x188   : > { %v789_v52 = vpop.f32.mrf.mxu0  ;;  %v11174_v34 = vmul.f32 0.5, %v7953_v17  ;;  %8262 = vmatprep.subr.mxu1 %v10894_v12  ;;  %8207 = vmatpush3.msra.mxu0 %v10885_v45 }
 0x189   : > { %v11164_v16 = vmul.f32 0.5, %v789_v52  ;;  %v950_v20 = vpop.f32.mrf.mxu1  ;;  %8263 = vmatpush3.msra.mxu1 %v10894_v12  ;;  %8208 = vmatprep.subr.mxu0 %v10912_v40 }
 0x18a   : > { %v11170_v63 = vmul.f32 0.5, %v950_v20  ;;  %8264 = vmatprep.subr.mxu1 %v10919_v58  ;;  %8209 = vmatpush3.msra.mxu0 %v10912_v40 }
 0x18b   : > { %8119 = vmatprep.mubr.f32.mxu0 %v11164_v16  ;;  %8265 = vmatpush3.msra.mxu1 %v10919_v58 }
 0x18c   : > { %14732 = vst [vmem:[#allocation71_spill] sm:$0xff] %v11170_v63  ;;  %8175 = vmatprep.mubr.f32.mxu1 %v11170_v63  ;;  %8120 = vmatmul.mubr.f32.gmra.mxu0 %v11168_v2 }
 0x18d   : > { %v7900_v52 = vpop.f32.mrf.mxu0  ;;  %v7956_v28 = vpop.f32.mrf.mxu1  ;;  %8176 = vmatmul.mubr.f32.gmra.mxu1 %v11174_v34  ;;  %8210 = vmatprep.subr.mxu0 %v10928_v5 }
 0x18e   : > { %v11188_v41 = vmul.f32 0.5, %v7900_v52  ;;  %v11194_v30 = vmul.f32 0.5, %v7956_v28  ;;  %8266 = vmatprep.subr.mxu1 %v10936_v8  ;;  %8211 = vmatpush3.msra.mxu0 %v10928_v5 }
 0x18f   : > { %v799_v51 = vpop.f32.mrf.mxu0  ;;  %v960_v20 = vpop.f32.mrf.mxu1  ;;  %8267 = vmatpush3.msra.mxu1 %v10936_v8  ;;  %8212 = vmatprep.subr.mxu0 %v10946_v25 }
 0x190   : > { %v11184_v17 = vmul.f32 0.5, %v799_v51  ;;  %14734 = vst [vmem:[#allocation73_spill] sm:$0xff] %v11188_v41  ;;  %v11190_v63 = vmul.f32 0.5, %v960_v20  ;;  %14736 = vst [vmem:[#allocation75_spill] sm:$0xff] %v11194_v30  ;;  %8268 = vmatprep.subr.mxu1 %v10950_v42  ;;  %8213 = vmatpush3.msra.mxu0 %v10946_v25 }
 0x191   : > { %8269 = vmatpush3.msra.mxu1 %v10950_v42  ;;  %8214 = vmatprep.subr.mxu0 %v10954_v36 }
 0x192   : > { %14733 = vst [vmem:[#allocation72_spill] sm:$0xff] %v11184_v17  ;;  %14735 = vst [vmem:[#allocation74_spill] sm:$0xff] %v11190_v63  ;;  %8122 = vmatprep.mubr.f32.mxu0 %v11184_v17  ;;  %8178 = vmatprep.mubr.f32.mxu1 %v11190_v63 }
 0x193   : > { %v7903_v51 = vpop.f32.mrf.mxu0  ;;  %8123 = vmatmul.mubr.f32.gmra.mxu0 %v11188_v41  ;;  %v7959_v12 = vpop.f32.mrf.mxu1  ;;  %8179 = vmatmul.mubr.f32.gmra.mxu1 %v11194_v30 }
 0x194   : > { %v11208_v58 = vmul.f32 0.5, %v7903_v51  ;;  %v11214_v40 = vmul.f32 0.5, %v7959_v12  ;;  %8270 = vmatprep.subr.mxu1 %v10958_v53  ;;  %8215 = vmatpush3.msra.mxu0 %v10954_v36 }
 0x195   : > { %v809_v52 = vpop.f32.mrf.mxu0  ;;  %v970_v20 = vpop.f32.mrf.mxu1  ;;  %8271 = vmatpush3.msra.mxu1 %v10958_v53  ;;  %8296 = vmatprep.subr.mxu0 %v14712_v44 }
 0x196   : > { %v11204_v28 = vmul.f32 0.5, %v809_v52  ;;  %14738 = vst [vmem:[#allocation77_spill] sm:$0xff] %v11208_v58  ;;  %v11210_v63 = vmul.f32 0.5, %v970_v20  ;;  %14740 = vst [vmem:[#allocation79_spill] sm:$0xff] %v11214_v40  ;;  %8352 = vmatprep.subr.mxu1 %v14714_v55 }
 0x198   : > { %14737 = vst [vmem:[#allocation76_spill] sm:$0xff] %v11204_v28  ;;  %14739 = vst [vmem:[#allocation78_spill] sm:$0xff] %v11210_v63  ;;  %8125 = vmatprep.mubr.f32.mxu0 %v11204_v28  ;;  %8181 = vmatprep.mubr.f32.mxu1 %v11210_v63 }
 0x199   : > { %v7994_v52 = vpop.f32.mrf.mxu0  ;;  %8126 = vmatmul.mubr.f32.gmra.mxu0 %v11208_v58  ;;  %v8050_v8 = vpop.f32.mrf.mxu1  ;;  %8182 = vmatmul.mubr.f32.gmra.mxu1 %v11214_v40 }
 0x19a   : > { %v11228_v42 = vmul.f32 0.5, %v7994_v52  ;;  %v11233_v28 = vmul.f32 0.5, %v8050_v8 }
 0x19b   : > { %v1061_v51 = vpop.f32.mrf.mxu0  ;;  %v1222_v20 = vpop.f32.mrf.mxu1 }
 0x19c   : > { %v11224_v12 = vmul.f32 0.5, %v1061_v51  ;;  %14742 = vst [vmem:[#allocation81_spill] sm:$0xff] %v11228_v42  ;;  %v11230_v63 = vmul.f32 0.5, %v1222_v20  ;;  %14744 = vst [vmem:[#allocation83_spill] sm:$0xff] %v11233_v28 }
 0x19d   : > { %v7997_v25 = vpop.f32.mrf.mxu0  ;;  %v8053_v40 = vpop.f32.mrf.mxu1 }
 0x19e   : > { %14741 = vst [vmem:[#allocation80_spill] sm:$0xff] %v11224_v12  ;;  %14743 = vst [vmem:[#allocation82_spill] sm:$0xff] %v11230_v63  ;;  %8216 = vmatprep.mubr.f32.mxu0 %v11224_v12  ;;  %8272 = vmatprep.mubr.f32.mxu1 %v11230_v63  ;;  %v11242_v52 = vmul.f32 0.5, %v7997_v25  ;;  %v11248_v63 = vmul.f32 0.5, %v8053_v40 }
 0x19f   : > { %v1071_v51 = vpop.f32.mrf.mxu0  ;;  %8217 = vmatmul.mubr.f32.vlgmr.msra.gmra.mxu0 %v11228_v42  ;;  %v1232_v36 = vpop.f32.mrf.mxu1  ;;  %8273 = vmatmul.mubr.f32.vlgmr.msra.gmra.mxu1 %v11233_v28 }
 0x1a0   : > { %v11238_v53 = vmul.f32 0.5, %v1071_v51  ;;  %8297 = vmatpush3.msra.mxu0 %v14712_v44  ;;  %14746 = vst [vmem:[#allocation85_spill] sm:$0xff] %v11242_v52  ;;  %v11244_v20 = vmul.f32 0.5, %v1232_v36  ;;  %8353 = vmatpush3.msra.mxu1 %v14714_v55  ;;  %14748 = vst [vmem:[#allocation87_spill] sm:$0xff] %v11248_v63  ;;  %v14783_v44 = vld [vmem:[#allocation47_spill] sm:$0xff] }
 0x1a1   : > { %v8000_v8 = vpop.f32.mrf.mxu0  ;;  %8298 = vmatprep.subr.mxu0 %v14708_v61  ;;  %v8056_v12 = vpop.f32.mrf.mxu1  ;;  %8354 = vmatprep.subr.mxu1 %v14710_v26 }
 0x1a2   : > { %14745 = vst [vmem:[#allocation84_spill] sm:$0xff] %v11238_v53  ;;  %14747 = vst [vmem:[#allocation86_spill] sm:$0xff] %v11244_v20  ;;  %8219 = vmatprep.mubr.f32.mxu0 %v11238_v53  ;;  %8275 = vmatprep.mubr.f32.mxu1 %v11244_v20  ;;  %v11258_v28 = vmul.f32 0.5, %v8000_v8  ;;  %v11264_v20 = vmul.f32 0.5, %v8056_v12 }
 0x1a3   : > { %v1081_v51 = vpop.f32.mrf.mxu0  ;;  %8220 = vmatmul.mubr.f32.gmra.mxu0 %v11242_v52  ;;  %v1242_v36 = vpop.f32.mrf.mxu1  ;;  %8276 = vmatmul.mubr.f32.gmra.mxu1 %v11248_v63 }
 0x1a4   : > { %v11254_v25 = vmul.f32 0.5, %v1081_v51  ;;  %8299 = vmatpush3.msra.mxu0 %v14708_v61  ;;  %14750 = vst [vmem:[#allocation89_spill] sm:$0xff] %v11258_v28  ;;  %v11260_v40 = vmul.f32 0.5, %v1242_v36  ;;  %8355 = vmatpush3.msra.mxu1 %v14710_v26  ;;  %14752 = vst [vmem:[#allocation91_spill] sm:$0xff] %v11264_v20  ;;  %v14782_v61 = vld [vmem:[#allocation49_spill] sm:$0xff] }
 0x1a5   : > { %v8003_v42 = vpop.f32.mrf.mxu0  ;;  %8300 = vmatprep.subr.mxu0 %v14704_v32  ;;  %v8059_v53 = vpop.f32.mrf.mxu1  ;;  %8356 = vmatprep.subr.mxu1 %v14706_v31 }
 0x1a6   : > { %14749 = vst [vmem:[#allocation88_spill] sm:$0xff] %v11254_v25  ;;  %14751 = vst [vmem:[#allocation90_spill] sm:$0xff] %v11260_v40  ;;  %8222 = vmatprep.mubr.f32.mxu0 %v11254_v25  ;;  %8278 = vmatprep.mubr.f32.mxu1 %v11260_v40  ;;  %v11274_v63 = vmul.f32 0.5, %v8003_v42  ;;  %v11280_v40 = vmul.f32 0.5, %v8059_v53 }
 0x1a7   : > { %v1091_v51 = vpop.f32.mrf.mxu0  ;;  %8223 = vmatmul.mubr.f32.gmra.mxu0 %v11258_v28  ;;  %v1252_v36 = vpop.f32.mrf.mxu1  ;;  %8279 = vmatmul.mubr.f32.gmra.mxu1 %v11264_v20 }
 0x1a8   : > { %v11270_v8 = vmul.f32 0.5, %v1091_v51  ;;  %8301 = vmatpush3.msra.mxu0 %v14704_v32  ;;  %14754 = vst [vmem:[#allocation93_spill] sm:$0xff] %v11274_v63  ;;  %v11276_v12 = vmul.f32 0.5, %v1252_v36  ;;  %8357 = vmatpush3.msra.mxu1 %v14706_v31  ;;  %14756 = vst [vmem:[#allocation95_spill] sm:$0xff] %v11280_v40  ;;  %v14785_v31 = vld [vmem:[#allocation26_spill] sm:$0xff] }
 0x1a9   : > { %v8006_v52 = vpop.f32.mrf.mxu0  ;;  %8302 = vmatprep.subr.mxu0 %v14700_v37  ;;  %v8062_v25 = vpop.f32.mrf.mxu1  ;;  %8358 = vmatprep.subr.mxu1 %v14702_v38 }
 0x1aa   : > { %14753 = vst [vmem:[#allocation92_spill] sm:$0xff] %v11270_v8  ;;  %14755 = vst [vmem:[#allocation94_spill] sm:$0xff] %v11276_v12  ;;  %8225 = vmatprep.mubr.f32.mxu0 %v11270_v8  ;;  %8281 = vmatprep.mubr.f32.mxu1 %v11276_v12  ;;  %v11290_v20 = vmul.f32 0.5, %v8006_v52  ;;  %v11296_v12 = vmul.f32 0.5, %v8062_v25 }
 0x1ab   : > { %v1101_v51 = vpop.f32.mrf.mxu0  ;;  %8226 = vmatmul.mubr.f32.gmra.mxu0 %v11274_v63  ;;  %v1262_v36 = vpop.f32.mrf.mxu1  ;;  %8282 = vmatmul.mubr.f32.gmra.mxu1 %v11280_v40 }
 0x1ac   : > { %v11286_v42 = vmul.f32 0.5, %v1101_v51  ;;  %8303 = vmatpush3.msra.mxu0 %v14700_v37  ;;  %14758 = vst [vmem:[#allocation97_spill] sm:$0xff] %v11290_v20  ;;  %v11292_v53 = vmul.f32 0.5, %v1262_v36  ;;  %8359 = vmatpush3.msra.mxu1 %v14702_v38  ;;  %14760 = vst [vmem:[#allocation99_spill] sm:$0xff] %v11296_v12  ;;  %v1317_v38 = vadd.f32 %v14783_v44, %v14723_v3 }
 0x1ad   : > { %v8009_v28 = vpop.f32.mrf.mxu0  ;;  %8304 = vmatprep.subr.mxu0 %v14695_v19  ;;  %v8065_v8 = vpop.f32.mrf.mxu1  ;;  %8360 = vmatprep.subr.mxu1 %v14697_v50 }
 0x1ae   : > { %14757 = vst [vmem:[#allocation96_spill] sm:$0xff] %v11286_v42  ;;  %14759 = vst [vmem:[#allocation98_spill] sm:$0xff] %v11292_v53  ;;  %8228 = vmatprep.mubr.f32.mxu0 %v11286_v42  ;;  %8284 = vmatprep.mubr.f32.mxu1 %v11292_v53  ;;  %v11306_v40 = vmul.f32 0.5, %v8009_v28  ;;  %v11312_v53 = vmul.f32 0.5, %v8065_v8 }
 0x1af   : > { %v1111_v51 = vpop.f32.mrf.mxu0  ;;  %8229 = vmatmul.mubr.f32.gmra.mxu0 %v11290_v20  ;;  %v1272_v36 = vpop.f32.mrf.mxu1  ;;  %8285 = vmatmul.mubr.f32.gmra.mxu1 %v11296_v12 }
 0x1b0   : > { %v11302_v52 = vmul.f32 0.5, %v1111_v51  ;;  %8305 = vmatpush3.msra.mxu0 %v14695_v19  ;;  %14762 = vst [vmem:[#allocation101_spill] sm:$0xff] %v11306_v40  ;;  %v11308_v25 = vmul.f32 0.5, %v1272_v36  ;;  %8361 = vmatpush3.msra.mxu1 %v14697_v50  ;;  %14764 = vst [vmem:[#allocation103_spill] sm:$0xff] %v11312_v53 }
 0x1b1   : > { %v8012_v63 = vpop.f32.mrf.mxu0  ;;  %8306 = vmatprep.subr.mxu0 %v14688_v24  ;;  %v8068_v42 = vpop.f32.mrf.mxu1  ;;  %8362 = vmatprep.subr.mxu1 %v14692_v0 }
 0x1b2   : > { %14761 = vst [vmem:[#allocation100_spill] sm:$0xff] %v11302_v52  ;;  %14763 = vst [vmem:[#allocation102_spill] sm:$0xff] %v11308_v25  ;;  %8231 = vmatprep.mubr.f32.mxu0 %v11302_v52  ;;  %8287 = vmatprep.mubr.f32.mxu1 %v11308_v25  ;;  %v11322_v12 = vmul.f32 0.5, %v8012_v63  ;;  %v11328_v25 = vmul.f32 0.5, %v8068_v42 }
 0x1b3   : > { %v1121_v51 = vpop.f32.mrf.mxu0  ;;  %8232 = vmatmul.mubr.f32.gmra.mxu0 %v11306_v40  ;;  %v1282_v36 = vpop.f32.mrf.mxu1  ;;  %8288 = vmatmul.mubr.f32.gmra.mxu1 %v11312_v53 }
 0x1b4   : > { %v11318_v28 = vmul.f32 0.5, %v1121_v51  ;;  %8307 = vmatpush3.msra.mxu0 %v14688_v24  ;;  %14766 = vst [vmem:[#allocation105_spill] sm:$0xff] %v11322_v12  ;;  %v11324_v8 = vmul.f32 0.5, %v1282_v36  ;;  %8363 = vmatpush3.msra.mxu1 %v14692_v0  ;;  %14768 = vst [vmem:[#allocation107_spill] sm:$0xff] %v11328_v25 }
 0x1b5   : > { %v8015_v20 = vpop.f32.mrf.mxu0  ;;  %8308 = vmatprep.subr.mxu0 %v14680_v22  ;;  %v8071_v52 = vpop.f32.mrf.mxu1  ;;  %8364 = vmatprep.subr.mxu1 %v14682_v21 }
 0x1b6   : > { %14765 = vst [vmem:[#allocation104_spill] sm:$0xff] %v11318_v28  ;;  %14767 = vst [vmem:[#allocation106_spill] sm:$0xff] %v11324_v8  ;;  %8234 = vmatprep.mubr.f32.mxu0 %v11318_v28  ;;  %8290 = vmatprep.mubr.f32.mxu1 %v11324_v8  ;;  %v11338_v53 = vmul.f32 0.5, %v8015_v20  ;;  %v11344_v28 = vmul.f32 0.5, %v8071_v52  ;;  %v14773_v20 = vld [vmem:[#allocation52_spill] sm:$0xff]  ;;  %v14774_v52 = vld [vmem:[#allocation53_spill] sm:$0xff] }
 0x1b7   : > { %v1131_v51 = vpop.f32.mrf.mxu0  ;;  %8235 = vmatmul.mubr.f32.gmra.mxu0 %v11322_v12  ;;  %v1292_v36 = vpop.f32.mrf.mxu1  ;;  %8291 = vmatmul.mubr.f32.gmra.mxu1 %v11328_v25  ;;  %v14781_v8 = vld [vmem:[#allocation61_spill] sm:$0xff] }
 0x1b8   : > { %v11334_v63 = vmul.f32 0.5, %v1131_v51  ;;  %8309 = vmatpush3.msra.mxu0 %v14680_v22  ;;  %14770 = vst [vmem:[#allocation109_spill] sm:$0xff] %v11338_v53  ;;  %v11340_v42 = vmul.f32 0.5, %v1292_v36  ;;  %8365 = vmatpush3.msra.mxu1 %v14682_v21  ;;  %14772 = vst [vmem:[#allocation111_spill] sm:$0xff] %v11344_v28  ;;  %v14775_v51 = vld [vmem:[#allocation54_spill] sm:$0xff]  ;;  %v14776_v36 = vld [vmem:[#allocation55_spill] sm:$0xff]  ;;  %v1333_v45 = vadd.f32 %v14785_v31, %v14781_v8 }
 0x1b9   : > { %8310 = vmatprep.subr.mxu0 %v14675_v18  ;;  %8366 = vmatprep.subr.mxu1 %v14678_v1  ;;  %v1336_v31 = vadd.f32 %v11094_v49, %v14776_v36 }
 0x1ba   : > { %14769 = vst [vmem:[#allocation108_spill] sm:$0xff] %v11334_v63  ;;  %14771 = vst [vmem:[#allocation110_spill] sm:$0xff] %v11340_v42  ;;  %8237 = vmatprep.mubr.f32.mxu0 %v11334_v63  ;;  %8293 = vmatprep.mubr.f32.mxu1 %v11340_v42  ;;  %v14777_v42 = vld [vmem:[#allocation56_spill] sm:$0xff]  ;;  %v14778_v63 = vld [vmem:[#allocation57_spill] sm:$0xff] }
 0x1bb   : > { %8238 = vmatmul.mubr.f32.gmra.mxu0 %v11338_v53  ;;  %8294 = vmatmul.mubr.f32.gmra.mxu1 %v11344_v28  ;;  %v14779_v28 = vld [vmem:[#allocation58_spill] sm:$0xff]  ;;  %v14780_v53 = vld [vmem:[#allocation59_spill] sm:$0xff] }
 0x1bc   : > { %8311 = vmatpush3.msra.mxu0 %v14675_v18  ;;  %8367 = vmatpush3.msra.mxu1 %v14678_v1  ;;  %v1318_v12 = vadd.f32 %v11069_v23, %v14779_v28  ;;  %v1334_v55 = vadd.f32 %v14782_v61, %v14780_v53 }
 0x1bd   : > { %8312 = vmatprep.subr.mxu0 %v14666_v60  ;;  %8368 = vmatprep.subr.mxu1 %v14669_v35 }
 0x1be   : > { %8313 = vmatpush3.msra.mxu0 %v14666_v60  ;;  %8369 = vmatpush3.msra.mxu1 %v14669_v35 }
 0x1bf   : > { %8314 = vmatprep.subr.mxu0 %v10498_v43  ;;  %8370 = vmatprep.subr.mxu1 %v10507_v4 }
 0x1c0   : > { %8315 = vmatpush3.msra.mxu0 %v10498_v43  ;;  %8371 = vmatpush3.msra.mxu1 %v10507_v4 }
 0x1c1   : > { %8316 = vmatprep.subr.mxu0 %v10520_v6  ;;  %8372 = vmatprep.subr.mxu1 %v10540_v56 }
 0x1c2   : > { %8317 = vmatpush3.msra.mxu0 %v10520_v6  ;;  %8373 = vmatpush3.msra.mxu1 %v10540_v56 }
 0x1c3   : > { %8318 = vmatprep.subr.mxu0 %v14773_v20  ;;  %8374 = vmatprep.subr.mxu1 %v14774_v52 }
 0x1c4   : > { %8319 = vmatpush3.msra.mxu0 %v14773_v20  ;;  %8375 = vmatpush3.msra.mxu1 %v14774_v52 }
 0x1c5   : > { %8320 = vmatprep.subr.mxu0 %v14775_v51  ;;  %8376 = vmatprep.subr.mxu1 %v14776_v36 }
 0x1c6   : > { %8321 = vmatpush3.msra.mxu0 %v14775_v51  ;;  %8377 = vmatpush3.msra.mxu1 %v14776_v36  ;;  %v14848_v36 = vld [vmem:[#allocation79_spill] sm:$0xff] }
 0x1c7   : > { %8322 = vmatprep.subr.mxu0 %v14777_v42  ;;  %8378 = vmatprep.subr.mxu1 %v14778_v63 }
 0x1c8   : > { %8323 = vmatpush3.msra.mxu0 %v14777_v42  ;;  %8379 = vmatpush3.msra.mxu1 %v14778_v63 }
 0x1c9   : > { %8324 = vmatprep.subr.mxu0 %v14779_v28  ;;  %8380 = vmatprep.subr.mxu1 %v14780_v53 }
 0x1ca   : > { %8325 = vmatpush3.msra.mxu0 %v14779_v28  ;;  %8381 = vmatpush3.msra.mxu1 %v14780_v53  ;;  %v14841_v53 = vld [vmem:[#allocation39_spill] sm:$0xff] }
 0x1cb   : > { %8326 = vmatprep.subr.mxu0 %v14723_v3  ;;  %8382 = vmatprep.subr.mxu1 %v14781_v8 }
 0x1cc   : > { %8327 = vmatpush3.msra.mxu0 %v14723_v3  ;;  %8383 = vmatpush3.msra.mxu1 %v14781_v8  ;;  %v14839_v8 = vld [vmem:[#allocation74_spill] sm:$0xff] }
 0x1cd   : > { %8408 = vmatprep.subr.mxu0 %v10675_v15  ;;  %8464 = vmatprep.subr.mxu1 %v10684_v62 }
 0x229   : > { %v8106_v25 = vpop.f32.mrf.mxu0 }
 0x22a   : > { %v1527_v40 = vmul.f32 0.33333334, %v8106_v25  ;;  %v8162_v26 = vpop.f32.mrf.mxu1 }
 0x22b   : > { %v1688_v5 = vmul.f32 0.33333334, %v8162_v26  ;;  %v1447_v58 = vpop.f32.mrf.mxu0 }
 0x22c   : > { %v11393_v17 = vadd.f32 %v1527_v40, %v1318_v12  ;;  %v1526_v37 = vmul.f32 0.33333334, %v1447_v58  ;;  %v1608_v30 = vpop.f32.mrf.mxu1  ;;  %v1320_v58 = vadd.f32 %v11088_v33, %v14775_v51  ;;  %v14792_v12 = vld [vmem:[#allocation23_spill] sm:$0xff]  ;;  %v14849_v51 = vld [vmem:[#allocation40_spill] sm:$0xff] }
 0x22d   : > { %v11397_v41 = vadd.f32 %v1688_v5, %v1334_v55  ;;  %v1687_v23 = vmul.f32 0.33333334, %v1608_v30  ;;  %v1335_v49 = vadd.f32 %v14792_v12, %v14778_v63 }
 0x22e   : > { %14784 = vst [vmem:[#allocation49_spill] sm:$0xff] %v11393_v17  ;;  %v11399_v25 = vadd.f32 %v1526_v37, %v1317_v38  ;;  %8328 = vmatprep.mubr.f32.mxu0 %v1526_v37  ;;  %v14789_v37 = vld [vmem:[#allocation62_spill] sm:$0xff]  ;;  %v1319_v38 = vadd.f32 %v11084_v46, %v14777_v42  ;;  %v14847_v42 = vld [vmem:[#allocation16_spill] sm:$0xff] }
 0x22f   : > { %14786 = vst [vmem:[#allocation47_spill] sm:$0xff] %v11397_v41  ;;  %v11401_v28 = vadd.f32 %v1687_v23, %v1333_v45  ;;  %8384 = vmatprep.mubr.f32.mxu1 %v1687_v23  ;;  %8329 = vmatmul.mubr.f32.vlgmr.msra.gmra.mxu0 %v1527_v40  ;;  %v14791_v40 = vld [vmem:[#allocation63_spill] sm:$0xff]  ;;  %v14833_v41 = vld [vmem:[#allocation37_spill] sm:$0xff]  ;;  %v14838_v17 = vld [vmem:[#allocation22_spill] sm:$0xff] }
 0x230   : > { %14787 = vst [vmem:[#allocation26_spill] sm:$0xff] %v11399_v25  ;;  %8385 = vmatmul.mubr.f32.vlgmr.msra.gmra.mxu1 %v1688_v5  ;;  %8409 = vmatpush3.msra.mxu0 %v10675_v15  ;;  %v14832_v25 = vld [vmem:[#allocation75_spill] sm:$0xff] }
 0x231   : > { %14788 = vst [vmem:[#allocation112_spill] sm:$0xff] %v11401_v28  ;;  %v8109_v61 = vpop.f32.mrf.mxu0  ;;  %8465 = vmatpush3.msra.mxu1 %v10684_v62  ;;  %8410 = vmatprep.subr.mxu0 %v10677_v27 }
 0x232   : > { %v1529_v26 = vmul.f32 0.33333334, %v8109_v61  ;;  %v8165_v44 = vpop.f32.mrf.mxu1  ;;  %8466 = vmatprep.subr.mxu1 %v14789_v37  ;;  %8411 = vmatpush3.msra.mxu0 %v10677_v27 }
 0x233   : > { %v1690_v30 = vmul.f32 0.33333334, %v8165_v44  ;;  %v1457_v45 = vpop.f32.mrf.mxu0  ;;  %8467 = vmatpush3.msra.mxu1 %v14789_v37  ;;  %8412 = vmatprep.subr.mxu0 %v14791_v40  ;;  %v14794_v44 = vld [vmem:[#allocation64_spill] sm:$0xff] }
 0x234   : > { %v11414_v5 = vadd.f32 %v1529_v26, %v1320_v58  ;;  %v1528_v55 = vmul.f32 0.33333334, %v1457_v45  ;;  %v1618_v33 = vpop.f32.mrf.mxu1  ;;  %8468 = vmatprep.subr.mxu1 %v14794_v44  ;;  %8413 = vmatpush3.msra.mxu0 %v14791_v40  ;;  %v1322_v45 = vadd.f32 %v11108_v10, %v10520_v6  ;;  %v14857_v6 = vld [vmem:[#allocation43_spill] sm:$0xff] }
 0x235   : > { %v11420_v23 = vadd.f32 %v1690_v30, %v1336_v31  ;;  %v1689_v61 = vmul.f32 0.33333334, %v1618_v33  ;;  %8469 = vmatpush3.msra.mxu1 %v14794_v44  ;;  %8414 = vmatprep.subr.mxu0 %v10732_v11 }
 0x236   : > { %14790 = vst [vmem:[#allocation113_spill] sm:$0xff] %v11414_v5  ;;  %v11424_v28 = vadd.f32 %v1528_v55, %v1319_v38  ;;  %8331 = vmatprep.mubr.f32.mxu0 %v1528_v55  ;;  %v1338_v38 = vadd.f32 %v11114_v14, %v10540_v56  ;;  %8415 = vmatpush3.msra.mxu0 %v10732_v11 }
 0x237   : > { %14793 = vst [vmem:[#allocation63_spill] sm:$0xff] %v11420_v23  ;;  %v11427_v46 = vadd.f32 %v1689_v61, %v1335_v49  ;;  %8387 = vmatprep.mubr.f32.mxu1 %v1689_v61  ;;  %8332 = vmatmul.mubr.f32.gmra.mxu0 %v1529_v26  ;;  %v1321_v26 = vadd.f32 %v11104_v48, %v14773_v20  ;;  %v14802_v23 = vld [vmem:[#allocation67_spill] sm:$0xff]  ;;  %v14855_v20 = vld [vmem:[#allocation78_spill] sm:$0xff] }
 0x238   : > { %14795 = vst [vmem:[#allocation23_spill] sm:$0xff] %v11424_v28  ;;  %v8112_v58 = vpop.f32.mrf.mxu0  ;;  %v8168_v12 = vpop.f32.mrf.mxu1  ;;  %8388 = vmatmul.mubr.f32.gmra.mxu1 %v1690_v30  ;;  %v14797_v28 = vld [vmem:[#allocation65_spill] sm:$0xff]  ;;  %v14799_v30 = vld [vmem:[#allocation66_spill] sm:$0xff] }
 0x239   : > { %14796 = vst [vmem:[#allocation64_spill] sm:$0xff] %v11427_v46  ;;  %v1531_v31 = vmul.f32 0.33333334, %v8112_v58  ;;  %v1692_v33 = vmul.f32 0.33333334, %v8168_v12  ;;  %8470 = vmatprep.subr.mxu1 %v14797_v28  ;;  %8416 = vmatprep.subr.mxu0 %v14799_v30  ;;  %v14800_v58 = vld [vmem:[#allocation24_spill] sm:$0xff] }
 0x23a   : > { %v1467_v55 = vpop.f32.mrf.mxu0  ;;  %v1628_v61 = vpop.f32.mrf.mxu1  ;;  %8471 = vmatpush3.msra.mxu1 %v14797_v28  ;;  %v1337_v14 = vadd.f32 %v14800_v58, %v14774_v52  ;;  %8417 = vmatpush3.msra.mxu0 %v14799_v30  ;;  %v14854_v52 = vld [vmem:[#allocation18_spill] sm:$0xff] }
 0x23b   : > { %v11438_v49 = vadd.f32 %v1531_v31, %v1322_v45  ;;  %v1530_v10 = vmul.f32 0.33333334, %v1467_v55  ;;  %v11444_v12 = vadd.f32 %v1692_v33, %v1338_v38  ;;  %v1691_v46 = vmul.f32 0.33333334, %v1628_v61  ;;  %8472 = vmatprep.subr.mxu1 %v14802_v23  ;;  %8418 = vmatprep.subr.mxu0 %v10769_v47 }
 0x23c   : > { %8473 = vmatpush3.msra.mxu1 %v14802_v23  ;;  %v1324_v55 = vadd.f32 %v11128_v13, %v14666_v60  ;;  %8419 = vmatpush3.msra.mxu0 %v10769_v47 }
 0x23d   : > { %14798 = vst [vmem:[#allocation114_spill] sm:$0xff] %v11438_v49  ;;  %14801 = vst [vmem:[#allocation66_spill] sm:$0xff] %v11444_v12  ;;  %v11448_v5 = vadd.f32 %v1530_v10, %v1321_v26  ;;  %8334 = vmatprep.mubr.f32.mxu0 %v1530_v10  ;;  %v11451_v48 = vadd.f32 %v1691_v46, %v1337_v14  ;;  %8390 = vmatprep.mubr.f32.mxu1 %v1691_v46  ;;  %v14810_v12 = vld [vmem:[#allocation70_spill] sm:$0xff] }
 0x23e   : > { %v8115_v45 = vpop.f32.mrf.mxu0  ;;  %8335 = vmatmul.mubr.f32.gmra.mxu0 %v1531_v31  ;;  %8391 = vmatmul.mubr.f32.gmra.mxu1 %v1692_v33  ;;  %v1340_v26 = vadd.f32 %v11134_v59, %v14669_v35  ;;  %v1323_v46 = vadd.f32 %v11124_v9, %v10498_v43  ;;  %v14807_v33 = vld [vmem:[#allocation69_spill] sm:$0xff]  ;;  %v14863_v43 = vld [vmem:[#allocation46_spill] sm:$0xff] }
 0x23f   : > { %14803 = vst [vmem:[#allocation24_spill] sm:$0xff] %v11448_v5  ;;  %14804 = vst [vmem:[#allocation67_spill] sm:$0xff] %v11451_v48  ;;  %v1533_v38 = vmul.f32 0.33333334, %v8115_v45  ;;  %v8171_v58 = vpop.f32.mrf.mxu1  ;;  %v14805_v5 = vld [vmem:[#allocation68_spill] sm:$0xff]  ;;  %8420 = vmatprep.subr.mxu0 %v14807_v33  ;;  %v14808_v45 = vld [vmem:[#allocation51_spill] sm:$0xff] }
 0x240   : > { %v1694_v61 = vmul.f32 0.33333334, %v8171_v58  ;;  %v1477_v10 = vpop.f32.mrf.mxu0  ;;  %8474 = vmatprep.subr.mxu1 %v14805_v5  ;;  %v1339_v59 = vadd.f32 %v14808_v45, %v10507_v4  ;;  %8421 = vmatpush3.msra.mxu0 %v14807_v33 }
 0x241   : > { %v11462_v31 = vadd.f32 %v1533_v38, %v1324_v55  ;;  %v1532_v13 = vmul.f32 0.33333334, %v1477_v10  ;;  %v1638_v14 = vpop.f32.mrf.mxu1  ;;  %8475 = vmatpush3.msra.mxu1 %v14805_v5  ;;  %v1326_v10 = vadd.f32 %v11148_v57, %v14680_v22  ;;  %8422 = vmatprep.subr.mxu0 %v10805_v29 }
 0x242   : > { %v11468_v58 = vadd.f32 %v1694_v61, %v1340_v26  ;;  %v1693_v48 = vmul.f32 0.33333334, %v1638_v14  ;;  %8476 = vmatprep.subr.mxu1 %v14810_v12  ;;  %8423 = vmatpush3.msra.mxu0 %v10805_v29 }
 0x243   : > { %14806 = vst [vmem:[#allocation115_spill] sm:$0xff] %v11462_v31  ;;  %v11472_v49 = vadd.f32 %v1532_v13, %v1323_v46  ;;  %8337 = vmatprep.mubr.f32.mxu0 %v1532_v13  ;;  %8477 = vmatpush3.msra.mxu1 %v14810_v12  ;;  %v1342_v46 = vadd.f32 %v11154_v54, %v14682_v21 }
 0x244   : > { %14809 = vst [vmem:[#allocation69_spill] sm:$0xff] %v11468_v58  ;;  %v11475_v9 = vadd.f32 %v1693_v48, %v1339_v59  ;;  %8393 = vmatprep.mubr.f32.mxu1 %v1693_v48  ;;  %8338 = vmatmul.mubr.f32.gmra.mxu0 %v1533_v38  ;;  %v1325_v48 = vadd.f32 %v11144_v39, %v14675_v18  ;;  %v14818_v58 = vld [vmem:[#allocation30_spill] sm:$0xff] }
 0x245   : > { %14811 = vst [vmem:[#allocation51_spill] sm:$0xff] %v11472_v49  ;;  %v8118_v55 = vpop.f32.mrf.mxu0  ;;  %8394 = vmatmul.mubr.f32.gmra.mxu1 %v1694_v61  ;;  %v14813_v49 = vld [vmem:[#allocation27_spill] sm:$0xff]  ;;  %v14815_v61 = vld [vmem:[#allocation28_spill] sm:$0xff] }
 0x246   : > { %14812 = vst [vmem:[#allocation70_spill] sm:$0xff] %v11475_v9  ;;  %v1535_v26 = vmul.f32 0.33333334, %v8118_v55  ;;  %v8174_v45 = vpop.f32.mrf.mxu1  ;;  %8478 = vmatprep.subr.mxu1 %v14813_v49  ;;  %8424 = vmatprep.subr.mxu0 %v14815_v61  ;;  %v14816_v55 = vld [vmem:[#allocation19_spill] sm:$0xff] }
 0x247   : > { %v1696_v14 = vmul.f32 0.33333334, %v8174_v45  ;;  %v1487_v13 = vpop.f32.mrf.mxu0  ;;  %8479 = vmatpush3.msra.mxu1 %v14813_v49  ;;  %v1341_v54 = vadd.f32 %v14816_v55, %v14678_v1  ;;  %8425 = vmatpush3.msra.mxu0 %v14815_v61 }
 0x248   : > { %v11486_v38 = vadd.f32 %v1535_v26, %v1326_v10  ;;  %v1534_v57 = vmul.f32 0.33333334, %v1487_v13  ;;  %v1648_v59 = vpop.f32.mrf.mxu1  ;;  %8480 = vmatprep.subr.mxu1 %v14818_v58  ;;  %v1328_v13 = vadd.f32 %v11168_v2, %v14695_v19  ;;  %8426 = vmatprep.subr.mxu0 %v10848_v7 }
 0x249   : > { %v11492_v45 = vadd.f32 %v1696_v14, %v1342_v46  ;;  %v1695_v9 = vmul.f32 0.33333334, %v1648_v59  ;;  %8481 = vmatpush3.msra.mxu1 %v14818_v58  ;;  %8427 = vmatpush3.msra.mxu0 %v10848_v7 }
 0x24a   : > { %14814 = vst [vmem:[#allocation116_spill] sm:$0xff] %v11486_v38  ;;  %v11496_v31 = vadd.f32 %v1534_v57, %v1325_v48  ;;  %8340 = vmatprep.mubr.f32.mxu0 %v1534_v57  ;;  %v1344_v48 = vadd.f32 %v11174_v34, %v14697_v50 }
 0x24b   : > { %14817 = vst [vmem:[#allocation28_spill] sm:$0xff] %v11492_v45  ;;  %v11499_v39 = vadd.f32 %v1695_v9, %v1341_v54  ;;  %8396 = vmatprep.mubr.f32.mxu1 %v1695_v9  ;;  %8341 = vmatmul.mubr.f32.gmra.mxu0 %v1535_v26  ;;  %v1327_v9 = vadd.f32 %v11164_v16, %v14688_v24  ;;  %v14826_v45 = vld [vmem:[#allocation34_spill] sm:$0xff] }
 0x24c   : > { %14819 = vst [vmem:[#allocation19_spill] sm:$0xff] %v11496_v31  ;;  %v8121_v10 = vpop.f32.mrf.mxu0  ;;  %8397 = vmatmul.mubr.f32.gmra.mxu1 %v1696_v14  ;;  %v14821_v31 = vld [vmem:[#allocation31_spill] sm:$0xff]  ;;  %v14823_v14 = vld [vmem:[#allocation33_spill] sm:$0xff] }
 0x24d   : > { %14820 = vst [vmem:[#allocation30_spill] sm:$0xff] %v11499_v39  ;;  %v1537_v46 = vmul.f32 0.33333334, %v8121_v10  ;;  %v8177_v55 = vpop.f32.mrf.mxu1  ;;  %8482 = vmatprep.subr.mxu1 %v14821_v31  ;;  %8428 = vmatprep.subr.mxu0 %v14823_v14  ;;  %v14824_v10 = vld [vmem:[#allocation71_spill] sm:$0xff] }
 0x24e   : > { %v1698_v59 = vmul.f32 0.33333334, %v8177_v55  ;;  %v1497_v57 = vpop.f32.mrf.mxu0  ;;  %8483 = vmatpush3.msra.mxu1 %v14821_v31  ;;  %v1343_v34 = vadd.f32 %v14824_v10, %v14692_v0  ;;  %8429 = vmatpush3.msra.mxu0 %v14823_v14 }
 0x24f   : > { %v11510_v26 = vadd.f32 %v1537_v46, %v1328_v13  ;;  %v1536_v2 = vmul.f32 0.33333334, %v1497_v57  ;;  %v1658_v54 = vpop.f32.mrf.mxu1  ;;  %8484 = vmatprep.subr.mxu1 %v14826_v45  ;;  %v14829_v57 = vld [vmem:[#allocation73_spill] sm:$0xff] }
 0x250   : > { %v11516_v55 = vadd.f32 %v1698_v59, %v1344_v48  ;;  %v1697_v39 = vmul.f32 0.33333334, %v1658_v54  ;;  %8485 = vmatpush3.msra.mxu1 %v14826_v45  ;;  %v1330_v10 = vadd.f32 %v14829_v57, %v14704_v32  ;;  %v14830_v54 = vld [vmem:[#allocation35_spill] sm:$0xff] }
 0x251   : > { %14822 = vst [vmem:[#allocation117_spill] sm:$0xff] %v11510_v26  ;;  %v11520_v38 = vadd.f32 %v1536_v2, %v1327_v9  ;;  %8343 = vmatprep.mubr.f32.mxu0 %v1536_v2  ;;  %8430 = vmatprep.subr.mxu0 %v14830_v54  ;;  %v14831_v26 = vld [vmem:[#allocation20_spill] sm:$0xff] }
 0x252   : > { %14825 = vst [vmem:[#allocation33_spill] sm:$0xff] %v11516_v55  ;;  %v11523_v16 = vadd.f32 %v1697_v39, %v1343_v34  ;;  %8399 = vmatprep.mubr.f32.mxu1 %v1697_v39  ;;  %8344 = vmatmul.mubr.f32.gmra.mxu0 %v1537_v46  ;;  %v1346_v9 = vadd.f32 %v14832_v25, %v14831_v26  ;;  %v14834_v34 = vld [vmem:[#allocation21_spill] sm:$0xff]  ;;  %v14835_v39 = vld [vmem:[#allocation72_spill] sm:$0xff] }
 0x253   : > { %14827 = vst [vmem:[#allocation71_spill] sm:$0xff] %v11520_v38  ;;  %v8124_v13 = vpop.f32.mrf.mxu0  ;;  %v8180_v55 = vpop.f32.mrf.mxu1  ;;  %8400 = vmatmul.mubr.f32.gmra.mxu1 %v1698_v59  ;;  %8486 = vmatprep.subr.mxu1 %v14833_v41  ;;  %v1329_v46 = vadd.f32 %v14835_v39, %v14834_v34  ;;  %v14837_v59 = vld [vmem:[#allocation29_spill] sm:$0xff]  ;;  %v1345_v25 = vadd.f32 %v14839_v8, %v14838_v17  ;;  %v14844_v39 = vld [vmem:[#allocation15_spill] sm:$0xff] }
 0x254   : > { %14828 = vst [vmem:[#allocation34_spill] sm:$0xff] %v11523_v16  ;;  %v1539_v48 = vmul.f32 0.33333334, %v8124_v13  ;;  %v1700_v38 = vmul.f32 0.33333334, %v8180_v55  ;;  %8431 = vmatpush3.msra.mxu0 %v14830_v54  ;;  %8487 = vmatpush3.msra.mxu1 %v14833_v41 }
 0x255   : > { %v1507_v2 = vpop.f32.mrf.mxu0  ;;  %v1668_v13 = vpop.f32.mrf.mxu1  ;;  %8432 = vmatprep.subr.mxu0 %v14837_v59  ;;  %8488 = vmatprep.subr.mxu1 %v14841_v53 }
 0x256   : > { %v11534_v16 = vadd.f32 %v1539_v48, %v1330_v10  ;;  %v1538_v57 = vmul.f32 0.33333334, %v1507_v2  ;;  %v11540_v55 = vadd.f32 %v1700_v38, %v1346_v9  ;;  %v1699_v3 = vmul.f32 0.33333334, %v1668_v13  ;;  %8433 = vmatpush3.msra.mxu0 %v14837_v59  ;;  %8489 = vmatpush3.msra.mxu1 %v14841_v53  ;;  %v14846_v13 = vld [vmem:[#allocation32_spill] sm:$0xff] }
 0x257   : > { %8434 = vmatprep.subr.mxu0 %v14846_v13  ;;  %8490 = vmatprep.subr.mxu1 %v14849_v51 }
 0x258   : > { %14836 = vst [vmem:[#allocation73_spill] sm:$0xff] %v11534_v16  ;;  %14840 = vst [vmem:[#allocation35_spill] sm:$0xff] %v11540_v55  ;;  %v11544_v63 = vadd.f32 %v1538_v57, %v1329_v46  ;;  %8346 = vmatprep.mubr.f32.mxu0 %v1538_v57  ;;  %v11547_v10 = vadd.f32 %v1699_v3, %v1345_v25  ;;  %8402 = vmatprep.mubr.f32.mxu1 %v1699_v3  ;;  %v14845_v16 = vld [vmem:[#allocation77_spill] sm:$0xff]  ;;  %v14851_v3 = vld [vmem:[#allocation76_spill] sm:$0xff] }
 0x259   : > { %v8127_v2 = vpop.f32.mrf.mxu0  ;;  %8347 = vmatmul.mubr.f32.gmra.mxu0 %v1539_v48  ;;  %v1332_v8 = vadd.f32 %v14845_v16, %v14844_v39  ;;  %v8183_v55 = vpop.f32.mrf.mxu1  ;;  %8403 = vmatmul.mubr.f32.gmra.mxu1 %v1700_v38  ;;  %v1348_v46 = vadd.f32 %v14848_v36, %v14847_v42  ;;  %v14850_v25 = vld [vmem:[#allocation17_spill] sm:$0xff]  ;;  %v14853_v38 = vld [vmem:[#allocation42_spill] sm:$0xff]  ;;  %v1347_v36 = vadd.f32 %v14855_v20, %v14854_v52 }
 0x25a   : > { %14842 = vst [vmem:[#allocation20_spill] sm:$0xff] %v11544_v63  ;;  %14843 = vst [vmem:[#allocation75_spill] sm:$0xff] %v11547_v10  ;;  %v1541_v9 = vmul.f32 0.33333334, %v8127_v2  ;;  %v1702_v63 = vmul.f32 0.33333334, %v8183_v55  ;;  %8435 = vmatpush3.msra.mxu0 %v14846_v13  ;;  %v1331_v48 = vadd.f32 %v14851_v3, %v14850_v25  ;;  %8491 = vmatpush3.msra.mxu1 %v14849_v51 }
 0x25b   : > { %v1517_v57 = vpop.f32.mrf.mxu0  ;;  %v1678_v2 = vpop.f32.mrf.mxu1  ;;  %8436 = vmatprep.subr.mxu0 %v14853_v38  ;;  %8492 = vmatprep.subr.mxu1 %v14857_v6  ;;  %v14860_v3 = vld [vmem:[#allocation81_spill] sm:$0xff] }
 0x25c   : > { %v11558_v10 = vadd.f32 %v1541_v9, %v1332_v8  ;;  %v1540_v16 = vmul.f32 0.33333334, %v1517_v57  ;;  %v11564_v55 = vadd.f32 %v1702_v63, %v1348_v46  ;;  %v1701_v56 = vmul.f32 0.33333334, %v1678_v2  ;;  %8437 = vmatpush3.msra.mxu0 %v14853_v38  ;;  %8493 = vmatpush3.msra.mxu1 %v14857_v6  ;;  %v14861_v2 = vld [vmem:[#allocation25_spill] sm:$0xff] }
 0x25d   : > { %v1350_v20 = vadd.f32 %v14860_v3, %v14853_v38  ;;  %8438 = vmatprep.subr.mxu0 %v14861_v2  ;;  %8494 = vmatprep.subr.mxu1 %v14863_v43  ;;  %v14868_v38 = vld [vmem:[#allocation85_spill] sm:$0xff] }
 0x25e   : > { %14852 = vst [vmem:[#allocation21_spill] sm:$0xff] %v11558_v10  ;;  %14856 = vst [vmem:[#allocation72_spill] sm:$0xff] %v11564_v55  ;;  %v11568_v4 = vadd.f32 %v1540_v16, %v1331_v48  ;;  %8349 = vmatprep.mubr.f32.mxu0 %v1540_v16  ;;  %v11571_v8 = vadd.f32 %v1701_v56, %v1347_v36  ;;  %8405 = vmatprep.mubr.f32.mxu1 %v1701_v56  ;;  %v14862_v10 = vld [vmem:[#allocation83_spill] sm:$0xff]  ;;  %v14864_v56 = vld [vmem:[#allocation80_spill] sm:$0xff] }
 0x25f   : > { %v8218_v57 = vpop.f32.mrf.mxu0  ;;  %8350 = vmatmul.mubr.f32.gmra.mxu0 %v1541_v9  ;;  %v8274_v55 = vpop.f32.mrf.mxu1  ;;  %8406 = vmatmul.mubr.f32.gmra.mxu1 %v1702_v63  ;;  %v1366_v48 = vadd.f32 %v14862_v10, %v14857_v6  ;;  %v1349_v9 = vadd.f32 %v14864_v56, %v14861_v2  ;;  %v14866_v63 = vld [vmem:[#allocation82_spill] sm:$0xff]  ;;  %v1352_v56 = vadd.f32 %v14868_v38, %v14837_v59 }
 0x260   : > { %14858 = vst [vmem:[#allocation29_spill] sm:$0xff] %v11568_v4  ;;  %14859 = vst [vmem:[#allocation22_spill] sm:$0xff] %v11571_v8  ;;  %v1849_v46 = vmul.f32 0.33333334, %v8218_v57  ;;  %v2010_v4 = vmul.f32 0.33333334, %v8274_v55  ;;  %8439 = vmatpush3.msra.mxu0 %v14861_v2  ;;  %8495 = vmatpush3.msra.mxu1 %v14863_v43  ;;  %v1365_v10 = vadd.f32 %v14866_v63, %v14863_v43 }
 0x261   : > { %v1769_v16 = vpop.f32.mrf.mxu0  ;;  %v1930_v57 = vpop.f32.mrf.mxu1  ;;  %8520 = vmatprep.subr.mxu0 %v14844_v39  ;;  %8576 = vmatprep.subr.mxu1 %v14847_v42  ;;  %v14869_v2 = vld [vmem:[#allocation87_spill] sm:$0xff] }
 0x262   : > { %v11582_v36 = vadd.f32 %v1849_v46, %v1350_v20  ;;  %v1848_v3 = vmul.f32 0.33333334, %v1769_v16  ;;  %v11588_v55 = vadd.f32 %v2010_v4, %v1366_v48  ;;  %v2009_v8 = vmul.f32 0.33333334, %v1930_v57  ;;  %v14871_v57 = vld [vmem:[#allocation84_spill] sm:$0xff] }
 0x263   : > { %v8221_v6 = vpop.f32.mrf.mxu0  ;;  %v1368_v35 = vadd.f32 %v14869_v2, %v14841_v53 }
 0x264   : > { %14865 = vst [vmem:[#allocation74_spill] sm:$0xff] %v11582_v36  ;;  %14867 = vst [vmem:[#allocation15_spill] sm:$0xff] %v11588_v55  ;;  %v11593_v20 = vadd.f32 %v1848_v3, %v1349_v9  ;;  %v1851_v16 = vmul.f32 0.33333334, %v8221_v6  ;;  %v8277_v36 = vpop.f32.mrf.mxu1  ;;  %8440 = vmatprep.mubr.f32.mxu0 %v1848_v3  ;;  %v11597_v60 = vadd.f32 %v2009_v8, %v1365_v10  ;;  %8496 = vmatprep.mubr.f32.mxu1 %v2009_v8  ;;  %v14873_v6 = vld [vmem:[#allocation86_spill] sm:$0xff]  ;;  %v14875_v8 = vld [vmem:[#allocation89_spill] sm:$0xff] }
 0x265   : > { %v2012_v63 = vmul.f32 0.33333334, %v8277_v36  ;;  %v1779_v48 = vpop.f32.mrf.mxu0  ;;  %8441 = vmatmul.mubr.f32.vlgmr.msra.gmra.mxu0 %v1849_v46  ;;  %v1351_v55 = vadd.f32 %v14871_v57, %v14846_v13  ;;  %8497 = vmatmul.mubr.f32.vlgmr.msra.gmra.mxu1 %v2010_v4  ;;  %v1367_v3 = vadd.f32 %v14873_v6, %v14849_v51  ;;  %v1354_v46 = vadd.f32 %v14875_v8, %v14823_v14  ;;  %v14877_v57 = vld [vmem:[#allocation91_spill] sm:$0xff] }
 0x266   : > { %14870 = vst [vmem:[#allocation77_spill] sm:$0xff] %v11597_v60  ;;  %v11601_v43 = vadd.f32 %v1851_v16, %v1352_v56  ;;  %v1850_v38 = vmul.f32 0.33333334, %v1779_v48  ;;  %v1940_v9 = vpop.f32.mrf.mxu1  ;;  %8521 = vmatpush3.msra.mxu0 %v14844_v39  ;;  %8577 = vmatpush3.msra.mxu1 %v14847_v42 }
 0x267   : > { %v11606_v2 = vadd.f32 %v2012_v63, %v1368_v35  ;;  %v2011_v10 = vmul.f32 0.33333334, %v1940_v9  ;;  %v8224_v36 = vpop.f32.mrf.mxu0  ;;  %8522 = vmatprep.subr.mxu0 %v14850_v25  ;;  %8578 = vmatprep.subr.mxu1 %v14854_v52  ;;  %v1370_v35 = vadd.f32 %v14877_v57, %v14826_v45 }
 0x268   : > { %14872 = vst [vmem:[#allocation16_spill] sm:$0xff] %v11601_v43  ;;  %v11612_v56 = vadd.f32 %v1850_v38, %v1351_v55  ;;  %v1853_v48 = vmul.f32 0.33333334, %v8224_v36  ;;  %v8280_v4 = vpop.f32.mrf.mxu1  ;;  %8443 = vmatprep.mubr.f32.mxu0 %v1850_v38  ;;  %v14879_v43 = vld [vmem:[#allocation88_spill] sm:$0xff]  ;;  %8523 = vmatpush3.msra.mxu0 %v14850_v25  ;;  %v14881_v38 = vld [vmem:[#allocation90_spill] sm:$0xff] }
 0x269   : > { %14874 = vst [vmem:[#allocation79_spill] sm:$0xff] %v11606_v2  ;;  %v11617_v6 = vadd.f32 %v2011_v10, %v1367_v3  ;;  %v2014_v9 = vmul.f32 0.33333334, %v8280_v4  ;;  %8499 = vmatprep.mubr.f32.mxu1 %v2011_v10  ;;  %v1789_v2 = vpop.f32.mrf.mxu0  ;;  %8444 = vmatmul.mubr.f32.gmra.mxu0 %v1851_v16  ;;  %v1353_v60 = vadd.f32 %v14879_v43, %v14830_v54  ;;  %v14883_v43 = vld [vmem:[#allocation93_spill] sm:$0xff] }
 0x26a   : > { %14876 = vst [vmem:[#allocation17_spill] sm:$0xff] %v11612_v56  ;;  %v11621_v8 = vadd.f32 %v1853_v48, %v1354_v46  ;;  %v1852_v55 = vmul.f32 0.33333334, %v1789_v2  ;;  %v1950_v36 = vpop.f32.mrf.mxu1  ;;  %8500 = vmatmul.mubr.f32.gmra.mxu1 %v2012_v63  ;;  %v1369_v56 = vadd.f32 %v14881_v38, %v14833_v41  ;;  %8524 = vmatprep.subr.mxu0 %v14704_v32  ;;  %v14885_v46 = vld [vmem:[#allocation95_spill] sm:$0xff] }
 0x26b   : > { %14878 = vst [vmem:[#allocation76_spill] sm:$0xff] %v11617_v6  ;;  %v11626_v57 = vadd.f32 %v2014_v9, %v1370_v35  ;;  %v2013_v3 = vmul.f32 0.33333334, %v1950_v36  ;;  %v8227_v4 = vpop.f32.mrf.mxu0  ;;  %8579 = vmatpush3.msra.mxu1 %v14854_v52  ;;  %v1356_v16 = vadd.f32 %v14883_v43, %v14815_v61  ;;  %v1372_v35 = vadd.f32 %v14885_v46, %v14818_v58 }
 0x26c   : > { %14880 = vst [vmem:[#allocation18_spill] sm:$0xff] %v11621_v8  ;;  %v11632_v10 = vadd.f32 %v1852_v55, %v1353_v60  ;;  %v1855_v2 = vmul.f32 0.33333334, %v8227_v4  ;;  %v8283_v63 = vpop.f32.mrf.mxu1  ;;  %8446 = vmatprep.mubr.f32.mxu0 %v1852_v55  ;;  %8580 = vmatprep.subr.mxu1 %v14831_v26  ;;  %v14887_v8 = vld [vmem:[#allocation92_spill] sm:$0xff]  ;;  %v14889_v55 = vld [vmem:[#allocation94_spill] sm:$0xff] }
 0x26d   : > { %14882 = vst [vmem:[#allocation78_spill] sm:$0xff] %v11626_v57  ;;  %v11637_v38 = vadd.f32 %v2013_v3, %v1369_v56  ;;  %v2016_v36 = vmul.f32 0.33333334, %v8283_v63  ;;  %8502 = vmatprep.mubr.f32.mxu1 %v2013_v3  ;;  %v1799_v57 = vpop.f32.mrf.mxu0  ;;  %8447 = vmatmul.mubr.f32.gmra.mxu0 %v1853_v48  ;;  %v1355_v6 = vadd.f32 %v14887_v8, %v10848_v7  ;;  %v14891_v48 = vld [vmem:[#allocation97_spill] sm:$0xff] }
 0x26e   : > { %14884 = vst [vmem:[#allocation81_spill] sm:$0xff] %v11632_v10  ;;  %v11641_v43 = vadd.f32 %v1855_v2, %v1356_v16  ;;  %v1854_v60 = vmul.f32 0.33333334, %v1799_v57  ;;  %v1960_v4 = vpop.f32.mrf.mxu1  ;;  %8503 = vmatmul.mubr.f32.gmra.mxu1 %v2014_v9  ;;  %8525 = vmatpush3.msra.mxu0 %v14704_v32  ;;  %v1371_v10 = vadd.f32 %v14889_v55, %v14821_v31  ;;  %v14893_v16 = vld [vmem:[#allocation99_spill] sm:$0xff] }
 0x26f   : > { %14886 = vst [vmem:[#allocation83_spill] sm:$0xff] %v11637_v38  ;;  %v11646_v46 = vadd.f32 %v2016_v36, %v1372_v35  ;;  %v2015_v56 = vmul.f32 0.33333334, %v1960_v4  ;;  %v8230_v63 = vpop.f32.mrf.mxu0  ;;  %8581 = vmatpush3.msra.mxu1 %v14831_v26  ;;  %8526 = vmatprep.subr.mxu0 %v14834_v34  ;;  %v1358_v8 = vadd.f32 %v14891_v48, %v14807_v33 }
 0x270   : > { %14888 = vst [vmem:[#allocation80_spill] sm:$0xff] %v11641_v43  ;;  %v11652_v3 = vadd.f32 %v1854_v60, %v1355_v6  ;;  %v1857_v57 = vmul.f32 0.33333334, %v8230_v63  ;;  %v8286_v9 = vpop.f32.mrf.mxu1  ;;  %8449 = vmatprep.mubr.f32.mxu0 %v1854_v60  ;;  %8582 = vmatprep.subr.mxu1 %v14838_v17  ;;  %v1374_v35 = vadd.f32 %v14893_v16, %v14810_v12  ;;  %v14895_v43 = vld [vmem:[#allocation96_spill] sm:$0xff]  ;;  %v14897_v60 = vld [vmem:[#allocation98_spill] sm:$0xff] }
 0x271   : > { %14890 = vst [vmem:[#allocation82_spill] sm:$0xff] %v11646_v46  ;;  %v11657_v55 = vadd.f32 %v2015_v56, %v1371_v10  ;;  %v2018_v4 = vmul.f32 0.33333334, %v8286_v9  ;;  %8505 = vmatprep.mubr.f32.mxu1 %v2015_v56  ;;  %v1809_v46 = vpop.f32.mrf.mxu0  ;;  %8450 = vmatmul.mubr.f32.gmra.mxu0 %v1855_v2  ;;  %v1357_v38 = vadd.f32 %v14895_v43, %v10805_v29  ;;  %v14899_v2 = vld [vmem:[#allocation101_spill] sm:$0xff] }
 0x272   : > { %14892 = vst [vmem:[#allocation85_spill] sm:$0xff] %v11652_v3  ;;  %v11661_v48 = vadd.f32 %v1857_v57, %v1358_v8  ;;  %v1856_v6 = vmul.f32 0.33333334, %v1809_v46  ;;  %v1970_v63 = vpop.f32.mrf.mxu1  ;;  %8506 = vmatmul.mubr.f32.gmra.mxu1 %v2016_v36  ;;  %8527 = vmatpush3.msra.mxu0 %v14834_v34  ;;  %v1373_v3 = vadd.f32 %v14897_v60, %v14813_v49  ;;  %v14901_v8 = vld [vmem:[#allocation103_spill] sm:$0xff] }
 0x273   : > { %14894 = vst [vmem:[#allocation87_spill] sm:$0xff] %v11657_v55  ;;  %v11666_v16 = vadd.f32 %v2018_v4, %v1374_v35  ;;  %v2017_v10 = vmul.f32 0.33333334, %v1970_v63  ;;  %v8233_v9 = vpop.f32.mrf.mxu0  ;;  %8583 = vmatpush3.msra.mxu1 %v14838_v17  ;;  %8528 = vmatprep.subr.mxu0 %v14695_v19  ;;  %v1360_v43 = vadd.f32 %v14899_v2, %v14799_v30 }
 0x274   : > { %14896 = vst [vmem:[#allocation84_spill] sm:$0xff] %v11661_v48  ;;  %v11672_v56 = vadd.f32 %v1856_v6, %v1357_v38  ;;  %v1859_v46 = vmul.f32 0.33333334, %v8233_v9  ;;  %v8289_v36 = vpop.f32.mrf.mxu1  ;;  %8452 = vmatprep.mubr.f32.mxu0 %v1856_v6  ;;  %8584 = vmatprep.subr.mxu1 %v14697_v50  ;;  %v1376_v35 = vadd.f32 %v14901_v8, %v14802_v23  ;;  %v14903_v48 = vld [vmem:[#allocation100_spill] sm:$0xff]  ;;  %v14905_v6 = vld [vmem:[#allocation102_spill] sm:$0xff] }
 0x275   : > { %14898 = vst [vmem:[#allocation86_spill] sm:$0xff] %v11666_v16  ;;  %v11677_v60 = vadd.f32 %v2017_v10, %v1373_v3  ;;  %v2020_v63 = vmul.f32 0.33333334, %v8289_v36  ;;  %8508 = vmatprep.mubr.f32.mxu1 %v2017_v10  ;;  %v1819_v16 = vpop.f32.mrf.mxu0  ;;  %8453 = vmatmul.mubr.f32.gmra.mxu0 %v1857_v57  ;;  %v1359_v55 = vadd.f32 %v14903_v48, %v10769_v47  ;;  %v14907_v57 = vld [vmem:[#allocation105_spill] sm:$0xff] }
 0x276   : > { %14900 = vst [vmem:[#allocation89_spill] sm:$0xff] %v11672_v56  ;;  %v11681_v2 = vadd.f32 %v1859_v46, %v1360_v43  ;;  %v1858_v38 = vmul.f32 0.33333334, %v1819_v16  ;;  %v1980_v9 = vpop.f32.mrf.mxu1  ;;  %8509 = vmatmul.mubr.f32.gmra.mxu1 %v2018_v4  ;;  %8529 = vmatpush3.msra.mxu0 %v14695_v19  ;;  %v1375_v56 = vadd.f32 %v14905_v6, %v14805_v5  ;;  %v14909_v43 = vld [vmem:[#allocation107_spill] sm:$0xff] }
 0x277   : > { %14902 = vst [vmem:[#allocation91_spill] sm:$0xff] %v11677_v60  ;;  %v11686_v8 = vadd.f32 %v2020_v63, %v1376_v35  ;;  %v2019_v3 = vmul.f32 0.33333334, %v1980_v9  ;;  %v8236_v36 = vpop.f32.mrf.mxu0  ;;  %8585 = vmatpush3.msra.mxu1 %v14697_v50  ;;  %8530 = vmatprep.subr.mxu0 %v14688_v24  ;;  %v1362_v48 = vadd.f32 %v14907_v57, %v14791_v40 }
 0x278   : > { %14904 = vst [vmem:[#allocation88_spill] sm:$0xff] %v11681_v2  ;;  %v11692_v10 = vadd.f32 %v1858_v38, %v1359_v55  ;;  %v1861_v16 = vmul.f32 0.33333334, %v8236_v36  ;;  %v8292_v4 = vpop.f32.mrf.mxu1  ;;  %8455 = vmatprep.mubr.f32.mxu0 %v1858_v38  ;;  %8586 = vmatprep.subr.mxu1 %v14692_v0  ;;  %v1378_v35 = vadd.f32 %v14909_v43, %v14794_v44  ;;  %v14911_v2 = vld [vmem:[#allocation104_spill] sm:$0xff]  ;;  %v14913_v38 = vld [vmem:[#allocation106_spill] sm:$0xff] }
 0x279   : > { %14906 = vst [vmem:[#allocation90_spill] sm:$0xff] %v11686_v8  ;;  %v11697_v6 = vadd.f32 %v2019_v3, %v1375_v56  ;;  %v2022_v9 = vmul.f32 0.33333334, %v8292_v4  ;;  %8511 = vmatprep.mubr.f32.mxu1 %v2019_v3  ;;  %v1829_v8 = vpop.f32.mrf.mxu0  ;;  %8456 = vmatmul.mubr.f32.gmra.mxu0 %v1859_v46  ;;  %v1361_v60 = vadd.f32 %v14911_v2, %v10732_v11  ;;  %v14915_v46 = vld [vmem:[#allocation109_spill] sm:$0xff] }
 0x27a   : > { %14908 = vst [vmem:[#allocation93_spill] sm:$0xff] %v11692_v10  ;;  %v11701_v57 = vadd.f32 %v1861_v16, %v1362_v48  ;;  %v1860_v55 = vmul.f32 0.33333334, %v1829_v8  ;;  %v1990_v36 = vpop.f32.mrf.mxu1  ;;  %8512 = vmatmul.mubr.f32.gmra.mxu1 %v2020_v63  ;;  %8531 = vmatpush3.msra.mxu0 %v14688_v24  ;;  %v1377_v10 = vadd.f32 %v14913_v38, %v14797_v28  ;;  %v14917_v48 = vld [vmem:[#allocation111_spill] sm:$0xff] }
 0x27b   : > { %14910 = vst [vmem:[#allocation95_spill] sm:$0xff] %v11697_v6  ;;  %v11706_v43 = vadd.f32 %v2022_v9, %v1378_v35  ;;  %v2021_v56 = vmul.f32 0.33333334, %v1990_v36  ;;  %v8239_v4 = vpop.f32.mrf.mxu0  ;;  %8587 = vmatpush3.msra.mxu1 %v14692_v0  ;;  %8532 = vmatprep.subr.mxu0 %v14680_v22  ;;  %v1364_v2 = vadd.f32 %v14915_v46, %v10675_v15 }
 0x27c   : > { %14912 = vst [vmem:[#allocation92_spill] sm:$0xff] %v11701_v57  ;;  %v11712_v3 = vadd.f32 %v1860_v55, %v1361_v60  ;;  %v1863_v8 = vmul.f32 0.33333334, %v8239_v4  ;;  %v8295_v63 = vpop.f32.mrf.mxu1  ;;  %8458 = vmatprep.mubr.f32.mxu0 %v1860_v55  ;;  %8588 = vmatprep.subr.mxu1 %v14682_v21  ;;  %v1380_v35 = vadd.f32 %v14917_v48, %v10684_v62  ;;  %v14918_v57 = vld [vmem:[#allocation108_spill] sm:$0xff]  ;;  %v14919_v55 = vld [vmem:[#allocation110_spill] sm:$0xff] }
 0x27d   : > { %14914 = vst [vmem:[#allocation94_spill] sm:$0xff] %v11706_v43  ;;  %v11717_v38 = vadd.f32 %v2021_v56, %v1377_v10  ;;  %v2024_v36 = vmul.f32 0.33333334, %v8295_v63  ;;  %8514 = vmatprep.mubr.f32.mxu1 %v2021_v56  ;;  %v1839_v43 = vpop.f32.mrf.mxu0  ;;  %8459 = vmatmul.mubr.f32.gmra.mxu0 %v1861_v16  ;;  %v1363_v6 = vadd.f32 %v14918_v57, %v10677_v27  ;;  %v14924_v56 = vld [vmem:[#allocation45_spill] sm:$0xff] }
 0x27e   : > { %14916 = vst [vmem:[#allocation97_spill] sm:$0xff] %v11712_v3  ;;  %v11721_v46 = vadd.f32 %v1863_v8, %v1364_v2  ;;  %v1862_v60 = vmul.f32 0.33333334, %v1839_v43  ;;  %v2000_v4 = vpop.f32.mrf.mxu1  ;;  %8515 = vmatmul.mubr.f32.gmra.mxu1 %v2022_v9  ;;  %8533 = vmatpush3.msra.mxu0 %v14680_v22  ;;  %v1379_v3 = vadd.f32 %v14919_v55, %v14789_v37  ;;  %v14921_v9 = vld [vmem:[#allocation38_spill] sm:$0xff]  ;;  %v14922_v43 = vld [vmem:[#allocation41_spill] sm:$0xff]  ;;  %v14925_v2 = vld [vmem:[#allocation48_spill] sm:$0xff] }
 0x27f   : > { %v11726_v48 = vadd.f32 %v2024_v36, %v1380_v35  ;;  %v2023_v10 = vmul.f32 0.33333334, %v2000_v4  ;;  %8589 = vmatpush3.msra.mxu1 %v14682_v21  ;;  %8534 = vmatprep.subr.mxu0 %v14675_v18  ;;  %v14928_v63 = vld [vmem:[#allocation53_spill] sm:$0xff]  ;;  %v14929_v35 = vld [vmem:[#allocation54_spill] sm:$0xff] }
 0x280   : > { %v11730_v16 = vadd.f32 %v1862_v60, %v1363_v6  ;;  %8461 = vmatprep.mubr.f32.mxu0 %v1862_v60  ;;  %8590 = vmatprep.subr.mxu1 %v14678_v1  ;;  %v14923_v6 = vld [vmem:[#allocation44_spill] sm:$0xff]  ;;  %v14932_v4 = vld [vmem:[#allocation57_spill] sm:$0xff]  ;;  %v14933_v55 = vld [vmem:[#allocation58_spill] sm:$0xff] }
 0x281   : > { %v11733_v57 = vadd.f32 %v2023_v10, %v1379_v3  ;;  %8517 = vmatprep.mubr.f32.mxu1 %v2023_v10  ;;  %8462 = vmatmul.mubr.f32.gmra.mxu0 %v1863_v8  ;;  %v14926_v3 = vld [vmem:[#allocation50_spill] sm:$0xff]  ;;  %v14927_v8 = vld [vmem:[#allocation52_spill] sm:$0xff]  ;;  %v14934_v10 = vld [vmem:[#allocation59_spill] sm:$0xff] }
 0x282   : > { %8518 = vmatmul.mubr.f32.gmra.mxu1 %v2024_v36  ;;  %8535 = vmatpush3.msra.mxu0 %v14675_v18  ;;  %v14930_v36 = vld [vmem:[#allocation55_spill] sm:$0xff]  ;;  %v14931_v60 = vld [vmem:[#allocation56_spill] sm:$0xff] }
 0x283   : > { %14920 = vst [vmem:[#allocation99_spill] sm:$0xff] %v11733_v57  ;;  %8591 = vmatpush3.msra.mxu1 %v14678_v1  ;;  %8536 = vmatprep.subr.mxu0 %v14921_v9  ;;  %v14940_v57 = vld [vmem:[#allocation112_spill] sm:$0xff] }
 0x284   : > { %8592 = vmatprep.subr.mxu1 %v14922_v43  ;;  %8537 = vmatpush3.msra.mxu0 %v14921_v9  ;;  %v14939_v9 = vld [vmem:[#allocation26_spill] sm:$0xff] }
 0x285   : > { %8593 = vmatpush3.msra.mxu1 %v14922_v43  ;;  %8538 = vmatprep.subr.mxu0 %v14923_v6 }
 0x286   : > { %8594 = vmatprep.subr.mxu1 %v14924_v56  ;;  %8539 = vmatpush3.msra.mxu0 %v14923_v6  ;;  %v14938_v6 = vld [vmem:[#allocation47_spill] sm:$0xff] }
 0x287   : > { %8595 = vmatpush3.msra.mxu1 %v14924_v56  ;;  %8540 = vmatprep.subr.mxu0 %v14925_v2 }
 0x288   : > { %8596 = vmatprep.subr.mxu1 %v14926_v3  ;;  %8541 = vmatpush3.msra.mxu0 %v14925_v2 }
 0x289   : > { %8597 = vmatpush3.msra.mxu1 %v14926_v3  ;;  %8542 = vmatprep.subr.mxu0 %v14927_v8 }
 0x28a   : > { %8598 = vmatprep.subr.mxu1 %v14928_v63  ;;  %8543 = vmatpush3.msra.mxu0 %v14927_v8 }
 0x28b   : > { %8599 = vmatpush3.msra.mxu1 %v14928_v63  ;;  %8544 = vmatprep.subr.mxu0 %v14929_v35  ;;  %v14935_v63 = vld [vmem:[#allocation60_spill] sm:$0xff] }
 0x28c   : > { %8600 = vmatprep.subr.mxu1 %v14930_v36  ;;  %8545 = vmatpush3.msra.mxu0 %v14929_v35  ;;  %v14936_v35 = vld [vmem:[#allocation61_spill] sm:$0xff] }
 0x28d   : > { %8601 = vmatpush3.msra.mxu1 %v14930_v36  ;;  %8546 = vmatprep.subr.mxu0 %v14931_v60 }
 0x28e   : > { %8602 = vmatprep.subr.mxu1 %v14932_v4  ;;  %8547 = vmatpush3.msra.mxu0 %v14931_v60 }
 0x28f   : > { %8603 = vmatpush3.msra.mxu1 %v14932_v4  ;;  %8548 = vmatprep.subr.mxu0 %v14933_v55 }
 0x290   : > { %8604 = vmatprep.subr.mxu1 %v14934_v10  ;;  %8549 = vmatpush3.msra.mxu0 %v14933_v55  ;;  %v14937_v55 = vld [vmem:[#allocation49_spill] sm:$0xff] }
 0x291   : > { %8605 = vmatpush3.msra.mxu1 %v14934_v10  ;;  %8550 = vmatprep.subr.mxu0 %v14935_v63 }
 0x292   : > { %8606 = vmatprep.subr.mxu1 %v14936_v35  ;;  %8551 = vmatpush3.msra.mxu0 %v14935_v63 }
 0x293   : > { %8607 = vmatpush3.msra.mxu1 %v14936_v35  ;;  %8632 = vmatprep.subr.mxu0 %v10675_v15 }
 0x294   : > { %8688 = vmatprep.subr.mxu1 %v10684_v62 }
 0x2ef   : > { %v8330_v4 = vpop.f32.mrf.mxu0 }
 0x2f0   : > { %v2235_v60 = vmul.f32 0.25, %v8330_v4  ;;  %v8386_v36 = vpop.f32.mrf.mxu1 }
 0x2f1   : > { %v2396_v8 = vmul.f32 0.25, %v8386_v36  ;;  %v2155_v3 = vpop.f32.mrf.mxu0 }
 0x2f2   : > { %v11772_v2 = vadd.f32 %v2235_v60, %v14937_v55  ;;  %v2234_v10 = vmul.f32 0.25, %v2155_v3  ;;  %v2316_v56 = vpop.f32.mrf.mxu1 }
 0x2f3   : > { %v11775_v43 = vadd.f32 %v2396_v8, %v14938_v6  ;;  %v2395_v63 = vmul.f32 0.25, %v2316_v56 }
 0x2f4   : > { %v11778_v35 = vadd.f32 %v2234_v10, %v14939_v9  ;;  %8552 = vmatprep.mubr.f32.mxu0 %v2234_v10 }
 0x2f5   : > { %v11781_v1 = vadd.f32 %v2395_v63, %v14940_v57  ;;  %8608 = vmatprep.mubr.f32.mxu1 %v2395_v63  ;;  %8553 = vmatmul.mubr.f32.vlgmr.msra.gmra.mxu0 %v2235_v60  ;;  %v14941_v57 = vld [vmem:[#allocation113_spill] sm:$0xff] }
 0x2f6   : > { %8609 = vmatmul.mubr.f32.vlgmr.msra.gmra.mxu1 %v2396_v8  ;;  %8633 = vmatpush3.msra.mxu0 %v10675_v15  ;;  %v14943_v8 = vld [vmem:[#allocation63_spill] sm:$0xff] }
 0x2f7   : > { %v8333_v36 = vpop.f32.mrf.mxu0  ;;  %8689 = vmatpush3.msra.mxu1 %v10684_v62  ;;  %8634 = vmatprep.subr.mxu0 %v10677_v27 }
 0x2f8   : > { %v2237_v4 = vmul.f32 0.25, %v8333_v36  ;;  %v8389_v3 = vpop.f32.mrf.mxu1  ;;  %8690 = vmatprep.subr.mxu1 %v14789_v37  ;;  %8635 = vmatpush3.msra.mxu0 %v10677_v27  ;;  %v14945_v36 = vld [vmem:[#allocation23_spill] sm:$0xff] }
 0x2f9   : > { %v2398_v6 = vmul.f32 0.25, %v8389_v3  ;;  %v2165_v56 = vpop.f32.mrf.mxu0  ;;  %8691 = vmatpush3.msra.mxu1 %v14789_v37  ;;  %8636 = vmatprep.subr.mxu0 %v14791_v40 }
 0x2fa   : > { %v11789_v9 = vadd.f32 %v2237_v4, %v14941_v57  ;;  %v2236_v63 = vmul.f32 0.25, %v2165_v56  ;;  %v2326_v60 = vpop.f32.mrf.mxu1  ;;  %8692 = vmatprep.subr.mxu1 %v14794_v44  ;;  %8637 = vmatpush3.msra.mxu0 %v14791_v40  ;;  %v14947_v56 = vld [vmem:[#allocation64_spill] sm:$0xff] }
 0x2fb   : > { %v11794_v55 = vadd.f32 %v2398_v6, %v14943_v8  ;;  %v2397_v10 = vmul.f32 0.25, %v2326_v60  ;;  %8693 = vmatpush3.msra.mxu1 %v14794_v44  ;;  %8638 = vmatprep.subr.mxu0 %v10732_v11 }
 0x2fc   : > { %14942 = vst [vmem:[#allocation96_spill] sm:$0xff] %v11789_v9  ;;  %v11799_v3 = vadd.f32 %v2236_v63, %v14945_v36  ;;  %8555 = vmatprep.mubr.f32.mxu0 %v2236_v63  ;;  %8694 = vmatprep.subr.mxu1 %v14797_v28  ;;  %v14948_v63 = vld [vmem:[#allocation114_spill] sm:$0xff] }
 0x2fd   : > { %14944 = vst [vmem:[#allocation98_spill] sm:$0xff] %v11794_v55  ;;  %v11803_v57 = vadd.f32 %v2397_v10, %v14947_v56  ;;  %8611 = vmatprep.mubr.f32.mxu1 %v2397_v10  ;;  %8556 = vmatmul.mubr.f32.gmra.mxu0 %v2237_v4  ;;  %v14950_v4 = vld [vmem:[#allocation66_spill] sm:$0xff]  ;;  %v14952_v10 = vld [vmem:[#allocation24_spill] sm:$0xff] }
 0x2fe   : > { %14946 = vst [vmem:[#allocation101_spill] sm:$0xff] %v11799_v3  ;;  %v8336_v9 = vpop.f32.mrf.mxu0  ;;  %v8392_v8 = vpop.f32.mrf.mxu1  ;;  %8612 = vmatmul.mubr.f32.gmra.mxu1 %v2398_v6  ;;  %8639 = vmatpush3.msra.mxu0 %v10732_v11 }
 0x2ff   : > { %v2239_v37 = vmul.f32 0.25, %v8336_v9  ;;  %v2400_v60 = vmul.f32 0.25, %v8392_v8  ;;  %8695 = vmatpush3.msra.mxu1 %v14797_v28  ;;  %8640 = vmatprep.subr.mxu0 %v14799_v30 }
 0x300   : > { %v2175_v55 = vpop.f32.mrf.mxu0  ;;  %v2336_v56 = vpop.f32.mrf.mxu1  ;;  %8696 = vmatprep.subr.mxu1 %v14802_v23  ;;  %8641 = vmatpush3.msra.mxu0 %v14799_v30 }
 0x301   : > { %v11809_v36 = vadd.f32 %v2239_v37, %v14948_v63  ;;  %v2238_v3 = vmul.f32 0.25, %v2175_v55  ;;  %v11814_v9 = vadd.f32 %v2400_v60, %v14950_v4  ;;  %v2399_v6 = vmul.f32 0.25, %v2336_v56  ;;  %8697 = vmatpush3.msra.mxu1 %v14802_v23  ;;  %v14954_v55 = vld [vmem:[#allocation67_spill] sm:$0xff]  ;;  %8642 = vmatprep.subr.mxu0 %v10769_v47 }
 0x302   : > { %8698 = vmatprep.subr.mxu1 %v14805_v5  ;;  %8643 = vmatpush3.msra.mxu0 %v10769_v47 }
 0x303   : > { %14949 = vst [vmem:[#allocation103_spill] sm:$0xff] %v11809_v36  ;;  %14951 = vst [vmem:[#allocation100_spill] sm:$0xff] %v11814_v9  ;;  %v11819_v8 = vadd.f32 %v2238_v3, %v14952_v10  ;;  %8558 = vmatprep.mubr.f32.mxu0 %v2238_v3  ;;  %v11823_v63 = vadd.f32 %v2399_v6, %v14954_v55  ;;  %8614 = vmatprep.mubr.f32.mxu1 %v2399_v6  ;;  %v14955_v3 = vld [vmem:[#allocation115_spill] sm:$0xff] }
 0x304   : > { %v8339_v36 = vpop.f32.mrf.mxu0  ;;  %8559 = vmatmul.mubr.f32.gmra.mxu0 %v2239_v37  ;;  %8615 = vmatmul.mubr.f32.gmra.mxu1 %v2400_v60  ;;  %v14957_v37 = vld [vmem:[#allocation69_spill] sm:$0xff]  ;;  %v14959_v6 = vld [vmem:[#allocation51_spill] sm:$0xff] }
 0x305   : > { %14953 = vst [vmem:[#allocation102_spill] sm:$0xff] %v11819_v8  ;;  %v2241_v28 = vmul.f32 0.25, %v8339_v36  ;;  %v8395_v4 = vpop.f32.mrf.mxu1  ;;  %8699 = vmatpush3.msra.mxu1 %v14805_v5  ;;  %8644 = vmatprep.subr.mxu0 %v14807_v33 }
 0x306   : > { %v2402_v56 = vmul.f32 0.25, %v8395_v4  ;;  %v2185_v9 = vpop.f32.mrf.mxu0  ;;  %8700 = vmatprep.subr.mxu1 %v14810_v12  ;;  %8645 = vmatpush3.msra.mxu0 %v14807_v33 }
 0x307   : > { %v11829_v10 = vadd.f32 %v2241_v28, %v14955_v3  ;;  %v2240_v8 = vmul.f32 0.25, %v2185_v9  ;;  %v2346_v55 = vpop.f32.mrf.mxu1  ;;  %8701 = vmatpush3.msra.mxu1 %v14810_v12  ;;  %v14961_v9 = vld [vmem:[#allocation70_spill] sm:$0xff]  ;;  %8646 = vmatprep.subr.mxu0 %v10805_v29 }
 0x308   : > { %v11834_v36 = vadd.f32 %v2402_v56, %v14957_v37  ;;  %v2401_v60 = vmul.f32 0.25, %v2346_v55  ;;  %8702 = vmatprep.subr.mxu1 %v14813_v49  ;;  %8647 = vmatpush3.msra.mxu0 %v10805_v29 }
 0x309   : > { %14956 = vst [vmem:[#allocation105_spill] sm:$0xff] %v11829_v10  ;;  %v11839_v4 = vadd.f32 %v2240_v8, %v14959_v6  ;;  %8561 = vmatprep.mubr.f32.mxu0 %v2240_v8  ;;  %v14962_v8 = vld [vmem:[#allocation116_spill] sm:$0xff]  ;;  %8703 = vmatpush3.msra.mxu1 %v14813_v49 }
 0x30a   : > { %14958 = vst [vmem:[#allocation107_spill] sm:$0xff] %v11834_v36  ;;  %v11843_v3 = vadd.f32 %v2401_v60, %v14961_v9  ;;  %8617 = vmatprep.mubr.f32.mxu1 %v2401_v60  ;;  %8562 = vmatmul.mubr.f32.gmra.mxu0 %v2241_v28  ;;  %v14964_v28 = vld [vmem:[#allocation28_spill] sm:$0xff]  ;;  %v14966_v60 = vld [vmem:[#allocation19_spill] sm:$0xff] }
 0x30b   : > { %14960 = vst [vmem:[#allocation104_spill] sm:$0xff] %v11839_v4  ;;  %v8342_v10 = vpop.f32.mrf.mxu0  ;;  %8618 = vmatmul.mubr.f32.gmra.mxu1 %v2402_v56  ;;  %8648 = vmatprep.subr.mxu0 %v14815_v61 }
 0x30c   : > { %v2243_v5 = vmul.f32 0.25, %v8342_v10  ;;  %v8398_v37 = vpop.f32.mrf.mxu1  ;;  %8704 = vmatprep.subr.mxu1 %v14818_v58  ;;  %8649 = vmatpush3.msra.mxu0 %v14815_v61 }
 0x30d   : > { %v2404_v55 = vmul.f32 0.25, %v8398_v37  ;;  %v2195_v36 = vpop.f32.mrf.mxu0  ;;  %8705 = vmatpush3.msra.mxu1 %v14818_v58  ;;  %8650 = vmatprep.subr.mxu0 %v10848_v7 }
 0x30e   : > { %v11849_v6 = vadd.f32 %v2243_v5, %v14962_v8  ;;  %v2242_v4 = vmul.f32 0.25, %v2195_v36  ;;  %v2356_v9 = vpop.f32.mrf.mxu1  ;;  %v14968_v36 = vld [vmem:[#allocation30_spill] sm:$0xff]  ;;  %8706 = vmatprep.subr.mxu1 %v14821_v31  ;;  %8651 = vmatpush3.msra.mxu0 %v10848_v7 }
 0x30f   : > { %v11854_v10 = vadd.f32 %v2404_v55, %v14964_v28  ;;  %v2403_v56 = vmul.f32 0.25, %v2356_v9  ;;  %8707 = vmatpush3.msra.mxu1 %v14821_v31  ;;  %8652 = vmatprep.subr.mxu0 %v14823_v14 }
 0x310   : > { %14963 = vst [vmem:[#allocation106_spill] sm:$0xff] %v11849_v6  ;;  %v11859_v37 = vadd.f32 %v2242_v4, %v14966_v60  ;;  %8564 = vmatprep.mubr.f32.mxu0 %v2242_v4  ;;  %v14969_v4 = vld [vmem:[#allocation117_spill] sm:$0xff]  ;;  %8708 = vmatprep.subr.mxu1 %v14826_v45 }
 0x311   : > { %14965 = vst [vmem:[#allocation109_spill] sm:$0xff] %v11854_v10  ;;  %v11863_v8 = vadd.f32 %v2403_v56, %v14968_v36  ;;  %8620 = vmatprep.mubr.f32.mxu1 %v2403_v56  ;;  %8565 = vmatmul.mubr.f32.gmra.mxu0 %v2243_v5  ;;  %v14971_v5 = vld [vmem:[#allocation33_spill] sm:$0xff]  ;;  %v14973_v56 = vld [vmem:[#allocation71_spill] sm:$0xff] }
 0x312   : > { %14967 = vst [vmem:[#allocation111_spill] sm:$0xff] %v11859_v37  ;;  %v8345_v6 = vpop.f32.mrf.mxu0  ;;  %8621 = vmatmul.mubr.f32.gmra.mxu1 %v2404_v55  ;;  %8653 = vmatpush3.msra.mxu0 %v14823_v14 }
 0x313   : > { %v2245_v49 = vmul.f32 0.25, %v8345_v6  ;;  %v8401_v28 = vpop.f32.mrf.mxu1  ;;  %8709 = vmatpush3.msra.mxu1 %v14826_v45  ;;  %8654 = vmatprep.subr.mxu0 %v14830_v54 }
 0x314   : > { %v2406_v9 = vmul.f32 0.25, %v8401_v28  ;;  %v2205_v10 = vpop.f32.mrf.mxu0  ;;  %8710 = vmatprep.subr.mxu1 %v14833_v41  ;;  %8655 = vmatpush3.msra.mxu0 %v14830_v54 }
 0x315   : > { %v11869_v60 = vadd.f32 %v2245_v49, %v14969_v4  ;;  %v2244_v37 = vmul.f32 0.25, %v2205_v10  ;;  %v2366_v36 = vpop.f32.mrf.mxu1  ;;  %v14975_v10 = vld [vmem:[#allocation34_spill] sm:$0xff]  ;;  %8711 = vmatpush3.msra.mxu1 %v14833_v41  ;;  %8656 = vmatprep.subr.mxu0 %v14837_v59 }
 0x316   : > { %v11874_v6 = vadd.f32 %v2406_v9, %v14971_v5  ;;  %v2405_v55 = vmul.f32 0.25, %v2366_v36  ;;  %8712 = vmatprep.subr.mxu1 %v14841_v53  ;;  %8657 = vmatpush3.msra.mxu0 %v14837_v59 }
 0x317   : > { %14970 = vst [vmem:[#allocation108_spill] sm:$0xff] %v11869_v60  ;;  %v11879_v28 = vadd.f32 %v2244_v37, %v14973_v56  ;;  %8567 = vmatprep.mubr.f32.mxu0 %v2244_v37  ;;  %v14976_v37 = vld [vmem:[#allocation73_spill] sm:$0xff]  ;;  %8713 = vmatpush3.msra.mxu1 %v14841_v53 }
 0x318   : > { %14972 = vst [vmem:[#allocation110_spill] sm:$0xff] %v11874_v6  ;;  %v11883_v4 = vadd.f32 %v2405_v55, %v14975_v10  ;;  %8623 = vmatprep.mubr.f32.mxu1 %v2405_v55  ;;  %8568 = vmatmul.mubr.f32.gmra.mxu0 %v2245_v49  ;;  %v14978_v49 = vld [vmem:[#allocation35_spill] sm:$0xff]  ;;  %v14980_v55 = vld [vmem:[#allocation20_spill] sm:$0xff] }
 0x319   : > { %14974 = vst [vmem:[#allocation49_spill] sm:$0xff] %v11879_v28  ;;  %v8348_v60 = vpop.f32.mrf.mxu0  ;;  %v8404_v5 = vpop.f32.mrf.mxu1  ;;  %8624 = vmatmul.mubr.f32.gmra.mxu1 %v2406_v9  ;;  %8658 = vmatprep.subr.mxu0 %v14846_v13 }
 0x31a   : > { %v2247_v31 = vmul.f32 0.25, %v8348_v60  ;;  %v2408_v36 = vmul.f32 0.25, %v8404_v5  ;;  %8714 = vmatprep.subr.mxu1 %v14849_v51  ;;  %8659 = vmatpush3.msra.mxu0 %v14846_v13 }
 0x31b   : > { %v2215_v6 = vpop.f32.mrf.mxu0  ;;  %v2376_v10 = vpop.f32.mrf.mxu1  ;;  %8715 = vmatpush3.msra.mxu1 %v14849_v51 }
 0x31c   : > { %v11889_v56 = vadd.f32 %v2247_v31, %v14976_v37  ;;  %v2246_v28 = vmul.f32 0.25, %v2215_v6  ;;  %v11894_v60 = vadd.f32 %v2408_v36, %v14978_v49  ;;  %v2407_v9 = vmul.f32 0.25, %v2376_v10  ;;  %v14982_v6 = vld [vmem:[#allocation75_spill] sm:$0xff] }
 0x31e   : > { %14977 = vst [vmem:[#allocation47_spill] sm:$0xff] %v11889_v56  ;;  %14979 = vst [vmem:[#allocation26_spill] sm:$0xff] %v11894_v60  ;;  %v11899_v5 = vadd.f32 %v2246_v28, %v14980_v55  ;;  %8570 = vmatprep.mubr.f32.mxu0 %v2246_v28  ;;  %v11903_v37 = vadd.f32 %v2407_v9, %v14982_v6  ;;  %8626 = vmatprep.mubr.f32.mxu1 %v2407_v9  ;;  %v14984_v28 = vld [vmem:[#allocation21_spill] sm:$0xff]  ;;  %v14986_v9 = vld [vmem:[#allocation42_spill] sm:$0xff] }
 0x31f   : > { %v8351_v56 = vpop.f32.mrf.mxu0  ;;  %8571 = vmatmul.mubr.f32.gmra.mxu0 %v2247_v31  ;;  %v8407_v49 = vpop.f32.mrf.mxu1  ;;  %8627 = vmatmul.mubr.f32.gmra.mxu1 %v2408_v36  ;;  %v14987_v31 = vld [vmem:[#allocation72_spill] sm:$0xff] }
 0x320   : > { %14981 = vst [vmem:[#allocation112_spill] sm:$0xff] %v11899_v5  ;;  %14983 = vst [vmem:[#allocation113_spill] sm:$0xff] %v11903_v37  ;;  %v2249_v41 = vmul.f32 0.25, %v8351_v56  ;;  %v2410_v10 = vmul.f32 0.25, %v8407_v49  ;;  %8660 = vmatprep.subr.mxu0 %v14986_v9  ;;  %v14989_v37 = vld [vmem:[#allocation43_spill] sm:$0xff]  ;;  %v14990_v49 = vld [vmem:[#allocation29_spill] sm:$0xff] }
 0x321   : > { %v2225_v60 = vpop.f32.mrf.mxu0  ;;  %v2386_v6 = vpop.f32.mrf.mxu1  ;;  %8716 = vmatprep.subr.mxu1 %v14989_v37  ;;  %8661 = vmatpush3.msra.mxu0 %v14986_v9  ;;  %v14995_v9 = vld [vmem:[#allocation46_spill] sm:$0xff] }
 0x322   : > { %v11909_v55 = vadd.f32 %v2249_v41, %v14984_v28  ;;  %v2248_v5 = vmul.f32 0.25, %v2225_v60  ;;  %v11914_v56 = vadd.f32 %v2410_v10, %v14987_v31  ;;  %v2409_v36 = vmul.f32 0.25, %v2386_v6  ;;  %8717 = vmatpush3.msra.mxu1 %v14989_v37  ;;  %v14992_v60 = vld [vmem:[#allocation22_spill] sm:$0xff]  ;;  %v14994_v6 = vld [vmem:[#allocation25_spill] sm:$0xff]  ;;  %v15002_v37 = vld [vmem:[#allocation16_spill] sm:$0xff] }
 0x323   : > { %8662 = vmatprep.subr.mxu0 %v14994_v6  ;;  %8718 = vmatprep.subr.mxu1 %v14995_v9 }
 0x324   : > { %14985 = vst [vmem:[#allocation63_spill] sm:$0xff] %v11909_v55  ;;  %14988 = vst [vmem:[#allocation23_spill] sm:$0xff] %v11914_v56  ;;  %v11919_v53 = vadd.f32 %v2248_v5, %v14990_v49  ;;  %8573 = vmatprep.mubr.f32.mxu0 %v2248_v5  ;;  %v11923_v28 = vadd.f32 %v2409_v36, %v14992_v60  ;;  %8629 = vmatprep.mubr.f32.mxu1 %v2409_v36  ;;  %v14996_v5 = vld [vmem:[#allocation74_spill] sm:$0xff] }
 0x325   : > { %v8442_v55 = vpop.f32.mrf.mxu0  ;;  %8574 = vmatmul.mubr.f32.gmra.mxu0 %v2249_v41  ;;  %v8498_v31 = vpop.f32.mrf.mxu1  ;;  %8630 = vmatmul.mubr.f32.gmra.mxu1 %v2410_v10  ;;  %v14998_v41 = vld [vmem:[#allocation15_spill] sm:$0xff] }
 0x326   : > { %14991 = vst [vmem:[#allocation64_spill] sm:$0xff] %v11919_v53  ;;  %14993 = vst [vmem:[#allocation114_spill] sm:$0xff] %v11923_v28  ;;  %v2557_v51 = vmul.f32 0.25, %v8442_v55  ;;  %v2718_v56 = vmul.f32 0.25, %v8498_v31  ;;  %8663 = vmatpush3.msra.mxu0 %v14994_v6  ;;  %8719 = vmatpush3.msra.mxu1 %v14995_v9 }
 0x327   : > { %v2477_v13 = vpop.f32.mrf.mxu0  ;;  %v2638_v60 = vpop.f32.mrf.mxu1  ;;  %8744 = vmatprep.subr.mxu0 %v14844_v39  ;;  %8800 = vmatprep.subr.mxu1 %v14847_v42 }
 0x328   : > { %v11929_v49 = vadd.f32 %v2557_v51, %v14996_v5  ;;  %v2556_v53 = vmul.f32 0.25, %v2477_v13  ;;  %v11934_v55 = vadd.f32 %v2718_v56, %v14998_v41  ;;  %v2717_v10 = vmul.f32 0.25, %v2638_v60  ;;  %v15001_v5 = vld [vmem:[#allocation77_spill] sm:$0xff] }
 0x329   : > { %v8445_v36 = vpop.f32.mrf.mxu0 }
 0x32a   : > { %14997 = vst [vmem:[#allocation66_spill] sm:$0xff] %v11929_v49  ;;  %14999 = vst [vmem:[#allocation24_spill] sm:$0xff] %v11934_v55  ;;  %v11938_v31 = vadd.f32 %v2556_v53, %v11593_v20  ;;  %v2559_v6 = vmul.f32 0.25, %v8445_v36  ;;  %v8501_v28 = vpop.f32.mrf.mxu1  ;;  %8664 = vmatprep.mubr.f32.mxu0 %v2556_v53  ;;  %v11941_v13 = vadd.f32 %v2717_v10, %v15001_v5  ;;  %8720 = vmatprep.mubr.f32.mxu1 %v2717_v10  ;;  %v15003_v20 = vld [vmem:[#allocation79_spill] sm:$0xff] }
 0x32b   : > { %v2720_v49 = vmul.f32 0.25, %v8501_v28  ;;  %v2487_v9 = vpop.f32.mrf.mxu0  ;;  %8665 = vmatmul.mubr.f32.vlgmr.msra.gmra.mxu0 %v2557_v51  ;;  %8721 = vmatmul.mubr.f32.vlgmr.msra.gmra.mxu1 %v2718_v56  ;;  %v15005_v28 = vld [vmem:[#allocation17_spill] sm:$0xff] }
 0x32c   : > { %15000 = vst [vmem:[#allocation67_spill] sm:$0xff] %v11938_v31  ;;  %v11944_v41 = vadd.f32 %v2559_v6, %v15002_v37  ;;  %v2558_v60 = vmul.f32 0.25, %v2487_v9  ;;  %v2648_v55 = vpop.f32.mrf.mxu1  ;;  %8745 = vmatpush3.msra.mxu0 %v14844_v39  ;;  %8801 = vmatpush3.msra.mxu1 %v14847_v42  ;;  %v15007_v9 = vld [vmem:[#allocation76_spill] sm:$0xff] }
 0x32d   : > { %v11948_v31 = vadd.f32 %v2720_v49, %v15003_v20  ;;  %v2719_v36 = vmul.f32 0.25, %v2648_v55  ;;  %v8448_v53 = vpop.f32.mrf.mxu0  ;;  %8746 = vmatprep.subr.mxu0 %v14850_v25  ;;  %8802 = vmatprep.subr.mxu1 %v14854_v52  ;;  %v15008_v55 = vld [vmem:[#allocation18_spill] sm:$0xff] }
 0x32e   : > { %v11953_v10 = vadd.f32 %v2558_v60, %v15005_v28  ;;  %v2561_v51 = vmul.f32 0.25, %v8448_v53  ;;  %v8504_v37 = vpop.f32.mrf.mxu1  ;;  %8667 = vmatprep.mubr.f32.mxu0 %v2558_v60  ;;  %8747 = vmatpush3.msra.mxu0 %v14850_v25  ;;  %v15009_v53 = vld [vmem:[#allocation78_spill] sm:$0xff] }
 0x32f   : > { %15004 = vst [vmem:[#allocation115_spill] sm:$0xff] %v11948_v31  ;;  %v11957_v56 = vadd.f32 %v2719_v36, %v15007_v9  ;;  %v2722_v39 = vmul.f32 0.25, %v8504_v37  ;;  %8723 = vmatprep.mubr.f32.mxu1 %v2719_v36  ;;  %v2497_v5 = vpop.f32.mrf.mxu0  ;;  %8668 = vmatmul.mubr.f32.gmra.mxu0 %v2559_v6  ;;  %v15011_v36 = vld [vmem:[#allocation81_spill] sm:$0xff] }
 0x330   : > { %15006 = vst [vmem:[#allocation69_spill] sm:$0xff] %v11953_v10  ;;  %v11960_v20 = vadd.f32 %v2561_v51, %v15008_v55  ;;  %v2560_v42 = vmul.f32 0.25, %v2497_v5  ;;  %v2658_v31 = vpop.f32.mrf.mxu1  ;;  %8724 = vmatmul.mubr.f32.gmra.mxu1 %v2720_v49  ;;  %8748 = vmatprep.subr.mxu0 %v14704_v32  ;;  %v15013_v49 = vld [vmem:[#allocation83_spill] sm:$0xff] }
 0x331   : > { %v11964_v28 = vadd.f32 %v2722_v39, %v15009_v53  ;;  %v2721_v60 = vmul.f32 0.25, %v2658_v31  ;;  %v8451_v10 = vpop.f32.mrf.mxu0  ;;  %8803 = vmatpush3.msra.mxu1 %v14854_v52  ;;  %v15014_v31 = vld [vmem:[#allocation80_spill] sm:$0xff]  ;;  %8749 = vmatpush3.msra.mxu0 %v14704_v32 }
 0x332   : > { %v11969_v37 = vadd.f32 %v2560_v42, %v15011_v36  ;;  %v2563_v6 = vmul.f32 0.25, %v8451_v10  ;;  %v8507_v9 = vpop.f32.mrf.mxu1  ;;  %8670 = vmatprep.mubr.f32.mxu0 %v2560_v42  ;;  %8804 = vmatprep.subr.mxu1 %v14831_v26  ;;  %v15015_v10 = vld [vmem:[#allocation82_spill] sm:$0xff] }
 0x333   : > { %15010 = vst [vmem:[#allocation51_spill] sm:$0xff] %v11964_v28  ;;  %v11973_v5 = vadd.f32 %v2721_v60, %v15013_v49  ;;  %v2724_v25 = vmul.f32 0.25, %v8507_v9  ;;  %8726 = vmatprep.mubr.f32.mxu1 %v2721_v60  ;;  %v2507_v55 = vpop.f32.mrf.mxu0  ;;  %8671 = vmatmul.mubr.f32.gmra.mxu0 %v2561_v51  ;;  %v15017_v60 = vld [vmem:[#allocation85_spill] sm:$0xff] }
 0x334   : > { %15012 = vst [vmem:[#allocation70_spill] sm:$0xff] %v11969_v37  ;;  %v11976_v53 = vadd.f32 %v2563_v6, %v15014_v31  ;;  %v2562_v52 = vmul.f32 0.25, %v2507_v55  ;;  %v2668_v28 = vpop.f32.mrf.mxu1  ;;  %8727 = vmatmul.mubr.f32.gmra.mxu1 %v2722_v39  ;;  %8750 = vmatprep.subr.mxu0 %v14834_v34  ;;  %v15019_v39 = vld [vmem:[#allocation87_spill] sm:$0xff] }
 0x335   : > { %v11980_v36 = vadd.f32 %v2724_v25, %v15015_v10  ;;  %v2723_v42 = vmul.f32 0.25, %v2668_v28  ;;  %v8454_v37 = vpop.f32.mrf.mxu0  ;;  %8805 = vmatpush3.msra.mxu1 %v14831_v26  ;;  %v15020_v28 = vld [vmem:[#allocation84_spill] sm:$0xff]  ;;  %8751 = vmatpush3.msra.mxu0 %v14834_v34 }
 0x336   : > { %v11985_v9 = vadd.f32 %v2562_v52, %v15017_v60  ;;  %v2565_v51 = vmul.f32 0.25, %v8454_v37  ;;  %v8510_v49 = vpop.f32.mrf.mxu1  ;;  %8673 = vmatprep.mubr.f32.mxu0 %v2562_v52  ;;  %8806 = vmatprep.subr.mxu1 %v14838_v17  ;;  %v15021_v37 = vld [vmem:[#allocation86_spill] sm:$0xff] }
 0x337   : > { %15016 = vst [vmem:[#allocation116_spill] sm:$0xff] %v11980_v36  ;;  %v11989_v55 = vadd.f32 %v2723_v42, %v15019_v39  ;;  %v2726_v32 = vmul.f32 0.25, %v8510_v49  ;;  %8729 = vmatprep.mubr.f32.mxu1 %v2723_v42  ;;  %v2517_v31 = vpop.f32.mrf.mxu0  ;;  %8674 = vmatmul.mubr.f32.gmra.mxu0 %v2563_v6  ;;  %v15023_v42 = vld [vmem:[#allocation89_spill] sm:$0xff] }
 0x338   : > { %15018 = vst [vmem:[#allocation28_spill] sm:$0xff] %v11985_v9  ;;  %v11992_v10 = vadd.f32 %v2565_v51, %v15020_v28  ;;  %v2564_v26 = vmul.f32 0.25, %v2517_v31  ;;  %v2678_v36 = vpop.f32.mrf.mxu1  ;;  %8730 = vmatmul.mubr.f32.gmra.mxu1 %v2724_v25  ;;  %8752 = vmatprep.subr.mxu0 %v14695_v19  ;;  %v15025_v25 = vld [vmem:[#allocation91_spill] sm:$0xff] }
 0x339   : > { %v11996_v60 = vadd.f32 %v2726_v32, %v15021_v37  ;;  %v2725_v52 = vmul.f32 0.25, %v2678_v36  ;;  %v8457_v9 = vpop.f32.mrf.mxu0  ;;  %8807 = vmatpush3.msra.mxu1 %v14838_v17  ;;  %v15026_v36 = vld [vmem:[#allocation88_spill] sm:$0xff]  ;;  %8753 = vmatpush3.msra.mxu0 %v14695_v19 }
 0x33a   : > { %v12001_v49 = vadd.f32 %v2564_v26, %v15023_v42  ;;  %v2567_v6 = vmul.f32 0.25, %v8457_v9  ;;  %v8513_v39 = vpop.f32.mrf.mxu1  ;;  %8676 = vmatprep.mubr.f32.mxu0 %v2564_v26  ;;  %8808 = vmatprep.subr.mxu1 %v14697_v50  ;;  %v15027_v9 = vld [vmem:[#allocation90_spill] sm:$0xff] }
 0x33b   : > { %15022 = vst [vmem:[#allocation19_spill] sm:$0xff] %v11996_v60  ;;  %v12005_v31 = vadd.f32 %v2725_v52, %v15025_v25  ;;  %v2728_v34 = vmul.f32 0.25, %v8513_v39  ;;  %8732 = vmatprep.mubr.f32.mxu1 %v2725_v52  ;;  %v2527_v28 = vpop.f32.mrf.mxu0  ;;  %8677 = vmatmul.mubr.f32.gmra.mxu0 %v2565_v51  ;;  %v15029_v52 = vld [vmem:[#allocation93_spill] sm:$0xff] }
 0x33c   : > { %15024 = vst [vmem:[#allocation30_spill] sm:$0xff] %v12001_v49  ;;  %v12008_v37 = vadd.f32 %v2567_v6, %v15026_v36  ;;  %v2566_v17 = vmul.f32 0.25, %v2527_v28  ;;  %v2688_v60 = vpop.f32.mrf.mxu1  ;;  %8733 = vmatmul.mubr.f32.gmra.mxu1 %v2726_v32  ;;  %8754 = vmatprep.subr.mxu0 %v14688_v24  ;;  %v15031_v32 = vld [vmem:[#allocation95_spill] sm:$0xff] }
 0x33d   : > { %v12012_v42 = vadd.f32 %v2728_v34, %v15027_v9  ;;  %v2727_v26 = vmul.f32 0.25, %v2688_v60  ;;  %v8460_v49 = vpop.f32.mrf.mxu0  ;;  %8809 = vmatpush3.msra.mxu1 %v14697_v50  ;;  %v15032_v60 = vld [vmem:[#allocation92_spill] sm:$0xff]  ;;  %8755 = vmatpush3.msra.mxu0 %v14688_v24 }
 0x33e   : > { %v12017_v39 = vadd.f32 %v2566_v17, %v15029_v52  ;;  %v2569_v51 = vmul.f32 0.25, %v8460_v49  ;;  %v8516_v25 = vpop.f32.mrf.mxu1  ;;  %8679 = vmatprep.mubr.f32.mxu0 %v2566_v17  ;;  %8810 = vmatprep.subr.mxu1 %v14692_v0  ;;  %v15033_v49 = vld [vmem:[#allocation94_spill] sm:$0xff] }
 0x33f   : > { %15028 = vst [vmem:[#allocation117_spill] sm:$0xff] %v12012_v42  ;;  %v12021_v28 = vadd.f32 %v2727_v26, %v15031_v32  ;;  %v2730_v19 = vmul.f32 0.25, %v8516_v25  ;;  %8735 = vmatprep.mubr.f32.mxu1 %v2727_v26  ;;  %v2537_v36 = vpop.f32.mrf.mxu0  ;;  %8680 = vmatmul.mubr.f32.gmra.mxu0 %v2567_v6  ;;  %v15034_v26 = vld [vmem:[#allocation97_spill] sm:$0xff] }
 0x340   : > { %15030 = vst [vmem:[#allocation33_spill] sm:$0xff] %v12017_v39  ;;  %v12024_v9 = vadd.f32 %v2569_v51, %v15032_v60  ;;  %v2568_v50 = vmul.f32 0.25, %v2537_v36  ;;  %v2698_v42 = vpop.f32.mrf.mxu1  ;;  %8736 = vmatmul.mubr.f32.gmra.mxu1 %v2728_v34  ;;  %8756 = vmatprep.subr.mxu0 %v14680_v22 }
 0x341   : > { %v12028_v52 = vadd.f32 %v2730_v19, %v15033_v49  ;;  %v2729_v17 = vmul.f32 0.25, %v2698_v42  ;;  %v8463_v39 = vpop.f32.mrf.mxu0  ;;  %8811 = vmatpush3.msra.mxu1 %v14692_v0  ;;  %8757 = vmatpush3.msra.mxu0 %v14680_v22  ;;  %v15037_v22 = vld [vmem:[#allocation38_spill] sm:$0xff] }
 0x342   : > { %v12033_v25 = vadd.f32 %v2568_v50, %v15034_v26  ;;  %v2571_v6 = vmul.f32 0.25, %v8463_v39  ;;  %v8519_v32 = vpop.f32.mrf.mxu1  ;;  %8682 = vmatprep.mubr.f32.mxu0 %v2568_v50  ;;  %8812 = vmatprep.subr.mxu1 %v14682_v21  ;;  %v15044_v26 = vld [vmem:[#allocation53_spill] sm:$0xff] }
 0x343   : > { %v12037_v34 = vadd.f32 %v2729_v17, %v11717_v38  ;;  %v2732_v24 = vmul.f32 0.25, %v8519_v32  ;;  %8738 = vmatprep.mubr.f32.mxu1 %v2729_v17  ;;  %v2547_v36 = vpop.f32.mrf.mxu0  ;;  %8683 = vmatmul.mubr.f32.gmra.mxu0 %v2569_v51  ;;  %v15035_v51 = vld [vmem:[#allocation36_spill] sm:$0xff]  ;;  %v15046_v32 = vld [vmem:[#allocation55_spill] sm:$0xff] }
 0x344   : > { %v12040_v42 = vadd.f32 %v2571_v6, %v11721_v46  ;;  %v2570_v0 = vmul.f32 0.25, %v2547_v36  ;;  %v2708_v60 = vpop.f32.mrf.mxu1  ;;  %8739 = vmatmul.mubr.f32.gmra.mxu1 %v2730_v19  ;;  %8758 = vmatprep.subr.mxu0 %v14675_v18  ;;  %v15036_v46 = vld [vmem:[#allocation99_spill] sm:$0xff]  ;;  %v15041_v19 = vld [vmem:[#allocation48_spill] sm:$0xff]  ;;  %v15048_v36 = vld [vmem:[#allocation57_spill] sm:$0xff] }
 0x345   : > { %v12044_v39 = vadd.f32 %v2732_v24, %v11726_v48  ;;  %v2731_v50 = vmul.f32 0.25, %v2708_v60  ;;  %8813 = vmatpush3.msra.mxu1 %v14682_v21  ;;  %8759 = vmatpush3.msra.mxu0 %v14675_v18  ;;  %v15038_v21 = vld [vmem:[#allocation41_spill] sm:$0xff]  ;;  %v15039_v48 = vld [vmem:[#allocation44_spill] sm:$0xff]  ;;  %v15042_v18 = vld [vmem:[#allocation50_spill] sm:$0xff] }
 0x346   : > { %v12049_v38 = vadd.f32 %v2570_v0, %v11730_v16  ;;  %8685 = vmatprep.mubr.f32.mxu0 %v2570_v0  ;;  %8814 = vmatprep.subr.mxu1 %v15035_v51  ;;  %v15040_v16 = vld [vmem:[#allocation45_spill] sm:$0xff]  ;;  %v15043_v17 = vld [vmem:[#allocation52_spill] sm:$0xff]  ;;  %v15049_v0 = vld [vmem:[#allocation58_spill] sm:$0xff] }
 0x347   : > { %v12053_v49 = vadd.f32 %v2731_v50, %v15036_v46  ;;  %8741 = vmatprep.mubr.f32.mxu1 %v2731_v50  ;;  %8686 = vmatmul.mubr.f32.gmra.mxu0 %v2571_v6  ;;  %v15045_v6 = vld [vmem:[#allocation54_spill] sm:$0xff]  ;;  %v15050_v60 = vld [vmem:[#allocation59_spill] sm:$0xff]  ;;  %v15051_v50 = vld [vmem:[#allocation60_spill] sm:$0xff] }
 0x348   : > { %8742 = vmatmul.mubr.f32.gmra.mxu1 %v2732_v24  ;;  %8760 = vmatprep.subr.mxu0 %v15037_v22  ;;  %v15047_v24 = vld [vmem:[#allocation56_spill] sm:$0xff] }
 0x349   : > { %8815 = vmatpush3.msra.mxu1 %v15035_v51  ;;  %8761 = vmatpush3.msra.mxu0 %v15037_v22  ;;  %v15052_v51 = vld [vmem:[#allocation61_spill] sm:$0xff] }
 0x34a   : > { %8816 = vmatprep.subr.mxu1 %v15038_v21  ;;  %8762 = vmatprep.subr.mxu0 %v15039_v48 }
 0x34b   : > { %8817 = vmatpush3.msra.mxu1 %v15038_v21  ;;  %8763 = vmatpush3.msra.mxu0 %v15039_v48 }
 0x34c   : > { %8818 = vmatprep.subr.mxu1 %v15040_v16  ;;  %8764 = vmatprep.subr.mxu0 %v15041_v19 }
 0x34d   : > { %8819 = vmatpush3.msra.mxu1 %v15040_v16  ;;  %8765 = vmatpush3.msra.mxu0 %v15041_v19 }
 0x34e   : > { %8820 = vmatprep.subr.mxu1 %v15042_v18  ;;  %8766 = vmatprep.subr.mxu0 %v15043_v17 }
 0x34f   : > { %8821 = vmatpush3.msra.mxu1 %v15042_v18  ;;  %8767 = vmatpush3.msra.mxu0 %v15043_v17 }
 0x350   : > { %8822 = vmatprep.subr.mxu1 %v15044_v26  ;;  %8768 = vmatprep.subr.mxu0 %v15045_v6 }
 0x351   : > { %8823 = vmatpush3.msra.mxu1 %v15044_v26  ;;  %8769 = vmatpush3.msra.mxu0 %v15045_v6 }
 0x352   : > { %8824 = vmatprep.subr.mxu1 %v15046_v32  ;;  %8770 = vmatprep.subr.mxu0 %v15047_v24 }
 0x353   : > { %8825 = vmatpush3.msra.mxu1 %v15046_v32  ;;  %8771 = vmatpush3.msra.mxu0 %v15047_v24 }
 0x354   : > { %8826 = vmatprep.subr.mxu1 %v15048_v36  ;;  %8772 = vmatprep.subr.mxu0 %v15049_v0 }
 0x355   : > { %8827 = vmatpush3.msra.mxu1 %v15048_v36  ;;  %8773 = vmatpush3.msra.mxu0 %v15049_v0 }
 0x356   : > { %8828 = vmatprep.subr.mxu1 %v15050_v60  ;;  %8774 = vmatprep.subr.mxu0 %v15051_v50 }
 0x357   : > { %8829 = vmatpush3.msra.mxu1 %v15050_v60  ;;  %8775 = vmatpush3.msra.mxu0 %v15051_v50 }
 0x358   : > { %8830 = vmatprep.subr.mxu1 %v15052_v51  ;;  %8856 = vmatprep.subr.mxu0 %v10675_v15 }
 0x359   : > { %8831 = vmatpush3.msra.mxu1 %v15052_v51 }
 0x35a   : > { %8912 = vmatprep.subr.mxu1 %v10684_v62 }
 0x3b5   : > { %v8554_v46 = vpop.f32.mrf.mxu0 }
 0x3b6   : > { %v2943_v22 = vmul.f32 0.2, %v8554_v46  ;;  %v8610_v21 = vpop.f32.mrf.mxu1 }
 0x3b7   : > { %v3104_v48 = vmul.f32 0.2, %v8610_v21  ;;  %v2863_v16 = vpop.f32.mrf.mxu0  ;;  %v15058_v21 = vld [vmem:[#allocation101_spill] sm:$0xff] }
 0x3b8   : > { %v12092_v19 = vadd.f32 %v2943_v22, %v11772_v2  ;;  %v2942_v18 = vmul.f32 0.2, %v2863_v16  ;;  %v3024_v17 = vpop.f32.mrf.mxu1 }
 0x3b9   : > { %v12095_v26 = vadd.f32 %v3104_v48, %v11775_v43  ;;  %v3103_v6 = vmul.f32 0.2, %v3024_v17 }
 0x3ba   : > { %v12098_v32 = vadd.f32 %v2942_v18, %v11778_v35  ;;  %8776 = vmatprep.mubr.f32.mxu0 %v2942_v18  ;;  %v15053_v35 = vld [vmem:[#allocation62_spill] sm:$0xff] }
 0x3bb   : > { %v12101_v24 = vadd.f32 %v3103_v6, %v11781_v1  ;;  %8832 = vmatprep.mubr.f32.mxu1 %v3103_v6  ;;  %8777 = vmatmul.mubr.f32.vlgmr.msra.gmra.mxu0 %v2943_v22  ;;  %v15054_v1 = vld [vmem:[#allocation96_spill] sm:$0xff] }
 0x3bc   : > { %8833 = vmatmul.mubr.f32.vlgmr.msra.gmra.mxu1 %v3104_v48  ;;  %8857 = vmatpush3.msra.mxu0 %v10675_v15  ;;  %v15056_v15 = vld [vmem:[#allocation98_spill] sm:$0xff] }
 0x3bd   : > { %v8557_v36 = vpop.f32.mrf.mxu0  ;;  %8913 = vmatpush3.msra.mxu1 %v10684_v62  ;;  %8858 = vmatprep.subr.mxu0 %v10677_v27 }
 0x3be   : > { %v2945_v2 = vmul.f32 0.2, %v8557_v36  ;;  %v8613_v0 = vpop.f32.mrf.mxu1  ;;  %8914 = vmatprep.subr.mxu1 %v15053_v35  ;;  %8859 = vmatpush3.msra.mxu0 %v10677_v27 }
 0x3bf   : > { %v3106_v43 = vmul.f32 0.2, %v8613_v0  ;;  %v2873_v60 = vpop.f32.mrf.mxu0  ;;  %8915 = vmatpush3.msra.mxu1 %v15053_v35  ;;  %8860 = vmatprep.subr.mxu0 %v14791_v40  ;;  %v15062_v0 = vld [vmem:[#allocation103_spill] sm:$0xff] }
 0x3c0   : > { %v12109_v50 = vadd.f32 %v2945_v2, %v15054_v1  ;;  %v2944_v51 = vmul.f32 0.2, %v2873_v60  ;;  %v3034_v46 = vpop.f32.mrf.mxu1  ;;  %8916 = vmatprep.subr.mxu1 %v14794_v44  ;;  %8861 = vmatpush3.msra.mxu0 %v14791_v40  ;;  %v15061_v40 = vld [vmem:[#allocation65_spill] sm:$0xff]  ;;  %v15064_v1 = vld [vmem:[#allocation102_spill] sm:$0xff] }
 0x3c1   : > { %v12114_v22 = vadd.f32 %v3106_v43, %v15056_v15  ;;  %v3105_v62 = vmul.f32 0.2, %v3034_v46  ;;  %8917 = vmatpush3.msra.mxu1 %v14794_v44  ;;  %8862 = vmatprep.subr.mxu0 %v10732_v11 }
 0x3c2   : > { %15055 = vst [vmem:[#allocation71_spill] sm:$0xff] %v12109_v50  ;;  %v12119_v48 = vadd.f32 %v2944_v51, %v15058_v21  ;;  %8779 = vmatprep.mubr.f32.mxu0 %v2944_v51  ;;  %8918 = vmatprep.subr.mxu1 %v15061_v40 }
 0x3c3   : > { %15057 = vst [vmem:[#allocation34_spill] sm:$0xff] %v12114_v22  ;;  %v12123_v27 = vadd.f32 %v3105_v62, %v11803_v57  ;;  %8835 = vmatprep.mubr.f32.mxu1 %v3105_v62  ;;  %8780 = vmatmul.mubr.f32.gmra.mxu0 %v2945_v2  ;;  %v15063_v2 = vld [vmem:[#allocation100_spill] sm:$0xff] }
 0x3c4   : > { %15059 = vst [vmem:[#allocation73_spill] sm:$0xff] %v12119_v48  ;;  %v8560_v16 = vpop.f32.mrf.mxu0  ;;  %v8616_v17 = vpop.f32.mrf.mxu1  ;;  %8836 = vmatmul.mubr.f32.gmra.mxu1 %v3106_v43  ;;  %8863 = vmatpush3.msra.mxu0 %v10732_v11  ;;  %v15097_v48 = vld [vmem:[#allocation67_spill] sm:$0xff] }
 0x3c5   : > { %15060 = vst [vmem:[#allocation35_spill] sm:$0xff] %v12123_v27  ;;  %v2947_v18 = vmul.f32 0.2, %v8560_v16  ;;  %v3108_v6 = vmul.f32 0.2, %v8616_v17  ;;  %8919 = vmatpush3.msra.mxu1 %v15061_v40  ;;  %8864 = vmatprep.subr.mxu0 %v14799_v30  ;;  %v15068_v17 = vld [vmem:[#allocation105_spill] sm:$0xff] }
 0x3c6   : > { %v2883_v36 = vpop.f32.mrf.mxu0  ;;  %v3044_v57 = vpop.f32.mrf.mxu1  ;;  %8920 = vmatprep.subr.mxu1 %v14802_v23  ;;  %8865 = vmatpush3.msra.mxu0 %v14799_v30  ;;  %v15067_v30 = vld [vmem:[#allocation68_spill] sm:$0xff] }
 0x3c7   : > { %v12129_v60 = vadd.f32 %v2947_v18, %v15062_v0  ;;  %v2946_v44 = vmul.f32 0.2, %v2883_v36  ;;  %v12134_v35 = vadd.f32 %v3108_v6, %v15063_v2  ;;  %v3107_v43 = vmul.f32 0.2, %v3044_v57  ;;  %8921 = vmatpush3.msra.mxu1 %v14802_v23  ;;  %8866 = vmatprep.subr.mxu0 %v10769_v47  ;;  %v15070_v0 = vld [vmem:[#allocation104_spill] sm:$0xff] }
 0x3c8   : > { %8922 = vmatprep.subr.mxu1 %v15067_v30  ;;  %8867 = vmatpush3.msra.mxu0 %v10769_v47 }
 0x3c9   : > { %v12139_v51 = vadd.f32 %v2946_v44, %v15064_v1  ;;  %8782 = vmatprep.mubr.f32.mxu0 %v2946_v44  ;;  %v12143_v11 = vadd.f32 %v3107_v43, %v11823_v63  ;;  %8838 = vmatprep.mubr.f32.mxu1 %v3107_v43 }
 0x3ca   : > { %v8563_v46 = vpop.f32.mrf.mxu0  ;;  %8783 = vmatmul.mubr.f32.gmra.mxu0 %v2947_v18  ;;  %8839 = vmatmul.mubr.f32.gmra.mxu1 %v3108_v6  ;;  %v15069_v18 = vld [vmem:[#allocation107_spill] sm:$0xff] }
 0x3cb   : > { %15065 = vst [vmem:[#allocation20_spill] sm:$0xff] %v12139_v51  ;;  %15066 = vst [vmem:[#allocation75_spill] sm:$0xff] %v12143_v11  ;;  %v2949_v15 = vmul.f32 0.2, %v8563_v46  ;;  %v8619_v62 = vpop.f32.mrf.mxu1  ;;  %8923 = vmatpush3.msra.mxu1 %v15067_v30  ;;  %8868 = vmatprep.subr.mxu0 %v14807_v33 }
 0x3cc   : > { %v3110_v21 = vmul.f32 0.2, %v8619_v62  ;;  %v2893_v16 = vpop.f32.mrf.mxu0  ;;  %8924 = vmatprep.subr.mxu1 %v14810_v12  ;;  %8869 = vmatpush3.msra.mxu0 %v14807_v33  ;;  %v15071_v33 = vld [vmem:[#allocation27_spill] sm:$0xff]  ;;  %v15072_v62 = vld [vmem:[#allocation106_spill] sm:$0xff] }
 0x3cd   : > { %v12149_v36 = vadd.f32 %v2949_v15, %v15068_v17  ;;  %v2948_v23 = vmul.f32 0.2, %v2893_v16  ;;  %v3054_v63 = vpop.f32.mrf.mxu1  ;;  %8925 = vmatpush3.msra.mxu1 %v14810_v12  ;;  %8870 = vmatprep.subr.mxu0 %v10805_v29  ;;  %v15074_v17 = vld [vmem:[#allocation111_spill] sm:$0xff] }
 0x3ce   : > { %v12154_v40 = vadd.f32 %v3110_v21, %v15069_v18  ;;  %v3109_v6 = vmul.f32 0.2, %v3054_v63  ;;  %8926 = vmatprep.subr.mxu1 %v15071_v33  ;;  %8871 = vmatpush3.msra.mxu0 %v10805_v29 }
 0x3cf   : > { %v12159_v44 = vadd.f32 %v2948_v23, %v15070_v0  ;;  %8785 = vmatprep.mubr.f32.mxu0 %v2948_v23  ;;  %8927 = vmatpush3.msra.mxu1 %v15071_v33 }
 0x3d0   : > { %v12163_v47 = vadd.f32 %v3109_v6, %v11843_v3  ;;  %8841 = vmatprep.mubr.f32.mxu1 %v3109_v6  ;;  %8786 = vmatmul.mubr.f32.gmra.mxu0 %v2949_v15  ;;  %v15073_v15 = vld [vmem:[#allocation109_spill] sm:$0xff] }
 0x3d1   : > { %v8566_v57 = vpop.f32.mrf.mxu0  ;;  %8842 = vmatmul.mubr.f32.gmra.mxu1 %v3110_v21  ;;  %8872 = vmatprep.subr.mxu0 %v14815_v61 }
 0x3d2   : > { %v2951_v2 = vmul.f32 0.2, %v8566_v57  ;;  %v8622_v43 = vpop.f32.mrf.mxu1  ;;  %8928 = vmatprep.subr.mxu1 %v14818_v58  ;;  %8873 = vmatpush3.msra.mxu0 %v14815_v61  ;;  %v15075_v61 = vld [vmem:[#allocation31_spill] sm:$0xff] }
 0x3d3   : > { %v3112_v1 = vmul.f32 0.2, %v8622_v43  ;;  %v2903_v46 = vpop.f32.mrf.mxu0  ;;  %8929 = vmatpush3.msra.mxu1 %v14818_v58  ;;  %8874 = vmatprep.subr.mxu0 %v10848_v7  ;;  %v15076_v43 = vld [vmem:[#allocation108_spill] sm:$0xff] }
 0x3d4   : > { %v12169_v16 = vadd.f32 %v2951_v2, %v15072_v62  ;;  %v2950_v12 = vmul.f32 0.2, %v2903_v46  ;;  %v3064_v3 = vpop.f32.mrf.mxu1  ;;  %8930 = vmatprep.subr.mxu1 %v15075_v61  ;;  %8875 = vmatpush3.msra.mxu0 %v10848_v7  ;;  %v15078_v62 = vld [vmem:[#allocation49_spill] sm:$0xff] }
 0x3d5   : > { %v12174_v30 = vadd.f32 %v3112_v1, %v15073_v15  ;;  %v3111_v21 = vmul.f32 0.2, %v3064_v3  ;;  %8931 = vmatpush3.msra.mxu1 %v15075_v61  ;;  %8876 = vmatprep.subr.mxu0 %v14823_v14 }
 0x3d6   : > { %v12179_v23 = vadd.f32 %v2950_v12, %v15074_v17  ;;  %8788 = vmatprep.mubr.f32.mxu0 %v2950_v12  ;;  %8932 = vmatprep.subr.mxu1 %v14826_v45 }
 0x3d7   : > { %v12183_v29 = vadd.f32 %v3111_v21, %v11863_v8  ;;  %8844 = vmatprep.mubr.f32.mxu1 %v3111_v21  ;;  %8789 = vmatmul.mubr.f32.gmra.mxu0 %v2951_v2  ;;  %v15077_v2 = vld [vmem:[#allocation110_spill] sm:$0xff] }
 0x3d8   : > { %v8569_v63 = vpop.f32.mrf.mxu0  ;;  %8845 = vmatmul.mubr.f32.gmra.mxu1 %v3112_v1  ;;  %8877 = vmatpush3.msra.mxu0 %v14823_v14  ;;  %v15079_v14 = vld [vmem:[#allocation37_spill] sm:$0xff] }
 0x3d9   : > { %v2953_v18 = vmul.f32 0.2, %v8569_v63  ;;  %v8625_v6 = vpop.f32.mrf.mxu1  ;;  %8933 = vmatpush3.msra.mxu1 %v14826_v45  ;;  %8878 = vmatprep.subr.mxu0 %v14830_v54 }
 0x3da   : > { %v3114_v0 = vmul.f32 0.2, %v8625_v6  ;;  %v2913_v57 = vpop.f32.mrf.mxu0  ;;  %8934 = vmatprep.subr.mxu1 %v15079_v14  ;;  %8879 = vmatpush3.msra.mxu0 %v14830_v54  ;;  %v15080_v6 = vld [vmem:[#allocation47_spill] sm:$0xff]  ;;  %v15084_v54 = vld [vmem:[#allocation113_spill] sm:$0xff] }
 0x3db   : > { %v12189_v46 = vadd.f32 %v2953_v18, %v15076_v43  ;;  %v2952_v58 = vmul.f32 0.2, %v2913_v57  ;;  %v3074_v8 = vpop.f32.mrf.mxu1  ;;  %8935 = vmatpush3.msra.mxu1 %v15079_v14  ;;  %8880 = vmatprep.subr.mxu0 %v14837_v59  ;;  %v15082_v43 = vld [vmem:[#allocation39_spill] sm:$0xff] }
 0x3dc   : > { %v12194_v33 = vadd.f32 %v3114_v0, %v15077_v2  ;;  %v3113_v1 = vmul.f32 0.2, %v3074_v8  ;;  %8936 = vmatprep.subr.mxu1 %v15082_v43  ;;  %8881 = vmatpush3.msra.mxu0 %v14837_v59  ;;  %v15086_v59 = vld [vmem:[#allocation40_spill] sm:$0xff] }
 0x3dd   : > { %v12199_v12 = vadd.f32 %v2952_v58, %v15078_v62  ;;  %8791 = vmatprep.mubr.f32.mxu0 %v2952_v58  ;;  %v15083_v58 = vld [vmem:[#allocation112_spill] sm:$0xff]  ;;  %8937 = vmatpush3.msra.mxu1 %v15082_v43 }
 0x3de   : > { %v12203_v7 = vadd.f32 %v3113_v1, %v11883_v4  ;;  %8847 = vmatprep.mubr.f32.mxu1 %v3113_v1  ;;  %8792 = vmatmul.mubr.f32.gmra.mxu0 %v2953_v18  ;;  %v15081_v18 = vld [vmem:[#allocation26_spill] sm:$0xff] }
 0x3df   : > { %v8572_v3 = vpop.f32.mrf.mxu0  ;;  %v8628_v21 = vpop.f32.mrf.mxu1  ;;  %8848 = vmatmul.mubr.f32.gmra.mxu1 %v3114_v0  ;;  %8938 = vmatprep.subr.mxu1 %v15086_v59 }
 0x3e0   : > { %v2955_v15 = vmul.f32 0.2, %v8572_v3  ;;  %v3116_v17 = vmul.f32 0.2, %v8628_v21  ;;  %v15085_v21 = vld [vmem:[#allocation32_spill] sm:$0xff]  ;;  %8939 = vmatpush3.msra.mxu1 %v15086_v59 }
 0x3e1   : > { %v2923_v63 = vpop.f32.mrf.mxu0  ;;  %v3084_v4 = vpop.f32.mrf.mxu1  ;;  %8882 = vmatprep.subr.mxu0 %v15085_v21 }
 0x3e2   : > { %v12209_v57 = vadd.f32 %v2955_v15, %v15080_v6  ;;  %v2954_v45 = vmul.f32 0.2, %v2923_v63  ;;  %v12214_v61 = vadd.f32 %v3116_v17, %v15081_v18  ;;  %v3115_v0 = vmul.f32 0.2, %v3084_v4  ;;  %8883 = vmatpush3.msra.mxu0 %v15085_v21  ;;  %v15087_v6 = vld [vmem:[#allocation63_spill] sm:$0xff] }
 0x3e4   : > { %v12219_v8 = vadd.f32 %v2954_v45, %v15083_v58  ;;  %8794 = vmatprep.mubr.f32.mxu0 %v2954_v45  ;;  %v12223_v2 = vadd.f32 %v3115_v0, %v15084_v54  ;;  %8850 = vmatprep.mubr.f32.mxu1 %v3115_v0  ;;  %v15088_v0 = vld [vmem:[#allocation42_spill] sm:$0xff]  ;;  %v15090_v58 = vld [vmem:[#allocation43_spill] sm:$0xff]  ;;  %v15091_v54 = vld [vmem:[#allocation64_spill] sm:$0xff] }
 0x3e5   : > { %v8575_v1 = vpop.f32.mrf.mxu0  ;;  %8795 = vmatmul.mubr.f32.gmra.mxu0 %v2955_v15  ;;  %v8631_v3 = vpop.f32.mrf.mxu1  ;;  %8851 = vmatmul.mubr.f32.gmra.mxu1 %v3116_v17  ;;  %v15089_v15 = vld [vmem:[#allocation23_spill] sm:$0xff] }
 0x3e6   : > { %v2957_v62 = vmul.f32 0.2, %v8575_v1  ;;  %v3118_v63 = vmul.f32 0.2, %v8631_v3  ;;  %8884 = vmatprep.subr.mxu0 %v15088_v0  ;;  %8940 = vmatprep.subr.mxu1 %v15090_v58  ;;  %v15092_v3 = vld [vmem:[#allocation114_spill] sm:$0xff] }
 0x3e7   : > { %v2933_v14 = vpop.f32.mrf.mxu0  ;;  %v3094_v18 = vpop.f32.mrf.mxu1  ;;  %8885 = vmatpush3.msra.mxu0 %v15088_v0  ;;  %8941 = vmatpush3.msra.mxu1 %v15090_v58  ;;  %v15094_v0 = vld [vmem:[#allocation46_spill] sm:$0xff] }
 0x3e8   : > { %v12229_v45 = vadd.f32 %v2957_v62, %v15087_v6  ;;  %v2956_v4 = vmul.f32 0.2, %v2933_v14  ;;  %v12234_v43 = vadd.f32 %v3118_v63, %v15089_v15  ;;  %v3117_v17 = vmul.f32 0.2, %v3094_v18  ;;  %v15093_v18 = vld [vmem:[#allocation25_spill] sm:$0xff]  ;;  %8942 = vmatprep.subr.mxu1 %v15094_v0 }
 0x3e9   : > { %8886 = vmatprep.subr.mxu0 %v15093_v18  ;;  %8943 = vmatpush3.msra.mxu1 %v15094_v0 }
 0x3ea   : > { %v12239_v1 = vadd.f32 %v2956_v4, %v15091_v54  ;;  %8797 = vmatprep.mubr.f32.mxu0 %v2956_v4  ;;  %v12243_v21 = vadd.f32 %v3117_v17, %v15092_v3  ;;  %8853 = vmatprep.mubr.f32.mxu1 %v3117_v17  ;;  %v15095_v4 = vld [vmem:[#allocation66_spill] sm:$0xff]  ;;  %v15096_v17 = vld [vmem:[#allocation24_spill] sm:$0xff] }
 0x3eb   : > { %v8666_v14 = vpop.f32.mrf.mxu0  ;;  %8798 = vmatmul.mubr.f32.gmra.mxu0 %v2957_v62  ;;  %v8722_v6 = vpop.f32.mrf.mxu1  ;;  %8854 = vmatmul.mubr.f32.gmra.mxu1 %v3118_v63 }
 0x3ec   : > { %v3265_v59 = vmul.f32 0.2, %v8666_v14  ;;  %v3426_v15 = vmul.f32 0.2, %v8722_v6  ;;  %8887 = vmatpush3.msra.mxu0 %v15093_v18 }
 0x3ed   : > { %v3185_v27 = vpop.f32.mrf.mxu0  ;;  %v3346_v3 = vpop.f32.mrf.mxu1 }
 0x3ee   : > { %v12249_v54 = vadd.f32 %v3265_v59, %v15095_v4  ;;  %v3264_v58 = vmul.f32 0.2, %v3185_v27  ;;  %v12253_v62 = vadd.f32 %v3426_v15, %v15096_v17  ;;  %v3425_v14 = vmul.f32 0.2, %v3346_v3  ;;  %v15101_v3 = vld [vmem:[#allocation115_spill] sm:$0xff] }
 0x3ef   : > { %v8669_v63 = vpop.f32.mrf.mxu0 }
 0x3f0   : > { %v12256_v22 = vadd.f32 %v3264_v58, %v15097_v48  ;;  %v3267_v6 = vmul.f32 0.2, %v8669_v63  ;;  %v8725_v50 = vpop.f32.mrf.mxu1  ;;  %8888 = vmatprep.mubr.f32.mxu0 %v3264_v58  ;;  %v12259_v18 = vadd.f32 %v3425_v14, %v11941_v13  ;;  %8944 = vmatprep.mubr.f32.mxu1 %v3425_v14 }
 0x3f1   : > { %v3428_v4 = vmul.f32 0.2, %v8725_v50  ;;  %v3195_v27 = vpop.f32.mrf.mxu0  ;;  %8889 = vmatmul.mubr.f32.vlgmr.msra.gmra.mxu0 %v3265_v59  ;;  %8945 = vmatmul.mubr.f32.vlgmr.msra.gmra.mxu1 %v3426_v15 }
 0x3f2   : > { %15098 = vst [vmem:[#allocation21_spill] sm:$0xff] %v12256_v22  ;;  %15099 = vst [vmem:[#allocation72_spill] sm:$0xff] %v12259_v18  ;;  %v12262_v0 = vadd.f32 %v3267_v6, %v11944_v41  ;;  %v3266_v17 = vmul.f32 0.2, %v3195_v27  ;;  %v3356_v11 = vpop.f32.mrf.mxu1  ;;  %v15103_v22 = vld [vmem:[#allocation69_spill] sm:$0xff] }
 0x3f3   : > { %v12265_v51 = vadd.f32 %v3428_v4, %v15101_v3  ;;  %v3427_v48 = vmul.f32 0.2, %v3356_v11  ;;  %v8672_v63 = vpop.f32.mrf.mxu0  ;;  %v15107_v11 = vld [vmem:[#allocation51_spill] sm:$0xff] }
 0x3f4   : > { %15100 = vst [vmem:[#allocation29_spill] sm:$0xff] %v12262_v0  ;;  %v12268_v58 = vadd.f32 %v3266_v17, %v15103_v22  ;;  %v3269_v13 = vmul.f32 0.2, %v8672_v63  ;;  %v8728_v18 = vpop.f32.mrf.mxu1  ;;  %8891 = vmatprep.mubr.f32.mxu0 %v3266_v17 }
 0x3f5   : > { %15102 = vst [vmem:[#allocation22_spill] sm:$0xff] %v12265_v51  ;;  %v12271_v50 = vadd.f32 %v3427_v48, %v11957_v56  ;;  %v3430_v59 = vmul.f32 0.2, %v8728_v18  ;;  %8947 = vmatprep.mubr.f32.mxu1 %v3427_v48  ;;  %v3205_v41 = vpop.f32.mrf.mxu0  ;;  %8892 = vmatmul.mubr.f32.gmra.mxu0 %v3267_v6  ;;  %v15115_v51 = vld [vmem:[#allocation28_spill] sm:$0xff] }
 0x3f6   : > { %15104 = vst [vmem:[#allocation74_spill] sm:$0xff] %v12268_v58  ;;  %v12274_v15 = vadd.f32 %v3269_v13, %v11960_v20  ;;  %v3268_v14 = vmul.f32 0.2, %v3205_v41  ;;  %v3366_v27 = vpop.f32.mrf.mxu1  ;;  %8948 = vmatmul.mubr.f32.gmra.mxu1 %v3428_v4  ;;  %v15109_v58 = vld [vmem:[#allocation70_spill] sm:$0xff] }
 0x3f7   : > { %15105 = vst [vmem:[#allocation15_spill] sm:$0xff] %v12271_v50  ;;  %v12277_v3 = vadd.f32 %v3430_v59, %v15107_v11  ;;  %v3429_v22 = vmul.f32 0.2, %v3366_v27  ;;  %v8675_v63 = vpop.f32.mrf.mxu0  ;;  %v15113_v27 = vld [vmem:[#allocation116_spill] sm:$0xff] }
 0x3f8   : > { %15106 = vst [vmem:[#allocation77_spill] sm:$0xff] %v12274_v15  ;;  %v12280_v17 = vadd.f32 %v3268_v14, %v15109_v58  ;;  %v3271_v56 = vmul.f32 0.2, %v8675_v63  ;;  %v8731_v50 = vpop.f32.mrf.mxu1  ;;  %8894 = vmatprep.mubr.f32.mxu0 %v3268_v14 }
 0x3f9   : > { %15108 = vst [vmem:[#allocation16_spill] sm:$0xff] %v12277_v3  ;;  %v12283_v18 = vadd.f32 %v3429_v22, %v11973_v5  ;;  %v3432_v6 = vmul.f32 0.2, %v8731_v50  ;;  %8950 = vmatprep.mubr.f32.mxu1 %v3429_v22  ;;  %v3215_v20 = vpop.f32.mrf.mxu0  ;;  %8895 = vmatmul.mubr.f32.gmra.mxu0 %v3269_v13  ;;  %v15127_v3 = vld [vmem:[#allocation33_spill] sm:$0xff] }
 0x3fa   : > { %15110 = vst [vmem:[#allocation79_spill] sm:$0xff] %v12280_v17  ;;  %v12286_v4 = vadd.f32 %v3271_v56, %v11976_v53  ;;  %v3270_v48 = vmul.f32 0.2, %v3215_v20  ;;  %v3376_v41 = vpop.f32.mrf.mxu1  ;;  %8951 = vmatmul.mubr.f32.gmra.mxu1 %v3430_v59 }
 0x3fb   : > { %15111 = vst [vmem:[#allocation17_spill] sm:$0xff] %v12283_v18  ;;  %v12289_v11 = vadd.f32 %v3432_v6, %v15113_v27  ;;  %v3431_v58 = vmul.f32 0.2, %v3376_v41  ;;  %v8678_v63 = vpop.f32.mrf.mxu0  ;;  %v15119_v41 = vld [vmem:[#allocation19_spill] sm:$0xff]  ;;  %v15121_v18 = vld [vmem:[#allocation30_spill] sm:$0xff] }
 0x3fc   : > { %15112 = vst [vmem:[#allocation76_spill] sm:$0xff] %v12286_v4  ;;  %v12292_v14 = vadd.f32 %v3270_v48, %v15115_v51  ;;  %v3273_v5 = vmul.f32 0.2, %v8678_v63  ;;  %v8734_v0 = vpop.f32.mrf.mxu1  ;;  %8897 = vmatprep.mubr.f32.mxu0 %v3270_v48 }
 0x3fd   : > { %15114 = vst [vmem:[#allocation18_spill] sm:$0xff] %v12289_v11  ;;  %v12295_v50 = vadd.f32 %v3431_v58, %v11989_v55  ;;  %v3434_v13 = vmul.f32 0.2, %v8734_v0  ;;  %8953 = vmatprep.mubr.f32.mxu1 %v3431_v58  ;;  %v3225_v53 = vpop.f32.mrf.mxu0  ;;  %8898 = vmatmul.mubr.f32.gmra.mxu0 %v3271_v56 }
 0x3fe   : > { %15116 = vst [vmem:[#allocation78_spill] sm:$0xff] %v12292_v14  ;;  %v12298_v59 = vadd.f32 %v3273_v5, %v11992_v10  ;;  %v3272_v22 = vmul.f32 0.2, %v3225_v53  ;;  %v3386_v20 = vpop.f32.mrf.mxu1  ;;  %8954 = vmatmul.mubr.f32.gmra.mxu1 %v3432_v6 }
 0x3ff   : > { %15117 = vst [vmem:[#allocation81_spill] sm:$0xff] %v12295_v50  ;;  %v12301_v27 = vadd.f32 %v3434_v13, %v15119_v41  ;;  %v3433_v51 = vmul.f32 0.2, %v3386_v20  ;;  %v8681_v63 = vpop.f32.mrf.mxu0  ;;  %v15125_v20 = vld [vmem:[#allocation117_spill] sm:$0xff] }
 0x400   : > { %15118 = vst [vmem:[#allocation83_spill] sm:$0xff] %v12298_v59  ;;  %v12304_v48 = vadd.f32 %v3272_v22, %v15121_v18  ;;  %v3275_v55 = vmul.f32 0.2, %v8681_v63  ;;  %v8737_v17 = vpop.f32.mrf.mxu1  ;;  %8900 = vmatprep.mubr.f32.mxu0 %v3272_v22 }
 0x401   : > { %15120 = vst [vmem:[#allocation80_spill] sm:$0xff] %v12301_v27  ;;  %v12307_v0 = vadd.f32 %v3433_v51, %v12005_v31  ;;  %v3436_v56 = vmul.f32 0.2, %v8737_v17  ;;  %8956 = vmatprep.mubr.f32.mxu1 %v3433_v51  ;;  %v3235_v10 = vpop.f32.mrf.mxu0  ;;  %8901 = vmatmul.mubr.f32.gmra.mxu0 %v3273_v5 }
 0x402   : > { %15122 = vst [vmem:[#allocation82_spill] sm:$0xff] %v12304_v48  ;;  %v12310_v6 = vadd.f32 %v3275_v55, %v12008_v37  ;;  %v3274_v58 = vmul.f32 0.2, %v3235_v10  ;;  %v3396_v53 = vpop.f32.mrf.mxu1  ;;  %8957 = vmatmul.mubr.f32.gmra.mxu1 %v3434_v13 }
 0x403   : > { %15123 = vst [vmem:[#allocation85_spill] sm:$0xff] %v12307_v0  ;;  %v12313_v41 = vadd.f32 %v3436_v56, %v15125_v20  ;;  %v3435_v18 = vmul.f32 0.2, %v3396_v53  ;;  %v8684_v63 = vpop.f32.mrf.mxu0 }
 0x404   : > { %15124 = vst [vmem:[#allocation87_spill] sm:$0xff] %v12310_v6  ;;  %v12316_v22 = vadd.f32 %v3274_v58, %v15127_v3  ;;  %v3277_v31 = vmul.f32 0.2, %v8684_v63  ;;  %v8740_v15 = vpop.f32.mrf.mxu1  ;;  %8903 = vmatprep.mubr.f32.mxu0 %v3274_v58 }
 0x405   : > { %15126 = vst [vmem:[#allocation84_spill] sm:$0xff] %v12313_v41  ;;  %v12319_v17 = vadd.f32 %v3435_v18, %v12021_v28  ;;  %v3438_v5 = vmul.f32 0.2, %v8740_v15  ;;  %8959 = vmatprep.mubr.f32.mxu1 %v3435_v18  ;;  %v3245_v37 = vpop.f32.mrf.mxu0  ;;  %8904 = vmatmul.mubr.f32.gmra.mxu0 %v3275_v55 }
 0x406   : > { %15128 = vst [vmem:[#allocation86_spill] sm:$0xff] %v12316_v22  ;;  %v12322_v13 = vadd.f32 %v3277_v31, %v12024_v9  ;;  %v3276_v51 = vmul.f32 0.2, %v3245_v37  ;;  %v3406_v10 = vpop.f32.mrf.mxu1  ;;  %8960 = vmatmul.mubr.f32.gmra.mxu1 %v3436_v56 }
 0x407   : > { %15129 = vst [vmem:[#allocation89_spill] sm:$0xff] %v12319_v17  ;;  %v12325_v53 = vadd.f32 %v3438_v5, %v12028_v52  ;;  %v3437_v3 = vmul.f32 0.2, %v3406_v10  ;;  %v8687_v20 = vpop.f32.mrf.mxu0 }
 0x408   : > { %15130 = vst [vmem:[#allocation91_spill] sm:$0xff] %v12322_v13  ;;  %v12328_v58 = vadd.f32 %v3276_v51, %v12033_v25  ;;  %v3279_v28 = vmul.f32 0.2, %v8687_v20  ;;  %v8743_v63 = vpop.f32.mrf.mxu1  ;;  %8906 = vmatprep.mubr.f32.mxu0 %v3276_v51 }
 0x409   : > { %15131 = vst [vmem:[#allocation88_spill] sm:$0xff] %v12325_v53  ;;  %v12331_v15 = vadd.f32 %v3437_v3, %v12037_v34  ;;  %v3440_v55 = vmul.f32 0.2, %v8743_v63  ;;  %8962 = vmatprep.mubr.f32.mxu1 %v3437_v3  ;;  %v3255_v9 = vpop.f32.mrf.mxu0  ;;  %8907 = vmatmul.mubr.f32.gmra.mxu0 %v3277_v31 }
 0x40a   : > { %15132 = vst [vmem:[#allocation90_spill] sm:$0xff] %v12328_v58  ;;  %v12334_v56 = vadd.f32 %v3279_v28, %v12040_v42  ;;  %v3278_v52 = vmul.f32 0.2, %v3255_v9  ;;  %v3416_v18 = vpop.f32.mrf.mxu1  ;;  %8963 = vmatmul.mubr.f32.gmra.mxu1 %v3438_v5 }
 0x40b   : > { %15133 = vst [vmem:[#allocation93_spill] sm:$0xff] %v12331_v15  ;;  %v12337_v37 = vadd.f32 %v3440_v55, %v12044_v39  ;;  %v3439_v25 = vmul.f32 0.2, %v3416_v18 }
 0x40c   : > { %15134 = vst [vmem:[#allocation95_spill] sm:$0xff] %v12334_v56  ;;  %v12340_v10 = vadd.f32 %v3278_v52, %v12049_v38  ;;  %8909 = vmatprep.mubr.f32.mxu0 %v3278_v52 }
 0x40d   : > { %15135 = vst [vmem:[#allocation92_spill] sm:$0xff] %v12337_v37  ;;  %v12343_v34 = vadd.f32 %v3439_v25, %v12053_v49  ;;  %8965 = vmatprep.mubr.f32.mxu1 %v3439_v25  ;;  %8910 = vmatmul.mubr.f32.gmra.mxu0 %v3279_v28 }
 0x40e   : > { %15136 = vst [vmem:[#allocation94_spill] sm:$0xff] %v12340_v10  ;;  %8966 = vmatmul.mubr.f32.gmra.mxu1 %v3440_v55 }
 0x40f   : > { %15137 = vst [vmem:[#allocation97_spill] sm:$0xff] %v12343_v34 }
 0x47b   : > { %v8778_v31 = vpop.f32.mrf.mxu0 }
 0x47c   : > { %v3651_v42 = vmul.f32 0.16666667, %v8778_v31  ;;  %v8834_v51 = vpop.f32.mrf.mxu1 }
 0x47d   : > { %v3812_v3 = vmul.f32 0.16666667, %v8834_v51  ;;  %v3571_v20 = vpop.f32.mrf.mxu0 }
 0x47e   : > { %v12346_v5 = vadd.f32 %v3651_v42, %v12092_v19  ;;  %v3650_v39 = vmul.f32 0.16666667, %v3571_v20  ;;  %v3732_v63 = vpop.f32.mrf.mxu1 }
 0x47f   : > { %v12349_v38 = vadd.f32 %v3812_v3, %v12095_v26  ;;  %v3811_v9 = vmul.f32 0.16666667, %v3732_v63 }
 0x480   : > { %15138 = vst [vmem:[#allocation36_spill] sm:$0xff] %v12346_v5  ;;  %v12352_v49 = vadd.f32 %v3650_v39, %v12098_v32 }
 0x481   : > { %15139 = vst [vmem:[#allocation99_spill] sm:$0xff] %v12349_v38  ;;  %v12355_v28 = vadd.f32 %v3811_v9, %v12101_v24 }
 0x482   : > { %15140 = vst [vmem:[#allocation38_spill] sm:$0xff] %v12352_v49  ;;  %9000 = vmatprep.mubr.f32.mxu0 %v12352_v49 }
 0x483   : > { %15141 = vst [vmem:[#allocation41_spill] sm:$0xff] %v12355_v28  ;;  %v12357_v55 = vpop.f32.mrf.mxu0  ;;  %9056 = vmatprep.mubr.f32.mxu1 %v12355_v28 }
 0x484   : > { %v12360_v52 = vpop.f32.mrf.mxu1 }
 0x485   : > { %v12363_v19 = vpop.f32.mrf.mxu0 }
 0x486   : > { %v12365_v18 = vpop.f32.mrf.mxu1 }
 0x48a   : > { %v12367_v26 = vpop.f32.mrf.mxu0  ;;  %v12369_v25 = vpop.f32.mrf.mxu1 }
 0x48c   : > { %v12371_v32 = vpop.f32.mrf.mxu0  ;;  %v12373_v24 = vpop.f32.mrf.mxu1 }
 0x490   : > { %v12375_v31 = vpop.f32.mrf.mxu0 }
 0x491   : > { %v12377_v42 = vpop.f32.mrf.mxu1 }
 0x492   : > { %v12379_v51 = vpop.f32.mrf.mxu0 }
 0x493   : > { %v12381_v3 = vpop.f32.mrf.mxu1 }
 0x497   : > { %v8790_v20 = vpop.f32.mrf.mxu0 }
 0x498   : > { %v8846_v39 = vpop.f32.mrf.mxu1 }
 0x499   : > { %v12383_v63 = vpop.f32.mrf.mxu0 }
 0x49a   : > { %v12385_v9 = vpop.f32.mrf.mxu1 }
 0x49e   : > { %v8793_v50 = vpop.f32.mrf.mxu0 }
 0x49f   : > { %v8849_v14 = vpop.f32.mrf.mxu1 }
 0x4a0   : > { %v3621_v11 = vpop.f32.mrf.mxu0 }
 0x4a1   : > { %v3782_v4 = vpop.f32.mrf.mxu1 }
 0x4a5   : > { %v8796_v0 = vpop.f32.mrf.mxu0  ;;  %v8852_v48 = vpop.f32.mrf.mxu1 }
 0x4a6   : > { %v3663_v58 = vmul.f32 0.16666667, %v8796_v0  ;;  %v3824_v10 = vmul.f32 0.16666667, %v8852_v48 }
 0x4a7   : > { %v3631_v27 = vpop.f32.mrf.mxu0  ;;  %v3792_v59 = vpop.f32.mrf.mxu1 }
 0x4a8   : > { %v3662_v28 = vmul.f32 0.16666667, %v3631_v27 }
 0x4ab   : > { %v8799_v17 = vpop.f32.mrf.mxu0  ;;  %v8855_v41 = vpop.f32.mrf.mxu1 }
 0x4ac   : > { %v3665_v22 = vmul.f32 0.16666667, %v8799_v17  ;;  %v3826_v6 = vmul.f32 0.16666667, %v8855_v41  ;;  %v3823_v17 = vmul.f32 0.16666667, %v3792_v59  ;;  %v12408_v59 = vadd.f32 %v3824_v10, %v12214_v61 }
 0x4ad   : > { %v3641_v15 = vpop.f32.mrf.mxu0  ;;  %v3802_v34 = vpop.f32.mrf.mxu1  ;;  %v3821_v61 = vmul.f32 0.16666667, %v3782_v4 }
 0x4ae   : > { %v12388_v53 = vadd.f32 %v3665_v22, %v12229_v45  ;;  %v3664_v13 = vmul.f32 0.16666667, %v3641_v15  ;;  %v12391_v37 = vadd.f32 %v3826_v6, %v12234_v43  ;;  %v3825_v56 = vmul.f32 0.16666667, %v3802_v34  ;;  %15146 = vst [vmem:[#allocation52_spill] sm:$0xff] %v12408_v59 }
 0x4af   : > { %v3661_v45 = vmul.f32 0.16666667, %v8793_v50  ;;  %v12403_v43 = vadd.f32 %v3663_v58, %v12209_v57  ;;  %v3660_v50 = vmul.f32 0.16666667, %v3621_v11  ;;  %v12415_v57 = vadd.f32 %v3662_v28, %v12219_v8 }
 0x4b0   : > { %15142 = vst [vmem:[#allocation44_spill] sm:$0xff] %v12388_v53  ;;  %15143 = vst [vmem:[#allocation45_spill] sm:$0xff] %v12391_v37  ;;  %v12394_v49 = vadd.f32 %v3664_v13, %v12239_v1  ;;  %8968 = vmatprep.subr.mxu0 %v12388_v53  ;;  %v12398_v41 = vadd.f32 %v3825_v56, %v12243_v21  ;;  %9024 = vmatprep.subr.mxu1 %v12391_v37  ;;  %v3822_v1 = vmul.f32 0.16666667, %v8849_v14 }
 0x4b1   : > { %v8890_v0 = vpop.f32.mrf.mxu0  ;;  %8969 = vmatpush3.msra.mxu0 %v12388_v53  ;;  %v8946_v27 = vpop.f32.mrf.mxu1  ;;  %9025 = vmatpush3.msra.mxu1 %v12391_v37  ;;  %v12425_v14 = vadd.f32 %v3823_v17, %v12223_v2  ;;  %v3659_v8 = vmul.f32 0.16666667, %v8790_v20  ;;  %v3820_v2 = vmul.f32 0.16666667, %v8846_v39  ;;  %v3658_v56 = vmul.f32 0.16666667, %v12383_v63 }
 0x4b2   : > { %15144 = vst [vmem:[#allocation48_spill] sm:$0xff] %v12394_v49  ;;  %15145 = vst [vmem:[#allocation50_spill] sm:$0xff] %v12398_v41  ;;  %v3973_v48 = vmul.f32 0.16666667, %v8890_v0  ;;  %8970 = vmatprep.subr.mxu0 %v12394_v49  ;;  %v4134_v21 = vmul.f32 0.16666667, %v8946_v27  ;;  %9026 = vmatprep.subr.mxu1 %v12398_v41  ;;  %v12458_v34 = vadd.f32 %v3821_v61, %v12203_v7 }
 0x4b3   : > { %v12410_v6 = vpop.f32.mrf.mxu0  ;;  %8971 = vmatpush3.msra.mxu0 %v12394_v49  ;;  %v12420_v13 = vpop.f32.mrf.mxu1  ;;  %9027 = vmatpush3.msra.mxu1 %v12398_v41  ;;  %v12466_v20 = vadd.f32 %v3659_v8, %v12169_v16  ;;  %v3818_v7 = vmul.f32 0.16666667, %v12377_v42  ;;  %v12474_v63 = vadd.f32 %v3820_v2, %v12174_v30  ;;  %v3656_v16 = vmul.f32 0.16666667, %v12379_v51  ;;  %v15162_v41 = vld [vmem:[#allocation92_spill] sm:$0xff] }
 0x4b4   : > { %15147 = vst [vmem:[#allocation53_spill] sm:$0xff] %v12410_v6  ;;  %v12418_v22 = vadd.f32 %v3973_v48, %v12249_v54  ;;  %15149 = vst [vmem:[#allocation55_spill] sm:$0xff] %v12420_v13  ;;  %8972 = vmatprep.subr.mxu0 %v12403_v43  ;;  %v12428_v58 = vadd.f32 %v4134_v21, %v12253_v62  ;;  %9028 = vmatprep.subr.mxu1 %v12408_v59  ;;  %v3817_v30 = vmul.f32 0.16666667, %v12381_v3 }
 0x4b5   : > { %v12430_v11 = vpop.f32.mrf.mxu0  ;;  %8973 = vmatpush3.msra.mxu0 %v12403_v43  ;;  %v12435_v54 = vadd.f32 %v3661_v45, %v12189_v46  ;;  %9029 = vmatpush3.msra.mxu1 %v12408_v59  ;;  %v12442_v62 = vadd.f32 %v3822_v1, %v12194_v33  ;;  %v12450_v46 = vadd.f32 %v3660_v50, %v12199_v12  ;;  %v3819_v33 = vmul.f32 0.16666667, %v12385_v9 }
 0x4b6   : > { %15148 = vst [vmem:[#allocation54_spill] sm:$0xff] %v12418_v22  ;;  %15150 = vst [vmem:[#allocation56_spill] sm:$0xff] %v12428_v58  ;;  %v12437_v15 = vpop.f32.mrf.mxu1  ;;  %8974 = vmatprep.subr.mxu0 %v12415_v57  ;;  %9030 = vmatprep.subr.mxu1 %v12425_v14  ;;  %v3657_v12 = vmul.f32 0.16666667, %v12375_v31  ;;  %v12482_v31 = vadd.f32 %v3658_v56, %v12179_v23  ;;  %v3655_v23 = vmul.f32 0.16666667, %v12367_v26 }
 0x4b7   : > { %v12444_v4 = vpop.f32.mrf.mxu0  ;;  %8975 = vmatpush3.msra.mxu0 %v12415_v57  ;;  %9031 = vmatpush3.msra.mxu1 %v12425_v14  ;;  %v12490_v42 = vadd.f32 %v3819_v33, %v12183_v29  ;;  %v3816_v29 = vmul.f32 0.16666667, %v12369_v25  ;;  %v12506_v3 = vadd.f32 %v3818_v7, %v12154_v40  ;;  %v12514_v26 = vadd.f32 %v3656_v16, %v12159_v44  ;;  %v15154_v7 = vld [vmem:[#allocation34_spill] sm:$0xff]  ;;  %v15159_v58 = vld [vmem:[#allocation41_spill] sm:$0xff]  ;;  %v15160_v22 = vld [vmem:[#allocation95_spill] sm:$0xff] }
 0x4b8   : > { %v12452_v10 = vpop.f32.mrf.mxu1  ;;  %8976 = vmatprep.subr.mxu0 %v12435_v54  ;;  %9032 = vmatprep.subr.mxu1 %v12442_v62  ;;  %v12498_v51 = vadd.f32 %v3657_v12, %v12149_v36  ;;  %v3654_v36 = vmul.f32 0.16666667, %v12371_v32  ;;  %v3815_v40 = vmul.f32 0.16666667, %v12373_v24  ;;  %v12522_v25 = vadd.f32 %v3817_v30, %v12163_v47  ;;  %v15155_v30 = vld [vmem:[#allocation73_spill] sm:$0xff] }
 0x4b9   : > { %v12460_v28 = vpop.f32.mrf.mxu0  ;;  %8977 = vmatpush3.msra.mxu0 %v12435_v54  ;;  %9033 = vmatpush3.msra.mxu1 %v12442_v62  ;;  %v3653_v44 = vmul.f32 0.16666667, %v12357_v55  ;;  %v12530_v32 = vadd.f32 %v3655_v23, %v12129_v60  ;;  %v3814_v47 = vmul.f32 0.16666667, %v12360_v52  ;;  %v12538_v24 = vadd.f32 %v3816_v29, %v12134_v35  ;;  %v15151_v55 = vld [vmem:[#allocation20_spill] sm:$0xff]  ;;  %v15152_v52 = vld [vmem:[#allocation75_spill] sm:$0xff] }
 0x4ba   : > { %v12468_v39 = vpop.f32.mrf.mxu1  ;;  %8978 = vmatprep.subr.mxu0 %v12450_v46  ;;  %9034 = vmatprep.subr.mxu1 %v12458_v34  ;;  %v3652_v60 = vmul.f32 0.16666667, %v12363_v19  ;;  %v12546_v61 = vadd.f32 %v3654_v36, %v15151_v55  ;;  %v3813_v35 = vmul.f32 0.16666667, %v12365_v18  ;;  %v12554_v2 = vadd.f32 %v3815_v40, %v15152_v52  ;;  %v15153_v19 = vld [vmem:[#allocation71_spill] sm:$0xff] }
 0x4bb   : > { %v12476_v9 = vpop.f32.mrf.mxu0  ;;  %8979 = vmatpush3.msra.mxu0 %v12450_v46  ;;  %9035 = vmatpush3.msra.mxu1 %v12458_v34  ;;  %v12561_v33 = vadd.f32 %v3653_v44, %v15153_v19  ;;  %v12568_v18 = vadd.f32 %v3814_v47, %v15154_v7  ;;  %v15156_v36 = vld [vmem:[#allocation35_spill] sm:$0xff]  ;;  %v15158_v7 = vld [vmem:[#allocation38_spill] sm:$0xff] }
 0x4bc   : > { %v12484_v17 = vpop.f32.mrf.mxu1  ;;  %8980 = vmatprep.subr.mxu0 %v12466_v20  ;;  %9036 = vmatprep.subr.mxu1 %v12474_v63  ;;  %v12575_v23 = vadd.f32 %v3652_v60, %v15155_v30  ;;  %v12582_v40 = vadd.f32 %v3813_v35, %v15156_v36 }
 0x4bd   : > { %v12492_v0 = vpop.f32.mrf.mxu0  ;;  %8981 = vmatpush3.msra.mxu0 %v12466_v20  ;;  %9037 = vmatpush3.msra.mxu1 %v12474_v63 }
 0x4be   : > { %v12500_v45 = vpop.f32.mrf.mxu1  ;;  %8982 = vmatprep.subr.mxu0 %v12482_v31  ;;  %9038 = vmatprep.subr.mxu1 %v12490_v42  ;;  %15157 = vst [vmem:[#allocation57_spill] sm:$0xff] %v12582_v40 }
 0x4bf   : > { %v12508_v48 = vpop.f32.mrf.mxu0  ;;  %8983 = vmatpush3.msra.mxu0 %v12482_v31  ;;  %9039 = vmatpush3.msra.mxu1 %v12490_v42 }
 0x4c0   : > { %v12516_v27 = vpop.f32.mrf.mxu1  ;;  %8984 = vmatprep.subr.mxu0 %v12498_v51  ;;  %9040 = vmatprep.subr.mxu1 %v12506_v3 }
 0x4c1   : > { %v12524_v1 = vpop.f32.mrf.mxu0  ;;  %8985 = vmatpush3.msra.mxu0 %v12498_v51  ;;  %9041 = vmatpush3.msra.mxu1 %v12506_v3 }
 0x4c2   : > { %v12532_v21 = vpop.f32.mrf.mxu1  ;;  %8986 = vmatprep.subr.mxu0 %v12514_v26  ;;  %9042 = vmatprep.subr.mxu1 %v12522_v25 }
 0x4c3   : > { %v12540_v50 = vpop.f32.mrf.mxu0  ;;  %8987 = vmatpush3.msra.mxu0 %v12514_v26  ;;  %9043 = vmatpush3.msra.mxu1 %v12522_v25 }
 0x4c4   : > { %v12548_v8 = vpop.f32.mrf.mxu1  ;;  %8988 = vmatprep.subr.mxu0 %v12530_v32  ;;  %9044 = vmatprep.subr.mxu1 %v12538_v24 }
 0x4c5   : > { %v12556_v56 = vpop.f32.mrf.mxu0  ;;  %8989 = vmatpush3.msra.mxu0 %v12530_v32  ;;  %9045 = vmatpush3.msra.mxu1 %v12538_v24 }
 0x4c6   : > { %v12563_v12 = vpop.f32.mrf.mxu1  ;;  %8990 = vmatprep.subr.mxu0 %v12546_v61  ;;  %9046 = vmatprep.subr.mxu1 %v12554_v2 }
 0x4c7   : > { %v12570_v16 = vpop.f32.mrf.mxu0  ;;  %8991 = vmatpush3.msra.mxu0 %v12546_v61  ;;  %9047 = vmatpush3.msra.mxu1 %v12554_v2 }
 0x4c8   : > { %v12577_v29 = vpop.f32.mrf.mxu1  ;;  %8992 = vmatprep.subr.mxu0 %v12561_v33  ;;  %9048 = vmatprep.subr.mxu1 %v12568_v18 }
 0x4c9   : > { %v8908_v44 = vpop.f32.mrf.mxu0  ;;  %8993 = vmatpush3.msra.mxu0 %v12561_v33  ;;  %9049 = vmatpush3.msra.mxu1 %v12568_v18 }
 0x4ca   : > { %v8964_v47 = vpop.f32.mrf.mxu1  ;;  %8994 = vmatprep.subr.mxu0 %v12575_v23  ;;  %9050 = vmatprep.subr.mxu1 %v12582_v40 }
 0x4cb   : > { %v3953_v60 = vpop.f32.mrf.mxu0  ;;  %8995 = vmatpush3.msra.mxu0 %v12575_v23  ;;  %9051 = vmatpush3.msra.mxu1 %v12582_v40 }
 0x4cc   : > { %v4114_v55 = vpop.f32.mrf.mxu1  ;;  %8996 = vmatprep.subr.mxu0 %v12346_v5  ;;  %9052 = vmatprep.subr.mxu1 %v12349_v38 }
 0x4cd   : > { %v8911_v35 = vpop.f32.mrf.mxu0  ;;  %8997 = vmatpush3.msra.mxu0 %v12346_v5  ;;  %9053 = vmatpush3.msra.mxu1 %v12349_v38 }
 0x4ce   : > { %v3987_v52 = vmul.f32 0.16666667, %v8911_v35  ;;  %v8967_v19 = vpop.f32.mrf.mxu1  ;;  %8998 = vmatprep.subr.mxu0 %v15158_v7  ;;  %9054 = vmatprep.subr.mxu1 %v15159_v58  ;;  %v3985_v35 = vmul.f32 0.16666667, %v8908_v44 }
 0x4cf   : > { %v4148_v30 = vmul.f32 0.16666667, %v8967_v19  ;;  %v3963_v36 = vpop.f32.mrf.mxu0  ;;  %8999 = vmatpush3.msra.mxu0 %v15158_v7  ;;  %9055 = vmatpush3.msra.mxu1 %v15159_v58  ;;  %v4146_v19 = vmul.f32 0.16666667, %v8964_v47  ;;  %v15164_v7 = vld [vmem:[#allocation94_spill] sm:$0xff]  ;;  %v15170_v47 = vld [vmem:[#allocation88_spill] sm:$0xff] }
 0x4d0   : > { %v12599_v37 = vadd.f32 %v3987_v52, %v15160_v22  ;;  %v3986_v53 = vmul.f32 0.16666667, %v3963_v36  ;;  %v4124_v13 = vpop.f32.mrf.mxu1  ;;  %9001 = vmatmul.mubr.f32.vlgmr.msra.gmra.mxu0 %v12346_v5  ;;  %9057 = vmatmul.mubr.f32.vlgmr.msra.gmra.mxu1 %v12349_v38  ;;  %v15166_v22 = vld [vmem:[#allocation97_spill] sm:$0xff] }
 0x4d1   : > { %v12604_v6 = vadd.f32 %v4148_v30, %v15162_v41  ;;  %v4147_v49 = vmul.f32 0.16666667, %v4124_v13  ;;  %9003 = vmatprep.mubr.f32.mxu0 %v12575_v23  ;;  %9059 = vmatprep.mubr.f32.mxu1 %v12582_v40  ;;  %v3984_v41 = vmul.f32 0.16666667, %v3953_v60  ;;  %v15168_v13 = vld [vmem:[#allocation91_spill] sm:$0xff]  ;;  %v15174_v36 = vld [vmem:[#allocation93_spill] sm:$0xff] }
 0x4d2   : > { %15161 = vst [vmem:[#allocation58_spill] sm:$0xff] %v12599_v37  ;;  %v12609_v59 = vadd.f32 %v3986_v53, %v15164_v7  ;;  %9080 = vmatprep.subr.mxu0 %v12599_v37  ;;  %v12621_v44 = vadd.f32 %v3985_v35, %v15168_v13  ;;  %v4145_v53 = vmul.f32 0.16666667, %v4114_v55  ;;  %v3983_v60 = vmul.f32 0.16666667, %v12556_v56  ;;  %v15172_v55 = vld [vmem:[#allocation90_spill] sm:$0xff] }
 0x4d3   : > { %15163 = vst [vmem:[#allocation59_spill] sm:$0xff] %v12604_v6  ;;  %v12614_v52 = vadd.f32 %v4147_v49, %v15166_v22  ;;  %9136 = vmatprep.subr.mxu1 %v12604_v6  ;;  %9081 = vmatpush3.msra.mxu0 %v12599_v37  ;;  %v12626_v49 = vadd.f32 %v4146_v19, %v15170_v47  ;;  %v4144_v7 = vmul.f32 0.16666667, %v12563_v12  ;;  %v3982_v56 = vmul.f32 0.16666667, %v12570_v16  ;;  %v15176_v12 = vld [vmem:[#allocation87_spill] sm:$0xff] }
 0x4d4   : > { %15165 = vst [vmem:[#allocation60_spill] sm:$0xff] %v12609_v59  ;;  %9137 = vmatpush3.msra.mxu1 %v12604_v6  ;;  %9082 = vmatprep.subr.mxu0 %v12609_v59  ;;  %15169 = vst [vmem:[#allocation62_spill] sm:$0xff] %v12621_v44  ;;  %v12635_v30 = vadd.f32 %v3984_v41, %v15172_v55  ;;  %v12640_v35 = vadd.f32 %v4145_v53, %v15174_v36  ;;  %v4143_v22 = vmul.f32 0.16666667, %v12577_v29  ;;  %v15178_v41 = vld [vmem:[#allocation84_spill] sm:$0xff]  ;;  %v15180_v29 = vld [vmem:[#allocation86_spill] sm:$0xff] }
 0x4d5   : > { %15167 = vst [vmem:[#allocation61_spill] sm:$0xff] %v12614_v52  ;;  %9138 = vmatprep.subr.mxu1 %v12614_v52  ;;  %9083 = vmatpush3.msra.mxu0 %v12609_v59  ;;  %15171 = vst [vmem:[#allocation96_spill] sm:$0xff] %v12626_v49  ;;  %v12648_v19 = vadd.f32 %v3983_v60, %v15176_v12  ;;  %v12654_v13 = vadd.f32 %v4144_v7, %v15178_v41  ;;  %v3981_v16 = vmul.f32 0.16666667, %v12524_v1  ;;  %v15182_v60 = vld [vmem:[#allocation89_spill] sm:$0xff]  ;;  %v15228_v40 = vld [vmem:[#allocation56_spill] sm:$0xff] }
 0x4d6   : > { %9139 = vmatpush3.msra.mxu1 %v12614_v52  ;;  %9004 = vmatmul.mubr.f32.gmra.mxu0 %v12561_v33  ;;  %15173 = vst [vmem:[#allocation98_spill] sm:$0xff] %v12635_v30  ;;  %15175 = vst [vmem:[#allocation101_spill] sm:$0xff] %v12640_v35  ;;  %v4142_v53 = vmul.f32 0.16666667, %v12532_v21  ;;  %v12663_v47 = vadd.f32 %v3982_v56, %v15180_v29  ;;  %v12668_v7 = vadd.f32 %v4143_v22, %v15182_v60  ;;  %v15184_v21 = vld [vmem:[#allocation83_spill] sm:$0xff]  ;;  %v15186_v56 = vld [vmem:[#allocation80_spill] sm:$0xff] }
 0x4d7   : > { %9060 = vmatmul.mubr.f32.gmra.mxu1 %v12568_v18  ;;  %9084 = vmatprep.subr.mxu0 %v12621_v44  ;;  %15177 = vst [vmem:[#allocation65_spill] sm:$0xff] %v12648_v19  ;;  %15179 = vst [vmem:[#allocation103_spill] sm:$0xff] %v12654_v13  ;;  %v3980_v1 = vmul.f32 0.16666667, %v12540_v50  ;;  %v12676_v55 = vadd.f32 %v3981_v16, %v15184_v21  ;;  %v4141_v36 = vmul.f32 0.16666667, %v12548_v8 }
 0x4d8   : > { %9140 = vmatprep.subr.mxu1 %v12626_v49  ;;  %9006 = vmatprep.mubr.f32.mxu0 %v12546_v61  ;;  %15181 = vst [vmem:[#allocation100_spill] sm:$0xff] %v12663_v47  ;;  %15183 = vst [vmem:[#allocation102_spill] sm:$0xff] %v12668_v7  ;;  %v12682_v12 = vadd.f32 %v4142_v53, %v15186_v56  ;;  %v3979_v50 = vmul.f32 0.16666667, %v12492_v0  ;;  %v4140_v22 = vmul.f32 0.16666667, %v12500_v45 }
 0x4d9   : > { %9062 = vmatprep.mubr.f32.mxu1 %v12554_v2  ;;  %9085 = vmatpush3.msra.mxu0 %v12621_v44  ;;  %15185 = vst [vmem:[#allocation68_spill] sm:$0xff] %v12676_v55  ;;  %v15188_v8 = vld [vmem:[#allocation82_spill] sm:$0xff]  ;;  %v15190_v16 = vld [vmem:[#allocation85_spill] sm:$0xff]  ;;  %v3978_v0 = vmul.f32 0.16666667, %v12508_v48  ;;  %v15192_v45 = vld [vmem:[#allocation76_spill] sm:$0xff] }
 0x4da   : > { %9141 = vmatpush3.msra.mxu1 %v12626_v49  ;;  %9086 = vmatprep.subr.mxu0 %v12635_v30  ;;  %15187 = vst [vmem:[#allocation105_spill] sm:$0xff] %v12682_v12  ;;  %v12691_v41 = vadd.f32 %v3980_v1, %v15188_v8  ;;  %v12696_v53 = vadd.f32 %v4141_v36, %v15190_v16  ;;  %v4139_v60 = vmul.f32 0.16666667, %v12516_v27  ;;  %v15194_v1 = vld [vmem:[#allocation18_spill] sm:$0xff]  ;;  %v3977_v48 = vmul.f32 0.16666667, %v12460_v28 }
 0x4db   : > { %9142 = vmatprep.subr.mxu1 %v12640_v35  ;;  %9087 = vmatpush3.msra.mxu0 %v12635_v30  ;;  %v12704_v29 = vadd.f32 %v3979_v50, %v15192_v45  ;;  %v12710_v21 = vadd.f32 %v4140_v22, %v15194_v1  ;;  %v4138_v36 = vmul.f32 0.16666667, %v12468_v39  ;;  %v15196_v27 = vld [vmem:[#allocation78_spill] sm:$0xff]  ;;  %v15198_v50 = vld [vmem:[#allocation81_spill] sm:$0xff]  ;;  %v3976_v28 = vmul.f32 0.16666667, %v12476_v9 }
 0x4dc   : > { %9143 = vmatpush3.msra.mxu1 %v12640_v35  ;;  %9007 = vmatmul.mubr.f32.gmra.mxu0 %v12530_v32  ;;  %15189 = vst [vmem:[#allocation107_spill] sm:$0xff] %v12691_v41  ;;  %15191 = vst [vmem:[#allocation104_spill] sm:$0xff] %v12696_v53  ;;  %v12719_v56 = vadd.f32 %v3978_v0, %v15196_v27  ;;  %v12724_v22 = vadd.f32 %v4139_v60, %v15198_v50  ;;  %v15200_v39 = vld [vmem:[#allocation77_spill] sm:$0xff]  ;;  %v4137_v16 = vmul.f32 0.16666667, %v12484_v17  ;;  %v15202_v0 = vld [vmem:[#allocation16_spill] sm:$0xff] }
 0x4dd   : > { %9063 = vmatmul.mubr.f32.gmra.mxu1 %v12538_v24  ;;  %9088 = vmatprep.subr.mxu0 %v12648_v19  ;;  %15193 = vst [vmem:[#allocation27_spill] sm:$0xff] %v12704_v29  ;;  %15195 = vst [vmem:[#allocation106_spill] sm:$0xff] %v12710_v21  ;;  %v12732_v8 = vadd.f32 %v3977_v48, %v15200_v39  ;;  %v12738_v45 = vadd.f32 %v4138_v36, %v15202_v0  ;;  %v3975_v9 = vmul.f32 0.16666667, %v12430_v11  ;;  %v15204_v17 = vld [vmem:[#allocation79_spill] sm:$0xff]  ;;  %v15206_v48 = vld [vmem:[#allocation17_spill] sm:$0xff] }
 0x4de   : > { %9144 = vmatprep.subr.mxu1 %v12654_v13  ;;  %9009 = vmatprep.mubr.f32.mxu0 %v12514_v26  ;;  %15197 = vst [vmem:[#allocation109_spill] sm:$0xff] %v12719_v56  ;;  %15199 = vst [vmem:[#allocation111_spill] sm:$0xff] %v12724_v22  ;;  %v4136_v60 = vmul.f32 0.16666667, %v12437_v15  ;;  %v12747_v1 = vadd.f32 %v3976_v28, %v15204_v17  ;;  %v12752_v36 = vadd.f32 %v4137_v16, %v15206_v48  ;;  %v15208_v15 = vld [vmem:[#allocation29_spill] sm:$0xff]  ;;  %v15210_v28 = vld [vmem:[#allocation22_spill] sm:$0xff] }
 0x4df   : > { %9065 = vmatprep.mubr.f32.mxu1 %v12522_v25  ;;  %9089 = vmatpush3.msra.mxu0 %v12648_v19  ;;  %15201 = vst [vmem:[#allocation31_spill] sm:$0xff] %v12732_v8  ;;  %15203 = vst [vmem:[#allocation108_spill] sm:$0xff] %v12738_v45  ;;  %v3974_v11 = vmul.f32 0.16666667, %v12444_v4  ;;  %v12760_v27 = vadd.f32 %v3975_v9, %v15208_v15  ;;  %v4135_v50 = vmul.f32 0.16666667, %v12452_v10 }
 0x4e0   : > { %9145 = vmatpush3.msra.mxu1 %v12654_v13  ;;  %9090 = vmatprep.subr.mxu0 %v12663_v47  ;;  %15205 = vst [vmem:[#allocation110_spill] sm:$0xff] %v12747_v1  ;;  %15207 = vst [vmem:[#allocation49_spill] sm:$0xff] %v12752_v36  ;;  %v12766_v39 = vadd.f32 %v4136_v60, %v15210_v28  ;;  %v15212_v4 = vld [vmem:[#allocation52_spill] sm:$0xff]  ;;  %v15213_v16 = vld [vmem:[#allocation74_spill] sm:$0xff] }
 0x4e1   : > { %9146 = vmatprep.subr.mxu1 %v12668_v7  ;;  %9091 = vmatpush3.msra.mxu0 %v12663_v47  ;;  %15209 = vst [vmem:[#allocation37_spill] sm:$0xff] %v12760_v27  ;;  %v12773_v0 = vadd.f32 %v3974_v11, %v15213_v16  ;;  %v15215_v10 = vld [vmem:[#allocation48_spill] sm:$0xff]  ;;  %v15216_v9 = vld [vmem:[#allocation53_spill] sm:$0xff]  ;;  %v15217_v48 = vld [vmem:[#allocation15_spill] sm:$0xff] }
 0x4e2   : > { %9147 = vmatpush3.msra.mxu1 %v12668_v7  ;;  %9010 = vmatmul.mubr.f32.gmra.mxu0 %v12498_v51  ;;  %15211 = vst [vmem:[#allocation47_spill] sm:$0xff] %v12766_v39  ;;  %v3972_v17 = vmul.f32 0.16666667, %v15216_v9  ;;  %v12779_v60 = vadd.f32 %v4135_v50, %v15217_v48  ;;  %v15219_v15 = vld [vmem:[#allocation50_spill] sm:$0xff]  ;;  %v15220_v28 = vld [vmem:[#allocation55_spill] sm:$0xff]  ;;  %v15221_v11 = vld [vmem:[#allocation44_spill] sm:$0xff] }
 0x4e3   : > { %9066 = vmatmul.mubr.f32.gmra.mxu1 %v12506_v3  ;;  %9092 = vmatprep.subr.mxu0 %v12676_v55  ;;  %15214 = vst [vmem:[#allocation26_spill] sm:$0xff] %v12773_v0  ;;  %v4133_v38 = vmul.f32 0.16666667, %v15220_v28  ;;  %v15222_v50 = vld [vmem:[#allocation21_spill] sm:$0xff]  ;;  %v15225_v48 = vld [vmem:[#allocation54_spill] sm:$0xff]  ;;  %v15226_v28 = vld [vmem:[#allocation72_spill] sm:$0xff] }
 0x4e4   : > { %9148 = vmatprep.subr.mxu1 %v12682_v12  ;;  %9012 = vmatprep.mubr.f32.mxu0 %v12482_v31  ;;  %15218 = vst [vmem:[#allocation39_spill] sm:$0xff] %v12779_v60  ;;  %v12791_v16 = vadd.f32 %v3972_v17, %v15222_v50  ;;  %v15224_v9 = vld [vmem:[#allocation45_spill] sm:$0xff]  ;;  %v15230_v50 = vld [vmem:[#allocation38_spill] sm:$0xff] }
 0x4e5   : > { %9068 = vmatprep.mubr.f32.mxu1 %v12490_v42  ;;  %9093 = vmatpush3.msra.mxu0 %v12676_v55  ;;  %v12796_v5 = vadd.f32 %v4133_v38, %v15226_v28  ;;  %v4793_v28 = vmul.f32 2.0, %v15230_v50 }
 0x4e6   : > { %9149 = vmatpush3.msra.mxu1 %v12682_v12  ;;  %9094 = vmatprep.subr.mxu0 %v12691_v41  ;;  %15223 = vst [vmem:[#allocation112_spill] sm:$0xff] %v12791_v16 }
 0x4e7   : > { %9150 = vmatprep.subr.mxu1 %v12696_v53  ;;  %9095 = vmatpush3.msra.mxu0 %v12691_v41  ;;  %15227 = vst [vmem:[#allocation113_spill] sm:$0xff] %v12796_v5 }
 0x4e8   : > { %9151 = vmatpush3.msra.mxu1 %v12696_v53  ;;  %9013 = vmatmul.mubr.f32.gmra.mxu0 %v12466_v20 }
 0x4e9   : > { %9069 = vmatmul.mubr.f32.gmra.mxu1 %v12474_v63  ;;  %9096 = vmatprep.subr.mxu0 %v12704_v29 }
 0x4ea   : > { %9152 = vmatprep.subr.mxu1 %v12710_v21  ;;  %9015 = vmatprep.mubr.f32.mxu0 %v12450_v46 }
 0x4eb   : > { %9071 = vmatprep.mubr.f32.mxu1 %v12458_v34  ;;  %9097 = vmatpush3.msra.mxu0 %v12704_v29 }
 0x4ec   : > { %9153 = vmatpush3.msra.mxu1 %v12710_v21  ;;  %9098 = vmatprep.subr.mxu0 %v12719_v56 }
 0x4ed   : > { %9154 = vmatprep.subr.mxu1 %v12724_v22  ;;  %9099 = vmatpush3.msra.mxu0 %v12719_v56 }
 0x4ee   : > { %9155 = vmatpush3.msra.mxu1 %v12724_v22  ;;  %9016 = vmatmul.mubr.f32.gmra.mxu0 %v12435_v54 }
 0x4ef   : > { %9072 = vmatmul.mubr.f32.gmra.mxu1 %v12442_v62  ;;  %9100 = vmatprep.subr.mxu0 %v12732_v8 }
 0x4f0   : > { %9156 = vmatprep.subr.mxu1 %v12738_v45  ;;  %9018 = vmatprep.mubr.f32.mxu0 %v12415_v57 }
 0x4f1   : > { %9074 = vmatprep.mubr.f32.mxu1 %v12425_v14  ;;  %9101 = vmatpush3.msra.mxu0 %v12732_v8 }
 0x4f2   : > { %9157 = vmatpush3.msra.mxu1 %v12738_v45  ;;  %9102 = vmatprep.subr.mxu0 %v12747_v1 }
 0x4f3   : > { %9158 = vmatprep.subr.mxu1 %v12752_v36  ;;  %9103 = vmatpush3.msra.mxu0 %v12747_v1 }
 0x4f4   : > { %9159 = vmatpush3.msra.mxu1 %v12752_v36  ;;  %9019 = vmatmul.mubr.f32.gmra.mxu0 %v12403_v43 }
 0x4f5   : > { %9075 = vmatmul.mubr.f32.gmra.mxu1 %v15212_v4  ;;  %9104 = vmatprep.subr.mxu0 %v12760_v27 }
 0x4f6   : > { %9160 = vmatprep.subr.mxu1 %v12766_v39  ;;  %9021 = vmatprep.mubr.f32.mxu0 %v15215_v10 }
 0x4f7   : > { %9077 = vmatprep.mubr.f32.mxu1 %v15219_v15  ;;  %9105 = vmatpush3.msra.mxu0 %v12760_v27 }
 0x4f8   : > { %9161 = vmatpush3.msra.mxu1 %v12766_v39  ;;  %9106 = vmatprep.subr.mxu0 %v12773_v0 }
 0x4f9   : > { %9162 = vmatprep.subr.mxu1 %v12779_v60  ;;  %9107 = vmatpush3.msra.mxu0 %v12773_v0 }
 0x4fa   : > { %9163 = vmatpush3.msra.mxu1 %v12779_v60  ;;  %9022 = vmatmul.mubr.f32.gmra.mxu0 %v15221_v11 }
 0x4fb   : > { %9078 = vmatmul.mubr.f32.gmra.mxu1 %v15224_v9  ;;  %9108 = vmatprep.subr.mxu0 %v15225_v48 }
 0x4fc   : > { %9164 = vmatprep.subr.mxu1 %v15228_v40  ;;  %9109 = vmatpush3.msra.mxu0 %v15225_v48 }
 0x4fd   : > { %9112 = vmatprep.mubr.f32.mxu0 %v12791_v16  ;;  %9165 = vmatpush3.msra.mxu1 %v15228_v40 }
 0x4fe   : > { %9168 = vmatprep.mubr.f32.mxu1 %v12796_v5  ;;  %9110 = vmatprep.subr.mxu0 %v12791_v16 }
 0x4ff   : > { %9166 = vmatprep.subr.mxu1 %v12796_v5  ;;  %9111 = vmatpush3.msra.mxu0 %v12791_v16  ;;  %v4825_v16 = vmul.f32 2.0, %v15159_v58 }
 0x500   : > { %9167 = vmatpush3.msra.mxu1 %v12796_v5  ;;  %9113 = vmatmul.mubr.f32.vlgmr.msra.gmra.mxu0 %v15225_v48 }
 0x501   : > { %9169 = vmatmul.mubr.f32.vlgmr.msra.gmra.mxu1 %v15228_v40  ;;  %9115 = vmatprep.mubr.f32.mxu0 %v12773_v0 }
 0x502   : > { %9171 = vmatprep.mubr.f32.mxu1 %v12779_v60 }
 0x504   : > { %9116 = vmatmul.mubr.f32.gmra.mxu0 %v12760_v27 }
 0x505   : > { %9172 = vmatmul.mubr.f32.gmra.mxu1 %v12766_v39  ;;  %9118 = vmatprep.mubr.f32.mxu0 %v12747_v1 }
 0x506   : > { %9174 = vmatprep.mubr.f32.mxu1 %v12752_v36 }
 0x508   : > { %9119 = vmatmul.mubr.f32.gmra.mxu0 %v12732_v8 }
 0x509   : > { %9175 = vmatmul.mubr.f32.gmra.mxu1 %v12738_v45  ;;  %9121 = vmatprep.mubr.f32.mxu0 %v12719_v56 }
 0x50a   : > { %9177 = vmatprep.mubr.f32.mxu1 %v12724_v22 }
 0x50c   : > { %9122 = vmatmul.mubr.f32.gmra.mxu0 %v12704_v29 }
 0x50d   : > { %9178 = vmatmul.mubr.f32.gmra.mxu1 %v12710_v21  ;;  %9124 = vmatprep.mubr.f32.mxu0 %v12691_v41 }
 0x50e   : > { %9180 = vmatprep.mubr.f32.mxu1 %v12696_v53 }
 0x510   : > { %9125 = vmatmul.mubr.f32.gmra.mxu0 %v12676_v55 }
 0x511   : > { %9181 = vmatmul.mubr.f32.gmra.mxu1 %v12682_v12  ;;  %9127 = vmatprep.mubr.f32.mxu0 %v12663_v47 }
 0x512   : > { %9183 = vmatprep.mubr.f32.mxu1 %v12668_v7 }
 0x514   : > { %9128 = vmatmul.mubr.f32.gmra.mxu0 %v12648_v19  ;;  %v4808_v19 = vmul.f32 2.0, %v15221_v11  ;;  %v4838_v11 = vmul.f32 2.0, %v15212_v4 }
 0x515   : > { %9184 = vmatmul.mubr.f32.gmra.mxu1 %v12654_v13  ;;  %9130 = vmatprep.mubr.f32.mxu0 %v12635_v30  ;;  %v4840_v30 = vmul.f32 2.0, %v15224_v9 }
 0x516   : > { %9186 = vmatprep.mubr.f32.mxu1 %v12640_v35 }
 0x518   : > { %9131 = vmatmul.mubr.f32.gmra.mxu0 %v12621_v44 }
 0x519   : > { %9187 = vmatmul.mubr.f32.gmra.mxu1 %v12626_v49  ;;  %9133 = vmatprep.mubr.f32.mxu0 %v12609_v59 }
 0x51a   : > { %9189 = vmatprep.mubr.f32.mxu1 %v12614_v52  ;;  %v4807_v52 = vmul.f32 2.0, %v15215_v10 }
 0x51c   : > { %9134 = vmatmul.mubr.f32.gmra.mxu0 %v12599_v37 }
 0x51d   : > { %9190 = vmatmul.mubr.f32.gmra.mxu1 %v12604_v6  ;;  %v4839_v6 = vmul.f32 2.0, %v15219_v15 }
 0x590   : > { %v12837_v38 = vpop.f32.mrf.mxu0  ;;  %v12839_v17 = vpop.f32.mrf.mxu1 }
 0x591   : > { %15229 = vst [vmem:[#allocation32_spill] sm:$0xff] %v12839_v17 }
 0x592   : > { %v4279_v5 = vpop.f32.mrf.mxu0  ;;  %v4424_v48 = vpop.f32.mrf.mxu1 }
 0x593   : > { %v12843_v40 = vadd.f32 %v4793_v28, %v4279_v5  ;;  %v12845_v60 = vadd.f32 %v4825_v16, %v4424_v48 }
 0x595   : > { %15231 = vst [vmem:[#allocation40_spill] sm:$0xff] %v12843_v40  ;;  %15232 = vst [vmem:[#allocation63_spill] sm:$0xff] %v12845_v60  ;;  %9224 = vmatprep.mubr.f32.mxu0 %v12843_v40  ;;  %9280 = vmatprep.mubr.f32.mxu1 %v12845_v60  ;;  %v4806_v40 = vmul.f32 2.0, %v12403_v43 }
 0x596   : > { %v12848_v0 = vpop.f32.mrf.mxu0 }
 0x597   : > { %v12851_v39 = vpop.f32.mrf.mxu1 }
 0x598   : > { %v12853_v27 = vpop.f32.mrf.mxu0 }
 0x599   : > { %v12855_v36 = vpop.f32.mrf.mxu1 }
 0x59c   : > { %v12857_v50 = vpop.f32.mrf.mxu0 }
 0x59d   : > { %v12859_v58 = vpop.f32.mrf.mxu1 }
 0x59e   : > { %v12861_v5 = vpop.f32.mrf.mxu0 }
 0x59f   : > { %v12863_v16 = vpop.f32.mrf.mxu1 }
 0x5a2   : > { %v12865_v48 = vpop.f32.mrf.mxu0 }
 0x5a3   : > { %v12867_v28 = vpop.f32.mrf.mxu1 }
 0x5a4   : > { %v12869_v1 = vpop.f32.mrf.mxu0 }
 0x5a5   : > { %v12871_v45 = vpop.f32.mrf.mxu1 }
 0x5a8   : > { %v12873_v8 = vpop.f32.mrf.mxu0 }
 0x5a9   : > { %v12875_v22 = vpop.f32.mrf.mxu1 }
 0x5aa   : > { %v12877_v56 = vpop.f32.mrf.mxu0 }
 0x5ab   : > { %v12879_v21 = vpop.f32.mrf.mxu1 }
 0x5ae   : > { %v9017_v29 = vpop.f32.mrf.mxu0 }
 0x5af   : > { %v9073_v53 = vpop.f32.mrf.mxu1 }
 0x5b0   : > { %v4329_v41 = vpop.f32.mrf.mxu0 }
 0x5b1   : > { %v4474_v12 = vpop.f32.mrf.mxu1 }
 0x5b4   : > { %v9020_v55 = vpop.f32.mrf.mxu0 }
 0x5b5   : > { %v9076_v7 = vpop.f32.mrf.mxu1 }
 0x5b6   : > { %v4339_v47 = vpop.f32.mrf.mxu0  ;;  %v12903_v43 = vadd.f32 %v9076_v7, %v4838_v11 }
 0x5b7   : > { %v4484_v13 = vpop.f32.mrf.mxu1 }
 0x5ba   : > { %v9023_v35 = vpop.f32.mrf.mxu0 }
 0x5bb   : > { %v12883_v49 = vadd.f32 %v9023_v35, %v4808_v19  ;;  %v9079_v44 = vpop.f32.mrf.mxu1 }
 0x5bc   : > { %v12886_v59 = vadd.f32 %v9079_v44, %v4840_v30  ;;  %v4349_v60 = vpop.f32.mrf.mxu0  ;;  %v12898_v44 = vadd.f32 %v9020_v55, %v4806_v40  ;;  %v4805_v30 = vmul.f32 2.0, %v12415_v57  ;;  %v4836_v57 = vmul.f32 2.0, %v12442_v62 }
 0x5bd   : > { %15233 = vst [vmem:[#allocation42_spill] sm:$0xff] %v12883_v49  ;;  %v12890_v37 = vadd.f32 %v4807_v52, %v4349_v60  ;;  %v4494_v17 = vpop.f32.mrf.mxu1  ;;  %9192 = vmatprep.subr.mxu0 %v12883_v49  ;;  %v4837_v52 = vmul.f32 2.0, %v12425_v14  ;;  %v4835_v62 = vmul.f32 2.0, %v12458_v34 }
 0x5be   : > { %15234 = vst [vmem:[#allocation23_spill] sm:$0xff] %v12886_v59  ;;  %v12894_v9 = vadd.f32 %v4839_v6, %v4494_v17  ;;  %9248 = vmatprep.subr.mxu1 %v12886_v59  ;;  %9193 = vmatpush3.msra.mxu0 %v12883_v49  ;;  %v4804_v6 = vmul.f32 2.0, %v12435_v54  ;;  %v12911_v40 = vadd.f32 %v4805_v30, %v4339_v47  ;;  %v4803_v54 = vmul.f32 2.0, %v12450_v46  ;;  %v15255_v49 = vld [vmem:[#allocation60_spill] sm:$0xff] }
 0x5bf   : > { %9249 = vmatpush3.msra.mxu1 %v12886_v59  ;;  %9194 = vmatprep.subr.mxu0 %v12890_v37  ;;  %v12918_v7 = vadd.f32 %v4837_v52, %v4484_v13  ;;  %v12931_v4 = vadd.f32 %v9073_v53, %v4836_v57  ;;  %v4834_v53 = vmul.f32 2.0, %v12474_v63  ;;  %v12946_v60 = vadd.f32 %v4835_v62, %v4474_v12 }
 0x5c0   : > { %15235 = vst [vmem:[#allocation43_spill] sm:$0xff] %v12894_v9  ;;  %v12906_v35 = vpop.f32.mrf.mxu0  ;;  %9250 = vmatprep.subr.mxu1 %v12894_v9  ;;  %9195 = vmatpush3.msra.mxu0 %v12890_v37  ;;  %v12924_v55 = vadd.f32 %v9017_v29, %v4804_v6  ;;  %v4802_v29 = vmul.f32 2.0, %v12466_v20  ;;  %v12939_v10 = vadd.f32 %v4803_v54, %v4329_v41  ;;  %v4801_v41 = vmul.f32 2.0, %v12482_v31 }
 0x5c1   : > { %15236 = vst [vmem:[#allocation64_spill] sm:$0xff] %v12906_v35  ;;  %v12913_v19 = vpop.f32.mrf.mxu1  ;;  %9251 = vmatpush3.msra.mxu1 %v12894_v9  ;;  %9196 = vmatprep.subr.mxu0 %v12898_v44  ;;  %v12961_v63 = vadd.f32 %v12875_v22, %v4834_v53  ;;  %v4833_v12 = vmul.f32 2.0, %v12490_v42  ;;  %v4832_v22 = vmul.f32 2.0, %v12506_v3  ;;  %v15257_v9 = vld [vmem:[#allocation61_spill] sm:$0xff] }
 0x5c2   : > { %15237 = vst [vmem:[#allocation114_spill] sm:$0xff] %v12913_v19  ;;  %v12920_v14 = vpop.f32.mrf.mxu0  ;;  %9252 = vmatprep.subr.mxu1 %v12903_v43  ;;  %9197 = vmatpush3.msra.mxu0 %v12898_v44  ;;  %v12953_v20 = vadd.f32 %v12873_v8, %v4802_v29  ;;  %v4800_v8 = vmul.f32 2.0, %v12498_v51  ;;  %v12970_v31 = vadd.f32 %v4801_v41, %v12877_v56  ;;  %v4799_v56 = vmul.f32 2.0, %v12514_v26 }
 0x5c3   : > { %15238 = vst [vmem:[#allocation25_spill] sm:$0xff] %v12920_v14  ;;  %v12927_v47 = vpop.f32.mrf.mxu1  ;;  %9253 = vmatpush3.msra.mxu1 %v12903_v43  ;;  %9198 = vmatprep.subr.mxu0 %v12911_v40  ;;  %v12978_v42 = vadd.f32 %v4833_v12, %v12879_v21  ;;  %v12993_v3 = vadd.f32 %v12867_v28, %v4832_v22  ;;  %v4831_v21 = vmul.f32 2.0, %v12522_v25  ;;  %v4830_v28 = vmul.f32 2.0, %v12538_v24 }
 0x5c4   : > { %15239 = vst [vmem:[#allocation46_spill] sm:$0xff] %v12927_v47  ;;  %v12934_v13 = vpop.f32.mrf.mxu0  ;;  %9254 = vmatprep.subr.mxu1 %v12918_v7  ;;  %9199 = vmatpush3.msra.mxu0 %v12911_v40  ;;  %v12985_v51 = vadd.f32 %v12865_v48, %v4800_v8  ;;  %v4798_v48 = vmul.f32 2.0, %v12530_v32  ;;  %v13002_v26 = vadd.f32 %v4799_v56, %v12869_v1  ;;  %v4797_v1 = vmul.f32 2.0, %v12546_v61  ;;  %v15254_v47 = vld [vmem:[#allocation63_spill] sm:$0xff] }
 0x5c5   : > { %v12941_v46 = vpop.f32.mrf.mxu1  ;;  %9255 = vmatpush3.msra.mxu1 %v12918_v7  ;;  %9200 = vmatprep.subr.mxu0 %v12924_v55  ;;  %v13010_v25 = vadd.f32 %v4831_v21, %v12871_v45  ;;  %v13025_v24 = vadd.f32 %v12859_v58, %v4830_v28  ;;  %v4829_v45 = vmul.f32 2.0, %v12554_v2  ;;  %v4828_v58 = vmul.f32 2.0, %v12568_v18 }
 0x5c6   : > { %v12948_v34 = vpop.f32.mrf.mxu0  ;;  %9256 = vmatprep.subr.mxu1 %v12931_v4  ;;  %9201 = vmatpush3.msra.mxu0 %v12924_v55  ;;  %v13017_v32 = vadd.f32 %v12857_v50, %v4798_v48  ;;  %v4796_v50 = vmul.f32 2.0, %v12561_v33  ;;  %v13034_v61 = vadd.f32 %v4797_v1, %v12861_v5  ;;  %v4795_v5 = vmul.f32 2.0, %v12575_v23 }
 0x5c7   : > { %v12956_v15 = vpop.f32.mrf.mxu1  ;;  %9257 = vmatpush3.msra.mxu1 %v12931_v4  ;;  %9202 = vmatprep.subr.mxu0 %v12939_v10  ;;  %v13042_v2 = vadd.f32 %v4829_v45, %v12863_v16  ;;  %v13057_v18 = vadd.f32 %v12851_v39, %v4828_v58  ;;  %v15243_v16 = vld [vmem:[#allocation57_spill] sm:$0xff]  ;;  %v15246_v39 = vld [vmem:[#allocation99_spill] sm:$0xff]  ;;  %v4871_v19 = vmul.f32 2.0, %v15255_v49  ;;  %v15259_v49 = vld [vmem:[#allocation62_spill] sm:$0xff] }
 0x5c8   : > { %15240 = vst [vmem:[#allocation66_spill] sm:$0xff] %v12956_v15  ;;  %v12964_v17 = vpop.f32.mrf.mxu0  ;;  %9258 = vmatprep.subr.mxu1 %v12946_v60  ;;  %9203 = vmatpush3.msra.mxu0 %v12939_v10  ;;  %v13049_v33 = vadd.f32 %v12848_v0, %v4796_v50  ;;  %v4827_v8 = vmul.f32 2.0, %v15243_v16  ;;  %v15244_v0 = vld [vmem:[#allocation36_spill] sm:$0xff]  ;;  %v13066_v23 = vadd.f32 %v4795_v5, %v12853_v27  ;;  %v4826_v48 = vmul.f32 2.0, %v15246_v39 }
 0x5c9   : > { %v12972_v11 = vpop.f32.mrf.mxu1  ;;  %9259 = vmatpush3.msra.mxu1 %v12946_v60  ;;  %9204 = vmatprep.subr.mxu0 %v12953_v20  ;;  %15242 = vst [vmem:[#allocation67_spill] sm:$0xff] %v13057_v18  ;;  %v4794_v56 = vmul.f32 2.0, %v15244_v0  ;;  %v15249_v50 = vld [vmem:[#allocation32_spill] sm:$0xff]  ;;  %v4903_v15 = vmul.f32 2.0, %v15257_v9 }
 0x5ca   : > { %v12980_v30 = vpop.f32.mrf.mxu0  ;;  %9260 = vmatprep.subr.mxu1 %v12961_v63  ;;  %9205 = vmatpush3.msra.mxu0 %v12953_v20  ;;  %15241 = vst [vmem:[#allocation24_spill] sm:$0xff] %v13049_v33  ;;  %15245 = vst [vmem:[#allocation115_spill] sm:$0xff] %v13066_v23  ;;  %v13074_v28 = vadd.f32 %v4827_v8, %v12855_v36  ;;  %v13088_v58 = vadd.f32 %v15249_v50, %v4826_v48  ;;  %v15251_v8 = vld [vmem:[#allocation58_spill] sm:$0xff]  ;;  %v15253_v48 = vld [vmem:[#allocation59_spill] sm:$0xff] }
 0x5cb   : > { %v12988_v52 = vpop.f32.mrf.mxu1  ;;  %9261 = vmatpush3.msra.mxu1 %v12961_v63  ;;  %9206 = vmatprep.subr.mxu0 %v12970_v31  ;;  %v13081_v27 = vadd.f32 %v12837_v38, %v4794_v56  ;;  %v4872_v0 = vmul.f32 2.0, %v15251_v8  ;;  %v15252_v56 = vld [vmem:[#allocation40_spill] sm:$0xff]  ;;  %v4904_v50 = vmul.f32 2.0, %v15253_v48 }
 0x5cc   : > { %v12996_v6 = vpop.f32.mrf.mxu0  ;;  %9262 = vmatprep.subr.mxu1 %v12978_v42  ;;  %9207 = vmatpush3.msra.mxu0 %v12970_v31  ;;  %15247 = vst [vmem:[#allocation69_spill] sm:$0xff] %v13074_v28  ;;  %15250 = vst [vmem:[#allocation70_spill] sm:$0xff] %v13088_v58  ;;  %v15261_v9 = vld [vmem:[#allocation96_spill] sm:$0xff] }
 0x5cd   : > { %v13004_v57 = vpop.f32.mrf.mxu1  ;;  %9263 = vmatpush3.msra.mxu1 %v12978_v42  ;;  %9208 = vmatprep.subr.mxu0 %v12985_v51  ;;  %15248 = vst [vmem:[#allocation51_spill] sm:$0xff] %v13081_v27 }
 0x5ce   : > { %v13012_v54 = vpop.f32.mrf.mxu0  ;;  %9264 = vmatprep.subr.mxu1 %v12993_v3  ;;  %9209 = vmatpush3.msra.mxu0 %v12985_v51 }
 0x5cf   : > { %v13020_v62 = vpop.f32.mrf.mxu1  ;;  %9265 = vmatpush3.msra.mxu1 %v12993_v3  ;;  %9210 = vmatprep.subr.mxu0 %v13002_v26 }
 0x5d0   : > { %v13028_v29 = vpop.f32.mrf.mxu0  ;;  %9266 = vmatprep.subr.mxu1 %v13010_v25  ;;  %9211 = vmatpush3.msra.mxu0 %v13002_v26 }
 0x5d1   : > { %v13036_v53 = vpop.f32.mrf.mxu1  ;;  %9267 = vmatpush3.msra.mxu1 %v13010_v25  ;;  %9212 = vmatprep.subr.mxu0 %v13017_v32 }
 0x5d2   : > { %v13044_v41 = vpop.f32.mrf.mxu0  ;;  %9268 = vmatprep.subr.mxu1 %v13025_v24  ;;  %9213 = vmatpush3.msra.mxu0 %v13017_v32 }
 0x5d3   : > { %v13052_v12 = vpop.f32.mrf.mxu1  ;;  %9269 = vmatpush3.msra.mxu1 %v13025_v24  ;;  %9214 = vmatprep.subr.mxu0 %v13034_v61 }
 0x5d4   : > { %v13060_v22 = vpop.f32.mrf.mxu0  ;;  %9270 = vmatprep.subr.mxu1 %v13042_v2  ;;  %9215 = vmatpush3.msra.mxu0 %v13034_v61 }
 0x5d5   : > { %v13068_v21 = vpop.f32.mrf.mxu1  ;;  %9271 = vmatpush3.msra.mxu1 %v13042_v2  ;;  %9216 = vmatprep.subr.mxu0 %v13049_v33 }
 0x5d6   : > { %v13076_v1 = vpop.f32.mrf.mxu0  ;;  %9272 = vmatprep.subr.mxu1 %v13057_v18  ;;  %9217 = vmatpush3.msra.mxu0 %v13049_v33 }
 0x5d7   : > { %v13083_v45 = vpop.f32.mrf.mxu1  ;;  %9273 = vmatpush3.msra.mxu1 %v13057_v18  ;;  %9218 = vmatprep.subr.mxu0 %v13066_v23 }
 0x5d8   : > { %v9132_v36 = vpop.f32.mrf.mxu0  ;;  %9274 = vmatprep.subr.mxu1 %v13074_v28  ;;  %9219 = vmatpush3.msra.mxu0 %v13066_v23 }
 0x5d9   : > { %v9188_v5 = vpop.f32.mrf.mxu1  ;;  %9275 = vmatpush3.msra.mxu1 %v13074_v28  ;;  %9220 = vmatprep.subr.mxu0 %v13081_v27 }
 0x5da   : > { %v4629_v38 = vpop.f32.mrf.mxu0  ;;  %9276 = vmatprep.subr.mxu1 %v13088_v58  ;;  %9221 = vmatpush3.msra.mxu0 %v13081_v27 }
 0x5db   : > { %v4774_v16 = vpop.f32.mrf.mxu1  ;;  %9277 = vmatpush3.msra.mxu1 %v13088_v58  ;;  %9222 = vmatprep.subr.mxu0 %v15252_v56 }
 0x5dc   : > { %v9135_v39 = vpop.f32.mrf.mxu0  ;;  %9278 = vmatprep.subr.mxu1 %v15254_v47  ;;  %9223 = vmatpush3.msra.mxu0 %v15252_v56 }
 0x5dd   : > { %v13102_v59 = vadd.f32 %v9135_v39, %v4872_v0  ;;  %v9191_v14 = vpop.f32.mrf.mxu1  ;;  %9279 = vmatpush3.msra.mxu1 %v15254_v47  ;;  %9225 = vmatmul.mubr.f32.vlgmr.msra.gmra.mxu0 %v13081_v27  ;;  %v4870_v39 = vmul.f32 2.0, %v15259_v49  ;;  %v15314_v27 = vld [vmem:[#allocation112_spill] sm:$0xff] }
 0x5de   : > { %v13107_v8 = vadd.f32 %v9191_v14, %v4904_v50  ;;  %v4639_v35 = vpop.f32.mrf.mxu0  ;;  %9281 = vmatmul.mubr.f32.vlgmr.msra.gmra.mxu1 %v13088_v58  ;;  %9227 = vmatprep.mubr.f32.mxu0 %v13066_v23  ;;  %v4902_v14 = vmul.f32 2.0, %v15261_v9 }
 0x5df   : > { %v13112_v48 = vadd.f32 %v4871_v19, %v4639_v35  ;;  %v4784_v0 = vpop.f32.mrf.mxu1  ;;  %9304 = vmatprep.subr.mxu0 %v13102_v59  ;;  %9283 = vmatprep.mubr.f32.mxu1 %v13074_v28  ;;  %v13124_v35 = vadd.f32 %v9132_v36, %v4870_v39  ;;  %v4857_v28 = vmul.f32 2.0, %v15314_v27  ;;  %v15322_v27 = vld [vmem:[#allocation46_spill] sm:$0xff] }
 0x5e0   : > { %15256 = vst [vmem:[#allocation116_spill] sm:$0xff] %v13107_v8  ;;  %v13117_v47 = vadd.f32 %v4903_v15, %v4784_v0  ;;  %9360 = vmatprep.subr.mxu1 %v13107_v8  ;;  %9305 = vmatpush3.msra.mxu0 %v13102_v59  ;;  %v13128_v19 = vadd.f32 %v9188_v5, %v4902_v14  ;;  %v15264_v15 = vld [vmem:[#allocation98_spill] sm:$0xff]  ;;  %v15265_v0 = vld [vmem:[#allocation101_spill] sm:$0xff]  ;;  %v15269_v14 = vld [vmem:[#allocation103_spill] sm:$0xff] }
 0x5e1   : > { %15258 = vst [vmem:[#allocation28_spill] sm:$0xff] %v13112_v48  ;;  %9361 = vmatpush3.msra.mxu1 %v13107_v8  ;;  %9306 = vmatprep.subr.mxu0 %v13112_v48  ;;  %15262 = vst [vmem:[#allocation30_spill] sm:$0xff] %v13124_v35  ;;  %v4869_v50 = vmul.f32 2.0, %v15264_v15  ;;  %v4901_v49 = vmul.f32 2.0, %v15265_v0  ;;  %v15267_v5 = vld [vmem:[#allocation65_spill] sm:$0xff]  ;;  %v4900_v15 = vmul.f32 2.0, %v15269_v14 }
 0x5e2   : > { %15260 = vst [vmem:[#allocation19_spill] sm:$0xff] %v13117_v47  ;;  %9362 = vmatprep.subr.mxu1 %v13117_v47  ;;  %9307 = vmatpush3.msra.mxu0 %v13112_v48  ;;  %15263 = vst [vmem:[#allocation117_spill] sm:$0xff] %v13128_v19  ;;  %v4868_v39 = vmul.f32 2.0, %v15267_v5 }
 0x5e3   : > { %9363 = vmatpush3.msra.mxu1 %v13117_v47  ;;  %9228 = vmatmul.mubr.f32.gmra.mxu0 %v13049_v33  ;;  %v13136_v36 = vadd.f32 %v4869_v50, %v4629_v38  ;;  %v13141_v9 = vadd.f32 %v4901_v49, %v4774_v16  ;;  %v13154_v16 = vadd.f32 %v13068_v21, %v4900_v15  ;;  %v15272_v50 = vld [vmem:[#allocation100_spill] sm:$0xff]  ;;  %v15273_v49 = vld [vmem:[#allocation102_spill] sm:$0xff]  ;;  %v15277_v15 = vld [vmem:[#allocation105_spill] sm:$0xff] }
 0x5e4   : > { %9284 = vmatmul.mubr.f32.gmra.mxu1 %v13057_v18  ;;  %9308 = vmatprep.subr.mxu0 %v13124_v35  ;;  %v13149_v38 = vadd.f32 %v13060_v22, %v4868_v39  ;;  %v4867_v0 = vmul.f32 2.0, %v15272_v50  ;;  %v4899_v5 = vmul.f32 2.0, %v15273_v49  ;;  %v15275_v21 = vld [vmem:[#allocation68_spill] sm:$0xff]  ;;  %v4898_v50 = vmul.f32 2.0, %v15277_v15  ;;  %v15319_v18 = vld [vmem:[#allocation25_spill] sm:$0xff] }
 0x5e5   : > { %15266 = vst [vmem:[#allocation33_spill] sm:$0xff] %v13136_v36  ;;  %9364 = vmatprep.subr.mxu1 %v13128_v19  ;;  %9230 = vmatprep.mubr.f32.mxu0 %v13034_v61  ;;  %15268 = vst [vmem:[#allocation20_spill] sm:$0xff] %v13141_v9  ;;  %v4866_v39 = vmul.f32 2.0, %v15275_v21  ;;  %v13301_v33 = vadd.f32 %v4857_v28, %v15319_v18  ;;  %v5501_v28 = vmul.f32 2.0, %v15252_v56 }
 0x5e6   : > { %9286 = vmatprep.mubr.f32.mxu1 %v13042_v2  ;;  %9309 = vmatpush3.msra.mxu0 %v13124_v35  ;;  %15270 = vst [vmem:[#allocation75_spill] sm:$0xff] %v13149_v38  ;;  %15271 = vst [vmem:[#allocation71_spill] sm:$0xff] %v13154_v16  ;;  %v13163_v22 = vadd.f32 %v4867_v0, %v13076_v1  ;;  %v13169_v14 = vadd.f32 %v4899_v5, %v13083_v45  ;;  %v15280_v0 = vld [vmem:[#allocation107_spill] sm:$0xff]  ;;  %v15281_v5 = vld [vmem:[#allocation104_spill] sm:$0xff] }
 0x5e7   : > { %9365 = vmatpush3.msra.mxu1 %v13128_v19  ;;  %9310 = vmatprep.subr.mxu0 %v13136_v36  ;;  %v13177_v1 = vadd.f32 %v13028_v29, %v4866_v39  ;;  %v13182_v45 = vadd.f32 %v13036_v53, %v4898_v50  ;;  %v4865_v49 = vmul.f32 2.0, %v15280_v0  ;;  %v4897_v21 = vmul.f32 2.0, %v15281_v5  ;;  %v15283_v53 = vld [vmem:[#allocation27_spill] sm:$0xff]  ;;  %v15285_v50 = vld [vmem:[#allocation106_spill] sm:$0xff]  ;;  %15320 = vst [vmem:[#allocation76_spill] sm:$0xff] %v13301_v33 }
 0x5e8   : > { %9366 = vmatprep.subr.mxu1 %v13141_v9  ;;  %9311 = vmatpush3.msra.mxu0 %v13136_v36  ;;  %15274 = vst [vmem:[#allocation34_spill] sm:$0xff] %v13163_v22  ;;  %15276 = vst [vmem:[#allocation73_spill] sm:$0xff] %v13169_v14  ;;  %v4864_v39 = vmul.f32 2.0, %v15283_v53  ;;  %v4896_v0 = vmul.f32 2.0, %v15285_v50 }
 0x5e9   : > { %9367 = vmatpush3.msra.mxu1 %v13141_v9  ;;  %9231 = vmatmul.mubr.f32.gmra.mxu0 %v13017_v32  ;;  %15278 = vst [vmem:[#allocation35_spill] sm:$0xff] %v13177_v1  ;;  %15279 = vst [vmem:[#allocation41_spill] sm:$0xff] %v13182_v45  ;;  %v13191_v29 = vadd.f32 %v4865_v49, %v13044_v41  ;;  %v13197_v15 = vadd.f32 %v4897_v21, %v13052_v12  ;;  %v15288_v49 = vld [vmem:[#allocation109_spill] sm:$0xff]  ;;  %v15289_v21 = vld [vmem:[#allocation111_spill] sm:$0xff] }
 0x5ea   : > { %9287 = vmatmul.mubr.f32.gmra.mxu1 %v13025_v24  ;;  %9312 = vmatprep.subr.mxu0 %v13149_v38  ;;  %v13205_v41 = vadd.f32 %v12996_v6, %v4864_v39  ;;  %v13210_v12 = vadd.f32 %v13004_v57, %v4896_v0  ;;  %v4863_v5 = vmul.f32 2.0, %v15288_v49  ;;  %v4895_v53 = vmul.f32 2.0, %v15289_v21  ;;  %v15291_v57 = vld [vmem:[#allocation31_spill] sm:$0xff]  ;;  %v15293_v0 = vld [vmem:[#allocation108_spill] sm:$0xff] }
 0x5eb   : > { %9368 = vmatprep.subr.mxu1 %v13154_v16  ;;  %9233 = vmatprep.mubr.f32.mxu0 %v13002_v26  ;;  %15282 = vst [vmem:[#allocation95_spill] sm:$0xff] %v13191_v29  ;;  %15284 = vst [vmem:[#allocation92_spill] sm:$0xff] %v13197_v15  ;;  %v4862_v39 = vmul.f32 2.0, %v15291_v57  ;;  %v4894_v49 = vmul.f32 2.0, %v15293_v0 }
 0x5ec   : > { %9289 = vmatprep.mubr.f32.mxu1 %v13010_v25  ;;  %9313 = vmatpush3.msra.mxu0 %v13149_v38  ;;  %15286 = vst [vmem:[#allocation94_spill] sm:$0xff] %v13205_v41  ;;  %15287 = vst [vmem:[#allocation97_spill] sm:$0xff] %v13210_v12  ;;  %v13219_v6 = vadd.f32 %v4863_v5, %v13012_v54  ;;  %v13225_v50 = vadd.f32 %v4895_v53, %v13020_v62  ;;  %v15296_v5 = vld [vmem:[#allocation110_spill] sm:$0xff]  ;;  %v15297_v53 = vld [vmem:[#allocation49_spill] sm:$0xff] }
 0x5ed   : > { %9369 = vmatpush3.msra.mxu1 %v13154_v16  ;;  %9314 = vmatprep.subr.mxu0 %v13163_v22  ;;  %v13233_v54 = vadd.f32 %v12964_v17, %v4862_v39  ;;  %v13238_v62 = vadd.f32 %v12972_v11, %v4894_v49  ;;  %v4861_v21 = vmul.f32 2.0, %v15296_v5  ;;  %v4893_v57 = vmul.f32 2.0, %v15297_v53  ;;  %v15299_v11 = vld [vmem:[#allocation37_spill] sm:$0xff]  ;;  %v15301_v49 = vld [vmem:[#allocation47_spill] sm:$0xff] }
 0x5ee   : > { %9370 = vmatprep.subr.mxu1 %v13169_v14  ;;  %9315 = vmatpush3.msra.mxu0 %v13163_v22  ;;  %15290 = vst [vmem:[#allocation91_spill] sm:$0xff] %v13219_v6  ;;  %15292 = vst [vmem:[#allocation88_spill] sm:$0xff] %v13225_v50  ;;  %v4860_v39 = vmul.f32 2.0, %v15299_v11  ;;  %v4892_v5 = vmul.f32 2.0, %v15301_v49  ;;  %v15308_v49 = vld [vmem:[#allocation66_spill] sm:$0xff] }
 0x5ef   : > { %9371 = vmatpush3.msra.mxu1 %v13169_v14  ;;  %9234 = vmatmul.mubr.f32.gmra.mxu0 %v12985_v51  ;;  %15294 = vst [vmem:[#allocation90_spill] sm:$0xff] %v13233_v54  ;;  %15295 = vst [vmem:[#allocation93_spill] sm:$0xff] %v13238_v62  ;;  %v13247_v17 = vadd.f32 %v4861_v21, %v12980_v30  ;;  %v13253_v0 = vadd.f32 %v4893_v57, %v12988_v52  ;;  %v15304_v21 = vld [vmem:[#allocation26_spill] sm:$0xff]  ;;  %v15305_v57 = vld [vmem:[#allocation39_spill] sm:$0xff] }
 0x5f0   : > { %9290 = vmatmul.mubr.f32.gmra.mxu1 %v12993_v3  ;;  %9316 = vmatprep.subr.mxu0 %v13177_v1  ;;  %v13261_v30 = vadd.f32 %v12934_v13, %v4860_v39  ;;  %v13266_v52 = vadd.f32 %v12941_v46, %v4892_v5  ;;  %v4859_v53 = vmul.f32 2.0, %v15304_v21  ;;  %v4891_v11 = vmul.f32 2.0, %v15305_v57  ;;  %v15307_v46 = vld [vmem:[#allocation54_spill] sm:$0xff]  ;;  %v15310_v21 = vld [vmem:[#allocation43_spill] sm:$0xff]  ;;  %v15311_v57 = vld [vmem:[#allocation56_spill] sm:$0xff] }
 0x5f1   : > { %9372 = vmatprep.subr.mxu1 %v13182_v45  ;;  %9236 = vmatprep.mubr.f32.mxu0 %v12970_v31  ;;  %15298 = vst [vmem:[#allocation87_spill] sm:$0xff] %v13247_v17  ;;  %15300 = vst [vmem:[#allocation84_spill] sm:$0xff] %v13253_v0  ;;  %v4858_v39 = vmul.f32 2.0, %v15307_v46  ;;  %v4890_v58 = vmul.f32 2.0, %v15311_v57  ;;  %v15318_v57 = vld [vmem:[#allocation42_spill] sm:$0xff] }
 0x5f2   : > { %9292 = vmatprep.mubr.f32.mxu1 %v12978_v42  ;;  %9317 = vmatpush3.msra.mxu0 %v13177_v1  ;;  %15302 = vst [vmem:[#allocation86_spill] sm:$0xff] %v13261_v30  ;;  %15303 = vst [vmem:[#allocation89_spill] sm:$0xff] %v13266_v52  ;;  %v13275_v13 = vadd.f32 %v4859_v53, %v12948_v34  ;;  %v13281_v5 = vadd.f32 %v4891_v11, %v15308_v49  ;;  %v15312_v34 = vld [vmem:[#allocation64_spill] sm:$0xff]  ;;  %v15315_v11 = vld [vmem:[#allocation114_spill] sm:$0xff] }
 0x5f3   : > { %9373 = vmatpush3.msra.mxu1 %v13182_v45  ;;  %9318 = vmatprep.subr.mxu0 %v13191_v29  ;;  %v13289_v53 = vadd.f32 %v15312_v34, %v4858_v39  ;;  %v13295_v46 = vadd.f32 %v15315_v11, %v4890_v58  ;;  %v15317_v49 = vld [vmem:[#allocation113_spill] sm:$0xff]  ;;  %v15321_v39 = vld [vmem:[#allocation23_spill] sm:$0xff] }
 0x5f4   : > { %9374 = vmatprep.subr.mxu1 %v13197_v15  ;;  %9319 = vmatpush3.msra.mxu0 %v13191_v29  ;;  %15306 = vst [vmem:[#allocation83_spill] sm:$0xff] %v13275_v13  ;;  %15309 = vst [vmem:[#allocation80_spill] sm:$0xff] %v13281_v5  ;;  %v4889_v23 = vmul.f32 2.0, %v15317_v49  ;;  %v15324_v11 = vld [vmem:[#allocation63_spill] sm:$0xff] }
 0x5f5   : > { %9375 = vmatpush3.msra.mxu1 %v13197_v15  ;;  %9237 = vmatmul.mubr.f32.gmra.mxu0 %v12953_v20  ;;  %15313 = vst [vmem:[#allocation82_spill] sm:$0xff] %v13289_v53  ;;  %15316 = vst [vmem:[#allocation85_spill] sm:$0xff] %v13295_v46  ;;  %v5533_v49 = vmul.f32 2.0, %v15324_v11 }
 0x5f6   : > { %9293 = vmatmul.mubr.f32.gmra.mxu1 %v12961_v63  ;;  %9320 = vmatprep.subr.mxu0 %v13205_v41  ;;  %v13306_v34 = vadd.f32 %v4889_v23, %v15322_v27 }
 0x5f7   : > { %9376 = vmatprep.subr.mxu1 %v13210_v12  ;;  %9239 = vmatprep.mubr.f32.mxu0 %v12939_v10 }
 0x5f8   : > { %9295 = vmatprep.mubr.f32.mxu1 %v12946_v60  ;;  %9321 = vmatpush3.msra.mxu0 %v13205_v41  ;;  %15323 = vst [vmem:[#allocation18_spill] sm:$0xff] %v13306_v34 }
 0x5f9   : > { %9377 = vmatpush3.msra.mxu1 %v13210_v12  ;;  %9322 = vmatprep.subr.mxu0 %v13219_v6 }
 0x5fa   : > { %9378 = vmatprep.subr.mxu1 %v13225_v50  ;;  %9323 = vmatpush3.msra.mxu0 %v13219_v6 }
 0x5fb   : > { %9379 = vmatpush3.msra.mxu1 %v13225_v50  ;;  %9240 = vmatmul.mubr.f32.gmra.mxu0 %v12924_v55 }
 0x5fc   : > { %9296 = vmatmul.mubr.f32.gmra.mxu1 %v12931_v4  ;;  %9324 = vmatprep.subr.mxu0 %v13233_v54 }
 0x5fd   : > { %9380 = vmatprep.subr.mxu1 %v13238_v62  ;;  %9242 = vmatprep.mubr.f32.mxu0 %v12911_v40 }
 0x5fe   : > { %9298 = vmatprep.mubr.f32.mxu1 %v12918_v7  ;;  %9325 = vmatpush3.msra.mxu0 %v13233_v54 }
 0x5ff   : > { %9381 = vmatpush3.msra.mxu1 %v13238_v62  ;;  %9326 = vmatprep.subr.mxu0 %v13247_v17 }
 0x600   : > { %9382 = vmatprep.subr.mxu1 %v13253_v0  ;;  %9327 = vmatpush3.msra.mxu0 %v13247_v17 }
 0x601   : > { %9383 = vmatpush3.msra.mxu1 %v13253_v0  ;;  %9243 = vmatmul.mubr.f32.gmra.mxu0 %v12898_v44 }
 0x602   : > { %9299 = vmatmul.mubr.f32.gmra.mxu1 %v12903_v43  ;;  %9328 = vmatprep.subr.mxu0 %v13261_v30 }
 0x603   : > { %9384 = vmatprep.subr.mxu1 %v13266_v52  ;;  %9245 = vmatprep.mubr.f32.mxu0 %v12890_v37 }
 0x604   : > { %9301 = vmatprep.mubr.f32.mxu1 %v15310_v21  ;;  %9329 = vmatpush3.msra.mxu0 %v13261_v30 }
 0x605   : > { %9385 = vmatpush3.msra.mxu1 %v13266_v52  ;;  %9330 = vmatprep.subr.mxu0 %v13275_v13 }
 0x606   : > { %9386 = vmatprep.subr.mxu1 %v13281_v5  ;;  %9331 = vmatpush3.msra.mxu0 %v13275_v13 }
 0x607   : > { %9387 = vmatpush3.msra.mxu1 %v13281_v5  ;;  %9246 = vmatmul.mubr.f32.gmra.mxu0 %v15318_v57 }
 0x608   : > { %9302 = vmatmul.mubr.f32.gmra.mxu1 %v15321_v39  ;;  %9332 = vmatprep.subr.mxu0 %v13289_v53 }
 0x609   : > { %9388 = vmatprep.subr.mxu1 %v13295_v46  ;;  %9333 = vmatpush3.msra.mxu0 %v13289_v53 }
 0x60a   : > { %9336 = vmatprep.mubr.f32.mxu0 %v13301_v33  ;;  %9389 = vmatpush3.msra.mxu1 %v13295_v46 }
 0x60b   : > { %9392 = vmatprep.mubr.f32.mxu1 %v13306_v34  ;;  %9334 = vmatprep.subr.mxu0 %v13301_v33 }
 0x60c   : > { %9390 = vmatprep.subr.mxu1 %v13306_v34  ;;  %9335 = vmatpush3.msra.mxu0 %v13301_v33 }
 0x60d   : > { %9391 = vmatpush3.msra.mxu1 %v13306_v34  ;;  %9337 = vmatmul.mubr.f32.vlgmr.msra.gmra.mxu0 %v13289_v53 }
 0x60e   : > { %9393 = vmatmul.mubr.f32.vlgmr.msra.gmra.mxu1 %v13295_v46  ;;  %9339 = vmatprep.mubr.f32.mxu0 %v13275_v13 }
 0x60f   : > { %9395 = vmatprep.mubr.f32.mxu1 %v13281_v5 }
 0x611   : > { %9340 = vmatmul.mubr.f32.gmra.mxu0 %v13261_v30 }
 0x612   : > { %9396 = vmatmul.mubr.f32.gmra.mxu1 %v13266_v52  ;;  %9342 = vmatprep.mubr.f32.mxu0 %v13247_v17 }
 0x613   : > { %9398 = vmatprep.mubr.f32.mxu1 %v13253_v0 }
 0x615   : > { %9343 = vmatmul.mubr.f32.gmra.mxu0 %v13233_v54 }
 0x616   : > { %9399 = vmatmul.mubr.f32.gmra.mxu1 %v13238_v62  ;;  %9345 = vmatprep.mubr.f32.mxu0 %v13219_v6 }
 0x617   : > { %9401 = vmatprep.mubr.f32.mxu1 %v13225_v50 }
 0x619   : > { %9346 = vmatmul.mubr.f32.gmra.mxu0 %v13205_v41 }
 0x61a   : > { %9402 = vmatmul.mubr.f32.gmra.mxu1 %v13210_v12  ;;  %9348 = vmatprep.mubr.f32.mxu0 %v13191_v29 }
 0x61b   : > { %9404 = vmatprep.mubr.f32.mxu1 %v13197_v15 }
 0x61d   : > { %9349 = vmatmul.mubr.f32.gmra.mxu0 %v13177_v1 }
 0x61e   : > { %9405 = vmatmul.mubr.f32.gmra.mxu1 %v13182_v45  ;;  %9351 = vmatprep.mubr.f32.mxu0 %v13163_v22 }
 0x61f   : > { %9407 = vmatprep.mubr.f32.mxu1 %v13169_v14  ;;  %v5516_v14 = vmul.f32 2.0, %v15318_v57  ;;  %v5546_v57 = vmul.f32 2.0, %v12903_v43  ;;  %v5512_v43 = vmul.f32 2.0, %v12924_v55  ;;  %v5511_v55 = vmul.f32 2.0, %v12939_v10 }
 0x621   : > { %9352 = vmatmul.mubr.f32.gmra.mxu0 %v13149_v38 }
 0x622   : > { %9408 = vmatmul.mubr.f32.gmra.mxu1 %v13154_v16  ;;  %9354 = vmatprep.mubr.f32.mxu0 %v13136_v36  ;;  %v5548_v16 = vmul.f32 2.0, %v15321_v39  ;;  %v5515_v36 = vmul.f32 2.0, %v12890_v37 }
 0x623   : > { %9410 = vmatprep.mubr.f32.mxu1 %v13141_v9 }
 0x625   : > { %9355 = vmatmul.mubr.f32.gmra.mxu0 %v13124_v35 }
 0x626   : > { %9411 = vmatmul.mubr.f32.gmra.mxu1 %v13128_v19  ;;  %9357 = vmatprep.mubr.f32.mxu0 %v13112_v48  ;;  %v5514_v48 = vmul.f32 2.0, %v12898_v44 }
 0x627   : > { %9413 = vmatprep.mubr.f32.mxu1 %v13117_v47  ;;  %v5547_v47 = vmul.f32 2.0, %v15310_v21 }
 0x629   : > { %9358 = vmatmul.mubr.f32.gmra.mxu0 %v13102_v59 }
 0x62a   : > { %9414 = vmatmul.mubr.f32.gmra.mxu1 %v13107_v8 }
 0x69d   : > { %v13347_v18 = vpop.f32.mrf.mxu0 }
 0x69e   : > { %v13349_v23 = vpop.f32.mrf.mxu1 }
 0x69f   : > { %v4987_v58 = vpop.f32.mrf.mxu0 }
 0x6a0   : > { %v13353_v27 = vadd.f32 %v5501_v28, %v4987_v58  ;;  %v5132_v34 = vpop.f32.mrf.mxu1 }
 0x6a1   : > { %v13355_v33 = vadd.f32 %v5533_v49, %v5132_v34 }
 0x6a2   : > { %15325 = vst [vmem:[#allocation78_spill] sm:$0xff] %v13353_v27  ;;  %9448 = vmatprep.mubr.f32.mxu0 %v13353_v27 }
 0x6a3   : > { %15326 = vst [vmem:[#allocation81_spill] sm:$0xff] %v13355_v33  ;;  %v13358_v46 = vpop.f32.mrf.mxu0  ;;  %9504 = vmatprep.mubr.f32.mxu1 %v13355_v33 }
 0x6a4   : > { %v13361_v53 = vpop.f32.mrf.mxu1 }
 0x6a5   : > { %v13363_v5 = vpop.f32.mrf.mxu0 }
 0x6a6   : > { %v13365_v13 = vpop.f32.mrf.mxu1 }
 0x6a9   : > { %v13367_v56 = vpop.f32.mrf.mxu0 }
 0x6aa   : > { %v13369_v11 = vpop.f32.mrf.mxu1 }
 0x6ab   : > { %v13371_v28 = vpop.f32.mrf.mxu0 }
 0x6ac   : > { %v13373_v34 = vpop.f32.mrf.mxu1 }
 0x6af   : > { %v13375_v58 = vpop.f32.mrf.mxu0 }
 0x6b0   : > { %v13377_v49 = vpop.f32.mrf.mxu1 }
 0x6b1   : > { %v13379_v52 = vpop.f32.mrf.mxu0 }
 0x6b2   : > { %v13381_v30 = vpop.f32.mrf.mxu1 }
 0x6b5   : > { %v13383_v0 = vpop.f32.mrf.mxu0 }
 0x6b6   : > { %v13385_v17 = vpop.f32.mrf.mxu1 }
 0x6b7   : > { %v13387_v62 = vpop.f32.mrf.mxu0 }
 0x6b8   : > { %v13389_v54 = vpop.f32.mrf.mxu1 }
 0x6bb   : > { %v9241_v50 = vpop.f32.mrf.mxu0 }
 0x6bc   : > { %v9297_v6 = vpop.f32.mrf.mxu1 }
 0x6bd   : > { %v5037_v12 = vpop.f32.mrf.mxu0 }
 0x6be   : > { %v5182_v41 = vpop.f32.mrf.mxu1 }
 0x6c1   : > { %v9244_v15 = vpop.f32.mrf.mxu0 }
 0x6c2   : > { %v9300_v29 = vpop.f32.mrf.mxu1  ;;  %v13408_v37 = vadd.f32 %v9244_v15, %v5514_v48  ;;  %v5542_v15 = vmul.f32 2.0, %v12961_v63 }
 0x6c3   : > { %v5047_v45 = vpop.f32.mrf.mxu0  ;;  %v13413_v44 = vadd.f32 %v9300_v29, %v5546_v57  ;;  %v13449_v29 = vadd.f32 %v5511_v55, %v5037_v12  ;;  %v5509_v12 = vmul.f32 2.0, %v12970_v31 }
 0x6c4   : > { %v5192_v1 = vpop.f32.mrf.mxu1  ;;  %v13471_v63 = vadd.f32 %v13385_v17, %v5542_v15  ;;  %v5540_v17 = vmul.f32 2.0, %v12993_v3 }
 0x6c5   : > { %v13480_v31 = vadd.f32 %v5509_v12, %v13387_v62  ;;  %v5507_v62 = vmul.f32 2.0, %v13002_v26 }
 0x6c6   : > { %v13503_v3 = vadd.f32 %v13377_v49, %v5540_v17  ;;  %v5538_v49 = vmul.f32 2.0, %v13025_v24  ;;  %v15337_v17 = vld [vmem:[#allocation115_spill] sm:$0xff] }
 0x6c7   : > { %v9247_v22 = vpop.f32.mrf.mxu0  ;;  %v13512_v26 = vadd.f32 %v5507_v62, %v13379_v52  ;;  %v5505_v52 = vmul.f32 2.0, %v13034_v61  ;;  %v5503_v62 = vmul.f32 2.0, %v15337_v17 }
 0x6c8   : > { %v13393_v38 = vadd.f32 %v9247_v22, %v5516_v14  ;;  %v9303_v9 = vpop.f32.mrf.mxu1  ;;  %v13535_v24 = vadd.f32 %v13369_v11, %v5538_v49  ;;  %v15336_v11 = vld [vmem:[#allocation67_spill] sm:$0xff] }
 0x6c9   : > { %v13396_v19 = vadd.f32 %v9303_v9, %v5548_v16  ;;  %v5057_v35 = vpop.f32.mrf.mxu0  ;;  %v5513_v9 = vmul.f32 2.0, %v12911_v40  ;;  %v5544_v40 = vmul.f32 2.0, %v12931_v4  ;;  %v13434_v16 = vadd.f32 %v9241_v50, %v5512_v43 }
 0x6ca   : > { %15327 = vst [vmem:[#allocation77_spill] sm:$0xff] %v13393_v38  ;;  %v13400_v33 = vadd.f32 %v5515_v36, %v5057_v35  ;;  %v5202_v8 = vpop.f32.mrf.mxu1  ;;  %9416 = vmatprep.subr.mxu0 %v13393_v38  ;;  %v5545_v35 = vmul.f32 2.0, %v12918_v7  ;;  %v5543_v4 = vmul.f32 2.0, %v12946_v60  ;;  %v13544_v61 = vadd.f32 %v5505_v52, %v13371_v28 }
 0x6cb   : > { %15328 = vst [vmem:[#allocation16_spill] sm:$0xff] %v13396_v19  ;;  %v13404_v39 = vadd.f32 %v5547_v47, %v5202_v8  ;;  %9472 = vmatprep.subr.mxu1 %v13396_v19  ;;  %9417 = vmatpush3.msra.mxu0 %v13393_v38  ;;  %v13421_v47 = vadd.f32 %v5513_v9, %v5047_v45  ;;  %v5510_v45 = vmul.f32 2.0, %v12953_v20  ;;  %v15349_v38 = vld [vmem:[#allocation28_spill] sm:$0xff] }
 0x6cc   : > { %9473 = vmatpush3.msra.mxu1 %v13396_v19  ;;  %9418 = vmatprep.subr.mxu0 %v13400_v33  ;;  %v13428_v48 = vadd.f32 %v5545_v35, %v5192_v1  ;;  %v13441_v14 = vadd.f32 %v9297_v6, %v5544_v40  ;;  %v13456_v6 = vadd.f32 %v5543_v4, %v5182_v41  ;;  %v5541_v41 = vmul.f32 2.0, %v12978_v42 }
 0x6cd   : > { %15329 = vst [vmem:[#allocation79_spill] sm:$0xff] %v13404_v39  ;;  %v13416_v36 = vpop.f32.mrf.mxu0  ;;  %9474 = vmatprep.subr.mxu1 %v13404_v39  ;;  %9419 = vmatpush3.msra.mxu0 %v13400_v33  ;;  %v13463_v20 = vadd.f32 %v13383_v0, %v5510_v45  ;;  %v5508_v0 = vmul.f32 2.0, %v12985_v51 }
 0x6ce   : > { %15330 = vst [vmem:[#allocation17_spill] sm:$0xff] %v13416_v36  ;;  %v13423_v8 = vpop.f32.mrf.mxu1  ;;  %9475 = vmatpush3.msra.mxu1 %v13404_v39  ;;  %9420 = vmatprep.subr.mxu0 %v13408_v37  ;;  %v13488_v42 = vadd.f32 %v5541_v41, %v13389_v54  ;;  %v5539_v54 = vmul.f32 2.0, %v13010_v25  ;;  %v5536_v41 = vmul.f32 2.0, %v15336_v11  ;;  %v15351_v39 = vld [vmem:[#allocation19_spill] sm:$0xff] }
 0x6cf   : > { %15331 = vst [vmem:[#allocation29_spill] sm:$0xff] %v13423_v8  ;;  %v13430_v7 = vpop.f32.mrf.mxu0  ;;  %9476 = vmatprep.subr.mxu1 %v13413_v44  ;;  %9421 = vmatpush3.msra.mxu0 %v13408_v37  ;;  %v13495_v51 = vadd.f32 %v13375_v58, %v5508_v0  ;;  %v5506_v58 = vmul.f32 2.0, %v13017_v32  ;;  %v5579_v8 = vmul.f32 2.0, %v15349_v38  ;;  %v15353_v38 = vld [vmem:[#allocation30_spill] sm:$0xff] }
 0x6d0   : > { %15332 = vst [vmem:[#allocation22_spill] sm:$0xff] %v13430_v7  ;;  %v13437_v22 = vpop.f32.mrf.mxu1  ;;  %9477 = vmatpush3.msra.mxu1 %v13413_v44  ;;  %9422 = vmatprep.subr.mxu0 %v13421_v47  ;;  %v13520_v25 = vadd.f32 %v5539_v54, %v13381_v30  ;;  %v5537_v30 = vmul.f32 2.0, %v13042_v2 }
 0x6d1   : > { %15333 = vst [vmem:[#allocation52_spill] sm:$0xff] %v13437_v22  ;;  %v13444_v1 = vpop.f32.mrf.mxu0  ;;  %9478 = vmatprep.subr.mxu1 %v13428_v48  ;;  %9423 = vmatpush3.msra.mxu0 %v13421_v47  ;;  %v13527_v32 = vadd.f32 %v13367_v56, %v5506_v58  ;;  %v15335_v56 = vld [vmem:[#allocation24_spill] sm:$0xff]  ;;  %v15339_v58 = vld [vmem:[#allocation69_spill] sm:$0xff] }
 0x6d2   : > { %v13451_v10 = vpop.f32.mrf.mxu1  ;;  %9479 = vmatpush3.msra.mxu1 %v13428_v48  ;;  %9424 = vmatprep.subr.mxu0 %v13434_v16  ;;  %v5504_v15 = vmul.f32 2.0, %v15335_v56  ;;  %v13552_v2 = vadd.f32 %v5537_v30, %v13373_v34  ;;  %v13567_v34 = vadd.f32 %v13361_v53, %v5536_v41  ;;  %v5535_v49 = vmul.f32 2.0, %v15339_v58  ;;  %v15342_v53 = vld [vmem:[#allocation70_spill] sm:$0xff]  ;;  %v15347_v22 = vld [vmem:[#allocation81_spill] sm:$0xff] }
 0x6d3   : > { %v13458_v60 = vpop.f32.mrf.mxu0  ;;  %9480 = vmatprep.subr.mxu1 %v13441_v14  ;;  %9425 = vmatpush3.msra.mxu0 %v13434_v16  ;;  %v13576_v56 = vadd.f32 %v5503_v62, %v13363_v5  ;;  %v5534_v11 = vmul.f32 2.0, %v15342_v53  ;;  %v15346_v53 = vld [vmem:[#allocation116_spill] sm:$0xff] }
 0x6d4   : > { %v13466_v50 = vpop.f32.mrf.mxu1  ;;  %9481 = vmatpush3.msra.mxu1 %v13441_v14  ;;  %9426 = vmatprep.subr.mxu0 %v13449_v29  ;;  %v13559_v28 = vadd.f32 %v13358_v46, %v5504_v15  ;;  %15338 = vst [vmem:[#allocation48_spill] sm:$0xff] %v13567_v34  ;;  %v15340_v46 = vld [vmem:[#allocation51_spill] sm:$0xff]  ;;  %v13584_v41 = vadd.f32 %v5535_v49, %v13365_v13 }
 0x6d5   : > { %15334 = vst [vmem:[#allocation74_spill] sm:$0xff] %v13466_v50  ;;  %v13474_v21 = vpop.f32.mrf.mxu0  ;;  %9482 = vmatprep.subr.mxu1 %v13456_v6  ;;  %9427 = vmatpush3.msra.mxu0 %v13449_v29  ;;  %v5502_v30 = vmul.f32 2.0, %v15340_v46  ;;  %15341 = vst [vmem:[#allocation53_spill] sm:$0xff] %v13576_v56  ;;  %v13598_v58 = vadd.f32 %v13349_v23, %v5534_v11  ;;  %v5612_v11 = vmul.f32 2.0, %v15346_v53  ;;  %v5611_v50 = vmul.f32 2.0, %v15351_v39  ;;  %v15355_v39 = vld [vmem:[#allocation117_spill] sm:$0xff] }
 0x6d6   : > { %v13482_v57 = vpop.f32.mrf.mxu1  ;;  %9483 = vmatpush3.msra.mxu1 %v13456_v6  ;;  %9428 = vmatprep.subr.mxu0 %v13463_v20  ;;  %15343 = vst [vmem:[#allocation15_spill] sm:$0xff] %v13584_v41 }
 0x6d7   : > { %v13490_v9 = vpop.f32.mrf.mxu0  ;;  %9484 = vmatprep.subr.mxu1 %v13471_v63  ;;  %9429 = vmatpush3.msra.mxu0 %v13463_v20  ;;  %v13591_v5 = vadd.f32 %v13347_v18, %v5502_v30  ;;  %15345 = vst [vmem:[#allocation55_spill] sm:$0xff] %v13598_v58  ;;  %v5580_v30 = vmul.f32 2.0, %v13102_v59 }
 0x6d8   : > { %v13498_v35 = vpop.f32.mrf.mxu1  ;;  %9485 = vmatpush3.msra.mxu1 %v13471_v63  ;;  %9430 = vmatprep.subr.mxu0 %v13480_v31 }
 0x6d9   : > { %v13506_v43 = vpop.f32.mrf.mxu0  ;;  %9486 = vmatprep.subr.mxu1 %v13488_v42  ;;  %9431 = vmatpush3.msra.mxu0 %v13480_v31  ;;  %15344 = vst [vmem:[#allocation50_spill] sm:$0xff] %v13591_v5 }
 0x6da   : > { %v13514_v40 = vpop.f32.mrf.mxu1  ;;  %9487 = vmatpush3.msra.mxu1 %v13488_v42  ;;  %9432 = vmatprep.subr.mxu0 %v13495_v51 }
 0x6db   : > { %v13522_v55 = vpop.f32.mrf.mxu0  ;;  %9488 = vmatprep.subr.mxu1 %v13503_v3  ;;  %9433 = vmatpush3.msra.mxu0 %v13495_v51 }
 0x6dc   : > { %v13530_v4 = vpop.f32.mrf.mxu1  ;;  %9489 = vmatpush3.msra.mxu1 %v13503_v3  ;;  %9434 = vmatprep.subr.mxu0 %v13512_v26 }
 0x6dd   : > { %v13538_v45 = vpop.f32.mrf.mxu0  ;;  %9490 = vmatprep.subr.mxu1 %v13520_v25  ;;  %9435 = vmatpush3.msra.mxu0 %v13512_v26 }
 0x6de   : > { %v13546_v12 = vpop.f32.mrf.mxu1  ;;  %9491 = vmatpush3.msra.mxu1 %v13520_v25  ;;  %9436 = vmatprep.subr.mxu0 %v13527_v32 }
 0x6df   : > { %v13554_v0 = vpop.f32.mrf.mxu0  ;;  %9492 = vmatprep.subr.mxu1 %v13535_v24  ;;  %9437 = vmatpush3.msra.mxu0 %v13527_v32 }
 0x6e0   : > { %v13562_v54 = vpop.f32.mrf.mxu1  ;;  %9493 = vmatpush3.msra.mxu1 %v13535_v24  ;;  %9438 = vmatprep.subr.mxu0 %v13544_v61 }
 0x6e1   : > { %v13570_v52 = vpop.f32.mrf.mxu0  ;;  %9494 = vmatprep.subr.mxu1 %v13552_v2  ;;  %9439 = vmatpush3.msra.mxu0 %v13544_v61 }
 0x6e2   : > { %v13578_v15 = vpop.f32.mrf.mxu1  ;;  %9495 = vmatpush3.msra.mxu1 %v13552_v2  ;;  %9440 = vmatprep.subr.mxu0 %v13559_v28 }
 0x6e3   : > { %v13586_v17 = vpop.f32.mrf.mxu0  ;;  %9496 = vmatprep.subr.mxu1 %v13567_v34  ;;  %9441 = vmatpush3.msra.mxu0 %v13559_v28 }
 0x6e4   : > { %v13593_v62 = vpop.f32.mrf.mxu1  ;;  %9497 = vmatpush3.msra.mxu1 %v13567_v34  ;;  %9442 = vmatprep.subr.mxu0 %v13576_v56 }
 0x6e5   : > { %v9356_v13 = vpop.f32.mrf.mxu0  ;;  %9498 = vmatprep.subr.mxu1 %v13584_v41  ;;  %9443 = vmatpush3.msra.mxu0 %v13576_v56 }
 0x6e6   : > { %v9412_v49 = vpop.f32.mrf.mxu1  ;;  %9499 = vmatpush3.msra.mxu1 %v13584_v41  ;;  %9444 = vmatprep.subr.mxu0 %v13591_v5 }
 0x6e7   : > { %v5337_v18 = vpop.f32.mrf.mxu0  ;;  %9500 = vmatprep.subr.mxu1 %v13598_v58  ;;  %9445 = vmatpush3.msra.mxu0 %v13591_v5 }
 0x6e8   : > { %v5482_v46 = vpop.f32.mrf.mxu1  ;;  %9501 = vmatpush3.msra.mxu1 %v13598_v58  ;;  %9446 = vmatprep.subr.mxu0 %v13353_v27 }
 0x6e9   : > { %v9359_v23 = vpop.f32.mrf.mxu0  ;;  %9502 = vmatprep.subr.mxu1 %v15347_v22  ;;  %9447 = vmatpush3.msra.mxu0 %v13353_v27 }
 0x6ea   : > { %v13612_v19 = vadd.f32 %v9359_v23, %v5580_v30  ;;  %v9415_v7 = vpop.f32.mrf.mxu1  ;;  %9503 = vmatpush3.msra.mxu1 %v15347_v22  ;;  %9449 = vmatmul.mubr.f32.vlgmr.msra.gmra.mxu0 %v13591_v5  ;;  %v5578_v23 = vmul.f32 2.0, %v15353_v38 }
 0x6eb   : > { %v13617_v59 = vadd.f32 %v9415_v7, %v5612_v11  ;;  %v5347_v36 = vpop.f32.mrf.mxu0  ;;  %9505 = vmatmul.mubr.f32.vlgmr.msra.gmra.mxu1 %v13598_v58  ;;  %9451 = vmatprep.mubr.f32.mxu0 %v13576_v56  ;;  %v5610_v7 = vmul.f32 2.0, %v15355_v39  ;;  %v15408_v58 = vld [vmem:[#allocation76_spill] sm:$0xff]  ;;  %v15413_v56 = vld [vmem:[#allocation22_spill] sm:$0xff] }
 0x6ec   : > { %15348 = vst [vmem:[#allocation44_spill] sm:$0xff] %v13612_v19  ;;  %v13622_v53 = vadd.f32 %v5579_v8, %v5347_v36  ;;  %v5492_v30 = vpop.f32.mrf.mxu1  ;;  %9528 = vmatprep.subr.mxu0 %v13612_v19  ;;  %9507 = vmatprep.mubr.f32.mxu1 %v13584_v41  ;;  %v13634_v36 = vadd.f32 %v9356_v13, %v5578_v23  ;;  %v5565_v5 = vmul.f32 2.0, %v15408_v58  ;;  %v15416_v58 = vld [vmem:[#allocation52_spill] sm:$0xff] }
 0x6ed   : > { %15350 = vst [vmem:[#allocation21_spill] sm:$0xff] %v13617_v59  ;;  %v13627_v22 = vadd.f32 %v5611_v50, %v5492_v30  ;;  %9584 = vmatprep.subr.mxu1 %v13617_v59  ;;  %9529 = vmatpush3.msra.mxu0 %v13612_v19  ;;  %v13638_v8 = vadd.f32 %v9412_v49, %v5610_v7  ;;  %v15358_v50 = vld [vmem:[#allocation33_spill] sm:$0xff]  ;;  %v15359_v30 = vld [vmem:[#allocation20_spill] sm:$0xff]  ;;  %v15361_v49 = vld [vmem:[#allocation75_spill] sm:$0xff] }
 0x6ee   : > { %15352 = vst [vmem:[#allocation45_spill] sm:$0xff] %v13622_v53  ;;  %9585 = vmatpush3.msra.mxu1 %v13617_v59  ;;  %9530 = vmatprep.subr.mxu0 %v13622_v53  ;;  %15356 = vst [vmem:[#allocation38_spill] sm:$0xff] %v13634_v36  ;;  %v5577_v11 = vmul.f32 2.0, %v15358_v50  ;;  %v5609_v38 = vmul.f32 2.0, %v15359_v30  ;;  %v5576_v23 = vmul.f32 2.0, %v15361_v49  ;;  %v15363_v7 = vld [vmem:[#allocation71_spill] sm:$0xff] }
 0x6ef   : > { %15354 = vst [vmem:[#allocation72_spill] sm:$0xff] %v13627_v22  ;;  %9586 = vmatprep.subr.mxu1 %v13627_v22  ;;  %9531 = vmatpush3.msra.mxu0 %v13622_v53  ;;  %15357 = vst [vmem:[#allocation57_spill] sm:$0xff] %v13638_v8  ;;  %v5608_v50 = vmul.f32 2.0, %v15363_v7 }
 0x6f0   : > { %9587 = vmatpush3.msra.mxu1 %v13627_v22  ;;  %9452 = vmatmul.mubr.f32.gmra.mxu0 %v13559_v28  ;;  %v13646_v13 = vadd.f32 %v5577_v11, %v5337_v18  ;;  %v13651_v39 = vadd.f32 %v5609_v38, %v5482_v46  ;;  %v13659_v18 = vadd.f32 %v13570_v52, %v5576_v23  ;;  %v15366_v11 = vld [vmem:[#allocation34_spill] sm:$0xff]  ;;  %v15367_v38 = vld [vmem:[#allocation73_spill] sm:$0xff] }
 0x6f1   : > { %9508 = vmatmul.mubr.f32.gmra.mxu1 %v13567_v34  ;;  %9532 = vmatprep.subr.mxu0 %v13634_v36  ;;  %v13664_v46 = vadd.f32 %v13578_v15, %v5608_v50  ;;  %v5575_v30 = vmul.f32 2.0, %v15366_v11  ;;  %v5607_v49 = vmul.f32 2.0, %v15367_v38  ;;  %v15369_v15 = vld [vmem:[#allocation35_spill] sm:$0xff]  ;;  %v15371_v50 = vld [vmem:[#allocation41_spill] sm:$0xff]  ;;  %v13811_v34 = vadd.f32 %v5565_v5, %v15413_v56 }
 0x6f2   : > { %15360 = vst [vmem:[#allocation36_spill] sm:$0xff] %v13646_v13  ;;  %9588 = vmatprep.subr.mxu1 %v13638_v8  ;;  %9454 = vmatprep.mubr.f32.mxu0 %v13544_v61  ;;  %15362 = vst [vmem:[#allocation99_spill] sm:$0xff] %v13651_v39  ;;  %v5574_v23 = vmul.f32 2.0, %v15369_v15  ;;  %v5606_v11 = vmul.f32 2.0, %v15371_v50 }
 0x6f3   : > { %9510 = vmatprep.mubr.f32.mxu1 %v13552_v2  ;;  %9533 = vmatpush3.msra.mxu0 %v13634_v36  ;;  %15364 = vst [vmem:[#allocation32_spill] sm:$0xff] %v13659_v18  ;;  %15365 = vst [vmem:[#allocation58_spill] sm:$0xff] %v13664_v46  ;;  %v13673_v52 = vadd.f32 %v5575_v30, %v13586_v17  ;;  %v13679_v7 = vadd.f32 %v5607_v49, %v13593_v62  ;;  %v15374_v30 = vld [vmem:[#allocation95_spill] sm:$0xff]  ;;  %v15375_v49 = vld [vmem:[#allocation92_spill] sm:$0xff] }
 0x6f4   : > { %9589 = vmatpush3.msra.mxu1 %v13638_v8  ;;  %9534 = vmatprep.subr.mxu0 %v13646_v13  ;;  %v13687_v17 = vadd.f32 %v13538_v45, %v5574_v23  ;;  %v13692_v62 = vadd.f32 %v13546_v12, %v5606_v11  ;;  %v5573_v38 = vmul.f32 2.0, %v15374_v30  ;;  %v5605_v15 = vmul.f32 2.0, %v15375_v49  ;;  %v15377_v12 = vld [vmem:[#allocation94_spill] sm:$0xff]  ;;  %v15379_v11 = vld [vmem:[#allocation97_spill] sm:$0xff]  ;;  %15414 = vst [vmem:[#allocation31_spill] sm:$0xff] %v13811_v34 }
 0x6f5   : > { %9590 = vmatprep.subr.mxu1 %v13651_v39  ;;  %9535 = vmatpush3.msra.mxu0 %v13646_v13  ;;  %15368 = vst [vmem:[#allocation40_spill] sm:$0xff] %v13673_v52  ;;  %15370 = vst [vmem:[#allocation59_spill] sm:$0xff] %v13679_v7  ;;  %v5572_v23 = vmul.f32 2.0, %v15377_v12  ;;  %v5604_v30 = vmul.f32 2.0, %v15379_v11 }
 0x6f6   : > { %9591 = vmatpush3.msra.mxu1 %v13651_v39  ;;  %9455 = vmatmul.mubr.f32.gmra.mxu0 %v13527_v32  ;;  %15372 = vst [vmem:[#allocation60_spill] sm:$0xff] %v13687_v17  ;;  %15373 = vst [vmem:[#allocation61_spill] sm:$0xff] %v13692_v62  ;;  %v13701_v45 = vadd.f32 %v5573_v38, %v13554_v0  ;;  %v13707_v50 = vadd.f32 %v5605_v15, %v13562_v54  ;;  %v15382_v38 = vld [vmem:[#allocation91_spill] sm:$0xff]  ;;  %v15383_v15 = vld [vmem:[#allocation88_spill] sm:$0xff] }
 0x6f7   : > { %9511 = vmatmul.mubr.f32.gmra.mxu1 %v13535_v24  ;;  %9536 = vmatprep.subr.mxu0 %v13659_v18  ;;  %v13715_v0 = vadd.f32 %v13506_v43, %v5572_v23  ;;  %v13720_v54 = vadd.f32 %v13514_v40, %v5604_v30  ;;  %v5571_v49 = vmul.f32 2.0, %v15382_v38  ;;  %v5603_v12 = vmul.f32 2.0, %v15383_v15  ;;  %v15385_v40 = vld [vmem:[#allocation90_spill] sm:$0xff]  ;;  %v15387_v30 = vld [vmem:[#allocation93_spill] sm:$0xff] }
 0x6f8   : > { %9592 = vmatprep.subr.mxu1 %v13664_v46  ;;  %9457 = vmatprep.mubr.f32.mxu0 %v13512_v26  ;;  %15376 = vst [vmem:[#allocation62_spill] sm:$0xff] %v13701_v45  ;;  %15378 = vst [vmem:[#allocation96_spill] sm:$0xff] %v13707_v50  ;;  %v5570_v23 = vmul.f32 2.0, %v15385_v40  ;;  %v5602_v38 = vmul.f32 2.0, %v15387_v30 }
 0x6f9   : > { %9513 = vmatprep.mubr.f32.mxu1 %v13520_v25  ;;  %9537 = vmatpush3.msra.mxu0 %v13659_v18  ;;  %15380 = vst [vmem:[#allocation98_spill] sm:$0xff] %v13715_v0  ;;  %15381 = vst [vmem:[#allocation101_spill] sm:$0xff] %v13720_v54  ;;  %v13729_v43 = vadd.f32 %v5571_v49, %v13522_v55  ;;  %v13735_v11 = vadd.f32 %v5603_v12, %v13530_v4  ;;  %v15390_v49 = vld [vmem:[#allocation87_spill] sm:$0xff]  ;;  %v15391_v12 = vld [vmem:[#allocation84_spill] sm:$0xff] }
 0x6fa   : > { %9593 = vmatpush3.msra.mxu1 %v13664_v46  ;;  %9538 = vmatprep.subr.mxu0 %v13673_v52  ;;  %v13743_v55 = vadd.f32 %v13474_v21, %v5570_v23  ;;  %v13748_v4 = vadd.f32 %v13482_v57, %v5602_v38  ;;  %v5569_v15 = vmul.f32 2.0, %v15390_v49  ;;  %v5601_v40 = vmul.f32 2.0, %v15391_v12  ;;  %v15393_v57 = vld [vmem:[#allocation86_spill] sm:$0xff]  ;;  %v15395_v38 = vld [vmem:[#allocation89_spill] sm:$0xff] }
 0x6fb   : > { %9594 = vmatprep.subr.mxu1 %v13679_v7  ;;  %9539 = vmatpush3.msra.mxu0 %v13673_v52  ;;  %15384 = vst [vmem:[#allocation65_spill] sm:$0xff] %v13729_v43  ;;  %15386 = vst [vmem:[#allocation103_spill] sm:$0xff] %v13735_v11  ;;  %v5568_v23 = vmul.f32 2.0, %v15393_v57  ;;  %v5600_v49 = vmul.f32 2.0, %v15395_v38  ;;  %v15402_v38 = vld [vmem:[#allocation74_spill] sm:$0xff] }
 0x6fc   : > { %9595 = vmatpush3.msra.mxu1 %v13679_v7  ;;  %9458 = vmatmul.mubr.f32.gmra.mxu0 %v13495_v51  ;;  %15388 = vst [vmem:[#allocation100_spill] sm:$0xff] %v13743_v55  ;;  %15389 = vst [vmem:[#allocation102_spill] sm:$0xff] %v13748_v4  ;;  %v13757_v21 = vadd.f32 %v5569_v15, %v13490_v9  ;;  %v13763_v30 = vadd.f32 %v5601_v40, %v13498_v35  ;;  %v15398_v15 = vld [vmem:[#allocation83_spill] sm:$0xff]  ;;  %v15399_v40 = vld [vmem:[#allocation80_spill] sm:$0xff] }
 0x6fd   : > { %9514 = vmatmul.mubr.f32.gmra.mxu1 %v13503_v3  ;;  %9540 = vmatprep.subr.mxu0 %v13687_v17  ;;  %v13771_v9 = vadd.f32 %v13444_v1, %v5568_v23  ;;  %v13776_v35 = vadd.f32 %v13451_v10, %v5600_v49  ;;  %v5567_v12 = vmul.f32 2.0, %v15398_v15  ;;  %v5599_v57 = vmul.f32 2.0, %v15399_v40  ;;  %v15401_v10 = vld [vmem:[#allocation82_spill] sm:$0xff]  ;;  %v15404_v15 = vld [vmem:[#allocation79_spill] sm:$0xff]  ;;  %v15405_v40 = vld [vmem:[#allocation85_spill] sm:$0xff] }
 0x6fe   : > { %9596 = vmatprep.subr.mxu1 %v13692_v62  ;;  %9460 = vmatprep.mubr.f32.mxu0 %v13480_v31  ;;  %15392 = vst [vmem:[#allocation68_spill] sm:$0xff] %v13757_v21  ;;  %15394 = vst [vmem:[#allocation105_spill] sm:$0xff] %v13763_v30  ;;  %v5566_v23 = vmul.f32 2.0, %v15401_v10  ;;  %v5598_v27 = vmul.f32 2.0, %v15405_v40  ;;  %v15412_v40 = vld [vmem:[#allocation77_spill] sm:$0xff] }
 0x6ff   : > { %9516 = vmatprep.mubr.f32.mxu1 %v13488_v42  ;;  %9541 = vmatpush3.msra.mxu0 %v13687_v17  ;;  %15396 = vst [vmem:[#allocation107_spill] sm:$0xff] %v13771_v9  ;;  %15397 = vst [vmem:[#allocation104_spill] sm:$0xff] %v13776_v35  ;;  %v13785_v1 = vadd.f32 %v5567_v12, %v13458_v60  ;;  %v13791_v49 = vadd.f32 %v5599_v57, %v15402_v38  ;;  %v15406_v60 = vld [vmem:[#allocation17_spill] sm:$0xff]  ;;  %v15411_v38 = vld [vmem:[#allocation18_spill] sm:$0xff] }
 0x700   : > { %9597 = vmatpush3.msra.mxu1 %v13692_v62  ;;  %9542 = vmatprep.subr.mxu0 %v13701_v45  ;;  %v13799_v12 = vadd.f32 %v15406_v60, %v5566_v23  ;;  %v15409_v57 = vld [vmem:[#allocation29_spill] sm:$0xff]  ;;  %v5597_v41 = vmul.f32 2.0, %v15411_v38  ;;  %v15415_v23 = vld [vmem:[#allocation16_spill] sm:$0xff] }
 0x701   : > { %9598 = vmatprep.subr.mxu1 %v13707_v50  ;;  %9543 = vmatpush3.msra.mxu0 %v13701_v45  ;;  %15400 = vst [vmem:[#allocation27_spill] sm:$0xff] %v13785_v1  ;;  %15403 = vst [vmem:[#allocation106_spill] sm:$0xff] %v13791_v49  ;;  %v13805_v10 = vadd.f32 %v15409_v57, %v5598_v27  ;;  %v14567_v27 = vmov 0.0  }
 0x702   : > { %9599 = vmatpush3.msra.mxu1 %v13707_v50  ;;  %9461 = vmatmul.mubr.f32.gmra.mxu0 %v13463_v20  ;;  %15407 = vst [vmem:[#allocation109_spill] sm:$0xff] %v13799_v12  ;;  %v13816_v60 = vadd.f32 %v5597_v41, %v15416_v58 }
 0x703   : > { %9517 = vmatmul.mubr.f32.gmra.mxu1 %v13471_v63  ;;  %9544 = vmatprep.subr.mxu0 %v13715_v0  ;;  %15410 = vst [vmem:[#allocation111_spill] sm:$0xff] %v13805_v10 }
 0x704   : > { %9600 = vmatprep.subr.mxu1 %v13720_v54  ;;  %9463 = vmatprep.mubr.f32.mxu0 %v13449_v29  ;;  %15417 = vst [vmem:[#allocation108_spill] sm:$0xff] %v13816_v60 }
 0x705   : > { %9519 = vmatprep.mubr.f32.mxu1 %v13456_v6  ;;  %9545 = vmatpush3.msra.mxu0 %v13715_v0 }
 0x706   : > { %9601 = vmatpush3.msra.mxu1 %v13720_v54  ;;  %9546 = vmatprep.subr.mxu0 %v13729_v43 }
 0x707   : > { %9602 = vmatprep.subr.mxu1 %v13735_v11  ;;  %9547 = vmatpush3.msra.mxu0 %v13729_v43 }
 0x708   : > { %9603 = vmatpush3.msra.mxu1 %v13735_v11  ;;  %9464 = vmatmul.mubr.f32.gmra.mxu0 %v13434_v16 }
 0x709   : > { %9520 = vmatmul.mubr.f32.gmra.mxu1 %v13441_v14  ;;  %9548 = vmatprep.subr.mxu0 %v13743_v55 }
 0x70a   : > { %9604 = vmatprep.subr.mxu1 %v13748_v4  ;;  %9466 = vmatprep.mubr.f32.mxu0 %v13421_v47 }
 0x70b   : > { %9522 = vmatprep.mubr.f32.mxu1 %v13428_v48  ;;  %9549 = vmatpush3.msra.mxu0 %v13743_v55 }
 0x70c   : > { %9605 = vmatpush3.msra.mxu1 %v13748_v4  ;;  %9550 = vmatprep.subr.mxu0 %v13757_v21 }
 0x70d   : > { %9606 = vmatprep.subr.mxu1 %v13763_v30  ;;  %9551 = vmatpush3.msra.mxu0 %v13757_v21 }
 0x70e   : > { %9607 = vmatpush3.msra.mxu1 %v13763_v30  ;;  %9467 = vmatmul.mubr.f32.gmra.mxu0 %v13408_v37 }
 0x70f   : > { %9523 = vmatmul.mubr.f32.gmra.mxu1 %v13413_v44  ;;  %9552 = vmatprep.subr.mxu0 %v13771_v9 }
 0x710   : > { %9608 = vmatprep.subr.mxu1 %v13776_v35  ;;  %9469 = vmatprep.mubr.f32.mxu0 %v13400_v33 }
 0x711   : > { %9525 = vmatprep.mubr.f32.mxu1 %v15404_v15  ;;  %9553 = vmatpush3.msra.mxu0 %v13771_v9 }
 0x712   : > { %9609 = vmatpush3.msra.mxu1 %v13776_v35  ;;  %9554 = vmatprep.subr.mxu0 %v13785_v1 }
 0x713   : > { %9610 = vmatprep.subr.mxu1 %v13791_v49  ;;  %9555 = vmatpush3.msra.mxu0 %v13785_v1 }
 0x714   : > { %9611 = vmatpush3.msra.mxu1 %v13791_v49  ;;  %9470 = vmatmul.mubr.f32.gmra.mxu0 %v15412_v40 }
 0x715   : > { %9526 = vmatmul.mubr.f32.gmra.mxu1 %v15415_v23  ;;  %9556 = vmatprep.subr.mxu0 %v13799_v12 }
 0x716   : > { %9612 = vmatprep.subr.mxu1 %v13805_v10  ;;  %9557 = vmatpush3.msra.mxu0 %v13799_v12 }
 0x717   : > { %9560 = vmatprep.mubr.f32.mxu0 %v13811_v34  ;;  %9613 = vmatpush3.msra.mxu1 %v13805_v10 }
 0x718   : > { %9616 = vmatprep.mubr.f32.mxu1 %v13816_v60  ;;  %9558 = vmatprep.subr.mxu0 %v13811_v34 }
 0x719   : > { %9614 = vmatprep.subr.mxu1 %v13816_v60  ;;  %9559 = vmatpush3.msra.mxu0 %v13811_v34 }
 0x71a   : > { %9615 = vmatpush3.msra.mxu1 %v13816_v60  ;;  %9561 = vmatmul.mubr.f32.vlgmr.msra.gmra.mxu0 %v13799_v12 }
 0x71b   : > { %9617 = vmatmul.mubr.f32.vlgmr.msra.gmra.mxu1 %v13805_v10  ;;  %9563 = vmatprep.mubr.f32.mxu0 %v13785_v1 }
 0x71c   : > { %9619 = vmatprep.mubr.f32.mxu1 %v13791_v49  ;;  %9640 = vmatprep.subr.mxu0 %v14567_v27 }
 0x71d   : > { %9675 = vmatprep.subr.mxu1 %v14567_v27 }
 0x71e   : > { %9564 = vmatmul.mubr.f32.gmra.mxu0 %v13771_v9 }
 0x71f   : > { %9620 = vmatmul.mubr.f32.gmra.mxu1 %v13776_v35  ;;  %9566 = vmatprep.mubr.f32.mxu0 %v13757_v21 }
 0x720   : > { %9622 = vmatprep.mubr.f32.mxu1 %v13763_v30 }
 0x722   : > { %9567 = vmatmul.mubr.f32.gmra.mxu0 %v13743_v55 }
 0x723   : > { %9623 = vmatmul.mubr.f32.gmra.mxu1 %v13748_v4  ;;  %9569 = vmatprep.mubr.f32.mxu0 %v13729_v43 }
 0x724   : > { %9625 = vmatprep.mubr.f32.mxu1 %v13735_v11 }
 0x726   : > { %9570 = vmatmul.mubr.f32.gmra.mxu0 %v13715_v0 }
 0x727   : > { %9626 = vmatmul.mubr.f32.gmra.mxu1 %v13720_v54  ;;  %9572 = vmatprep.mubr.f32.mxu0 %v13701_v45 }
 0x728   : > { %9628 = vmatprep.mubr.f32.mxu1 %v13707_v50 }
 0x72a   : > { %9573 = vmatmul.mubr.f32.gmra.mxu0 %v13687_v17 }
 0x72b   : > { %9629 = vmatmul.mubr.f32.gmra.mxu1 %v13692_v62  ;;  %9575 = vmatprep.mubr.f32.mxu0 %v13673_v52  ;;  %v6224_v52 = vmul.f32 2.0, %v15412_v40  ;;  %v15421_v40 = vmov 0.0  }
 0x72c   : > { %9631 = vmatprep.mubr.f32.mxu1 %v13679_v7 }
 0x72e   : > { %9576 = vmatmul.mubr.f32.gmra.mxu0 %v13659_v18  ;;  %v6256_v18 = vmul.f32 2.0, %v15415_v23 }
 0x72f   : > { %9632 = vmatmul.mubr.f32.gmra.mxu1 %v13664_v46  ;;  %9578 = vmatprep.mubr.f32.mxu0 %v13646_v13 }
 0x730   : > { %9634 = vmatprep.mubr.f32.mxu1 %v13651_v39 }
 0x732   : > { %9579 = vmatmul.mubr.f32.gmra.mxu0 %v13634_v36 }
 0x733   : > { %9635 = vmatmul.mubr.f32.gmra.mxu1 %v13638_v8  ;;  %9581 = vmatprep.mubr.f32.mxu0 %v13622_v53  ;;  %v6223_v8 = vmul.f32 2.0, %v13400_v33  ;;  %v6255_v53 = vmul.f32 2.0, %v15404_v15 }
 0x734   : > { %9637 = vmatprep.mubr.f32.mxu1 %v13627_v22 }
 0x736   : > { %9582 = vmatmul.mubr.f32.gmra.mxu0 %v13612_v19 }
 0x737   : > { %9638 = vmatmul.mubr.f32.gmra.mxu1 %v13617_v59  ;;  %9672 = vmatprep.mubr.msk.f32.mxu0 %vm10048_vm0, %v14567_v27  ;;  %v6222_v59 = vmul.f32 2.0, %v13408_v37  ;;  %v6220_v37 = vmul.f32 2.0, %v13434_v16 }
 0x738   : > { %9707 = vmatprep.mubr.msk.f32.mxu1 %vm10048_vm0, %v14567_v27 }
 0x7aa   : > { %v13863_v56 = vpop.f32.mrf.mxu0 }
 0x7ab   : > { %v13865_v41 = vpop.f32.mrf.mxu1 }
 0x7ac   : > { %15418 = vst [vmem:[#allocation110_spill] sm:$0xff] %v13865_v41  ;;  %v13867_v5 = vpop.f32.mrf.mxu0 }
 0x7ad   : > { %15419 = vst [vmem:[#allocation49_spill] sm:$0xff] %v13867_v5  ;;  %v13869_v57 = vpop.f32.mrf.mxu1  ;;  %v6254_v5 = vmul.f32 2.0, %v13413_v44 }
 0x7ae   : > { %15420 = vst [vmem:[#allocation37_spill] sm:$0xff] %v13869_v57 }
 0x7b0   : > { %v13871_v38 = vpop.f32.mrf.mxu0 }
 0x7b1   : > { %v13873_v58 = vpop.f32.mrf.mxu1 }
 0x7b2   : > { %v13875_v60 = vpop.f32.mrf.mxu0 }
 0x7b3   : > { %v13877_v34 = vpop.f32.mrf.mxu1 }
 0x7b6   : > { %v13879_v10 = vpop.f32.mrf.mxu0 }
 0x7b7   : > { %v13881_v12 = vpop.f32.mrf.mxu1 }
 0x7b8   : > { %v13883_v27 = vpop.f32.mrf.mxu0 }
 0x7b9   : > { %v13885_v49 = vpop.f32.mrf.mxu1 }
 0x7bc   : > { %v13887_v1 = vpop.f32.mrf.mxu0 }
 0x7bd   : > { %v13889_v35 = vpop.f32.mrf.mxu1 }
 0x7be   : > { %v13891_v9 = vpop.f32.mrf.mxu0 }
 0x7bf   : > { %v13893_v30 = vpop.f32.mrf.mxu1 }
 0x7c2   : > { %v13895_v21 = vpop.f32.mrf.mxu0 }
 0x7c3   : > { %v13897_v4 = vpop.f32.mrf.mxu1 }
 0x7c4   : > { %v13899_v55 = vpop.f32.mrf.mxu0 }
 0x7c5   : > { %v13901_v11 = vpop.f32.mrf.mxu1 }
 0x7c8   : > { %v9465_v43 = vpop.f32.mrf.mxu0 }
 0x7c9   : > { %v9521_v54 = vpop.f32.mrf.mxu1 }
 0x7ca   : > { %v5745_v0 = vpop.f32.mrf.mxu0 }
 0x7cb   : > { %v5890_v50 = vpop.f32.mrf.mxu1 }
 0x7ce   : > { %v9468_v45 = vpop.f32.mrf.mxu0 }
 0x7cf   : > { %v9524_v62 = vpop.f32.mrf.mxu1  ;;  %v6238_v23 = vadd.f32 %v9468_v45, %v6222_v59  ;;  %v6217_v45 = vmul.f32 2.0, %v13480_v31  ;;  %v6248_v31 = vmul.f32 2.0, %v13503_v3  ;;  %v6247_v3 = vmul.f32 2.0, %v13520_v25 }
 0x7d0   : > { %v5755_v17 = vpop.f32.mrf.mxu0  ;;  %v6270_v33 = vadd.f32 %v9524_v62, %v6254_v5 }
 0x7d1   : > { %v5900_v7 = vpop.f32.mrf.mxu1 }
 0x7d4   : > { %v9471_v46 = vpop.f32.mrf.mxu0 }
 0x7d5   : > { %v6240_v39 = vadd.f32 %v9471_v46, %v6224_v52  ;;  %v9527_v13 = vpop.f32.mrf.mxu1  ;;  %v6221_v46 = vmul.f32 2.0, %v13421_v47  ;;  %v6252_v47 = vmul.f32 2.0, %v13441_v14  ;;  %v6218_v14 = vmul.f32 2.0, %v13463_v20 }
 0x7d6   : > { %v6272_v36 = vadd.f32 %v9527_v13, %v6256_v18  ;;  %v5765_v22 = vpop.f32.mrf.mxu0  ;;  %v6253_v13 = vmul.f32 2.0, %v13428_v48  ;;  %v6236_v48 = vadd.f32 %v9465_v43, %v6220_v37  ;;  %v6233_v43 = vadd.f32 %v6217_v45, %v13899_v55  ;;  %v15427_v45 = vld [vmem:[#allocation78_spill] sm:$0xff] }
 0x7d7   : > { %v6239_v19 = vadd.f32 %v6223_v8, %v5765_v22  ;;  %v5910_v57 = vpop.f32.mrf.mxu1  ;;  %9641 = vmatpush3.msra.mxu0 %v6240_v39  ;;  %v6237_v44 = vadd.f32 %v6221_v46, %v5755_v17  ;;  %v6268_v16 = vadd.f32 %v9521_v54, %v6252_v47  ;;  %v6251_v8 = vmul.f32 2.0, %v13456_v6  ;;  %v15423_v47 = vld [vmem:[#allocation53_spill] sm:$0xff] }
 0x7d8   : > { %v6271_v41 = vadd.f32 %v6255_v53, %v5910_v57  ;;  %9676 = vmatpush3.msra.mxu1 %v6272_v36  ;;  %9642 = vmatprep.subr.mxu0 %v15421_v40  ;;  %v6269_v59 = vadd.f32 %v6253_v13, %v5900_v7  ;;  %v6219_v53 = vmul.f32 2.0, %v13449_v29  ;;  %v6250_v29 = vmul.f32 2.0, %v13471_v63 }
 0x7d9   : > { %9677 = vmatprep.subr.mxu1 %v15421_v40  ;;  %9643 = vmatpush3.msra.mxu0 %v6239_v19  ;;  %v6267_v17 = vadd.f32 %v6251_v8, %v5890_v50  ;;  %v6234_v6 = vadd.f32 %v13895_v21, %v6218_v14  ;;  %v6216_v50 = vmul.f32 2.0, %v13495_v51  ;;  %v6215_v51 = vmul.f32 2.0, %v13512_v26 }
 0x7da   : > { %v13913_v18 = vpop.f32.mrf.mxu0  ;;  %9678 = vmatpush3.msra.mxu1 %v6271_v41  ;;  %9644 = vmatprep.subr.mxu0 %v15421_v40  ;;  %v6235_v52 = vadd.f32 %v6219_v53, %v5745_v0  ;;  %v6266_v20 = vadd.f32 %v13897_v4, %v6250_v29  ;;  %v6249_v0 = vmul.f32 2.0, %v13488_v42  ;;  %v6264_v55 = vadd.f32 %v13889_v35, %v6248_v31 }
 0x7db   : > { %v13917_v22 = vpop.f32.mrf.mxu1  ;;  %9679 = vmatprep.subr.mxu1 %v15421_v40  ;;  %9645 = vmatpush3.msra.mxu0 %v6238_v23  ;;  %v6232_v42 = vadd.f32 %v13887_v1, %v6216_v50  ;;  %v6231_v1 = vadd.f32 %v6215_v51, %v13891_v9  ;;  %v6246_v26 = vmul.f32 2.0, %v13535_v24  ;;  %v6263_v35 = vadd.f32 %v6247_v3, %v13893_v30 }
 0x7dc   : > { %v13921_v19 = vpop.f32.mrf.mxu0  ;;  %9680 = vmatpush3.msra.mxu1 %v6270_v33  ;;  %9646 = vmatprep.subr.mxu0 %v15421_v40  ;;  %v6265_v4 = vadd.f32 %v6249_v0, %v13901_v11  ;;  %v6214_v11 = vmul.f32 2.0, %v13527_v32  ;;  %v6213_v32 = vmul.f32 2.0, %v13544_v61  ;;  %v6245_v24 = vmul.f32 2.0, %v13552_v2  ;;  %v15422_v61 = vld [vmem:[#allocation48_spill] sm:$0xff]  ;;  %v15428_v0 = vld [vmem:[#allocation110_spill] sm:$0xff] }
 0x7dd   : > { %v13925_v36 = vpop.f32.mrf.mxu1  ;;  %9681 = vmatprep.subr.mxu1 %v15421_v40  ;;  %9647 = vmatpush3.msra.mxu0 %v6237_v44  ;;  %v6262_v9 = vadd.f32 %v13881_v12, %v6246_v26  ;;  %v6212_v30 = vmul.f32 2.0, %v13559_v28  ;;  %v6244_v37 = vmul.f32 2.0, %v15422_v61  ;;  %v6211_v28 = vmul.f32 2.0, %v15423_v47  ;;  %v15434_v61 = vld [vmem:[#allocation45_spill] sm:$0xff]  ;;  %v15435_v47 = vld [vmem:[#allocation72_spill] sm:$0xff] }
 0x7de   : > { %v13929_v39 = vpop.f32.mrf.mxu0  ;;  %9682 = vmatpush3.msra.mxu1 %v6269_v59  ;;  %9648 = vmatprep.subr.mxu0 %v15421_v40  ;;  %v6230_v25 = vadd.f32 %v13879_v10, %v6214_v11  ;;  %v6229_v10 = vadd.f32 %v6213_v32, %v13883_v27  ;;  %v6261_v12 = vadd.f32 %v6245_v24, %v13885_v49  ;;  %v15425_v49 = vld [vmem:[#allocation50_spill] sm:$0xff] }
 0x7df   : > { %v13933_v7 = vpop.f32.mrf.mxu1  ;;  %9683 = vmatprep.subr.mxu1 %v15421_v40  ;;  %9649 = vmatpush3.msra.mxu0 %v6236_v48  ;;  %v6228_v2 = vadd.f32 %v13871_v38, %v6212_v30  ;;  %v6260_v27 = vadd.f32 %v13873_v58, %v6244_v37  ;;  %v15424_v48 = vld [vmem:[#allocation15_spill] sm:$0xff]  ;;  %v6210_v8 = vmul.f32 2.0, %v15425_v49  ;;  %v6227_v38 = vadd.f32 %v6211_v28, %v13875_v60 }
 0x7e0   : > { %v13937_v62 = vpop.f32.mrf.mxu0  ;;  %9684 = vmatpush3.msra.mxu1 %v6268_v16  ;;  %9650 = vmatprep.subr.mxu0 %v15421_v40  ;;  %v6243_v53 = vmul.f32 2.0, %v15424_v48  ;;  %v6287_v37 = vmul.f32 2.0, %v15434_v61  ;;  %v6319_v28 = vmul.f32 2.0, %v15435_v47 }
 0x7e1   : > { %v13942_v54 = vpop.f32.mrf.mxu1  ;;  %9685 = vmatprep.subr.mxu1 %v15421_v40  ;;  %9651 = vmatpush3.msra.mxu0 %v6235_v52  ;;  %v15426_v52 = vld [vmem:[#allocation55_spill] sm:$0xff] }
 0x7e2   : > { %v13947_v63 = vpop.f32.mrf.mxu0  ;;  %9686 = vmatpush3.msra.mxu1 %v6267_v17  ;;  %9652 = vmatprep.subr.mxu0 %v15421_v40  ;;  %v6242_v29 = vmul.f32 2.0, %v15426_v52  ;;  %v6259_v58 = vadd.f32 %v6243_v53, %v13877_v34 }
 0x7e3   : > { %v13952_v21 = vpop.f32.mrf.mxu1  ;;  %9687 = vmatprep.subr.mxu1 %v15421_v40  ;;  %9653 = vmatpush3.msra.mxu0 %v6234_v6  ;;  %v6226_v6 = vadd.f32 %v13863_v56, %v6210_v8  ;;  %v14031_v56 = vld [vmem:[%s10205_s20 + $0x4] sm:$0x1] }
 0x7e4   : > { %v13957_v15 = vpop.f32.mrf.mxu0  ;;  %9688 = vmatpush3.msra.mxu1 %v6266_v20  ;;  %9654 = vmatprep.subr.mxu0 %v15421_v40  ;;  %v6209_v20 = vmul.f32 2.0, %v15427_v45  ;;  %v6258_v50 = vadd.f32 %v15428_v0, %v6242_v29  ;;  %v15437_v8 = vld [vmem:[#allocation57_spill] sm:$0xff] }
 0x7e5   : > { %v13962_v41 = vpop.f32.mrf.mxu1  ;;  %9689 = vmatprep.subr.mxu1 %v15421_v40  ;;  %9655 = vmatpush3.msra.mxu0 %v6233_v43  ;;  %v15429_v43 = vld [vmem:[#allocation81_spill] sm:$0xff] }
 0x7e6   : > { %v13967_v5 = vpop.f32.mrf.mxu0  ;;  %9690 = vmatpush3.msra.mxu1 %v6265_v4  ;;  %9656 = vmatprep.subr.mxu0 %v15421_v40  ;;  %v6241_v34 = vmul.f32 2.0, %v15429_v43  ;;  %v15430_v4 = vld [vmem:[#allocation49_spill] sm:$0xff] }
 0x7e7   : > { %v13972_v57 = vpop.f32.mrf.mxu1  ;;  %9691 = vmatprep.subr.mxu1 %v15421_v40  ;;  %9657 = vmatpush3.msra.mxu0 %v6232_v42  ;;  %v6225_v42 = vadd.f32 %v6209_v20, %v15430_v4  ;;  %v15439_v20 = vld [vmem:[#allocation99_spill] sm:$0xff]  ;;  %v15441_v4 = vld [vmem:[#allocation58_spill] sm:$0xff] }
 0x7e8   : > { %v13977_v23 = vpop.f32.mrf.mxu0  ;;  %9692 = vmatpush3.msra.mxu1 %v6264_v55  ;;  %9658 = vmatprep.subr.mxu0 %v15421_v40  ;;  %v15431_v55 = vld [vmem:[#allocation37_spill] sm:$0xff]  ;;  %v6317_v0 = vmul.f32 2.0, %v15439_v20 }
 0x7e9   : > { %v13982_v46 = vpop.f32.mrf.mxu1  ;;  %9693 = vmatprep.subr.mxu1 %v15421_v40  ;;  %9659 = vmatpush3.msra.mxu0 %v6231_v1  ;;  %v6257_v3 = vadd.f32 %v6241_v34, %v15431_v55  ;;  %v14036_v1 = vld [vmem:[%s10205_s20 + $0x5] sm:$0x1] }
 0x7ea   : > { %v13987_v33 = vpop.f32.mrf.mxu0  ;;  %9694 = vmatpush3.msra.mxu1 %v6263_v35  ;;  %9660 = vmatprep.subr.mxu0 %v15421_v40  ;;  %v15432_v35 = vld [vmem:[#allocation44_spill] sm:$0xff] }
 0x7eb   : > { %v13992_v13 = vpop.f32.mrf.mxu1  ;;  %9695 = vmatprep.subr.mxu1 %v15421_v40  ;;  %9661 = vmatpush3.msra.mxu0 %v6230_v25  ;;  %v6288_v25 = vmul.f32 2.0, %v15432_v35 }
 0x7ec   : > { %v13997_v44 = vpop.f32.mrf.mxu0  ;;  %9696 = vmatpush3.msra.mxu1 %v6262_v9  ;;  %9662 = vmatprep.subr.mxu0 %v15421_v40  ;;  %v15433_v9 = vld [vmem:[#allocation21_spill] sm:$0xff] }
 0x7ed   : > { %v14002_v59 = vpop.f32.mrf.mxu1  ;;  %9697 = vmatprep.subr.mxu1 %v15421_v40  ;;  %9663 = vmatpush3.msra.mxu0 %v6229_v10  ;;  %v6320_v24 = vmul.f32 2.0, %v15433_v9 }
 0x7ee   : > { %v14007_v16 = vpop.f32.mrf.mxu0  ;;  %9698 = vmatpush3.msra.mxu1 %v6261_v12  ;;  %9664 = vmatprep.subr.mxu0 %v15421_v40 }
 0x7ef   : > { %v14012_v14 = vpop.f32.mrf.mxu1  ;;  %9699 = vmatprep.subr.mxu1 %v15421_v40  ;;  %9665 = vmatpush3.msra.mxu0 %v6228_v2 }
 0x7f0   : > { %v14017_v17 = vpop.f32.mrf.mxu0  ;;  %9700 = vmatpush3.msra.mxu1 %v6260_v27  ;;  %9666 = vmatprep.subr.mxu0 %v15421_v40  ;;  %v15436_v27 = vld [vmem:[#allocation38_spill] sm:$0xff] }
 0x7f1   : > { %v14022_v60 = vpop.f32.mrf.mxu1  ;;  %9701 = vmatprep.subr.mxu1 %v15421_v40  ;;  %9667 = vmatpush3.msra.mxu0 %v6227_v38  ;;  %v6286_v48 = vmul.f32 2.0, %v15436_v27  ;;  %v6318_v38 = vmul.f32 2.0, %v15437_v8 }
 0x7f2   : > { %v9580_v31 = vpop.f32.mrf.mxu0  ;;  %9702 = vmatpush3.msra.mxu1 %v6259_v58  ;;  %9668 = vmatprep.subr.mxu0 %v15421_v40  ;;  %v15438_v58 = vld [vmem:[#allocation36_spill] sm:$0xff] }
 0x7f3   : > { %v9636_v51 = vpop.f32.mrf.mxu1  ;;  %9703 = vmatprep.subr.mxu1 %v15421_v40  ;;  %9669 = vmatpush3.msra.mxu0 %v6226_v6  ;;  %v6302_v29 = vadd.f32 %v9580_v31, %v6286_v48  ;;  %v6285_v6 = vmul.f32 2.0, %v15438_v58  ;;  %v15450_v48 = vld [vmem:[#allocation65_spill] sm:$0xff] }
 0x7f4   : > { %v6045_v11 = vpop.f32.mrf.mxu0  ;;  %9704 = vmatpush3.msra.mxu1 %v6258_v50  ;;  %9670 = vmatprep.subr.mxu0 %v15421_v40  ;;  %v6334_v45 = vadd.f32 %v9636_v51, %v6318_v38  ;;  %v15440_v50 = vld [vmem:[#allocation32_spill] sm:$0xff] }
 0x7f5   : > { %v6190_v26 = vpop.f32.mrf.mxu1  ;;  %9705 = vmatprep.subr.mxu1 %v15421_v40  ;;  %9671 = vmatpush3.msra.mxu0 %v6225_v42  ;;  %v6284_v43 = vmul.f32 2.0, %v15440_v50  ;;  %v6301_v34 = vadd.f32 %v6285_v6, %v6045_v11  ;;  %v6316_v42 = vmul.f32 2.0, %v15441_v4  ;;  %v15442_v51 = vld [vmem:[#allocation40_spill] sm:$0xff]  ;;  %v15456_v50 = vld [vmem:[#allocation107_spill] sm:$0xff] }
 0x7f6   : > { %v9583_v32 = vpop.f32.mrf.mxu0  ;;  %9706 = vmatpush3.msra.mxu1 %v6257_v3  ;;  %9673 = vmatmul.mubr.f32.vlgmr.msra.gmra.mxu0 %v14031_v56  ;;  %v6333_v31 = vadd.f32 %v6317_v0, %v6190_v26  ;;  %v6283_v3 = vmul.f32 2.0, %v15442_v51  ;;  %v15452_v38 = vld [vmem:[#allocation100_spill] sm:$0xff] }
 0x7f7   : > { %v6304_v30 = vadd.f32 %v9583_v32, %v6288_v25  ;;  %v9639_v10 = vpop.f32.mrf.mxu1  ;;  %9708 = vmatmul.mubr.f32.vlgmr.msra.gmra.mxu1 %v14036_v1  ;;  %9710 = vmatprep.subr.mxu0 %v15421_v40  ;;  %v6300_v55 = vadd.f32 %v14007_v16, %v6284_v43  ;;  %v6332_v35 = vadd.f32 %v14012_v14, %v6316_v42  ;;  %v15443_v25 = vld [vmem:[#allocation59_spill] sm:$0xff]  ;;  %v15444_v32 = vld [vmem:[#allocation60_spill] sm:$0xff]  ;;  %v15445_v16 = vld [vmem:[#allocation61_spill] sm:$0xff]  ;;  %v6276_v43 = vmul.f32 2.0, %v15456_v50 }
 0x7f8   : > { %v6336_v12 = vadd.f32 %v9639_v10, %v6320_v24  ;;  %v6055_v2 = vpop.f32.mrf.mxu0  ;;  %9745 = vmatprep.subr.mxu1 %v15421_v40  ;;  %9742 = vmatprep.mubr.msk.f32.mxu0 %vm10048_vm0, %v15421_v40  ;;  %v6315_v11 = vmul.f32 2.0, %v15443_v25  ;;  %v6282_v9 = vmul.f32 2.0, %v15444_v32  ;;  %v6299_v26 = vadd.f32 %v6283_v3, %v14017_v17  ;;  %v15446_v10 = vld [vmem:[#allocation62_spill] sm:$0xff]  ;;  %v15447_v17 = vld [vmem:[#allocation96_spill] sm:$0xff]  ;;  %v15458_v42 = vld [vmem:[#allocation27_spill] sm:$0xff] }
 0x7f9   : > { %v6303_v53 = vadd.f32 %v6287_v37, %v6055_v2  ;;  %v6200_v49 = vpop.f32.mrf.mxu1  ;;  %9711 = vmatpush3.msra.mxu0 %v6304_v30  ;;  %9777 = vmatprep.mubr.msk.f32.mxu1 %vm10048_vm0, %v15421_v40  ;;  %v6314_v24 = vmul.f32 2.0, %v15445_v16  ;;  %v6281_v61 = vmul.f32 2.0, %v15446_v10  ;;  %v15448_v2 = vld [vmem:[#allocation98_spill] sm:$0xff]  ;;  %v15454_v6 = vld [vmem:[#allocation68_spill] sm:$0xff]  ;;  %v15460_v3 = vld [vmem:[#allocation109_spill] sm:$0xff] }
 0x7fa   : > { %v6335_v52 = vadd.f32 %v6319_v28, %v6200_v49  ;;  %9746 = vmatpush3.msra.mxu1 %v6336_v12  ;;  %9712 = vmatprep.subr.mxu0 %v15421_v40  ;;  %v6331_v30 = vadd.f32 %v6315_v11, %v14022_v60  ;;  %v6298_v14 = vadd.f32 %v13987_v33, %v6282_v9  ;;  %v6313_v12 = vmul.f32 2.0, %v15447_v17  ;;  %v15449_v33 = vld [vmem:[#allocation101_spill] sm:$0xff]  ;;  %v15462_v32 = vld [vmem:[#allocation31_spill] sm:$0xff] }
 0x7fb   : > { %9747 = vmatprep.subr.mxu1 %v15421_v40  ;;  %9713 = vmatpush3.msra.mxu0 %v6303_v53  ;;  %v6330_v37 = vadd.f32 %v13992_v13, %v6314_v24  ;;  %v6280_v47 = vmul.f32 2.0, %v15448_v2  ;;  %v6297_v60 = vadd.f32 %v6281_v61, %v13997_v44  ;;  %v6312_v28 = vmul.f32 2.0, %v15449_v33  ;;  %v15451_v44 = vld [vmem:[#allocation103_spill] sm:$0xff]  ;;  %v490_v24 = vld [vmem:[%s10205_s20 + $0x6] sm:$0x1] }
 0x7fc   : > { %9748 = vmatpush3.msra.mxu1 %v6335_v52  ;;  %9714 = vmatprep.subr.mxu0 %v15421_v40  ;;  %v6329_v27 = vadd.f32 %v6313_v12, %v14002_v59  ;;  %v6279_v53 = vmul.f32 2.0, %v15450_v48  ;;  %v6311_v8 = vmul.f32 2.0, %v15451_v44  ;;  %v6278_v52 = vmul.f32 2.0, %v15452_v38 }
 0x7fd   : > { %9749 = vmatprep.subr.mxu1 %v15421_v40  ;;  %9715 = vmatpush3.msra.mxu0 %v6302_v29  ;;  %v6296_v13 = vadd.f32 %v13967_v5, %v6280_v47  ;;  %v6328_v49 = vadd.f32 %v13972_v57, %v6312_v28  ;;  %v15453_v5 = vld [vmem:[#allocation102_spill] sm:$0xff]  ;;  %v6273_v9 = vmul.f32 2.0, %v15462_v32 }
 0x7fe   : > { %9750 = vmatpush3.msra.mxu1 %v6334_v45  ;;  %9716 = vmatprep.subr.mxu0 %v15421_v40  ;;  %v6295_v59 = vadd.f32 %v6279_v53, %v13977_v23  ;;  %v6310_v29 = vmul.f32 2.0, %v15453_v5  ;;  %v6327_v58 = vadd.f32 %v6311_v8, %v13982_v46  ;;  %v6294_v57 = vadd.f32 %v13947_v63, %v6278_v52  ;;  %v15455_v23 = vld [vmem:[#allocation105_spill] sm:$0xff]  ;;  %v15457_v63 = vld [vmem:[#allocation104_spill] sm:$0xff] }
 0x7ff   : > { %9751 = vmatprep.subr.mxu1 %v15421_v40  ;;  %9717 = vmatpush3.msra.mxu0 %v6301_v34  ;;  %v6277_v45 = vmul.f32 2.0, %v15454_v6  ;;  %v6309_v0 = vmul.f32 2.0, %v15455_v23  ;;  %v6308_v34 = vmul.f32 2.0, %v15457_v63 }
 0x800   : > { %9752 = vmatpush3.msra.mxu1 %v6333_v31  ;;  %9718 = vmatprep.subr.mxu0 %v15421_v40  ;;  %v6326_v20 = vadd.f32 %v13952_v21, %v6310_v29  ;;  %v6292_v21 = vadd.f32 %v13929_v39, %v6276_v43  ;;  %v6275_v31 = vmul.f32 2.0, %v15458_v42  ;;  %v15461_v39 = vld [vmem:[#allocation111_spill] sm:$0xff] }
 0x801   : > { %9753 = vmatprep.subr.mxu1 %v15421_v40  ;;  %9719 = vmatpush3.msra.mxu0 %v6300_v55  ;;  %v6293_v46 = vadd.f32 %v6277_v45, %v13957_v15  ;;  %v6325_v4 = vadd.f32 %v6309_v0, %v13962_v41  ;;  %v6324_v55 = vadd.f32 %v13933_v7, %v6308_v34  ;;  %v15459_v15 = vld [vmem:[#allocation106_spill] sm:$0xff]  ;;  %v6306_v25 = vmul.f32 2.0, %v15461_v39 }
 0x802   : > { %9754 = vmatpush3.msra.mxu1 %v6332_v35  ;;  %9720 = vmatprep.subr.mxu0 %v15421_v40  ;;  %v6307_v51 = vmul.f32 2.0, %v15459_v15  ;;  %v6274_v35 = vmul.f32 2.0, %v15460_v3  ;;  %v6291_v41 = vadd.f32 %v6275_v31, %v13937_v62 }
 0x803   : > { %9755 = vmatprep.subr.mxu1 %v15421_v40  ;;  %9721 = vmatpush3.msra.mxu0 %v6299_v26  ;;  %v6322_v62 = vadd.f32 %v13917_v22, %v6306_v25  ;;  %v15463_v26 = vld [vmem:[#allocation108_spill] sm:$0xff] }
 0x804   : > { %9756 = vmatpush3.msra.mxu1 %v6331_v30  ;;  %9722 = vmatprep.subr.mxu0 %v15421_v40  ;;  %v6323_v11 = vadd.f32 %v6307_v51, %v13942_v54  ;;  %v6290_v7 = vadd.f32 %v13913_v18, %v6274_v35  ;;  %v6305_v16 = vmul.f32 2.0, %v15463_v26  ;;  %v6289_v54 = vadd.f32 %v6273_v9, %v13921_v19  ;;  %v582_v30 = vld [vmem:[%s10205_s20 + $0x7] sm:$0x1] }
 0x805   : > { %9757 = vmatprep.subr.mxu1 %v15421_v40  ;;  %9723 = vmatpush3.msra.mxu0 %v6298_v14 }
 0x806   : > { %9758 = vmatpush3.msra.mxu1 %v6330_v37  ;;  %9724 = vmatprep.subr.mxu0 %v15421_v40  ;;  %v6321_v18 = vadd.f32 %v6305_v16, %v13925_v36 }
 0x807   : > { %9759 = vmatprep.subr.mxu1 %v15421_v40  ;;  %9725 = vmatpush3.msra.mxu0 %v6297_v60 }
 0x808   : > { %9760 = vmatpush3.msra.mxu1 %v6329_v27  ;;  %9726 = vmatprep.subr.mxu0 %v15421_v40 }
 0x809   : > { %9761 = vmatprep.subr.mxu1 %v15421_v40  ;;  %9727 = vmatpush3.msra.mxu0 %v6296_v13 }
 0x80a   : > { %9762 = vmatpush3.msra.mxu1 %v6328_v49  ;;  %9728 = vmatprep.subr.mxu0 %v15421_v40 }
 0x80b   : > { %9763 = vmatprep.subr.mxu1 %v15421_v40  ;;  %9729 = vmatpush3.msra.mxu0 %v6295_v59 }
 0x80c   : > { %9764 = vmatpush3.msra.mxu1 %v6327_v58  ;;  %9730 = vmatprep.subr.mxu0 %v15421_v40 }
 0x80d   : > { %9765 = vmatprep.subr.mxu1 %v15421_v40  ;;  %9731 = vmatpush3.msra.mxu0 %v6294_v57 }
 0x80e   : > { %9766 = vmatpush3.msra.mxu1 %v6326_v20  ;;  %9732 = vmatprep.subr.mxu0 %v15421_v40 }
 0x80f   : > { %9767 = vmatprep.subr.mxu1 %v15421_v40  ;;  %9733 = vmatpush3.msra.mxu0 %v6293_v46 }
 0x810   : > { %9768 = vmatpush3.msra.mxu1 %v6325_v4  ;;  %9734 = vmatprep.subr.mxu0 %v15421_v40 }
 0x811   : > { %9769 = vmatprep.subr.mxu1 %v15421_v40  ;;  %9735 = vmatpush3.msra.mxu0 %v6292_v21 }
 0x812   : > { %9770 = vmatpush3.msra.mxu1 %v6324_v55  ;;  %9736 = vmatprep.subr.mxu0 %v15421_v40 }
 0x813   : > { %9771 = vmatprep.subr.mxu1 %v15421_v40  ;;  %9737 = vmatpush3.msra.mxu0 %v6291_v41 }
 0x814   : > { %9772 = vmatpush3.msra.mxu1 %v6323_v11  ;;  %9738 = vmatprep.subr.mxu0 %v15421_v40 }
 0x815   : > { %9773 = vmatprep.subr.mxu1 %v15421_v40  ;;  %9739 = vmatpush3.msra.mxu0 %v6290_v7 }
 0x816   : > { %9774 = vmatpush3.msra.mxu1 %v6322_v62  ;;  %9740 = vmatprep.subr.mxu0 %v15421_v40 }
 0x817   : > { %9775 = vmatprep.subr.mxu1 %v15421_v40  ;;  %9741 = vmatpush3.msra.mxu0 %v6289_v54 }
 0x818   : > { %9776 = vmatpush3.msra.mxu1 %v6321_v18  ;;  %9743 = vmatmul.mubr.f32.vlgmr.msra.gmra.mxu0 %v490_v24 }
 0x819   : > { %9778 = vmatmul.mubr.f32.vlgmr.msra.gmra.mxu1 %v582_v30 }
 0x8b6   : > { %v6403_v22 = vpop.f32.mrf.mxu0 }
 0x8b7   : > { %v6407_v19 = vadd.f32 %v6403_v22, %v14031_v56  ;;  %v6475_v14 = vpop.f32.mrf.mxu1 }
 0x8b8   : > { %v6479_v10 = vadd.f32 %v6475_v14, %v14036_v1  ;;  %v9674_v61 = vpop.f32.mrf.mxu0 }
 0x8b9   : > { %6408 = vst [vmem:[%s256_s23] sm:$0x1] %v6407_v19  ;;  %v9709_v36 = vpop.f32.mrf.mxu1 }
 0x8ba   : > { %6480 = vst [vmem:[%s256_s23 + $0x1] sm:$0x1] %v6479_v10 }
 0x8d8   : > { %v6547_v40 = vpop.f32.mrf.mxu0 }
 0x8d9   : > { %v6551_v37 = vadd.f32 %v6547_v40, %v490_v24  ;;  %v6619_v17 = vpop.f32.mrf.mxu1 }
 0x8da   : > { %v6623_v12 = vadd.f32 %v6619_v17, %v582_v30  ;;  %v9744_v2 = vpop.f32.mrf.mxu0 }
 0x8db   : > { %6552 = vst [vmem:[%s256_s23 + $0x2] sm:$0x1] %v6551_v37  ;;  %v9779_v56 = vpop.f32.mrf.mxu1 }
 0x8dc   : > { %6624 = vst [vmem:[%s256_s23 + $0x3] sm:$0x1] %v6623_v12 }
 0x8dd   : > { %9980 = shalt.err (!%p9977_p9)
}
 0x8de   : > { %s9981_s6 = scalar_lea.hbm %s14142_s25, 64  ;;  %s9985_s13 = scalar_lea.hbm %s14189_s4, 128 }
 0x8df   : > { %p9982_p13 = scmp.ne.s32.totalorder %s14142_s25, %s9981_s6  ;;  %p9986_p10 = scmp.lt.s32.totalorder %s14142_s25, %s14189_s4 }
 0x8e0   : > { %p9987_p11 = scmp.lt.s32.totalorder %s9985_s13, %s9981_s6 }
 0x8e1   : > { %p9983_p1 = pnand %p9982_p13, %p15464_p6 }
 0x8e2   : > { %p9988_p2 = por %p9987_p11, %p9986_p10 }
 0x8e3   : > { %p9984_p8 = pneg %p9983_p1 }
 0x8e5   : > { %p9989_p4 = pnand %p9988_p2, %p9984_p8 }
 0x8e7   : > { %9992 = shalt.err (!%p9989_p4)
}
 0x8e8   : > { %9794 = dma.vmem_to_hbm [thread:$0]  (%p15464_p6), %s14144_s10, 64, %s14142_s25, %s6626_s19  }
 0x8e9 PF: > { %s6651_s21 = sand.u32 1, %s10027_s15   ;;  %p15465_p12 = scmp.ne.s32.totalorder %s14598_s22, 0 }
 0x8ea   : > { %p15466_p0 = scmp.ge.s32.totalorder %s10039_s18, 2  ;;  %s6652_s23 = scalar_lea.sflag [#allocation4], %s6651_s21 }
 0x8ec   : > { %p9811_p5 = pnand %p15466_p0, %p15465_p12 }
 0x8ee   : > { %p9812_p3 = pneg %p9811_p5 }
 0x8f0   : > { %10022 = dma.done.wait (%p9812_p3), %s6652_s23, 64  }
 0x8f1   : > { %10024 = vsyncadd (%p9812_p3), %s6652_s23, 4294967232  ;;  %p19_p7 = scmp.ge.s32.totalorder %s10155_s24, 4   ;;  %s15467_s15 = smov %s10031_s16 }
 0x8f2   : > { %s15468_s16 = smov %s10035_s17  ;;  %s15469_s17 = smov %s10165_s27 }
 0x8f3   : > { %s15470_s18 = smov %s10155_s24  ;;  %21 = sbr.rel (!%p19_p7) target bundleno = 7 (0x7), region = 93 }
 0x8f8   :  { %6657 = vsyncpa [#allocation3], 1 }
 0x8f9   :  { %6659 = vsyncpa [#allocation3 + $0x1], 1 }
 0x8fa   :  { %6660 = vsyncpa [#allocation6], 1 }
 0x8fb   :  { %6661 = vsyncpa [#allocation9], 1 }
 0x8fc   :  { %6662 = vsyncpa [#allocation4], 1 }
 0x8fd   :  { %6664 = vsyncpa [#allocation4 + $0x1], 1 }

</bundles_post_ra>
